<compile_context>
chip_gen: v5e
topology: v5e:2x2
jax: 0.10.0
libtpu: 0.0.40
codegen_flags: <defaults>
</compile_context>

<pallas_src>
import math

import numpy as np
import jax
import jax.numpy as jnp
from jax.experimental import pallas as pl
from jax.experimental.pallas import tpu as pltpu

EPS = 1e-4        # BatchNorm2d eps set in the module
THRESHOLD = 1.0   # m.threshold = 1.0 set in __init__


# ----------------------------- static config --------------------------------

def build_layer_cfg(n, nFilters, img_size):
    """Per-conv-layer geometry (square feature maps), same order as conv_list."""
    cfg = [dict(cin=2, cout=nFilters, stride=2, Hi=img_size, Ho=img_size // 2,
                level=0)]
    cur = img_size // 2
    for block in range(3):
        for layer in range(2 * n):
            if block != 0 and layer == 0:
                stride, cin = 2, nFilters * 2 ** (block - 1)
            else:
                stride, cin = 1, nFilters * 2 ** block
            cout = nFilters * 2 ** block
            cfg.append(dict(cin=cin, cout=cout, stride=stride,
                            Hi=cur, Ho=cur // stride, level=block))
            cur = cur // stride
    return cfg


# --------------------- host-built structured operands -----------------------

def rowsel_conv3x3(B, Hi, Ho, stride):
    """(3*B*Ho, B*Hi) 0/1 row-selection matrices for the 3 ky taps (pad=1)."""
    R = np.zeros((3, B * Ho, B * Hi), np.float32)
    for ky in range(3):
        for b in range(B):
            for i in range(Ho):
                hi = stride * i - 1 + ky
                if 0 <= hi < Hi:
                    R[ky, b * Ho + i, b * Hi + hi] = 1.0
    return R.reshape(3 * B * Ho, B * Hi)


def band_conv3x3(w, Wi, Wo, stride):
    """(3*Wi*Cin, Wo*Cout) banded weights folding kx taps + channel mixing."""
    Cout, Cin = w.shape[0], w.shape[1]
    C = np.zeros((3, Wi * Cin, Wo * Cout), np.float32)
    for ky in range(3):
        for kx in range(3):
            for wo in range(Wo):
                wi = stride * wo - 1 + kx
                if 0 <= wi < Wi:
                    C[ky, wi * Cin:(wi + 1) * Cin,
                      wo * Cout:(wo + 1) * Cout] = w[:, :, ky, kx].T
    return C.reshape(3 * Wi * Cin, Wo * Cout)


def rowsel_1x1_s2(B, Hi, Ho):
    R = np.zeros((B * Ho, B * Hi), np.float32)
    for b in range(B):
        for i in range(Ho):
            R[b * Ho + i, b * Hi + 2 * i] = 1.0
    return R


def band_1x1_s2(w, Wi, Wo):
    Cout, Cin = w.shape
    C = np.zeros((Wi * Cin, Wo * Cout), np.float32)
    for wo in range(Wo):
        wi = 2 * wo
        C[wi * Cin:(wi + 1) * Cin, wo * Cout:(wo + 1) * Cout] = w.T
    return C


def group_mat(Wo, C):
    """(Wo*C, C) grouping matrix: lane (wo*C + c) -> channel c."""
    G = np.zeros((Wo * C, C), np.float32)
    for wo in range(Wo):
        for c in range(C):
            G[wo * C + c, c] = 1.0
    return G


# ------------------------------- parameters ---------------------------------

def xavier_uniform(key, shape, gain=2.0):
    if len(shape) == 4:
        rf = shape[2] * shape[3]
        fan_in, fan_out = shape[1] * rf, shape[0] * rf
    else:
        fan_out, fan_in = shape
    bound = gain * math.sqrt(6.0 / (fan_in + fan_out))
    return jax.random.uniform(key, shape, jnp.float32, -bound, bound)


def init_params(key, cfg, nFilters, num_steps, num_cls):
    keys = iter(jax.random.split(key, 3 * len(cfg) + 8))
    conv_w, bn_g, bn_b = [], [], []
    for c in cfg:
        conv_w.append(xavier_uniform(next(keys), (c['cout'], c['cin'], 3, 3)))
        bn_g.append(1.0 + 0.1 * jax.random.normal(next(keys),
                                                  (num_steps, c['cout'])))
        bn_b.append(0.1 * jax.random.normal(next(keys), (num_steps, c['cout'])))
    w1, g1, b1 = [], [], []
    for (cin, cout) in [(nFilters, 2 * nFilters), (2 * nFilters, 4 * nFilters)]:
        w1.append(xavier_uniform(next(keys), (cout, cin, 1, 1))[:, :, 0, 0])
        g1.append(1.0 + 0.1 * jax.random.normal(next(keys), (num_steps, cout)))
        b1.append(0.1 * jax.random.normal(next(keys), (num_steps, cout)))
    fc_w = xavier_uniform(next(keys), (num_cls, 4 * nFilters))
    return dict(conv_w=conv_w, bn_g=bn_g, bn_b=bn_b,
                conv1x1_w=w1, bn1_g=g1, bn1_b=b1, fc_w=fc_w)


# --------------------------- fused forward builder ---------------------------

def make_sresnet_nm(params, *, n, nFilters, num_steps, leak_mem, num_cls,
                    img_size, batch):
    B, T = batch, num_steps
    cfg = build_layer_cfg(n, nFilters, img_size)
    nL = len(cfg)
    img_half = img_size // 2

    levels = [c['level'] for c in cfg]
    BHo = [B * c['Ho'] for c in cfg]
    Ks = [c['Hi'] * c['cin'] for c in cfg]          # Wi*Cin (square maps)
    Ns = [c['Ho'] * c['cout'] for c in cfg]         # Wo*Cout (lane width)
    Npix = [B * c['Ho'] * c['Ho'] for c in cfg]     # elements per channel (BN)
    skip_1x1_at = {2 + 2 * n: 0, 2 + 4 * n: 1}

    conv_w_np = [np.asarray(w, np.float32) for w in params['conv_w']]
    w1_np = [np.asarray(w, np.float32) for w in params['conv1x1_w']]
    fc_np = np.asarray(params['fc_w'], np.float32)

    const_arrays, const_specs = [], []

    def add_const(arr, dtype):                      # 2-D, grid-invariant
        a = jnp.asarray(arr, dtype=dtype)
        const_arrays.append(a)
        const_specs.append(pl.BlockSpec(a.shape, lambda t: (0, 0)))

    def add_timed(arr, dtype):                      # (T, 1, C), indexed by t
        a = jnp.asarray(arr, dtype=dtype)
        const_arrays.append(a)
        const_specs.append(pl.BlockSpec((1,) + a.shape[1:],
                                        lambda t: (t, 0, 0)))

    # conv layers: R, C (bf16), gamma, beta (f32, per-timestep)
    for i, c in enumerate(cfg):
        add_const(rowsel_conv3x3(B, c['Hi'], c['Ho'], c['stride']),
                  jnp.bfloat16)
        add_const(band_conv3x3(conv_w_np[i], c['Hi'], c['Ho'], c['stride']),
                  jnp.bfloat16)
        add_timed(params['bn_g'][i].reshape(T, 1, c['cout']), jnp.float32)
        add_timed(params['bn_b'][i].reshape(T, 1, c['cout']), jnp.float32)

    # 1x1 stride-2 residual-resize convs
    for j in range(2):
        Hi, Cin = img_half >> j, nFilters << j
        Ho, Cout = Hi // 2, Cin * 2
        add_const(rowsel_1x1_s2(B, Hi, Ho), jnp.bfloat16)
        add_const(band_1x1_s2(w1_np[j], Hi, Ho), jnp.bfloat16)
        add_timed(params['bn1_g'][j].reshape(T, 1, Cout), jnp.float32)
        add_timed(params['bn1_b'][j].reshape(T, 1, Cout), jnp.float32)

    # channel-grouping matrices per resolution level (BN stats / expansion)
    for lvl in range(3):
        G = group_mat(img_half >> lvl, nFilters << lvl)
        add_const(G, jnp.float32)
        add_const(G.T, jnp.float32)

    # AdaptiveAvgPool2d((1,1)) row-averaging matrix and FC weight
    H_last = cfg[-1]['Ho']
    Ppool = np.zeros((B, B * H_last), np.float32)
    for b in range(B):
        Ppool[b, b * H_last:(b + 1) * H_last] = 1.0 / (H_last * H_last)
    add_const(Ppool, jnp.float32)
    add_const(fc_np.T, jnp.float32)                 # (C_last, num_cls)

    BH0, WC0 = B * img_size, img_size * 2

    # ------------------------------- kernel ---------------------------------
    def kernel(*refs):
        frames_ref = refs[0]
        p = 1
        conv_refs = [refs[p + 4 * i:p + 4 * i + 4] for i in range(nL)]
        p += 4 * nL
        res_refs = [refs[p:p + 4], refs[p + 4:p + 8]]
        p += 8
        G_refs = [(refs[p + 2 * l], refs[p + 2 * l + 1]) for l in range(3)]
        p += 6
        ppool_ref, wfc_ref = refs[p], refs[p + 1]
        p += 2
        out_ref = refs[p]
        mem_refs = refs[p + 1:p + 1 + nL]

        t = pl.program_id(0)

        @pl.when(t == 0)
        def _init():
            out_ref[...] = jnp.zeros_like(out_ref)
            for m in mem_refs:
                m[...] = jnp.zeros_like(m)

        def batchnorm(y, g_ref, b_ref, lvl, npix):
            # training-mode batch stats, one pass (sum & sum-of-squares)
            G_ref, Gt_ref = G_refs[lvl]
            G = G_ref[...]
            s1 = jnp.sum(jnp.dot(y, G, preferred_element_type=jnp.float32),
                         axis=0, keepdims=True)
            s2 = jnp.sum(jnp.dot(y * y, G,
                                 preferred_element_type=jnp.float32),
                         axis=0, keepdims=True)
            mean = s1 * (1.0 / npix)
            var = s2 * (1.0 / npix) - mean * mean
            scale = g_ref[0] * jax.lax.rsqrt(var + EPS)        # (1, C)
            shift = b_ref[0] - mean * scale                    # (1, C)
            Gt = Gt_ref[...]
            return (y * jnp.dot(scale, Gt, preferred_element_type=jnp.float32)
                    + jnp.dot(shift, Gt, preferred_element_type=jnp.float32))

        x = frames_ref[0]                       # (B*H0, W0*Cin0), bf16
        skip = None
        out = None
        for i in range(nL):
            R_ref, C_ref, g_ref, b_ref = conv_refs[i]
            bho, K = BHo[i], Ks[i]
            # row gather: ky taps + stride + zero row padding (one matmul)
            a = jnp.dot(R_ref[...], x,
                        preferred_element_type=jnp.float32
                        ).astype(jnp.bfloat16)
            # kx taps + channel mixing via banded weights, f32 accumulate
            y = None
            for ky in range(3):
                contrib = jnp.dot(a[ky * bho:(ky + 1) * bho, :],
                                  C_ref[ky * K:(ky + 1) * K, :],
                                  preferred_element_type=jnp.float32)
                y = contrib if y is None else y + contrib
            y = batchnorm(y, g_ref, b_ref, levels[i], Npix[i])

            # leaky integrate, surrogate spike (mem/thr - 1 > 0), soft reset
            mem = leak_mem * mem_refs[i][...] + y
            spike = (mem > THRESHOLD).astype(jnp.float32)
            mem_refs[i][...] = mem - spike * THRESHOLD

            out = spike
            if i > 0 and i % 2 == 0:
                if i in skip_1x1_at:
                    j = skip_1x1_at[i]
                    R1_ref, C1_ref, g1_ref, b1_ref = res_refs[j]
                    a1 = jnp.dot(R1_ref[...], skip.astype(jnp.bfloat16),
                                 preferred_element_type=jnp.float32
                                 ).astype(jnp.bfloat16)
                    y1 = jnp.dot(a1, C1_ref[...],
                                 preferred_element_type=jnp.float32)
                    skip = batchnorm(y1, g1_ref, b1_ref, levels[i], Npix[i])
                out = out + skip                 # residual add
                skip = out
            elif i == 0:
                skip = out
            x = out.astype(jnp.bfloat16)

        # AdaptiveAvgPool2d((1,1)) + Linear (no bias), accumulated into mem_fc
        pooled = jnp.dot(jnp.dot(ppool_ref[...], out,
                                 preferred_element_type=jnp.float32),
                         G_refs[levels[-1]][0][...],
                         preferred_element_type=jnp.float32)       # (B, C)
        out_ref[...] += jnp.dot(pooled, wfc_ref[...],
                                preferred_element_type=jnp.float32)

        @pl.when(t == num_steps - 1)
        def _finalize():
            out_ref[...] = out_ref[...] * (1.0 / num_steps)

    fwd = pl.pallas_call(
        kernel,
        out_shape=jax.ShapeDtypeStruct((B, num_cls), jnp.float32),
        grid_spec=pltpu.PrefetchScalarGridSpec(
            num_scalar_prefetch=0,
            grid=(T,),
            in_specs=[pl.BlockSpec((1, BH0, WC0), lambda t: (t, 0, 0))]
                     + const_specs,
            out_specs=pl.BlockSpec((B, num_cls), lambda t: (0, 0)),
            scratch_shapes=[pltpu.VMEM((BHo[i], Ns[i]), jnp.float32)
                            for i in range(nL)]),
        compiler_params=pltpu.CompilerParams(
            dimension_semantics=("arbitrary",)),   # sequential: membrane carry
    )

    @jax.jit
    def forward(frames):
        # frames: (B, T, 2, H, W) neuromorphic event frames (PyTorch layout)
        assert frames.shape == (B, T, 2, img_size, img_size)
        # TODO(synk): torchvision transforms.Resize([64, 64]) (bilinear,
        # antialias) is not replicated; inputs are already 64x64 -> identity.
        x = jnp.transpose(frames, (1, 0, 3, 4, 2)).astype(jnp.bfloat16)
        x = x.reshape(T, B * img_size, img_size * 2)   # (T, B*H, W*C)
        return fwd(x, *const_arrays)

    return forward


# ----------------------------------- main ------------------------------------

if __name__ == "__main__":
    key = jax.random.PRNGKey(0)
    n, nFilters, num_steps, num_cls, img_size = 1, 4, 2, 10, 64
    B = 2

    cfg = build_layer_cfg(n, nFilters, img_size)
    params = init_params(key, cfg, nFilters, num_steps, num_cls)
    forward = make_sresnet_nm(params, n=n, nFilters=nFilters,
                              num_steps=num_steps, leak_mem=0.95,
                              num_cls=num_cls, img_size=img_size, batch=B)

    kx = jax.random.fold_in(key, 12345)
    # neuromorphic (DVS-style) event frames: (B, T, 2, 64, 64)
    x = (jax.random.uniform(kx, (B, num_steps, 2, img_size, img_size)) > 0.7
         ).astype(jnp.float32)

    out = jax.block_until_ready(forward(x))
    assert out.shape == (B, num_cls)
    assert bool(jnp.all(jnp.isfinite(out)))
    print("KERNEL_OK")
</pallas_src>

<mosaic_0001>
module attributes {stable_mosaic.version = 11 : i64} {
  func.func @kernel(%arg0: i32, %arg1: memref<1x128x128xbf16, #tpu.memory_space<vmem>>, %arg2: memref<192x128xbf16, #tpu.memory_space<vmem>>, %arg3: memref<384x128xbf16, #tpu.memory_space<vmem>>, %arg4: memref<1x1x4xf32, #tpu.memory_space<vmem>>, %arg5: memref<1x1x4xf32, #tpu.memory_space<vmem>>, %arg6: memref<192x64xbf16, #tpu.memory_space<vmem>>, %arg7: memref<384x128xbf16, #tpu.memory_space<vmem>>, %arg8: memref<1x1x4xf32, #tpu.memory_space<vmem>>, %arg9: memref<1x1x4xf32, #tpu.memory_space<vmem>>, %arg10: memref<192x64xbf16, #tpu.memory_space<vmem>>, %arg11: memref<384x128xbf16, #tpu.memory_space<vmem>>, %arg12: memref<1x1x4xf32, #tpu.memory_space<vmem>>, %arg13: memref<1x1x4xf32, #tpu.memory_space<vmem>>, %arg14: memref<96x64xbf16, #tpu.memory_space<vmem>>, %arg15: memref<384x128xbf16, #tpu.memory_space<vmem>>, %arg16: memref<1x1x8xf32, #tpu.memory_space<vmem>>, %arg17: memref<1x1x8xf32, #tpu.memory_space<vmem>>, %arg18: memref<96x32xbf16, #tpu.memory_space<vmem>>, %arg19: memref<384x128xbf16, #tpu.memory_space<vmem>>, %arg20: memref<1x1x8xf32, #tpu.memory_space<vmem>>, %arg21: memref<1x1x8xf32, #tpu.memory_space<vmem>>, %arg22: memref<48x32xbf16, #tpu.memory_space<vmem>>, %arg23: memref<384x128xbf16, #tpu.memory_space<vmem>>, %arg24: memref<1x1x16xf32, #tpu.memory_space<vmem>>, %arg25: memref<1x1x16xf32, #tpu.memory_space<vmem>>, %arg26: memref<48x16xbf16, #tpu.memory_space<vmem>>, %arg27: memref<384x128xbf16, #tpu.memory_space<vmem>>, %arg28: memref<1x1x16xf32, #tpu.memory_space<vmem>>, %arg29: memref<1x1x16xf32, #tpu.memory_space<vmem>>, %arg30: memref<32x64xbf16, #tpu.memory_space<vmem>>, %arg31: memref<128x128xbf16, #tpu.memory_space<vmem>>, %arg32: memref<1x1x8xf32, #tpu.memory_space<vmem>>, %arg33: memref<1x1x8xf32, #tpu.memory_space<vmem>>, %arg34: memref<16x32xbf16, #tpu.memory_space<vmem>>, %arg35: memref<128x128xbf16, #tpu.memory_space<vmem>>, %arg36: memref<1x1x16xf32, #tpu.memory_space<vmem>>, %arg37: memref<1x1x16xf32, #tpu.memory_space<vmem>>, %arg38: memref<128x4xf32, #tpu.memory_space<vmem>>, %arg39: memref<4x128xf32, #tpu.memory_space<vmem>>, %arg40: memref<128x8xf32, #tpu.memory_space<vmem>>, %arg41: memref<8x128xf32, #tpu.memory_space<vmem>>, %arg42: memref<128x16xf32, #tpu.memory_space<vmem>>, %arg43: memref<16x128xf32, #tpu.memory_space<vmem>>, %arg44: memref<2x16xf32, #tpu.memory_space<vmem>>, %arg45: memref<16x10xf32, #tpu.memory_space<vmem>>, %arg46: memref<2x10xf32, #tpu.memory_space<vmem>>, %arg47: memref<64x128xf32, #tpu.memory_space<vmem>>, %arg48: memref<64x128xf32, #tpu.memory_space<vmem>>, %arg49: memref<64x128xf32, #tpu.memory_space<vmem>>, %arg50: memref<32x128xf32, #tpu.memory_space<vmem>>, %arg51: memref<32x128xf32, #tpu.memory_space<vmem>>, %arg52: memref<16x128xf32, #tpu.memory_space<vmem>>, %arg53: memref<16x128xf32, #tpu.memory_space<vmem>>) attributes {dimension_semantics = [#tpu.dimension_semantics<arbitrary>], iteration_bounds = array<i64: 2>, scalar_prefetch = 0 : i64, scratch_operands = 7 : i64, tpu.core_type = #tpu.core_type<tc>, window_params = [{transform_indices = @transform_0, window_bounds = array<i64: 1, 128, 128>}, {pipeline_mode = #tpu.pipeline_mode<synchronous>, transform_indices = @transform_1, window_bounds = array<i64: 192, 128>}, {pipeline_mode = #tpu.pipeline_mode<synchronous>, transform_indices = @transform_2, window_bounds = array<i64: 384, 128>}, {transform_indices = @transform_3, window_bounds = array<i64: 1, 1, 4>}, {transform_indices = @transform_4, window_bounds = array<i64: 1, 1, 4>}, {pipeline_mode = #tpu.pipeline_mode<synchronous>, transform_indices = @transform_5, window_bounds = array<i64: 192, 64>}, {pipeline_mode = #tpu.pipeline_mode<synchronous>, transform_indices = @transform_6, window_bounds = array<i64: 384, 128>}, {transform_indices = @transform_7, window_bounds = array<i64: 1, 1, 4>}, {transform_indices = @transform_8, window_bounds = array<i64: 1, 1, 4>}, {pipeline_mode = #tpu.pipeline_mode<synchronous>, transform_indices = @transform_9, window_bounds = array<i64: 192, 64>}, {pipeline_mode = #tpu.pipeline_mode<synchronous>, transform_indices = @transform_10, window_bounds = array<i64: 384, 128>}, {transform_indices = @transform_11, window_bounds = array<i64: 1, 1, 4>}, {transform_indices = @transform_12, window_bounds = array<i64: 1, 1, 4>}, {pipeline_mode = #tpu.pipeline_mode<synchronous>, transform_indices = @transform_13, window_bounds = array<i64: 96, 64>}, {pipeline_mode = #tpu.pipeline_mode<synchronous>, transform_indices = @transform_14, window_bounds = array<i64: 384, 128>}, {transform_indices = @transform_15, window_bounds = array<i64: 1, 1, 8>}, {transform_indices = @transform_16, window_bounds = array<i64: 1, 1, 8>}, {pipeline_mode = #tpu.pipeline_mode<synchronous>, transform_indices = @transform_17, window_bounds = array<i64: 96, 32>}, {pipeline_mode = #tpu.pipeline_mode<synchronous>, transform_indices = @transform_18, window_bounds = array<i64: 384, 128>}, {transform_indices = @transform_19, window_bounds = array<i64: 1, 1, 8>}, {transform_indices = @transform_20, window_bounds = array<i64: 1, 1, 8>}, {pipeline_mode = #tpu.pipeline_mode<synchronous>, transform_indices = @transform_21, window_bounds = array<i64: 48, 32>}, {pipeline_mode = #tpu.pipeline_mode<synchronous>, transform_indices = @transform_22, window_bounds = array<i64: 384, 128>}, {transform_indices = @transform_23, window_bounds = array<i64: 1, 1, 16>}, {transform_indices = @transform_24, window_bounds = array<i64: 1, 1, 16>}, {pipeline_mode = #tpu.pipeline_mode<synchronous>, transform_indices = @transform_25, window_bounds = array<i64: 48, 16>}, {pipeline_mode = #tpu.pipeline_mode<synchronous>, transform_indices = @transform_26, window_bounds = array<i64: 384, 128>}, {transform_indices = @transform_27, window_bounds = array<i64: 1, 1, 16>}, {transform_indices = @transform_28, window_bounds = array<i64: 1, 1, 16>}, {pipeline_mode = #tpu.pipeline_mode<synchronous>, transform_indices = @transform_29, window_bounds = array<i64: 32, 64>}, {pipeline_mode = #tpu.pipeline_mode<synchronous>, transform_indices = @transform_30, window_bounds = array<i64: 128, 128>}, {transform_indices = @transform_31, window_bounds = array<i64: 1, 1, 8>}, {transform_indices = @transform_32, window_bounds = array<i64: 1, 1, 8>}, {pipeline_mode = #tpu.pipeline_mode<synchronous>, transform_indices = @transform_33, window_bounds = array<i64: 16, 32>}, {pipeline_mode = #tpu.pipeline_mode<synchronous>, transform_indices = @transform_34, window_bounds = array<i64: 128, 128>}, {transform_indices = @transform_35, window_bounds = array<i64: 1, 1, 16>}, {transform_indices = @transform_36, window_bounds = array<i64: 1, 1, 16>}, {pipeline_mode = #tpu.pipeline_mode<synchronous>, transform_indices = @transform_37, window_bounds = array<i64: 128, 4>}, {pipeline_mode = #tpu.pipeline_mode<synchronous>, transform_indices = @transform_38, window_bounds = array<i64: 4, 128>}, {pipeline_mode = #tpu.pipeline_mode<synchronous>, transform_indices = @transform_39, window_bounds = array<i64: 128, 8>}, {pipeline_mode = #tpu.pipeline_mode<synchronous>, transform_indices = @transform_40, window_bounds = array<i64: 8, 128>}, {pipeline_mode = #tpu.pipeline_mode<synchronous>, transform_indices = @transform_41, window_bounds = array<i64: 128, 16>}, {pipeline_mode = #tpu.pipeline_mode<synchronous>, transform_indices = @transform_42, window_bounds = array<i64: 16, 128>}, {pipeline_mode = #tpu.pipeline_mode<synchronous>, transform_indices = @transform_43, window_bounds = array<i64: 2, 16>}, {pipeline_mode = #tpu.pipeline_mode<synchronous>, transform_indices = @transform_44, window_bounds = array<i64: 16, 10>}, {pipeline_mode = #tpu.pipeline_mode<synchronous>, transform_indices = @transform_45, window_bounds = array<i64: 2, 10>}]} {
    %c0_i32 = arith.constant 0 : i32
    %0 = arith.cmpi eq, %arg0, %c0_i32 : i32
    %1 = arith.extui %0 : i1 to i32
    %c0_i32_0 = arith.constant 0 : i32
    %2 = arith.cmpi ne, %1, %c0_i32_0 : i32
    scf.if %2 {
      %cst_330 = arith.constant 0.000000e+00 : f32
      %499 = vector.broadcast %cst_330 : f32 to vector<2x10xf32>
      %c0_331 = arith.constant 0 : index
      %c0_332 = arith.constant 0 : index
      %500 = vector.load %arg46[%c0_331, %c0_332] : memref<2x10xf32, #tpu.memory_space<vmem>>, vector<2x10xf32>
      tpu.vector_store %arg46[%c0_331, %c0_332], %499 {strides = array<i32>} : memref<2x10xf32, #tpu.memory_space<vmem>>, vector<2x10xf32>,
      %cst_333 = arith.constant 0.000000e+00 : f32
      %501 = vector.broadcast %cst_333 : f32 to vector<64x128xf32>
      %c0_334 = arith.constant 0 : index
      %c0_335 = arith.constant 0 : index
      %502 = vector.load %arg47[%c0_334, %c0_335] : memref<64x128xf32, #tpu.memory_space<vmem>>, vector<64x128xf32>
      tpu.vector_store %arg47[%c0_334, %c0_335], %501 {strides = array<i32>} : memref<64x128xf32, #tpu.memory_space<vmem>>, vector<64x128xf32>,
      %cst_336 = arith.constant 0.000000e+00 : f32
      %503 = vector.broadcast %cst_336 : f32 to vector<64x128xf32>
      %c0_337 = arith.constant 0 : index
      %c0_338 = arith.constant 0 : index
      %504 = vector.load %arg48[%c0_337, %c0_338] : memref<64x128xf32, #tpu.memory_space<vmem>>, vector<64x128xf32>
      tpu.vector_store %arg48[%c0_337, %c0_338], %503 {strides = array<i32>} : memref<64x128xf32, #tpu.memory_space<vmem>>, vector<64x128xf32>,
      %cst_339 = arith.constant 0.000000e+00 : f32
      %505 = vector.broadcast %cst_339 : f32 to vector<64x128xf32>
      %c0_340 = arith.constant 0 : index
      %c0_341 = arith.constant 0 : index
      %506 = vector.load %arg49[%c0_340, %c0_341] : memref<64x128xf32, #tpu.memory_space<vmem>>, vector<64x128xf32>
      tpu.vector_store %arg49[%c0_340, %c0_341], %505 {strides = array<i32>} : memref<64x128xf32, #tpu.memory_space<vmem>>, vector<64x128xf32>,
      %cst_342 = arith.constant 0.000000e+00 : f32
      %507 = vector.broadcast %cst_342 : f32 to vector<32x128xf32>
      %c0_343 = arith.constant 0 : index
      %c0_344 = arith.constant 0 : index
      %508 = vector.load %arg50[%c0_343, %c0_344] : memref<32x128xf32, #tpu.memory_space<vmem>>, vector<32x128xf32>
      tpu.vector_store %arg50[%c0_343, %c0_344], %507 {strides = array<i32>} : memref<32x128xf32, #tpu.memory_space<vmem>>, vector<32x128xf32>,
      %cst_345 = arith.constant 0.000000e+00 : f32
      %509 = vector.broadcast %cst_345 : f32 to vector<32x128xf32>
      %c0_346 = arith.constant 0 : index
      %c0_347 = arith.constant 0 : index
      %510 = vector.load %arg51[%c0_346, %c0_347] : memref<32x128xf32, #tpu.memory_space<vmem>>, vector<32x128xf32>
      tpu.vector_store %arg51[%c0_346, %c0_347], %509 {strides = array<i32>} : memref<32x128xf32, #tpu.memory_space<vmem>>, vector<32x128xf32>,
      %cst_348 = arith.constant 0.000000e+00 : f32
      %511 = vector.broadcast %cst_348 : f32 to vector<16x128xf32>
      %c0_349 = arith.constant 0 : index
      %c0_350 = arith.constant 0 : index
      %512 = vector.load %arg52[%c0_349, %c0_350] : memref<16x128xf32, #tpu.memory_space<vmem>>, vector<16x128xf32>
      tpu.vector_store %arg52[%c0_349, %c0_350], %511 {strides = array<i32>} : memref<16x128xf32, #tpu.memory_space<vmem>>, vector<16x128xf32>,
      %cst_351 = arith.constant 0.000000e+00 : f32
      %513 = vector.broadcast %cst_351 : f32 to vector<16x128xf32>
      %c0_352 = arith.constant 0 : index
      %c0_353 = arith.constant 0 : index
      %514 = vector.load %arg53[%c0_352, %c0_353] : memref<16x128xf32, #tpu.memory_space<vmem>>, vector<16x128xf32>
      tpu.vector_store %arg53[%c0_352, %c0_353], %513 {strides = array<i32>} : memref<16x128xf32, #tpu.memory_space<vmem>>, vector<16x128xf32>,
    } else {
    }
    %c0 = arith.constant 0 : index
    %c0_1 = arith.constant 0 : index
    %c0_2 = arith.constant 0 : index
    %3 = vector.load %arg1[%c0, %c0_1, %c0_2] : memref<1x128x128xbf16, #tpu.memory_space<vmem>>, vector<1x128x128xbf16>
    %4 = vector.shape_cast %3 : vector<1x128x128xbf16> to vector<128x128xbf16>
    %c0_3 = arith.constant 0 : index
    %c0_4 = arith.constant 0 : index
    %5 = vector.load %arg2[%c0_3, %c0_4] : memref<192x128xbf16, #tpu.memory_space<vmem>>, vector<192x128xbf16>
    %cst = arith.constant dense<0.000000e+00> : vector<192x128xf32>
    %6 = tpu.matmul %5, %4, %cst {dimension_numbers = #tpu.dot_dimension_numbers<[1], [0], [0], [1], [0, 0, 1, 1], [], []>} : vector<192x128xbf16>, vector<128x128xbf16>, vector<192x128xf32> -> vector<192x128xf32>
    %7 = arith.truncf %6 : vector<192x128xf32> to vector<192x128xbf16>
    %8 = vector.extract_strided_slice %7 {offsets = [0, 0], sizes = [64, 128], strides = [1, 1]} : vector<192x128xbf16> to vector<64x128xbf16>
    %c0_5 = arith.constant 0 : index
    %c0_6 = arith.constant 0 : index
    %9 = vector.load %arg3[%c0_5, %c0_6] : memref<384x128xbf16, #tpu.memory_space<vmem>>, vector<128x128xbf16>
    %cst_7 = arith.constant dense<0.000000e+00> : vector<64x128xf32>
    %10 = tpu.matmul %8, %9, %cst_7 {dimension_numbers = #tpu.dot_dimension_numbers<[1], [0], [0], [1], [0, 0, 1, 1], [], []>} : vector<64x128xbf16>, vector<128x128xbf16>, vector<64x128xf32> -> vector<64x128xf32>
    %11 = vector.extract_strided_slice %7 {offsets = [64, 0], sizes = [64, 128], strides = [1, 1]} : vector<192x128xbf16> to vector<64x128xbf16>
    %c128 = arith.constant 128 : index
    %c0_8 = arith.constant 0 : index
    %12 = vector.load %arg3[%c128, %c0_8] : memref<384x128xbf16, #tpu.memory_space<vmem>>, vector<128x128xbf16>
    %cst_9 = arith.constant dense<0.000000e+00> : vector<64x128xf32>
    %13 = tpu.matmul %11, %12, %cst_9 {dimension_numbers = #tpu.dot_dimension_numbers<[1], [0], [0], [1], [0, 0, 1, 1], [], []>} : vector<64x128xbf16>, vector<128x128xbf16>, vector<64x128xf32> -> vector<64x128xf32>
    %14 = arith.addf %10, %13 : vector<64x128xf32>
    %15 = vector.extract_strided_slice %7 {offsets = [128, 0], sizes = [64, 128], strides = [1, 1]} : vector<192x128xbf16> to vector<64x128xbf16>
    %c256 = arith.constant 256 : index
    %c0_10 = arith.constant 0 : index
    %16 = vector.load %arg3[%c256, %c0_10] : memref<384x128xbf16, #tpu.memory_space<vmem>>, vector<128x128xbf16>
    %cst_11 = arith.constant dense<0.000000e+00> : vector<64x128xf32>
    %17 = tpu.matmul %15, %16, %cst_11 {dimension_numbers = #tpu.dot_dimension_numbers<[1], [0], [0], [1], [0, 0, 1, 1], [], []>} : vector<64x128xbf16>, vector<128x128xbf16>, vector<64x128xf32> -> vector<64x128xf32>
    %18 = arith.addf %14, %17 : vector<64x128xf32>
    %c0_12 = arith.constant 0 : index
    %c0_13 = arith.constant 0 : index
    %19 = vector.load %arg38[%c0_12, %c0_13] : memref<128x4xf32, #tpu.memory_space<vmem>>, vector<128x4xf32>
    %cst_14 = arith.constant dense<0.000000e+00> : vector<64x4xf32>
    %20 = tpu.matmul %18, %19, %cst_14 {dimension_numbers = #tpu.dot_dimension_numbers<[1], [0], [0], [1], [0, 0, 1, 1], [], []>} : vector<64x128xf32>, vector<128x4xf32>, vector<64x4xf32> -> vector<64x4xf32>
    %cst_15 = arith.constant dense<0.000000e+00> : vector<4xf32>
    %21 = vector.multi_reduction <add>, %20, %cst_15 [0] : vector<64x4xf32> to vector<4xf32>
    %22 = vector.shape_cast %21 : vector<4xf32> to vector<1x4xf32>
    %23 = arith.mulf %18, %18 : vector<64x128xf32>
    %cst_16 = arith.constant dense<0.000000e+00> : vector<64x4xf32>
    %24 = tpu.matmul %23, %19, %cst_16 {dimension_numbers = #tpu.dot_dimension_numbers<[1], [0], [0], [1], [0, 0, 1, 1], [], []>} : vector<64x128xf32>, vector<128x4xf32>, vector<64x4xf32> -> vector<64x4xf32>
    %cst_17 = arith.constant dense<0.000000e+00> : vector<4xf32>
    %25 = vector.multi_reduction <add>, %24, %cst_17 [0] : vector<64x4xf32> to vector<4xf32>
    %26 = vector.shape_cast %25 : vector<4xf32> to vector<1x4xf32>
    %cst_18 = arith.constant 4.8828125E-4 : f32
    %27 = vector.broadcast %cst_18 : f32 to vector<1x4xf32>
    %28 = arith.mulf %22, %27 : vector<1x4xf32>
    %cst_19 = arith.constant 4.8828125E-4 : f32
    %29 = vector.broadcast %cst_19 : f32 to vector<1x4xf32>
    %30 = arith.mulf %26, %29 : vector<1x4xf32>
    %31 = arith.mulf %28, %28 : vector<1x4xf32>
    %32 = arith.subf %30, %31 : vector<1x4xf32>
    %c0_20 = arith.constant 0 : index
    %c0_21 = arith.constant 0 : index
    %c0_22 = arith.constant 0 : index
    %33 = vector.load %arg4[%c0_20, %c0_21, %c0_22] : memref<1x1x4xf32, #tpu.memory_space<vmem>>, vector<1x1x4xf32>
    %34 = vector.shape_cast %33 : vector<1x1x4xf32> to vector<1x4xf32>
    %cst_23 = arith.constant 9.99999974E-5 : f32
    %35 = vector.broadcast %cst_23 : f32 to vector<1x4xf32>
    %36 = arith.addf %32, %35 : vector<1x4xf32>
    %37 = math.rsqrt %36 : vector<1x4xf32>
    %38 = arith.mulf %34, %37 : vector<1x4xf32>
    %c0_24 = arith.constant 0 : index
    %c0_25 = arith.constant 0 : index
    %c0_26 = arith.constant 0 : index
    %39 = vector.load %arg5[%c0_24, %c0_25, %c0_26] : memref<1x1x4xf32, #tpu.memory_space<vmem>>, vector<1x1x4xf32>
    %40 = vector.shape_cast %39 : vector<1x1x4xf32> to vector<1x4xf32>
    %41 = arith.mulf %28, %38 : vector<1x4xf32>
    %42 = arith.subf %40, %41 : vector<1x4xf32>
    %c0_27 = arith.constant 0 : index
    %c0_28 = arith.constant 0 : index
    %43 = vector.load %arg39[%c0_27, %c0_28] : memref<4x128xf32, #tpu.memory_space<vmem>>, vector<4x128xf32>
    %cst_29 = arith.constant dense<0.000000e+00> : vector<1x128xf32>
    %44 = tpu.matmul %38, %43, %cst_29 {dimension_numbers = #tpu.dot_dimension_numbers<[1], [0], [0], [1], [0, 0, 1, 1], [], []>} : vector<1x4xf32>, vector<4x128xf32>, vector<1x128xf32> -> vector<1x128xf32>
    %45 = vector.broadcast %44 : vector<1x128xf32> to vector<64x128xf32>
    %46 = arith.mulf %18, %45 : vector<64x128xf32>
    %cst_30 = arith.constant dense<0.000000e+00> : vector<1x128xf32>
    %47 = tpu.matmul %42, %43, %cst_30 {dimension_numbers = #tpu.dot_dimension_numbers<[1], [0], [0], [1], [0, 0, 1, 1], [], []>} : vector<1x4xf32>, vector<4x128xf32>, vector<1x128xf32> -> vector<1x128xf32>
    %48 = vector.broadcast %47 : vector<1x128xf32> to vector<64x128xf32>
    %49 = arith.addf %46, %48 : vector<64x128xf32>
    %c0_31 = arith.constant 0 : index
    %c0_32 = arith.constant 0 : index
    %50 = vector.load %arg47[%c0_31, %c0_32] : memref<64x128xf32, #tpu.memory_space<vmem>>, vector<64x128xf32>
    %cst_33 = arith.constant 0.949999988 : f32
    %51 = vector.broadcast %cst_33 : f32 to vector<64x128xf32>
    %52 = arith.mulf %51, %50 : vector<64x128xf32>
    %53 = arith.addf %52, %49 : vector<64x128xf32>
    %cst_34 = arith.constant 1.000000e+00 : f32
    %54 = vector.broadcast %cst_34 : f32 to vector<64x128xf32>
    %55 = arith.cmpf ogt, %53, %54 : vector<64x128xf32>
    %56 = arith.extui %55 : vector<64x128xi1> to vector<64x128xi32>
    %57 = arith.sitofp %56 : vector<64x128xi32> to vector<64x128xf32>
    %cst_35 = arith.constant 1.000000e+00 : f32
    %58 = vector.broadcast %cst_35 : f32 to vector<64x128xf32>
    %59 = arith.mulf %57, %58 : vector<64x128xf32>
    %60 = arith.subf %53, %59 : vector<64x128xf32>
    %c0_36 = arith.constant 0 : index
    %c0_37 = arith.constant 0 : index
    %61 = vector.load %arg47[%c0_36, %c0_37] : memref<64x128xf32, #tpu.memory_space<vmem>>, vector<64x128xf32>
    tpu.vector_store %arg47[%c0_36, %c0_37], %60 {strides = array<i32>} : memref<64x128xf32, #tpu.memory_space<vmem>>, vector<64x128xf32>,
    %62 = arith.truncf %57 : vector<64x128xf32> to vector<64x128xbf16>
    %c0_38 = arith.constant 0 : index
    %c0_39 = arith.constant 0 : index
    %63 = vector.load %arg6[%c0_38, %c0_39] : memref<192x64xbf16, #tpu.memory_space<vmem>>, vector<192x64xbf16>
    %cst_40 = arith.constant dense<0.000000e+00> : vector<192x128xf32>
    %64 = tpu.matmul %63, %62, %cst_40 {dimension_numbers = #tpu.dot_dimension_numbers<[1], [0], [0], [1], [0, 0, 1, 1], [], []>} : vector<192x64xbf16>, vector<64x128xbf16>, vector<192x128xf32> -> vector<192x128xf32>
    %65 = arith.truncf %64 : vector<192x128xf32> to vector<192x128xbf16>
    %66 = vector.extract_strided_slice %65 {offsets = [0, 0], sizes = [64, 128], strides = [1, 1]} : vector<192x128xbf16> to vector<64x128xbf16>
    %c0_41 = arith.constant 0 : index
    %c0_42 = arith.constant 0 : index
    %67 = vector.load %arg7[%c0_41, %c0_42] : memref<384x128xbf16, #tpu.memory_space<vmem>>, vector<128x128xbf16>
    %cst_43 = arith.constant dense<0.000000e+00> : vector<64x128xf32>
    %68 = tpu.matmul %66, %67, %cst_43 {dimension_numbers = #tpu.dot_dimension_numbers<[1], [0], [0], [1], [0, 0, 1, 1], [], []>} : vector<64x128xbf16>, vector<128x128xbf16>, vector<64x128xf32> -> vector<64x128xf32>
    %69 = vector.extract_strided_slice %65 {offsets = [64, 0], sizes = [64, 128], strides = [1, 1]} : vector<192x128xbf16> to vector<64x128xbf16>
    %c128_44 = arith.constant 128 : index
    %c0_45 = arith.constant 0 : index
    %70 = vector.load %arg7[%c128_44, %c0_45] : memref<384x128xbf16, #tpu.memory_space<vmem>>, vector<128x128xbf16>
    %cst_46 = arith.constant dense<0.000000e+00> : vector<64x128xf32>
    %71 = tpu.matmul %69, %70, %cst_46 {dimension_numbers = #tpu.dot_dimension_numbers<[1], [0], [0], [1], [0, 0, 1, 1], [], []>} : vector<64x128xbf16>, vector<128x128xbf16>, vector<64x128xf32> -> vector<64x128xf32>
    %72 = arith.addf %68, %71 : vector<64x128xf32>
    %73 = vector.extract_strided_slice %65 {offsets = [128, 0], sizes = [64, 128], strides = [1, 1]} : vector<192x128xbf16> to vector<64x128xbf16>
    %c256_47 = arith.constant 256 : index
    %c0_48 = arith.constant 0 : index
    %74 = vector.load %arg7[%c256_47, %c0_48] : memref<384x128xbf16, #tpu.memory_space<vmem>>, vector<128x128xbf16>
    %cst_49 = arith.constant dense<0.000000e+00> : vector<64x128xf32>
    %75 = tpu.matmul %73, %74, %cst_49 {dimension_numbers = #tpu.dot_dimension_numbers<[1], [0], [0], [1], [0, 0, 1, 1], [], []>} : vector<64x128xbf16>, vector<128x128xbf16>, vector<64x128xf32> -> vector<64x128xf32>
    %76 = arith.addf %72, %75 : vector<64x128xf32>
    %c0_50 = arith.constant 0 : index
    %c0_51 = arith.constant 0 : index
    %77 = vector.load %arg38[%c0_50, %c0_51] : memref<128x4xf32, #tpu.memory_space<vmem>>, vector<128x4xf32>
    %cst_52 = arith.constant dense<0.000000e+00> : vector<64x4xf32>
    %78 = tpu.matmul %76, %77, %cst_52 {dimension_numbers = #tpu.dot_dimension_numbers<[1], [0], [0], [1], [0, 0, 1, 1], [], []>} : vector<64x128xf32>, vector<128x4xf32>, vector<64x4xf32> -> vector<64x4xf32>
    %cst_53 = arith.constant dense<0.000000e+00> : vector<4xf32>
    %79 = vector.multi_reduction <add>, %78, %cst_53 [0] : vector<64x4xf32> to vector<4xf32>
    %80 = vector.shape_cast %79 : vector<4xf32> to vector<1x4xf32>
    %81 = arith.mulf %76, %76 : vector<64x128xf32>
    %cst_54 = arith.constant dense<0.000000e+00> : vector<64x4xf32>
    %82 = tpu.matmul %81, %77, %cst_54 {dimension_numbers = #tpu.dot_dimension_numbers<[1], [0], [0], [1], [0, 0, 1, 1], [], []>} : vector<64x128xf32>, vector<128x4xf32>, vector<64x4xf32> -> vector<64x4xf32>
    %cst_55 = arith.constant dense<0.000000e+00> : vector<4xf32>
    %83 = vector.multi_reduction <add>, %82, %cst_55 [0] : vector<64x4xf32> to vector<4xf32>
    %84 = vector.shape_cast %83 : vector<4xf32> to vector<1x4xf32>
    %cst_56 = arith.constant 4.8828125E-4 : f32
    %85 = vector.broadcast %cst_56 : f32 to vector<1x4xf32>
    %86 = arith.mulf %80, %85 : vector<1x4xf32>
    %cst_57 = arith.constant 4.8828125E-4 : f32
    %87 = vector.broadcast %cst_57 : f32 to vector<1x4xf32>
    %88 = arith.mulf %84, %87 : vector<1x4xf32>
    %89 = arith.mulf %86, %86 : vector<1x4xf32>
    %90 = arith.subf %88, %89 : vector<1x4xf32>
    %c0_58 = arith.constant 0 : index
    %c0_59 = arith.constant 0 : index
    %c0_60 = arith.constant 0 : index
    %91 = vector.load %arg8[%c0_58, %c0_59, %c0_60] : memref<1x1x4xf32, #tpu.memory_space<vmem>>, vector<1x1x4xf32>
    %92 = vector.shape_cast %91 : vector<1x1x4xf32> to vector<1x4xf32>
    %cst_61 = arith.constant 9.99999974E-5 : f32
    %93 = vector.broadcast %cst_61 : f32 to vector<1x4xf32>
    %94 = arith.addf %90, %93 : vector<1x4xf32>
    %95 = math.rsqrt %94 : vector<1x4xf32>
    %96 = arith.mulf %92, %95 : vector<1x4xf32>
    %c0_62 = arith.constant 0 : index
    %c0_63 = arith.constant 0 : index
    %c0_64 = arith.constant 0 : index
    %97 = vector.load %arg9[%c0_62, %c0_63, %c0_64] : memref<1x1x4xf32, #tpu.memory_space<vmem>>, vector<1x1x4xf32>
    %98 = vector.shape_cast %97 : vector<1x1x4xf32> to vector<1x4xf32>
    %99 = arith.mulf %86, %96 : vector<1x4xf32>
    %100 = arith.subf %98, %99 : vector<1x4xf32>
    %c0_65 = arith.constant 0 : index
    %c0_66 = arith.constant 0 : index
    %101 = vector.load %arg39[%c0_65, %c0_66] : memref<4x128xf32, #tpu.memory_space<vmem>>, vector<4x128xf32>
    %cst_67 = arith.constant dense<0.000000e+00> : vector<1x128xf32>
    %102 = tpu.matmul %96, %101, %cst_67 {dimension_numbers = #tpu.dot_dimension_numbers<[1], [0], [0], [1], [0, 0, 1, 1], [], []>} : vector<1x4xf32>, vector<4x128xf32>, vector<1x128xf32> -> vector<1x128xf32>
    %103 = vector.broadcast %102 : vector<1x128xf32> to vector<64x128xf32>
    %104 = arith.mulf %76, %103 : vector<64x128xf32>
    %cst_68 = arith.constant dense<0.000000e+00> : vector<1x128xf32>
    %105 = tpu.matmul %100, %101, %cst_68 {dimension_numbers = #tpu.dot_dimension_numbers<[1], [0], [0], [1], [0, 0, 1, 1], [], []>} : vector<1x4xf32>, vector<4x128xf32>, vector<1x128xf32> -> vector<1x128xf32>
    %106 = vector.broadcast %105 : vector<1x128xf32> to vector<64x128xf32>
    %107 = arith.addf %104, %106 : vector<64x128xf32>
    %c0_69 = arith.constant 0 : index
    %c0_70 = arith.constant 0 : index
    %108 = vector.load %arg48[%c0_69, %c0_70] : memref<64x128xf32, #tpu.memory_space<vmem>>, vector<64x128xf32>
    %cst_71 = arith.constant 0.949999988 : f32
    %109 = vector.broadcast %cst_71 : f32 to vector<64x128xf32>
    %110 = arith.mulf %109, %108 : vector<64x128xf32>
    %111 = arith.addf %110, %107 : vector<64x128xf32>
    %cst_72 = arith.constant 1.000000e+00 : f32
    %112 = vector.broadcast %cst_72 : f32 to vector<64x128xf32>
    %113 = arith.cmpf ogt, %111, %112 : vector<64x128xf32>
    %114 = arith.extui %113 : vector<64x128xi1> to vector<64x128xi32>
    %115 = arith.sitofp %114 : vector<64x128xi32> to vector<64x128xf32>
    %cst_73 = arith.constant 1.000000e+00 : f32
    %116 = vector.broadcast %cst_73 : f32 to vector<64x128xf32>
    %117 = arith.mulf %115, %116 : vector<64x128xf32>
    %118 = arith.subf %111, %117 : vector<64x128xf32>
    %c0_74 = arith.constant 0 : index
    %c0_75 = arith.constant 0 : index
    %119 = vector.load %arg48[%c0_74, %c0_75] : memref<64x128xf32, #tpu.memory_space<vmem>>, vector<64x128xf32>
    tpu.vector_store %arg48[%c0_74, %c0_75], %118 {strides = array<i32>} : memref<64x128xf32, #tpu.memory_space<vmem>>, vector<64x128xf32>,
    %120 = arith.truncf %115 : vector<64x128xf32> to vector<64x128xbf16>
    %c0_76 = arith.constant 0 : index
    %c0_77 = arith.constant 0 : index
    %121 = vector.load %arg10[%c0_76, %c0_77] : memref<192x64xbf16, #tpu.memory_space<vmem>>, vector<192x64xbf16>
    %cst_78 = arith.constant dense<0.000000e+00> : vector<192x128xf32>
    %122 = tpu.matmul %121, %120, %cst_78 {dimension_numbers = #tpu.dot_dimension_numbers<[1], [0], [0], [1], [0, 0, 1, 1], [], []>} : vector<192x64xbf16>, vector<64x128xbf16>, vector<192x128xf32> -> vector<192x128xf32>
    %123 = arith.truncf %122 : vector<192x128xf32> to vector<192x128xbf16>
    %124 = vector.extract_strided_slice %123 {offsets = [0, 0], sizes = [64, 128], strides = [1, 1]} : vector<192x128xbf16> to vector<64x128xbf16>
    %c0_79 = arith.constant 0 : index
    %c0_80 = arith.constant 0 : index
    %125 = vector.load %arg11[%c0_79, %c0_80] : memref<384x128xbf16, #tpu.memory_space<vmem>>, vector<128x128xbf16>
    %cst_81 = arith.constant dense<0.000000e+00> : vector<64x128xf32>
    %126 = tpu.matmul %124, %125, %cst_81 {dimension_numbers = #tpu.dot_dimension_numbers<[1], [0], [0], [1], [0, 0, 1, 1], [], []>} : vector<64x128xbf16>, vector<128x128xbf16>, vector<64x128xf32> -> vector<64x128xf32>
    %127 = vector.extract_strided_slice %123 {offsets = [64, 0], sizes = [64, 128], strides = [1, 1]} : vector<192x128xbf16> to vector<64x128xbf16>
    %c128_82 = arith.constant 128 : index
    %c0_83 = arith.constant 0 : index
    %128 = vector.load %arg11[%c128_82, %c0_83] : memref<384x128xbf16, #tpu.memory_space<vmem>>, vector<128x128xbf16>
    %cst_84 = arith.constant dense<0.000000e+00> : vector<64x128xf32>
    %129 = tpu.matmul %127, %128, %cst_84 {dimension_numbers = #tpu.dot_dimension_numbers<[1], [0], [0], [1], [0, 0, 1, 1], [], []>} : vector<64x128xbf16>, vector<128x128xbf16>, vector<64x128xf32> -> vector<64x128xf32>
    %130 = arith.addf %126, %129 : vector<64x128xf32>
    %131 = vector.extract_strided_slice %123 {offsets = [128, 0], sizes = [64, 128], strides = [1, 1]} : vector<192x128xbf16> to vector<64x128xbf16>
    %c256_85 = arith.constant 256 : index
    %c0_86 = arith.constant 0 : index
    %132 = vector.load %arg11[%c256_85, %c0_86] : memref<384x128xbf16, #tpu.memory_space<vmem>>, vector<128x128xbf16>
    %cst_87 = arith.constant dense<0.000000e+00> : vector<64x128xf32>
    %133 = tpu.matmul %131, %132, %cst_87 {dimension_numbers = #tpu.dot_dimension_numbers<[1], [0], [0], [1], [0, 0, 1, 1], [], []>} : vector<64x128xbf16>, vector<128x128xbf16>, vector<64x128xf32> -> vector<64x128xf32>
    %134 = arith.addf %130, %133 : vector<64x128xf32>
    %c0_88 = arith.constant 0 : index
    %c0_89 = arith.constant 0 : index
    %135 = vector.load %arg38[%c0_88, %c0_89] : memref<128x4xf32, #tpu.memory_space<vmem>>, vector<128x4xf32>
    %cst_90 = arith.constant dense<0.000000e+00> : vector<64x4xf32>
    %136 = tpu.matmul %134, %135, %cst_90 {dimension_numbers = #tpu.dot_dimension_numbers<[1], [0], [0], [1], [0, 0, 1, 1], [], []>} : vector<64x128xf32>, vector<128x4xf32>, vector<64x4xf32> -> vector<64x4xf32>
    %cst_91 = arith.constant dense<0.000000e+00> : vector<4xf32>
    %137 = vector.multi_reduction <add>, %136, %cst_91 [0] : vector<64x4xf32> to vector<4xf32>
    %138 = vector.shape_cast %137 : vector<4xf32> to vector<1x4xf32>
    %139 = arith.mulf %134, %134 : vector<64x128xf32>
    %cst_92 = arith.constant dense<0.000000e+00> : vector<64x4xf32>
    %140 = tpu.matmul %139, %135, %cst_92 {dimension_numbers = #tpu.dot_dimension_numbers<[1], [0], [0], [1], [0, 0, 1, 1], [], []>} : vector<64x128xf32>, vector<128x4xf32>, vector<64x4xf32> -> vector<64x4xf32>
    %cst_93 = arith.constant dense<0.000000e+00> : vector<4xf32>
    %141 = vector.multi_reduction <add>, %140, %cst_93 [0] : vector<64x4xf32> to vector<4xf32>
    %142 = vector.shape_cast %141 : vector<4xf32> to vector<1x4xf32>
    %cst_94 = arith.constant 4.8828125E-4 : f32
    %143 = vector.broadcast %cst_94 : f32 to vector<1x4xf32>
    %144 = arith.mulf %138, %143 : vector<1x4xf32>
    %cst_95 = arith.constant 4.8828125E-4 : f32
    %145 = vector.broadcast %cst_95 : f32 to vector<1x4xf32>
    %146 = arith.mulf %142, %145 : vector<1x4xf32>
    %147 = arith.mulf %144, %144 : vector<1x4xf32>
    %148 = arith.subf %146, %147 : vector<1x4xf32>
    %c0_96 = arith.constant 0 : index
    %c0_97 = arith.constant 0 : index
    %c0_98 = arith.constant 0 : index
    %149 = vector.load %arg12[%c0_96, %c0_97, %c0_98] : memref<1x1x4xf32, #tpu.memory_space<vmem>>, vector<1x1x4xf32>
    %150 = vector.shape_cast %149 : vector<1x1x4xf32> to vector<1x4xf32>
    %cst_99 = arith.constant 9.99999974E-5 : f32
    %151 = vector.broadcast %cst_99 : f32 to vector<1x4xf32>
    %152 = arith.addf %148, %151 : vector<1x4xf32>
    %153 = math.rsqrt %152 : vector<1x4xf32>
    %154 = arith.mulf %150, %153 : vector<1x4xf32>
    %c0_100 = arith.constant 0 : index
    %c0_101 = arith.constant 0 : index
    %c0_102 = arith.constant 0 : index
    %155 = vector.load %arg13[%c0_100, %c0_101, %c0_102] : memref<1x1x4xf32, #tpu.memory_space<vmem>>, vector<1x1x4xf32>
    %156 = vector.shape_cast %155 : vector<1x1x4xf32> to vector<1x4xf32>
    %157 = arith.mulf %144, %154 : vector<1x4xf32>
    %158 = arith.subf %156, %157 : vector<1x4xf32>
    %c0_103 = arith.constant 0 : index
    %c0_104 = arith.constant 0 : index
    %159 = vector.load %arg39[%c0_103, %c0_104] : memref<4x128xf32, #tpu.memory_space<vmem>>, vector<4x128xf32>
    %cst_105 = arith.constant dense<0.000000e+00> : vector<1x128xf32>
    %160 = tpu.matmul %154, %159, %cst_105 {dimension_numbers = #tpu.dot_dimension_numbers<[1], [0], [0], [1], [0, 0, 1, 1], [], []>} : vector<1x4xf32>, vector<4x128xf32>, vector<1x128xf32> -> vector<1x128xf32>
    %161 = vector.broadcast %160 : vector<1x128xf32> to vector<64x128xf32>
    %162 = arith.mulf %134, %161 : vector<64x128xf32>
    %cst_106 = arith.constant dense<0.000000e+00> : vector<1x128xf32>
    %163 = tpu.matmul %158, %159, %cst_106 {dimension_numbers = #tpu.dot_dimension_numbers<[1], [0], [0], [1], [0, 0, 1, 1], [], []>} : vector<1x4xf32>, vector<4x128xf32>, vector<1x128xf32> -> vector<1x128xf32>
    %164 = vector.broadcast %163 : vector<1x128xf32> to vector<64x128xf32>
    %165 = arith.addf %162, %164 : vector<64x128xf32>
    %c0_107 = arith.constant 0 : index
    %c0_108 = arith.constant 0 : index
    %166 = vector.load %arg49[%c0_107, %c0_108] : memref<64x128xf32, #tpu.memory_space<vmem>>, vector<64x128xf32>
    %cst_109 = arith.constant 0.949999988 : f32
    %167 = vector.broadcast %cst_109 : f32 to vector<64x128xf32>
    %168 = arith.mulf %167, %166 : vector<64x128xf32>
    %169 = arith.addf %168, %165 : vector<64x128xf32>
    %cst_110 = arith.constant 1.000000e+00 : f32
    %170 = vector.broadcast %cst_110 : f32 to vector<64x128xf32>
    %171 = arith.cmpf ogt, %169, %170 : vector<64x128xf32>
    %172 = arith.extui %171 : vector<64x128xi1> to vector<64x128xi32>
    %173 = arith.sitofp %172 : vector<64x128xi32> to vector<64x128xf32>
    %cst_111 = arith.constant 1.000000e+00 : f32
    %174 = vector.broadcast %cst_111 : f32 to vector<64x128xf32>
    %175 = arith.mulf %173, %174 : vector<64x128xf32>
    %176 = arith.subf %169, %175 : vector<64x128xf32>
    %c0_112 = arith.constant 0 : index
    %c0_113 = arith.constant 0 : index
    %177 = vector.load %arg49[%c0_112, %c0_113] : memref<64x128xf32, #tpu.memory_space<vmem>>, vector<64x128xf32>
    tpu.vector_store %arg49[%c0_112, %c0_113], %176 {strides = array<i32>} : memref<64x128xf32, #tpu.memory_space<vmem>>, vector<64x128xf32>,
    %178 = arith.addf %173, %57 : vector<64x128xf32>
    %179 = arith.truncf %178 : vector<64x128xf32> to vector<64x128xbf16>
    %c0_114 = arith.constant 0 : index
    %c0_115 = arith.constant 0 : index
    %180 = vector.load %arg14[%c0_114, %c0_115] : memref<96x64xbf16, #tpu.memory_space<vmem>>, vector<96x64xbf16>
    %cst_116 = arith.constant dense<0.000000e+00> : vector<96x128xf32>
    %181 = tpu.matmul %180, %179, %cst_116 {dimension_numbers = #tpu.dot_dimension_numbers<[1], [0], [0], [1], [0, 0, 1, 1], [], []>} : vector<96x64xbf16>, vector<64x128xbf16>, vector<96x128xf32> -> vector<96x128xf32>
    %182 = arith.truncf %181 : vector<96x128xf32> to vector<96x128xbf16>
    %183 = vector.extract_strided_slice %182 {offsets = [0, 0], sizes = [32, 128], strides = [1, 1]} : vector<96x128xbf16> to vector<32x128xbf16>
    %c0_117 = arith.constant 0 : index
    %c0_118 = arith.constant 0 : index
    %184 = vector.load %arg15[%c0_117, %c0_118] : memref<384x128xbf16, #tpu.memory_space<vmem>>, vector<128x128xbf16>
    %cst_119 = arith.constant dense<0.000000e+00> : vector<32x128xf32>
    %185 = tpu.matmul %183, %184, %cst_119 {dimension_numbers = #tpu.dot_dimension_numbers<[1], [0], [0], [1], [0, 0, 1, 1], [], []>} : vector<32x128xbf16>, vector<128x128xbf16>, vector<32x128xf32> -> vector<32x128xf32>
    %186 = vector.extract_strided_slice %182 {offsets = [32, 0], sizes = [32, 128], strides = [1, 1]} : vector<96x128xbf16> to vector<32x128xbf16>
    %c128_120 = arith.constant 128 : index
    %c0_121 = arith.constant 0 : index
    %187 = vector.load %arg15[%c128_120, %c0_121] : memref<384x128xbf16, #tpu.memory_space<vmem>>, vector<128x128xbf16>
    %cst_122 = arith.constant dense<0.000000e+00> : vector<32x128xf32>
    %188 = tpu.matmul %186, %187, %cst_122 {dimension_numbers = #tpu.dot_dimension_numbers<[1], [0], [0], [1], [0, 0, 1, 1], [], []>} : vector<32x128xbf16>, vector<128x128xbf16>, vector<32x128xf32> -> vector<32x128xf32>
    %189 = arith.addf %185, %188 : vector<32x128xf32>
    %190 = vector.extract_strided_slice %182 {offsets = [64, 0], sizes = [32, 128], strides = [1, 1]} : vector<96x128xbf16> to vector<32x128xbf16>
    %c256_123 = arith.constant 256 : index
    %c0_124 = arith.constant 0 : index
    %191 = vector.load %arg15[%c256_123, %c0_124] : memref<384x128xbf16, #tpu.memory_space<vmem>>, vector<128x128xbf16>
    %cst_125 = arith.constant dense<0.000000e+00> : vector<32x128xf32>
    %192 = tpu.matmul %190, %191, %cst_125 {dimension_numbers = #tpu.dot_dimension_numbers<[1], [0], [0], [1], [0, 0, 1, 1], [], []>} : vector<32x128xbf16>, vector<128x128xbf16>, vector<32x128xf32> -> vector<32x128xf32>
    %193 = arith.addf %189, %192 : vector<32x128xf32>
    %c0_126 = arith.constant 0 : index
    %c0_127 = arith.constant 0 : index
    %194 = vector.load %arg40[%c0_126, %c0_127] : memref<128x8xf32, #tpu.memory_space<vmem>>, vector<128x8xf32>
    %cst_128 = arith.constant dense<0.000000e+00> : vector<32x8xf32>
    %195 = tpu.matmul %193, %194, %cst_128 {dimension_numbers = #tpu.dot_dimension_numbers<[1], [0], [0], [1], [0, 0, 1, 1], [], []>} : vector<32x128xf32>, vector<128x8xf32>, vector<32x8xf32> -> vector<32x8xf32>
    %cst_129 = arith.constant dense<0.000000e+00> : vector<8xf32>
    %196 = vector.multi_reduction <add>, %195, %cst_129 [0] : vector<32x8xf32> to vector<8xf32>
    %197 = vector.shape_cast %196 : vector<8xf32> to vector<1x8xf32>
    %198 = arith.mulf %193, %193 : vector<32x128xf32>
    %cst_130 = arith.constant dense<0.000000e+00> : vector<32x8xf32>
    %199 = tpu.matmul %198, %194, %cst_130 {dimension_numbers = #tpu.dot_dimension_numbers<[1], [0], [0], [1], [0, 0, 1, 1], [], []>} : vector<32x128xf32>, vector<128x8xf32>, vector<32x8xf32> -> vector<32x8xf32>
    %cst_131 = arith.constant dense<0.000000e+00> : vector<8xf32>
    %200 = vector.multi_reduction <add>, %199, %cst_131 [0] : vector<32x8xf32> to vector<8xf32>
    %201 = vector.shape_cast %200 : vector<8xf32> to vector<1x8xf32>
    %cst_132 = arith.constant 0.001953125 : f32
    %202 = vector.broadcast %cst_132 : f32 to vector<1x8xf32>
    %203 = arith.mulf %197, %202 : vector<1x8xf32>
    %cst_133 = arith.constant 0.001953125 : f32
    %204 = vector.broadcast %cst_133 : f32 to vector<1x8xf32>
    %205 = arith.mulf %201, %204 : vector<1x8xf32>
    %206 = arith.mulf %203, %203 : vector<1x8xf32>
    %207 = arith.subf %205, %206 : vector<1x8xf32>
    %c0_134 = arith.constant 0 : index
    %c0_135 = arith.constant 0 : index
    %c0_136 = arith.constant 0 : index
    %208 = vector.load %arg16[%c0_134, %c0_135, %c0_136] : memref<1x1x8xf32, #tpu.memory_space<vmem>>, vector<1x1x8xf32>
    %209 = vector.shape_cast %208 : vector<1x1x8xf32> to vector<1x8xf32>
    %cst_137 = arith.constant 9.99999974E-5 : f32
    %210 = vector.broadcast %cst_137 : f32 to vector<1x8xf32>
    %211 = arith.addf %207, %210 : vector<1x8xf32>
    %212 = math.rsqrt %211 : vector<1x8xf32>
    %213 = arith.mulf %209, %212 : vector<1x8xf32>
    %c0_138 = arith.constant 0 : index
    %c0_139 = arith.constant 0 : index
    %c0_140 = arith.constant 0 : index
    %214 = vector.load %arg17[%c0_138, %c0_139, %c0_140] : memref<1x1x8xf32, #tpu.memory_space<vmem>>, vector<1x1x8xf32>
    %215 = vector.shape_cast %214 : vector<1x1x8xf32> to vector<1x8xf32>
    %216 = arith.mulf %203, %213 : vector<1x8xf32>
    %217 = arith.subf %215, %216 : vector<1x8xf32>
    %c0_141 = arith.constant 0 : index
    %c0_142 = arith.constant 0 : index
    %218 = vector.load %arg41[%c0_141, %c0_142] : memref<8x128xf32, #tpu.memory_space<vmem>>, vector<8x128xf32>
    %cst_143 = arith.constant dense<0.000000e+00> : vector<1x128xf32>
    %219 = tpu.matmul %213, %218, %cst_143 {dimension_numbers = #tpu.dot_dimension_numbers<[1], [0], [0], [1], [0, 0, 1, 1], [], []>} : vector<1x8xf32>, vector<8x128xf32>, vector<1x128xf32> -> vector<1x128xf32>
    %220 = vector.broadcast %219 : vector<1x128xf32> to vector<32x128xf32>
    %221 = arith.mulf %193, %220 : vector<32x128xf32>
    %cst_144 = arith.constant dense<0.000000e+00> : vector<1x128xf32>
    %222 = tpu.matmul %217, %218, %cst_144 {dimension_numbers = #tpu.dot_dimension_numbers<[1], [0], [0], [1], [0, 0, 1, 1], [], []>} : vector<1x8xf32>, vector<8x128xf32>, vector<1x128xf32> -> vector<1x128xf32>
    %223 = vector.broadcast %222 : vector<1x128xf32> to vector<32x128xf32>
    %224 = arith.addf %221, %223 : vector<32x128xf32>
    %c0_145 = arith.constant 0 : index
    %c0_146 = arith.constant 0 : index
    %225 = vector.load %arg50[%c0_145, %c0_146] : memref<32x128xf32, #tpu.memory_space<vmem>>, vector<32x128xf32>
    %cst_147 = arith.constant 0.949999988 : f32
    %226 = vector.broadcast %cst_147 : f32 to vector<32x128xf32>
    %227 = arith.mulf %226, %225 : vector<32x128xf32>
    %228 = arith.addf %227, %224 : vector<32x128xf32>
    %cst_148 = arith.constant 1.000000e+00 : f32
    %229 = vector.broadcast %cst_148 : f32 to vector<32x128xf32>
    %230 = arith.cmpf ogt, %228, %229 : vector<32x128xf32>
    %231 = arith.extui %230 : vector<32x128xi1> to vector<32x128xi32>
    %232 = arith.sitofp %231 : vector<32x128xi32> to vector<32x128xf32>
    %cst_149 = arith.constant 1.000000e+00 : f32
    %233 = vector.broadcast %cst_149 : f32 to vector<32x128xf32>
    %234 = arith.mulf %232, %233 : vector<32x128xf32>
    %235 = arith.subf %228, %234 : vector<32x128xf32>
    %c0_150 = arith.constant 0 : index
    %c0_151 = arith.constant 0 : index
    %236 = vector.load %arg50[%c0_150, %c0_151] : memref<32x128xf32, #tpu.memory_space<vmem>>, vector<32x128xf32>
    tpu.vector_store %arg50[%c0_150, %c0_151], %235 {strides = array<i32>} : memref<32x128xf32, #tpu.memory_space<vmem>>, vector<32x128xf32>,
    %237 = arith.truncf %232 : vector<32x128xf32> to vector<32x128xbf16>
    %c0_152 = arith.constant 0 : index
    %c0_153 = arith.constant 0 : index
    %238 = vector.load %arg18[%c0_152, %c0_153] : memref<96x32xbf16, #tpu.memory_space<vmem>>, vector<96x32xbf16>
    %cst_154 = arith.constant dense<0.000000e+00> : vector<96x128xf32>
    %239 = tpu.matmul %238, %237, %cst_154 {dimension_numbers = #tpu.dot_dimension_numbers<[1], [0], [0], [1], [0, 0, 1, 1], [], []>} : vector<96x32xbf16>, vector<32x128xbf16>, vector<96x128xf32> -> vector<96x128xf32>
    %240 = arith.truncf %239 : vector<96x128xf32> to vector<96x128xbf16>
    %241 = vector.extract_strided_slice %240 {offsets = [0, 0], sizes = [32, 128], strides = [1, 1]} : vector<96x128xbf16> to vector<32x128xbf16>
    %c0_155 = arith.constant 0 : index
    %c0_156 = arith.constant 0 : index
    %242 = vector.load %arg19[%c0_155, %c0_156] : memref<384x128xbf16, #tpu.memory_space<vmem>>, vector<128x128xbf16>
    %cst_157 = arith.constant dense<0.000000e+00> : vector<32x128xf32>
    %243 = tpu.matmul %241, %242, %cst_157 {dimension_numbers = #tpu.dot_dimension_numbers<[1], [0], [0], [1], [0, 0, 1, 1], [], []>} : vector<32x128xbf16>, vector<128x128xbf16>, vector<32x128xf32> -> vector<32x128xf32>
    %244 = vector.extract_strided_slice %240 {offsets = [32, 0], sizes = [32, 128], strides = [1, 1]} : vector<96x128xbf16> to vector<32x128xbf16>
    %c128_158 = arith.constant 128 : index
    %c0_159 = arith.constant 0 : index
    %245 = vector.load %arg19[%c128_158, %c0_159] : memref<384x128xbf16, #tpu.memory_space<vmem>>, vector<128x128xbf16>
    %cst_160 = arith.constant dense<0.000000e+00> : vector<32x128xf32>
    %246 = tpu.matmul %244, %245, %cst_160 {dimension_numbers = #tpu.dot_dimension_numbers<[1], [0], [0], [1], [0, 0, 1, 1], [], []>} : vector<32x128xbf16>, vector<128x128xbf16>, vector<32x128xf32> -> vector<32x128xf32>
    %247 = arith.addf %243, %246 : vector<32x128xf32>
    %248 = vector.extract_strided_slice %240 {offsets = [64, 0], sizes = [32, 128], strides = [1, 1]} : vector<96x128xbf16> to vector<32x128xbf16>
    %c256_161 = arith.constant 256 : index
    %c0_162 = arith.constant 0 : index
    %249 = vector.load %arg19[%c256_161, %c0_162] : memref<384x128xbf16, #tpu.memory_space<vmem>>, vector<128x128xbf16>
    %cst_163 = arith.constant dense<0.000000e+00> : vector<32x128xf32>
    %250 = tpu.matmul %248, %249, %cst_163 {dimension_numbers = #tpu.dot_dimension_numbers<[1], [0], [0], [1], [0, 0, 1, 1], [], []>} : vector<32x128xbf16>, vector<128x128xbf16>, vector<32x128xf32> -> vector<32x128xf32>
    %251 = arith.addf %247, %250 : vector<32x128xf32>
    %c0_164 = arith.constant 0 : index
    %c0_165 = arith.constant 0 : index
    %252 = vector.load %arg40[%c0_164, %c0_165] : memref<128x8xf32, #tpu.memory_space<vmem>>, vector<128x8xf32>
    %cst_166 = arith.constant dense<0.000000e+00> : vector<32x8xf32>
    %253 = tpu.matmul %251, %252, %cst_166 {dimension_numbers = #tpu.dot_dimension_numbers<[1], [0], [0], [1], [0, 0, 1, 1], [], []>} : vector<32x128xf32>, vector<128x8xf32>, vector<32x8xf32> -> vector<32x8xf32>
    %cst_167 = arith.constant dense<0.000000e+00> : vector<8xf32>
    %254 = vector.multi_reduction <add>, %253, %cst_167 [0] : vector<32x8xf32> to vector<8xf32>
    %255 = vector.shape_cast %254 : vector<8xf32> to vector<1x8xf32>
    %256 = arith.mulf %251, %251 : vector<32x128xf32>
    %cst_168 = arith.constant dense<0.000000e+00> : vector<32x8xf32>
    %257 = tpu.matmul %256, %252, %cst_168 {dimension_numbers = #tpu.dot_dimension_numbers<[1], [0], [0], [1], [0, 0, 1, 1], [], []>} : vector<32x128xf32>, vector<128x8xf32>, vector<32x8xf32> -> vector<32x8xf32>
    %cst_169 = arith.constant dense<0.000000e+00> : vector<8xf32>
    %258 = vector.multi_reduction <add>, %257, %cst_169 [0] : vector<32x8xf32> to vector<8xf32>
    %259 = vector.shape_cast %258 : vector<8xf32> to vector<1x8xf32>
    %cst_170 = arith.constant 0.001953125 : f32
    %260 = vector.broadcast %cst_170 : f32 to vector<1x8xf32>
    %261 = arith.mulf %255, %260 : vector<1x8xf32>
    %cst_171 = arith.constant 0.001953125 : f32
    %262 = vector.broadcast %cst_171 : f32 to vector<1x8xf32>
    %263 = arith.mulf %259, %262 : vector<1x8xf32>
    %264 = arith.mulf %261, %261 : vector<1x8xf32>
    %265 = arith.subf %263, %264 : vector<1x8xf32>
    %c0_172 = arith.constant 0 : index
    %c0_173 = arith.constant 0 : index
    %c0_174 = arith.constant 0 : index
    %266 = vector.load %arg20[%c0_172, %c0_173, %c0_174] : memref<1x1x8xf32, #tpu.memory_space<vmem>>, vector<1x1x8xf32>
    %267 = vector.shape_cast %266 : vector<1x1x8xf32> to vector<1x8xf32>
    %cst_175 = arith.constant 9.99999974E-5 : f32
    %268 = vector.broadcast %cst_175 : f32 to vector<1x8xf32>
    %269 = arith.addf %265, %268 : vector<1x8xf32>
    %270 = math.rsqrt %269 : vector<1x8xf32>
    %271 = arith.mulf %267, %270 : vector<1x8xf32>
    %c0_176 = arith.constant 0 : index
    %c0_177 = arith.constant 0 : index
    %c0_178 = arith.constant 0 : index
    %272 = vector.load %arg21[%c0_176, %c0_177, %c0_178] : memref<1x1x8xf32, #tpu.memory_space<vmem>>, vector<1x1x8xf32>
    %273 = vector.shape_cast %272 : vector<1x1x8xf32> to vector<1x8xf32>
    %274 = arith.mulf %261, %271 : vector<1x8xf32>
    %275 = arith.subf %273, %274 : vector<1x8xf32>
    %c0_179 = arith.constant 0 : index
    %c0_180 = arith.constant 0 : index
    %276 = vector.load %arg41[%c0_179, %c0_180] : memref<8x128xf32, #tpu.memory_space<vmem>>, vector<8x128xf32>
    %cst_181 = arith.constant dense<0.000000e+00> : vector<1x128xf32>
    %277 = tpu.matmul %271, %276, %cst_181 {dimension_numbers = #tpu.dot_dimension_numbers<[1], [0], [0], [1], [0, 0, 1, 1], [], []>} : vector<1x8xf32>, vector<8x128xf32>, vector<1x128xf32> -> vector<1x128xf32>
    %278 = vector.broadcast %277 : vector<1x128xf32> to vector<32x128xf32>
    %279 = arith.mulf %251, %278 : vector<32x128xf32>
    %cst_182 = arith.constant dense<0.000000e+00> : vector<1x128xf32>
    %280 = tpu.matmul %275, %276, %cst_182 {dimension_numbers = #tpu.dot_dimension_numbers<[1], [0], [0], [1], [0, 0, 1, 1], [], []>} : vector<1x8xf32>, vector<8x128xf32>, vector<1x128xf32> -> vector<1x128xf32>
    %281 = vector.broadcast %280 : vector<1x128xf32> to vector<32x128xf32>
    %282 = arith.addf %279, %281 : vector<32x128xf32>
    %c0_183 = arith.constant 0 : index
    %c0_184 = arith.constant 0 : index
    %283 = vector.load %arg51[%c0_183, %c0_184] : memref<32x128xf32, #tpu.memory_space<vmem>>, vector<32x128xf32>
    %cst_185 = arith.constant 0.949999988 : f32
    %284 = vector.broadcast %cst_185 : f32 to vector<32x128xf32>
    %285 = arith.mulf %284, %283 : vector<32x128xf32>
    %286 = arith.addf %285, %282 : vector<32x128xf32>
    %cst_186 = arith.constant 1.000000e+00 : f32
    %287 = vector.broadcast %cst_186 : f32 to vector<32x128xf32>
    %288 = arith.cmpf ogt, %286, %287 : vector<32x128xf32>
    %289 = arith.extui %288 : vector<32x128xi1> to vector<32x128xi32>
    %290 = arith.sitofp %289 : vector<32x128xi32> to vector<32x128xf32>
    %cst_187 = arith.constant 1.000000e+00 : f32
    %291 = vector.broadcast %cst_187 : f32 to vector<32x128xf32>
    %292 = arith.mulf %290, %291 : vector<32x128xf32>
    %293 = arith.subf %286, %292 : vector<32x128xf32>
    %c0_188 = arith.constant 0 : index
    %c0_189 = arith.constant 0 : index
    %294 = vector.load %arg51[%c0_188, %c0_189] : memref<32x128xf32, #tpu.memory_space<vmem>>, vector<32x128xf32>
    tpu.vector_store %arg51[%c0_188, %c0_189], %293 {strides = array<i32>} : memref<32x128xf32, #tpu.memory_space<vmem>>, vector<32x128xf32>,
    %c0_190 = arith.constant 0 : index
    %c0_191 = arith.constant 0 : index
    %295 = vector.load %arg30[%c0_190, %c0_191] : memref<32x64xbf16, #tpu.memory_space<vmem>>, vector<32x64xbf16>
    %296 = arith.truncf %178 : vector<64x128xf32> to vector<64x128xbf16>
    %cst_192 = arith.constant dense<0.000000e+00> : vector<32x128xf32>
    %297 = tpu.matmul %295, %296, %cst_192 {dimension_numbers = #tpu.dot_dimension_numbers<[1], [0], [0], [1], [0, 0, 1, 1], [], []>} : vector<32x64xbf16>, vector<64x128xbf16>, vector<32x128xf32> -> vector<32x128xf32>
    %298 = arith.truncf %297 : vector<32x128xf32> to vector<32x128xbf16>
    %c0_193 = arith.constant 0 : index
    %c0_194 = arith.constant 0 : index
    %299 = vector.load %arg31[%c0_193, %c0_194] : memref<128x128xbf16, #tpu.memory_space<vmem>>, vector<128x128xbf16>
    %cst_195 = arith.constant dense<0.000000e+00> : vector<32x128xf32>
    %300 = tpu.matmul %298, %299, %cst_195 {dimension_numbers = #tpu.dot_dimension_numbers<[1], [0], [0], [1], [0, 0, 1, 1], [], []>} : vector<32x128xbf16>, vector<128x128xbf16>, vector<32x128xf32> -> vector<32x128xf32>
    %c0_196 = arith.constant 0 : index
    %c0_197 = arith.constant 0 : index
    %301 = vector.load %arg40[%c0_196, %c0_197] : memref<128x8xf32, #tpu.memory_space<vmem>>, vector<128x8xf32>
    %cst_198 = arith.constant dense<0.000000e+00> : vector<32x8xf32>
    %302 = tpu.matmul %300, %301, %cst_198 {dimension_numbers = #tpu.dot_dimension_numbers<[1], [0], [0], [1], [0, 0, 1, 1], [], []>} : vector<32x128xf32>, vector<128x8xf32>, vector<32x8xf32> -> vector<32x8xf32>
    %cst_199 = arith.constant dense<0.000000e+00> : vector<8xf32>
    %303 = vector.multi_reduction <add>, %302, %cst_199 [0] : vector<32x8xf32> to vector<8xf32>
    %304 = vector.shape_cast %303 : vector<8xf32> to vector<1x8xf32>
    %305 = arith.mulf %300, %300 : vector<32x128xf32>
    %cst_200 = arith.constant dense<0.000000e+00> : vector<32x8xf32>
    %306 = tpu.matmul %305, %301, %cst_200 {dimension_numbers = #tpu.dot_dimension_numbers<[1], [0], [0], [1], [0, 0, 1, 1], [], []>} : vector<32x128xf32>, vector<128x8xf32>, vector<32x8xf32> -> vector<32x8xf32>
    %cst_201 = arith.constant dense<0.000000e+00> : vector<8xf32>
    %307 = vector.multi_reduction <add>, %306, %cst_201 [0] : vector<32x8xf32> to vector<8xf32>
    %308 = vector.shape_cast %307 : vector<8xf32> to vector<1x8xf32>
    %cst_202 = arith.constant 0.001953125 : f32
    %309 = vector.broadcast %cst_202 : f32 to vector<1x8xf32>
    %310 = arith.mulf %304, %309 : vector<1x8xf32>
    %cst_203 = arith.constant 0.001953125 : f32
    %311 = vector.broadcast %cst_203 : f32 to vector<1x8xf32>
    %312 = arith.mulf %308, %311 : vector<1x8xf32>
    %313 = arith.mulf %310, %310 : vector<1x8xf32>
    %314 = arith.subf %312, %313 : vector<1x8xf32>
    %c0_204 = arith.constant 0 : index
    %c0_205 = arith.constant 0 : index
    %c0_206 = arith.constant 0 : index
    %315 = vector.load %arg32[%c0_204, %c0_205, %c0_206] : memref<1x1x8xf32, #tpu.memory_space<vmem>>, vector<1x1x8xf32>
    %316 = vector.shape_cast %315 : vector<1x1x8xf32> to vector<1x8xf32>
    %cst_207 = arith.constant 9.99999974E-5 : f32
    %317 = vector.broadcast %cst_207 : f32 to vector<1x8xf32>
    %318 = arith.addf %314, %317 : vector<1x8xf32>
    %319 = math.rsqrt %318 : vector<1x8xf32>
    %320 = arith.mulf %316, %319 : vector<1x8xf32>
    %c0_208 = arith.constant 0 : index
    %c0_209 = arith.constant 0 : index
    %c0_210 = arith.constant 0 : index
    %321 = vector.load %arg33[%c0_208, %c0_209, %c0_210] : memref<1x1x8xf32, #tpu.memory_space<vmem>>, vector<1x1x8xf32>
    %322 = vector.shape_cast %321 : vector<1x1x8xf32> to vector<1x8xf32>
    %323 = arith.mulf %310, %320 : vector<1x8xf32>
    %324 = arith.subf %322, %323 : vector<1x8xf32>
    %c0_211 = arith.constant 0 : index
    %c0_212 = arith.constant 0 : index
    %325 = vector.load %arg41[%c0_211, %c0_212] : memref<8x128xf32, #tpu.memory_space<vmem>>, vector<8x128xf32>
    %cst_213 = arith.constant dense<0.000000e+00> : vector<1x128xf32>
    %326 = tpu.matmul %320, %325, %cst_213 {dimension_numbers = #tpu.dot_dimension_numbers<[1], [0], [0], [1], [0, 0, 1, 1], [], []>} : vector<1x8xf32>, vector<8x128xf32>, vector<1x128xf32> -> vector<1x128xf32>
    %327 = vector.broadcast %326 : vector<1x128xf32> to vector<32x128xf32>
    %328 = arith.mulf %300, %327 : vector<32x128xf32>
    %cst_214 = arith.constant dense<0.000000e+00> : vector<1x128xf32>
    %329 = tpu.matmul %324, %325, %cst_214 {dimension_numbers = #tpu.dot_dimension_numbers<[1], [0], [0], [1], [0, 0, 1, 1], [], []>} : vector<1x8xf32>, vector<8x128xf32>, vector<1x128xf32> -> vector<1x128xf32>
    %330 = vector.broadcast %329 : vector<1x128xf32> to vector<32x128xf32>
    %331 = arith.addf %328, %330 : vector<32x128xf32>
    %332 = arith.addf %290, %331 : vector<32x128xf32>
    %333 = arith.truncf %332 : vector<32x128xf32> to vector<32x128xbf16>
    %c0_215 = arith.constant 0 : index
    %c0_216 = arith.constant 0 : index
    %334 = vector.load %arg22[%c0_215, %c0_216] : memref<48x32xbf16, #tpu.memory_space<vmem>>, vector<48x32xbf16>
    %cst_217 = arith.constant dense<0.000000e+00> : vector<48x128xf32>
    %335 = tpu.matmul %334, %333, %cst_217 {dimension_numbers = #tpu.dot_dimension_numbers<[1], [0], [0], [1], [0, 0, 1, 1], [], []>} : vector<48x32xbf16>, vector<32x128xbf16>, vector<48x128xf32> -> vector<48x128xf32>
    %336 = arith.truncf %335 : vector<48x128xf32> to vector<48x128xbf16>
    %337 = vector.extract_strided_slice %336 {offsets = [0, 0], sizes = [16, 128], strides = [1, 1]} : vector<48x128xbf16> to vector<16x128xbf16>
    %c0_218 = arith.constant 0 : index
    %c0_219 = arith.constant 0 : index
    %338 = vector.load %arg23[%c0_218, %c0_219] : memref<384x128xbf16, #tpu.memory_space<vmem>>, vector<128x128xbf16>
    %cst_220 = arith.constant dense<0.000000e+00> : vector<16x128xf32>
    %339 = tpu.matmul %337, %338, %cst_220 {dimension_numbers = #tpu.dot_dimension_numbers<[1], [0], [0], [1], [0, 0, 1, 1], [], []>} : vector<16x128xbf16>, vector<128x128xbf16>, vector<16x128xf32> -> vector<16x128xf32>
    %340 = vector.extract_strided_slice %336 {offsets = [16, 0], sizes = [16, 128], strides = [1, 1]} : vector<48x128xbf16> to vector<16x128xbf16>
    %c128_221 = arith.constant 128 : index
    %c0_222 = arith.constant 0 : index
    %341 = vector.load %arg23[%c128_221, %c0_222] : memref<384x128xbf16, #tpu.memory_space<vmem>>, vector<128x128xbf16>
    %cst_223 = arith.constant dense<0.000000e+00> : vector<16x128xf32>
    %342 = tpu.matmul %340, %341, %cst_223 {dimension_numbers = #tpu.dot_dimension_numbers<[1], [0], [0], [1], [0, 0, 1, 1], [], []>} : vector<16x128xbf16>, vector<128x128xbf16>, vector<16x128xf32> -> vector<16x128xf32>
    %343 = arith.addf %339, %342 : vector<16x128xf32>
    %344 = vector.extract_strided_slice %336 {offsets = [32, 0], sizes = [16, 128], strides = [1, 1]} : vector<48x128xbf16> to vector<16x128xbf16>
    %c256_224 = arith.constant 256 : index
    %c0_225 = arith.constant 0 : index
    %345 = vector.load %arg23[%c256_224, %c0_225] : memref<384x128xbf16, #tpu.memory_space<vmem>>, vector<128x128xbf16>
    %cst_226 = arith.constant dense<0.000000e+00> : vector<16x128xf32>
    %346 = tpu.matmul %344, %345, %cst_226 {dimension_numbers = #tpu.dot_dimension_numbers<[1], [0], [0], [1], [0, 0, 1, 1], [], []>} : vector<16x128xbf16>, vector<128x128xbf16>, vector<16x128xf32> -> vector<16x128xf32>
    %347 = arith.addf %343, %346 : vector<16x128xf32>
    %c0_227 = arith.constant 0 : index
    %c0_228 = arith.constant 0 : index
    %348 = vector.load %arg42[%c0_227, %c0_228] : memref<128x16xf32, #tpu.memory_space<vmem>>, vector<128x16xf32>
    %cst_229 = arith.constant dense<0.000000e+00> : vector<16x16xf32>
    %349 = tpu.matmul %347, %348, %cst_229 {dimension_numbers = #tpu.dot_dimension_numbers<[1], [0], [0], [1], [0, 0, 1, 1], [], []>} : vector<16x128xf32>, vector<128x16xf32>, vector<16x16xf32> -> vector<16x16xf32>
    %cst_230 = arith.constant dense<0.000000e+00> : vector<16xf32>
    %350 = vector.multi_reduction <add>, %349, %cst_230 [0] : vector<16x16xf32> to vector<16xf32>
    %351 = vector.shape_cast %350 : vector<16xf32> to vector<1x16xf32>
    %352 = arith.mulf %347, %347 : vector<16x128xf32>
    %cst_231 = arith.constant dense<0.000000e+00> : vector<16x16xf32>
    %353 = tpu.matmul %352, %348, %cst_231 {dimension_numbers = #tpu.dot_dimension_numbers<[1], [0], [0], [1], [0, 0, 1, 1], [], []>} : vector<16x128xf32>, vector<128x16xf32>, vector<16x16xf32> -> vector<16x16xf32>
    %cst_232 = arith.constant dense<0.000000e+00> : vector<16xf32>
    %354 = vector.multi_reduction <add>, %353, %cst_232 [0] : vector<16x16xf32> to vector<16xf32>
    %355 = vector.shape_cast %354 : vector<16xf32> to vector<1x16xf32>
    %cst_233 = arith.constant 7.812500e-03 : f32
    %356 = vector.broadcast %cst_233 : f32 to vector<1x16xf32>
    %357 = arith.mulf %351, %356 : vector<1x16xf32>
    %cst_234 = arith.constant 7.812500e-03 : f32
    %358 = vector.broadcast %cst_234 : f32 to vector<1x16xf32>
    %359 = arith.mulf %355, %358 : vector<1x16xf32>
    %360 = arith.mulf %357, %357 : vector<1x16xf32>
    %361 = arith.subf %359, %360 : vector<1x16xf32>
    %c0_235 = arith.constant 0 : index
    %c0_236 = arith.constant 0 : index
    %c0_237 = arith.constant 0 : index
    %362 = vector.load %arg24[%c0_235, %c0_236, %c0_237] : memref<1x1x16xf32, #tpu.memory_space<vmem>>, vector<1x1x16xf32>
    %363 = vector.shape_cast %362 : vector<1x1x16xf32> to vector<1x16xf32>
    %cst_238 = arith.constant 9.99999974E-5 : f32
    %364 = vector.broadcast %cst_238 : f32 to vector<1x16xf32>
    %365 = arith.addf %361, %364 : vector<1x16xf32>
    %366 = math.rsqrt %365 : vector<1x16xf32>
    %367 = arith.mulf %363, %366 : vector<1x16xf32>
    %c0_239 = arith.constant 0 : index
    %c0_240 = arith.constant 0 : index
    %c0_241 = arith.constant 0 : index
    %368 = vector.load %arg25[%c0_239, %c0_240, %c0_241] : memref<1x1x16xf32, #tpu.memory_space<vmem>>, vector<1x1x16xf32>
    %369 = vector.shape_cast %368 : vector<1x1x16xf32> to vector<1x16xf32>
    %370 = arith.mulf %357, %367 : vector<1x16xf32>
    %371 = arith.subf %369, %370 : vector<1x16xf32>
    %c0_242 = arith.constant 0 : index
    %c0_243 = arith.constant 0 : index
    %372 = vector.load %arg43[%c0_242, %c0_243] : memref<16x128xf32, #tpu.memory_space<vmem>>, vector<16x128xf32>
    %cst_244 = arith.constant dense<0.000000e+00> : vector<1x128xf32>
    %373 = tpu.matmul %367, %372, %cst_244 {dimension_numbers = #tpu.dot_dimension_numbers<[1], [0], [0], [1], [0, 0, 1, 1], [], []>} : vector<1x16xf32>, vector<16x128xf32>, vector<1x128xf32> -> vector<1x128xf32>
    %374 = vector.broadcast %373 : vector<1x128xf32> to vector<16x128xf32>
    %375 = arith.mulf %347, %374 : vector<16x128xf32>
    %cst_245 = arith.constant dense<0.000000e+00> : vector<1x128xf32>
    %376 = tpu.matmul %371, %372, %cst_245 {dimension_numbers = #tpu.dot_dimension_numbers<[1], [0], [0], [1], [0, 0, 1, 1], [], []>} : vector<1x16xf32>, vector<16x128xf32>, vector<1x128xf32> -> vector<1x128xf32>
    %377 = vector.broadcast %376 : vector<1x128xf32> to vector<16x128xf32>
    %378 = arith.addf %375, %377 : vector<16x128xf32>
    %c0_246 = arith.constant 0 : index
    %c0_247 = arith.constant 0 : index
    %379 = vector.load %arg52[%c0_246, %c0_247] : memref<16x128xf32, #tpu.memory_space<vmem>>, vector<16x128xf32>
    %cst_248 = arith.constant 0.949999988 : f32
    %380 = vector.broadcast %cst_248 : f32 to vector<16x128xf32>
    %381 = arith.mulf %380, %379 : vector<16x128xf32>
    %382 = arith.addf %381, %378 : vector<16x128xf32>
    %cst_249 = arith.constant 1.000000e+00 : f32
    %383 = vector.broadcast %cst_249 : f32 to vector<16x128xf32>
    %384 = arith.cmpf ogt, %382, %383 : vector<16x128xf32>
    %385 = arith.extui %384 : vector<16x128xi1> to vector<16x128xi32>
    %386 = arith.sitofp %385 : vector<16x128xi32> to vector<16x128xf32>
    %cst_250 = arith.constant 1.000000e+00 : f32
    %387 = vector.broadcast %cst_250 : f32 to vector<16x128xf32>
    %388 = arith.mulf %386, %387 : vector<16x128xf32>
    %389 = arith.subf %382, %388 : vector<16x128xf32>
    %c0_251 = arith.constant 0 : index
    %c0_252 = arith.constant 0 : index
    %390 = vector.load %arg52[%c0_251, %c0_252] : memref<16x128xf32, #tpu.memory_space<vmem>>, vector<16x128xf32>
    tpu.vector_store %arg52[%c0_251, %c0_252], %389 {strides = array<i32>} : memref<16x128xf32, #tpu.memory_space<vmem>>, vector<16x128xf32>,
    %391 = arith.truncf %386 : vector<16x128xf32> to vector<16x128xbf16>
    %c0_253 = arith.constant 0 : index
    %c0_254 = arith.constant 0 : index
    %392 = vector.load %arg26[%c0_253, %c0_254] : memref<48x16xbf16, #tpu.memory_space<vmem>>, vector<48x16xbf16>
    %cst_255 = arith.constant dense<0.000000e+00> : vector<48x128xf32>
    %393 = tpu.matmul %392, %391, %cst_255 {dimension_numbers = #tpu.dot_dimension_numbers<[1], [0], [0], [1], [0, 0, 1, 1], [], []>} : vector<48x16xbf16>, vector<16x128xbf16>, vector<48x128xf32> -> vector<48x128xf32>
    %394 = arith.truncf %393 : vector<48x128xf32> to vector<48x128xbf16>
    %395 = vector.extract_strided_slice %394 {offsets = [0, 0], sizes = [16, 128], strides = [1, 1]} : vector<48x128xbf16> to vector<16x128xbf16>
    %c0_256 = arith.constant 0 : index
    %c0_257 = arith.constant 0 : index
    %396 = vector.load %arg27[%c0_256, %c0_257] : memref<384x128xbf16, #tpu.memory_space<vmem>>, vector<128x128xbf16>
    %cst_258 = arith.constant dense<0.000000e+00> : vector<16x128xf32>
    %397 = tpu.matmul %395, %396, %cst_258 {dimension_numbers = #tpu.dot_dimension_numbers<[1], [0], [0], [1], [0, 0, 1, 1], [], []>} : vector<16x128xbf16>, vector<128x128xbf16>, vector<16x128xf32> -> vector<16x128xf32>
    %398 = vector.extract_strided_slice %394 {offsets = [16, 0], sizes = [16, 128], strides = [1, 1]} : vector<48x128xbf16> to vector<16x128xbf16>
    %c128_259 = arith.constant 128 : index
    %c0_260 = arith.constant 0 : index
    %399 = vector.load %arg27[%c128_259, %c0_260] : memref<384x128xbf16, #tpu.memory_space<vmem>>, vector<128x128xbf16>
    %cst_261 = arith.constant dense<0.000000e+00> : vector<16x128xf32>
    %400 = tpu.matmul %398, %399, %cst_261 {dimension_numbers = #tpu.dot_dimension_numbers<[1], [0], [0], [1], [0, 0, 1, 1], [], []>} : vector<16x128xbf16>, vector<128x128xbf16>, vector<16x128xf32> -> vector<16x128xf32>
    %401 = arith.addf %397, %400 : vector<16x128xf32>
    %402 = vector.extract_strided_slice %394 {offsets = [32, 0], sizes = [16, 128], strides = [1, 1]} : vector<48x128xbf16> to vector<16x128xbf16>
    %c256_262 = arith.constant 256 : index
    %c0_263 = arith.constant 0 : index
    %403 = vector.load %arg27[%c256_262, %c0_263] : memref<384x128xbf16, #tpu.memory_space<vmem>>, vector<128x128xbf16>
    %cst_264 = arith.constant dense<0.000000e+00> : vector<16x128xf32>
    %404 = tpu.matmul %402, %403, %cst_264 {dimension_numbers = #tpu.dot_dimension_numbers<[1], [0], [0], [1], [0, 0, 1, 1], [], []>} : vector<16x128xbf16>, vector<128x128xbf16>, vector<16x128xf32> -> vector<16x128xf32>
    %405 = arith.addf %401, %404 : vector<16x128xf32>
    %c0_265 = arith.constant 0 : index
    %c0_266 = arith.constant 0 : index
    %406 = vector.load %arg42[%c0_265, %c0_266] : memref<128x16xf32, #tpu.memory_space<vmem>>, vector<128x16xf32>
    %cst_267 = arith.constant dense<0.000000e+00> : vector<16x16xf32>
    %407 = tpu.matmul %405, %406, %cst_267 {dimension_numbers = #tpu.dot_dimension_numbers<[1], [0], [0], [1], [0, 0, 1, 1], [], []>} : vector<16x128xf32>, vector<128x16xf32>, vector<16x16xf32> -> vector<16x16xf32>
    %cst_268 = arith.constant dense<0.000000e+00> : vector<16xf32>
    %408 = vector.multi_reduction <add>, %407, %cst_268 [0] : vector<16x16xf32> to vector<16xf32>
    %409 = vector.shape_cast %408 : vector<16xf32> to vector<1x16xf32>
    %410 = arith.mulf %405, %405 : vector<16x128xf32>
    %cst_269 = arith.constant dense<0.000000e+00> : vector<16x16xf32>
    %411 = tpu.matmul %410, %406, %cst_269 {dimension_numbers = #tpu.dot_dimension_numbers<[1], [0], [0], [1], [0, 0, 1, 1], [], []>} : vector<16x128xf32>, vector<128x16xf32>, vector<16x16xf32> -> vector<16x16xf32>
    %cst_270 = arith.constant dense<0.000000e+00> : vector<16xf32>
    %412 = vector.multi_reduction <add>, %411, %cst_270 [0] : vector<16x16xf32> to vector<16xf32>
    %413 = vector.shape_cast %412 : vector<16xf32> to vector<1x16xf32>
    %cst_271 = arith.constant 7.812500e-03 : f32
    %414 = vector.broadcast %cst_271 : f32 to vector<1x16xf32>
    %415 = arith.mulf %409, %414 : vector<1x16xf32>
    %cst_272 = arith.constant 7.812500e-03 : f32
    %416 = vector.broadcast %cst_272 : f32 to vector<1x16xf32>
    %417 = arith.mulf %413, %416 : vector<1x16xf32>
    %418 = arith.mulf %415, %415 : vector<1x16xf32>
    %419 = arith.subf %417, %418 : vector<1x16xf32>
    %c0_273 = arith.constant 0 : index
    %c0_274 = arith.constant 0 : index
    %c0_275 = arith.constant 0 : index
    %420 = vector.load %arg28[%c0_273, %c0_274, %c0_275] : memref<1x1x16xf32, #tpu.memory_space<vmem>>, vector<1x1x16xf32>
    %421 = vector.shape_cast %420 : vector<1x1x16xf32> to vector<1x16xf32>
    %cst_276 = arith.constant 9.99999974E-5 : f32
    %422 = vector.broadcast %cst_276 : f32 to vector<1x16xf32>
    %423 = arith.addf %419, %422 : vector<1x16xf32>
    %424 = math.rsqrt %423 : vector<1x16xf32>
    %425 = arith.mulf %421, %424 : vector<1x16xf32>
    %c0_277 = arith.constant 0 : index
    %c0_278 = arith.constant 0 : index
    %c0_279 = arith.constant 0 : index
    %426 = vector.load %arg29[%c0_277, %c0_278, %c0_279] : memref<1x1x16xf32, #tpu.memory_space<vmem>>, vector<1x1x16xf32>
    %427 = vector.shape_cast %426 : vector<1x1x16xf32> to vector<1x16xf32>
    %428 = arith.mulf %415, %425 : vector<1x16xf32>
    %429 = arith.subf %427, %428 : vector<1x16xf32>
    %c0_280 = arith.constant 0 : index
    %c0_281 = arith.constant 0 : index
    %430 = vector.load %arg43[%c0_280, %c0_281] : memref<16x128xf32, #tpu.memory_space<vmem>>, vector<16x128xf32>
    %cst_282 = arith.constant dense<0.000000e+00> : vector<1x128xf32>
    %431 = tpu.matmul %425, %430, %cst_282 {dimension_numbers = #tpu.dot_dimension_numbers<[1], [0], [0], [1], [0, 0, 1, 1], [], []>} : vector<1x16xf32>, vector<16x128xf32>, vector<1x128xf32> -> vector<1x128xf32>
    %432 = vector.broadcast %431 : vector<1x128xf32> to vector<16x128xf32>
    %433 = arith.mulf %405, %432 : vector<16x128xf32>
    %cst_283 = arith.constant dense<0.000000e+00> : vector<1x128xf32>
    %434 = tpu.matmul %429, %430, %cst_283 {dimension_numbers = #tpu.dot_dimension_numbers<[1], [0], [0], [1], [0, 0, 1, 1], [], []>} : vector<1x16xf32>, vector<16x128xf32>, vector<1x128xf32> -> vector<1x128xf32>
    %435 = vector.broadcast %434 : vector<1x128xf32> to vector<16x128xf32>
    %436 = arith.addf %433, %435 : vector<16x128xf32>
    %c0_284 = arith.constant 0 : index
    %c0_285 = arith.constant 0 : index
    %437 = vector.load %arg53[%c0_284, %c0_285] : memref<16x128xf32, #tpu.memory_space<vmem>>, vector<16x128xf32>
    %cst_286 = arith.constant 0.949999988 : f32
    %438 = vector.broadcast %cst_286 : f32 to vector<16x128xf32>
    %439 = arith.mulf %438, %437 : vector<16x128xf32>
    %440 = arith.addf %439, %436 : vector<16x128xf32>
    %cst_287 = arith.constant 1.000000e+00 : f32
    %441 = vector.broadcast %cst_287 : f32 to vector<16x128xf32>
    %442 = arith.cmpf ogt, %440, %441 : vector<16x128xf32>
    %443 = arith.extui %442 : vector<16x128xi1> to vector<16x128xi32>
    %444 = arith.sitofp %443 : vector<16x128xi32> to vector<16x128xf32>
    %cst_288 = arith.constant 1.000000e+00 : f32
    %445 = vector.broadcast %cst_288 : f32 to vector<16x128xf32>
    %446 = arith.mulf %444, %445 : vector<16x128xf32>
    %447 = arith.subf %440, %446 : vector<16x128xf32>
    %c0_289 = arith.constant 0 : index
    %c0_290 = arith.constant 0 : index
    %448 = vector.load %arg53[%c0_289, %c0_290] : memref<16x128xf32, #tpu.memory_space<vmem>>, vector<16x128xf32>
    tpu.vector_store %arg53[%c0_289, %c0_290], %447 {strides = array<i32>} : memref<16x128xf32, #tpu.memory_space<vmem>>, vector<16x128xf32>,
    %c0_291 = arith.constant 0 : index
    %c0_292 = arith.constant 0 : index
    %449 = vector.load %arg34[%c0_291, %c0_292] : memref<16x32xbf16, #tpu.memory_space<vmem>>, vector<16x32xbf16>
    %450 = arith.truncf %332 : vector<32x128xf32> to vector<32x128xbf16>
    %cst_293 = arith.constant dense<0.000000e+00> : vector<16x128xf32>
    %451 = tpu.matmul %449, %450, %cst_293 {dimension_numbers = #tpu.dot_dimension_numbers<[1], [0], [0], [1], [0, 0, 1, 1], [], []>} : vector<16x32xbf16>, vector<32x128xbf16>, vector<16x128xf32> -> vector<16x128xf32>
    %452 = arith.truncf %451 : vector<16x128xf32> to vector<16x128xbf16>
    %c0_294 = arith.constant 0 : index
    %c0_295 = arith.constant 0 : index
    %453 = vector.load %arg35[%c0_294, %c0_295] : memref<128x128xbf16, #tpu.memory_space<vmem>>, vector<128x128xbf16>
    %cst_296 = arith.constant dense<0.000000e+00> : vector<16x128xf32>
    %454 = tpu.matmul %452, %453, %cst_296 {dimension_numbers = #tpu.dot_dimension_numbers<[1], [0], [0], [1], [0, 0, 1, 1], [], []>} : vector<16x128xbf16>, vector<128x128xbf16>, vector<16x128xf32> -> vector<16x128xf32>
    %c0_297 = arith.constant 0 : index
    %c0_298 = arith.constant 0 : index
    %455 = vector.load %arg42[%c0_297, %c0_298] : memref<128x16xf32, #tpu.memory_space<vmem>>, vector<128x16xf32>
    %cst_299 = arith.constant dense<0.000000e+00> : vector<16x16xf32>
    %456 = tpu.matmul %454, %455, %cst_299 {dimension_numbers = #tpu.dot_dimension_numbers<[1], [0], [0], [1], [0, 0, 1, 1], [], []>} : vector<16x128xf32>, vector<128x16xf32>, vector<16x16xf32> -> vector<16x16xf32>
    %cst_300 = arith.constant dense<0.000000e+00> : vector<16xf32>
    %457 = vector.multi_reduction <add>, %456, %cst_300 [0] : vector<16x16xf32> to vector<16xf32>
    %458 = vector.shape_cast %457 : vector<16xf32> to vector<1x16xf32>
    %459 = arith.mulf %454, %454 : vector<16x128xf32>
    %cst_301 = arith.constant dense<0.000000e+00> : vector<16x16xf32>
    %460 = tpu.matmul %459, %455, %cst_301 {dimension_numbers = #tpu.dot_dimension_numbers<[1], [0], [0], [1], [0, 0, 1, 1], [], []>} : vector<16x128xf32>, vector<128x16xf32>, vector<16x16xf32> -> vector<16x16xf32>
    %cst_302 = arith.constant dense<0.000000e+00> : vector<16xf32>
    %461 = vector.multi_reduction <add>, %460, %cst_302 [0] : vector<16x16xf32> to vector<16xf32>
    %462 = vector.shape_cast %461 : vector<16xf32> to vector<1x16xf32>
    %cst_303 = arith.constant 7.812500e-03 : f32
    %463 = vector.broadcast %cst_303 : f32 to vector<1x16xf32>
    %464 = arith.mulf %458, %463 : vector<1x16xf32>
    %cst_304 = arith.constant 7.812500e-03 : f32
    %465 = vector.broadcast %cst_304 : f32 to vector<1x16xf32>
    %466 = arith.mulf %462, %465 : vector<1x16xf32>
    %467 = arith.mulf %464, %464 : vector<1x16xf32>
    %468 = arith.subf %466, %467 : vector<1x16xf32>
    %c0_305 = arith.constant 0 : index
    %c0_306 = arith.constant 0 : index
    %c0_307 = arith.constant 0 : index
    %469 = vector.load %arg36[%c0_305, %c0_306, %c0_307] : memref<1x1x16xf32, #tpu.memory_space<vmem>>, vector<1x1x16xf32>
    %470 = vector.shape_cast %469 : vector<1x1x16xf32> to vector<1x16xf32>
    %cst_308 = arith.constant 9.99999974E-5 : f32
    %471 = vector.broadcast %cst_308 : f32 to vector<1x16xf32>
    %472 = arith.addf %468, %471 : vector<1x16xf32>
    %473 = math.rsqrt %472 : vector<1x16xf32>
    %474 = arith.mulf %470, %473 : vector<1x16xf32>
    %c0_309 = arith.constant 0 : index
    %c0_310 = arith.constant 0 : index
    %c0_311 = arith.constant 0 : index
    %475 = vector.load %arg37[%c0_309, %c0_310, %c0_311] : memref<1x1x16xf32, #tpu.memory_space<vmem>>, vector<1x1x16xf32>
    %476 = vector.shape_cast %475 : vector<1x1x16xf32> to vector<1x16xf32>
    %477 = arith.mulf %464, %474 : vector<1x16xf32>
    %478 = arith.subf %476, %477 : vector<1x16xf32>
    %c0_312 = arith.constant 0 : index
    %c0_313 = arith.constant 0 : index
    %479 = vector.load %arg43[%c0_312, %c0_313] : memref<16x128xf32, #tpu.memory_space<vmem>>, vector<16x128xf32>
    %cst_314 = arith.constant dense<0.000000e+00> : vector<1x128xf32>
    %480 = tpu.matmul %474, %479, %cst_314 {dimension_numbers = #tpu.dot_dimension_numbers<[1], [0], [0], [1], [0, 0, 1, 1], [], []>} : vector<1x16xf32>, vector<16x128xf32>, vector<1x128xf32> -> vector<1x128xf32>
    %481 = vector.broadcast %480 : vector<1x128xf32> to vector<16x128xf32>
    %482 = arith.mulf %454, %481 : vector<16x128xf32>
    %cst_315 = arith.constant dense<0.000000e+00> : vector<1x128xf32>
    %483 = tpu.matmul %478, %479, %cst_315 {dimension_numbers = #tpu.dot_dimension_numbers<[1], [0], [0], [1], [0, 0, 1, 1], [], []>} : vector<1x16xf32>, vector<16x128xf32>, vector<1x128xf32> -> vector<1x128xf32>
    %484 = vector.broadcast %483 : vector<1x128xf32> to vector<16x128xf32>
    %485 = arith.addf %482, %484 : vector<16x128xf32>
    %486 = arith.addf %444, %485 : vector<16x128xf32>
    %c0_316 = arith.constant 0 : index
    %c0_317 = arith.constant 0 : index
    %487 = vector.load %arg44[%c0_316, %c0_317] : memref<2x16xf32, #tpu.memory_space<vmem>>, vector<2x16xf32>
    %cst_318 = arith.constant dense<0.000000e+00> : vector<2x128xf32>
    %488 = tpu.matmul %487, %486, %cst_318 {dimension_numbers = #tpu.dot_dimension_numbers<[1], [0], [0], [1], [0, 0, 1, 1], [], []>} : vector<2x16xf32>, vector<16x128xf32>, vector<2x128xf32> -> vector<2x128xf32>
    %c0_319 = arith.constant 0 : index
    %c0_320 = arith.constant 0 : index
    %489 = vector.load %arg42[%c0_319, %c0_320] : memref<128x16xf32, #tpu.memory_space<vmem>>, vector<128x16xf32>
    %cst_321 = arith.constant dense<0.000000e+00> : vector<2x16xf32>
    %490 = tpu.matmul %488, %489, %cst_321 {dimension_numbers = #tpu.dot_dimension_numbers<[1], [0], [0], [1], [0, 0, 1, 1], [], []>} : vector<2x128xf32>, vector<128x16xf32>, vector<2x16xf32> -> vector<2x16xf32>
    %c0_322 = arith.constant 0 : index
    %c0_323 = arith.constant 0 : index
    %491 = vector.load %arg46[%c0_322, %c0_323] : memref<2x10xf32, #tpu.memory_space<vmem>>, vector<2x10xf32>
    %c0_324 = arith.constant 0 : index
    %c0_325 = arith.constant 0 : index
    %492 = vector.load %arg45[%c0_324, %c0_325] : memref<16x10xf32, #tpu.memory_space<vmem>>, vector<16x10xf32>
    %cst_326 = arith.constant dense<0.000000e+00> : vector<2x10xf32>
    %493 = tpu.matmul %490, %492, %cst_326 {dimension_numbers = #tpu.dot_dimension_numbers<[1], [0], [0], [1], [0, 0, 1, 1], [], []>} : vector<2x16xf32>, vector<16x10xf32>, vector<2x10xf32> -> vector<2x10xf32>
    %494 = arith.addf %491, %493 : vector<2x10xf32>
    %c0_327 = arith.constant 0 : index
    %c0_328 = arith.constant 0 : index
    %495 = vector.load %arg46[%c0_327, %c0_328] : memref<2x10xf32, #tpu.memory_space<vmem>>, vector<2x10xf32>
    tpu.vector_store %arg46[%c0_327, %c0_328], %494 {strides = array<i32>} : memref<2x10xf32, #tpu.memory_space<vmem>>, vector<2x10xf32>,
    %c1_i32 = arith.constant 1 : i32
    %496 = arith.cmpi eq, %arg0, %c1_i32 : i32
    %497 = arith.extui %496 : i1 to i32
    %c0_i32_329 = arith.constant 0 : i32
    %498 = arith.cmpi ne, %497, %c0_i32_329 : i32
    scf.if %498 {
      %c0_330 = arith.constant 0 : index
      %c0_331 = arith.constant 0 : index
      %499 = vector.load %arg46[%c0_330, %c0_331] : memref<2x10xf32, #tpu.memory_space<vmem>>, vector<2x10xf32>
      %cst_332 = arith.constant 5.000000e-01 : f32
      %500 = vector.broadcast %cst_332 : f32 to vector<2x10xf32>
      %501 = arith.mulf %499, %500 : vector<2x10xf32>
      %c0_333 = arith.constant 0 : index
      %c0_334 = arith.constant 0 : index
      %502 = vector.load %arg46[%c0_333, %c0_334] : memref<2x10xf32, #tpu.memory_space<vmem>>, vector<2x10xf32>
      tpu.vector_store %arg46[%c0_333, %c0_334], %501 {strides = array<i32>} : memref<2x10xf32, #tpu.memory_space<vmem>>, vector<2x10xf32>,
    } else {
    }
    return
  }
  func.func @transform_0(%arg0: i32) -> (i32, i32, i32) {
    %c0_i32 = arith.constant 0 : i32
    %c0_i32_0 = arith.constant 0 : i32
    %c0_i32_1 = arith.constant 0 : i32
    return %arg0, %c0_i32, %c0_i32_0 : i32, i32, i32
  }
  func.func @transform_1(%arg0: i32) -> (i32, i32) {
    %c0_i32 = arith.constant 0 : i32
    %c0_i32_0 = arith.constant 0 : i32
    %c0_i32_1 = arith.constant 0 : i32
    return %c0_i32, %c0_i32_0 : i32, i32
  }
  func.func @transform_2(%arg0: i32) -> (i32, i32) {
    %c0_i32 = arith.constant 0 : i32
    %c0_i32_0 = arith.constant 0 : i32
    %c0_i32_1 = arith.constant 0 : i32
    return %c0_i32, %c0_i32_0 : i32, i32
  }
  func.func @transform_3(%arg0: i32) -> (i32, i32, i32) {
    %c0_i32 = arith.constant 0 : i32
    %c0_i32_0 = arith.constant 0 : i32
    %c0_i32_1 = arith.constant 0 : i32
    return %arg0, %c0_i32, %c0_i32_0 : i32, i32, i32
  }
  func.func @transform_4(%arg0: i32) -> (i32, i32, i32) {
    %c0_i32 = arith.constant 0 : i32
    %c0_i32_0 = arith.constant 0 : i32
    %c0_i32_1 = arith.constant 0 : i32
    return %arg0, %c0_i32, %c0_i32_0 : i32, i32, i32
  }
  func.func @transform_5(%arg0: i32) -> (i32, i32) {
    %c0_i32 = arith.constant 0 : i32
    %c0_i32_0 = arith.constant 0 : i32
    %c0_i32_1 = arith.constant 0 : i32
    return %c0_i32, %c0_i32_0 : i32, i32
  }
  func.func @transform_6(%arg0: i32) -> (i32, i32) {
    %c0_i32 = arith.constant 0 : i32
    %c0_i32_0 = arith.constant 0 : i32
    %c0_i32_1 = arith.constant 0 : i32
    return %c0_i32, %c0_i32_0 : i32, i32
  }
  func.func @transform_7(%arg0: i32) -> (i32, i32, i32) {
    %c0_i32 = arith.constant 0 : i32
    %c0_i32_0 = arith.constant 0 : i32
    %c0_i32_1 = arith.constant 0 : i32
    return %arg0, %c0_i32, %c0_i32_0 : i32, i32, i32
  }
  func.func @transform_8(%arg0: i32) -> (i32, i32, i32) {
    %c0_i32 = arith.constant 0 : i32
    %c0_i32_0 = arith.constant 0 : i32
    %c0_i32_1 = arith.constant 0 : i32
    return %arg0, %c0_i32, %c0_i32_0 : i32, i32, i32
  }
  func.func @transform_9(%arg0: i32) -> (i32, i32) {
    %c0_i32 = arith.constant 0 : i32
    %c0_i32_0 = arith.constant 0 : i32
    %c0_i32_1 = arith.constant 0 : i32
    return %c0_i32, %c0_i32_0 : i32, i32
  }
  func.func @transform_10(%arg0: i32) -> (i32, i32) {
    %c0_i32 = arith.constant 0 : i32
    %c0_i32_0 = arith.constant 0 : i32
    %c0_i32_1 = arith.constant 0 : i32
    return %c0_i32, %c0_i32_0 : i32, i32
  }
  func.func @transform_11(%arg0: i32) -> (i32, i32, i32) {
    %c0_i32 = arith.constant 0 : i32
    %c0_i32_0 = arith.constant 0 : i32
    %c0_i32_1 = arith.constant 0 : i32
    return %arg0, %c0_i32, %c0_i32_0 : i32, i32, i32
  }
  func.func @transform_12(%arg0: i32) -> (i32, i32, i32) {
    %c0_i32 = arith.constant 0 : i32
    %c0_i32_0 = arith.constant 0 : i32
    %c0_i32_1 = arith.constant 0 : i32
    return %arg0, %c0_i32, %c0_i32_0 : i32, i32, i32
  }
  func.func @transform_13(%arg0: i32) -> (i32, i32) {
    %c0_i32 = arith.constant 0 : i32
    %c0_i32_0 = arith.constant 0 : i32
    %c0_i32_1 = arith.constant 0 : i32
    return %c0_i32, %c0_i32_0 : i32, i32
  }
  func.func @transform_14(%arg0: i32) -> (i32, i32) {
    %c0_i32 = arith.constant 0 : i32
    %c0_i32_0 = arith.constant 0 : i32
    %c0_i32_1 = arith.constant 0 : i32
    return %c0_i32, %c0_i32_0 : i32, i32
  }
  func.func @transform_15(%arg0: i32) -> (i32, i32, i32) {
    %c0_i32 = arith.constant 0 : i32
    %c0_i32_0 = arith.constant 0 : i32
    %c0_i32_1 = arith.constant 0 : i32
    return %arg0, %c0_i32, %c0_i32_0 : i32, i32, i32
  }
  func.func @transform_16(%arg0: i32) -> (i32, i32, i32) {
    %c0_i32 = arith.constant 0 : i32
    %c0_i32_0 = arith.constant 0 : i32
    %c0_i32_1 = arith.constant 0 : i32
    return %arg0, %c0_i32, %c0_i32_0 : i32, i32, i32
  }
  func.func @transform_17(%arg0: i32) -> (i32, i32) {
    %c0_i32 = arith.constant 0 : i32
    %c0_i32_0 = arith.constant 0 : i32
    %c0_i32_1 = arith.constant 0 : i32
    return %c0_i32, %c0_i32_0 : i32, i32
  }
  func.func @transform_18(%arg0: i32) -> (i32, i32) {
    %c0_i32 = arith.constant 0 : i32
    %c0_i32_0 = arith.constant 0 : i32
    %c0_i32_1 = arith.constant 0 : i32
    return %c0_i32, %c0_i32_0 : i32, i32
  }
  func.func @transform_19(%arg0: i32) -> (i32, i32, i32) {
    %c0_i32 = arith.constant 0 : i32
    %c0_i32_0 = arith.constant 0 : i32
    %c0_i32_1 = arith.constant 0 : i32
    return %arg0, %c0_i32, %c0_i32_0 : i32, i32, i32
  }
  func.func @transform_20(%arg0: i32) -> (i32, i32, i32) {
    %c0_i32 = arith.constant 0 : i32
    %c0_i32_0 = arith.constant 0 : i32
    %c0_i32_1 = arith.constant 0 : i32
    return %arg0, %c0_i32, %c0_i32_0 : i32, i32, i32
  }
  func.func @transform_21(%arg0: i32) -> (i32, i32) {
    %c0_i32 = arith.constant 0 : i32
    %c0_i32_0 = arith.constant 0 : i32
    %c0_i32_1 = arith.constant 0 : i32
    return %c0_i32, %c0_i32_0 : i32, i32
  }
  func.func @transform_22(%arg0: i32) -> (i32, i32) {
    %c0_i32 = arith.constant 0 : i32
    %c0_i32_0 = arith.constant 0 : i32
    %c0_i32_1 = arith.constant 0 : i32
    return %c0_i32, %c0_i32_0 : i32, i32
  }
  func.func @transform_23(%arg0: i32) -> (i32, i32, i32) {
    %c0_i32 = arith.constant 0 : i32
    %c0_i32_0 = arith.constant 0 : i32
    %c0_i32_1 = arith.constant 0 : i32
    return %arg0, %c0_i32, %c0_i32_0 : i32, i32, i32
  }
  func.func @transform_24(%arg0: i32) -> (i32, i32, i32) {
    %c0_i32 = arith.constant 0 : i32
    %c0_i32_0 = arith.constant 0 : i32
    %c0_i32_1 = arith.constant 0 : i32
    return %arg0, %c0_i32, %c0_i32_0 : i32, i32, i32
  }
  func.func @transform_25(%arg0: i32) -> (i32, i32) {
    %c0_i32 = arith.constant 0 : i32
    %c0_i32_0 = arith.constant 0 : i32
    %c0_i32_1 = arith.constant 0 : i32
    return %c0_i32, %c0_i32_0 : i32, i32
  }
  func.func @transform_26(%arg0: i32) -> (i32, i32) {
    %c0_i32 = arith.constant 0 : i32
    %c0_i32_0 = arith.constant 0 : i32
    %c0_i32_1 = arith.constant 0 : i32
    return %c0_i32, %c0_i32_0 : i32, i32
  }
  func.func @transform_27(%arg0: i32) -> (i32, i32, i32) {
    %c0_i32 = arith.constant 0 : i32
    %c0_i32_0 = arith.constant 0 : i32
    %c0_i32_1 = arith.constant 0 : i32
    return %arg0, %c0_i32, %c0_i32_0 : i32, i32, i32
  }
  func.func @transform_28(%arg0: i32) -> (i32, i32, i32) {
    %c0_i32 = arith.constant 0 : i32
    %c0_i32_0 = arith.constant 0 : i32
    %c0_i32_1 = arith.constant 0 : i32
    return %arg0, %c0_i32, %c0_i32_0 : i32, i32, i32
  }
  func.func @transform_29(%arg0: i32) -> (i32, i32) {
    %c0_i32 = arith.constant 0 : i32
    %c0_i32_0 = arith.constant 0 : i32
    %c0_i32_1 = arith.constant 0 : i32
    return %c0_i32, %c0_i32_0 : i32, i32
  }
  func.func @transform_30(%arg0: i32) -> (i32, i32) {
    %c0_i32 = arith.constant 0 : i32
    %c0_i32_0 = arith.constant 0 : i32
    %c0_i32_1 = arith.constant 0 : i32
    return %c0_i32, %c0_i32_0 : i32, i32
  }
  func.func @transform_31(%arg0: i32) -> (i32, i32, i32) {
    %c0_i32 = arith.constant 0 : i32
    %c0_i32_0 = arith.constant 0 : i32
    %c0_i32_1 = arith.constant 0 : i32
    return %arg0, %c0_i32, %c0_i32_0 : i32, i32, i32
  }
  func.func @transform_32(%arg0: i32) -> (i32, i32, i32) {
    %c0_i32 = arith.constant 0 : i32
    %c0_i32_0 = arith.constant 0 : i32
    %c0_i32_1 = arith.constant 0 : i32
    return %arg0, %c0_i32, %c0_i32_0 : i32, i32, i32
  }
  func.func @transform_33(%arg0: i32) -> (i32, i32) {
    %c0_i32 = arith.constant 0 : i32
    %c0_i32_0 = arith.constant 0 : i32
    %c0_i32_1 = arith.constant 0 : i32
    return %c0_i32, %c0_i32_0 : i32, i32
  }
  func.func @transform_34(%arg0: i32) -> (i32, i32) {
    %c0_i32 = arith.constant 0 : i32
    %c0_i32_0 = arith.constant 0 : i32
    %c0_i32_1 = arith.constant 0 : i32
    return %c0_i32, %c0_i32_0 : i32, i32
  }
  func.func @transform_35(%arg0: i32) -> (i32, i32, i32) {
    %c0_i32 = arith.constant 0 : i32
    %c0_i32_0 = arith.constant 0 : i32
    %c0_i32_1 = arith.constant 0 : i32
    return %arg0, %c0_i32, %c0_i32_0 : i32, i32, i32
  }
  func.func @transform_36(%arg0: i32) -> (i32, i32, i32) {
    %c0_i32 = arith.constant 0 : i32
    %c0_i32_0 = arith.constant 0 : i32
    %c0_i32_1 = arith.constant 0 : i32
    return %arg0, %c0_i32, %c0_i32_0 : i32, i32, i32
  }
  func.func @transform_37(%arg0: i32) -> (i32, i32) {
    %c0_i32 = arith.constant 0 : i32
    %c0_i32_0 = arith.constant 0 : i32
    %c0_i32_1 = arith.constant 0 : i32
    return %c0_i32, %c0_i32_0 : i32, i32
  }
  func.func @transform_38(%arg0: i32) -> (i32, i32) {
    %c0_i32 = arith.constant 0 : i32
    %c0_i32_0 = arith.constant 0 : i32
    %c0_i32_1 = arith.constant 0 : i32
    return %c0_i32, %c0_i32_0 : i32, i32
  }
  func.func @transform_39(%arg0: i32) -> (i32, i32) {
    %c0_i32 = arith.constant 0 : i32
    %c0_i32_0 = arith.constant 0 : i32
    %c0_i32_1 = arith.constant 0 : i32
    return %c0_i32, %c0_i32_0 : i32, i32
  }
  func.func @transform_40(%arg0: i32) -> (i32, i32) {
    %c0_i32 = arith.constant 0 : i32
    %c0_i32_0 = arith.constant 0 : i32
    %c0_i32_1 = arith.constant 0 : i32
    return %c0_i32, %c0_i32_0 : i32, i32
  }
  func.func @transform_41(%arg0: i32) -> (i32, i32) {
    %c0_i32 = arith.constant 0 : i32
    %c0_i32_0 = arith.constant 0 : i32
    %c0_i32_1 = arith.constant 0 : i32
    return %c0_i32, %c0_i32_0 : i32, i32
  }
  func.func @transform_42(%arg0: i32) -> (i32, i32) {
    %c0_i32 = arith.constant 0 : i32
    %c0_i32_0 = arith.constant 0 : i32
    %c0_i32_1 = arith.constant 0 : i32
    return %c0_i32, %c0_i32_0 : i32, i32
  }
  func.func @transform_43(%arg0: i32) -> (i32, i32) {
    %c0_i32 = arith.constant 0 : i32
    %c0_i32_0 = arith.constant 0 : i32
    %c0_i32_1 = arith.constant 0 : i32
    return %c0_i32, %c0_i32_0 : i32, i32
  }
  func.func @transform_44(%arg0: i32) -> (i32, i32) {
    %c0_i32 = arith.constant 0 : i32
    %c0_i32_0 = arith.constant 0 : i32
    %c0_i32_1 = arith.constant 0 : i32
    return %c0_i32, %c0_i32_0 : i32, i32
  }
  func.func @transform_45(%arg0: i32) -> (i32, i32) {
    %c0_i32 = arith.constant 0 : i32
    %c0_i32_0 = arith.constant 0 : i32
    %c0_i32_1 = arith.constant 0 : i32
    return %c0_i32, %c0_i32_0 : i32, i32
  }
}

</mosaic_0001>

<bundles_post_ra>
// kernel: forward.1
= control target key start
LH: loop header
LB: loop body
LE: loop exit
PB: predicated region body
PF: predicated region fallthrough
CT: control target
= control target key end

     0   :  { %s10773_s6 = smov 1   ;;  %s10774_s10 = smov 2   ;;  %s12779_s0 = inlined_call_operand.smem [shape: u32[46], index: -1, kind: input, shape index: {}] }
   0x1   :  { %s10844_s5 = sld [smem:[%s12779_s0]]   ;;  %s10775_s14 = smov 3  }
   0x2   :  { %s10849_s9 = sld [smem:[%s12779_s0 + %s10773_s6]]   ;;  %s10776_s18 = smov 4  }
   0x3   :  { %s10854_s13 = sld [smem:[%s12779_s0 + %s10774_s10]]   ;;  %s10777_s22 = smov 5  }
   0x4   :  { %s10859_s17 = sld [smem:[%s12779_s0 + %s10775_s14]]   ;;  %s10778_s26 = smov 6  }
   0x5   :  { %s10864_s21 = sld [smem:[%s12779_s0 + %s10776_s18]]   ;;  %s10779_s30 = smov 7  }
   0x6   :  { %s10869_s25 = sld [smem:[%s12779_s0 + %s10777_s22]]   ;;  %s10780_s4 = smov 8  }
   0x7   :  { %12846 = sst [smem:[#allocation71_spill]] %s10844_s5  ;;  %s10781_s10 = smov 9  }
   0x8   :  { %12847 = sst [smem:[#allocation72_spill]] %s10849_s9  ;;  %s10782_s15 = smov 10  }
   0x9   :  { %12848 = sst [smem:[#allocation73_spill]] %s10854_s13  ;;  %s10783_s20 = smov 11  }
   0xa   :  { %s10874_s29 = sld [smem:[%s12779_s0 + %s10778_s26]]   ;;  %s10784_s26 = smov 12  }
   0xb   :  { %s10879_s3 = sld [smem:[%s12779_s0 + %s10779_s30]]   ;;  %s10785_s1 = smov 13  }
   0xc   :  { %12849 = sst [smem:[#allocation74_spill]] %s10869_s25  ;;  %s10786_s7 = smov 14  }
   0xd   :  { %s10884_s8 = sld [smem:[%s12779_s0 + %s10780_s4]]   ;;  %s10788_s22 = smov 16  }
   0xe   :  { %s10889_s14 = sld [smem:[%s12779_s0 + %s10781_s10]]   ;;  %s10789_s28 = smov 17  }
   0xf   :  { %s10894_s19 = sld [smem:[%s12779_s0 + %s10782_s15]]   ;;  %s10787_s15 = smov 15  }
  0x10   :  { %12850 = sst [smem:[#allocation75_spill]] %s10874_s29 }
  0x11   :  { %12851 = sst [smem:[#allocation76_spill]] %s10879_s3 }
  0x12   :  { %s10899_s24 = sld [smem:[%s12779_s0 + %s10783_s20]]  }
  0x13   :  { %12852 = sst [smem:[#allocation77_spill]] %s10884_s8 }
  0x14   :  { %12853 = sst [smem:[#allocation78_spill]] %s10889_s14 }
  0x15   :  { %12854 = sst [smem:[#allocation79_spill]] %s10894_s19 }
  0x16   :  { %s10904_s30 = sld [smem:[%s12779_s0 + %s10784_s26]]  }
  0x17   :  { %s10909_s6 = sld [smem:[%s12779_s0 + %s10785_s1]]  }
  0x18   :  { %12855 = sst [smem:[#allocation80_spill]] %s10899_s24 }
  0x19   :  { %s10914_s12 = sld [smem:[%s12779_s0 + %s10786_s7]]   ;;  %s10790_s7 = smov 18  }
  0x1a   :  { %s10919_s20 = sld [smem:[%s12779_s0 + %s10787_s15]]   ;;  %s10791_s15 = smov 19  }
  0x1b   :  { %s10924_s27 = sld [smem:[%s12779_s0 + %s10788_s22]]   ;;  %s10792_s22 = smov 20  }
  0x1c   :  { %12856 = sst [smem:[#allocation81_spill]] %s10904_s30 }
  0x1d   :  { %12857 = sst [smem:[#allocation82_spill]] %s10909_s6 }
  0x1e   :  { %s10929_s4 = sld [smem:[%s12779_s0 + %s10789_s28]]   ;;  %s10793_s28 = smov 21  }
  0x1f   :  { %12858 = sst [smem:[#allocation83_spill]] %s10914_s12 }
  0x20   :  { %s10934_s12 = sld [smem:[%s12779_s0 + %s10790_s7]]   ;;  %s10794_s7 = smov 22  }
  0x21   :  { %12859 = sst [smem:[#allocation84_spill]] %s10924_s27 }
  0x22   :  { %s10939_s19 = sld [smem:[%s12779_s0 + %s10791_s15]]   ;;  %s10795_s15 = smov 23  }
  0x23   :  { %s10944_s14 = sld [smem:[%s12779_s0 + %s10792_s22]]   ;;  %s10796_s22 = smov 24  }
  0x24   :  { %12860 = sst [smem:[#allocation85_spill]] %s10929_s4 }
  0x25   :  { %s10949_s29 = sld [smem:[%s12779_s0 + %s10793_s28]]   ;;  %s10797_s28 = smov 25  }
  0x26   :  { %12861 = sst [smem:[#allocation86_spill]] %s10934_s12 }
  0x27   :  { %s10954_s12 = sld [smem:[%s12779_s0 + %s10794_s7]]   ;;  %s10798_s7 = smov 26  }
  0x28   :  { %12862 = sst [smem:[#allocation87_spill]] %s10939_s19 }
  0x29   :  { %12863 = sst [smem:[#allocation88_spill]] %s10944_s14 }
  0x2a   :  { %s10959_s25 = sld [smem:[%s12779_s0 + %s10795_s15]]   ;;  %s10799_s15 = smov 27  }
  0x2b   :  { %s10964_s13 = sld [smem:[%s12779_s0 + %s10796_s22]]   ;;  %s10800_s22 = smov 28  }
  0x2c   :  { %s10969_s9 = sld [smem:[%s12779_s0 + %s10797_s28]]   ;;  %s10801_s28 = smov 29  }
  0x2d   :  { %12864 = sst [smem:[#allocation89_spill]] %s10954_s12 }
  0x2e   :  { %s10974_s12 = sld [smem:[%s12779_s0 + %s10798_s7]]   ;;  %s10802_s7 = smov 30  }
  0x2f   :  { %s10979_s5 = sld [smem:[%s12779_s0 + %s10799_s15]]   ;;  %s10803_s15 = smov 31  }
  0x30   :  { %12865 = sst [smem:[#allocation90_spill]] %s10959_s25 }
  0x31   :  { %12866 = sst [smem:[#allocation91_spill]] %s10964_s13 }
  0x32   :  { %12867 = sst [smem:[#allocation92_spill]] %s10969_s9 }
  0x33   :  { %s10984_s13 = sld [smem:[%s12779_s0 + %s10800_s22]]   ;;  %s10804_s22 = smov 32  }
  0x34   :  { %12868 = sst [smem:[#allocation93_spill]] %s10974_s12 }
  0x35   :  { %12869 = sst [smem:[#allocation94_spill]] %s10979_s5 }
  0x36   :  { %s10989_s25 = sld [smem:[%s12779_s0 + %s10801_s28]]   ;;  %s10805_s28 = smov 33  }
  0x37   :  { %s10994_s12 = sld [smem:[%s12779_s0 + %s10802_s7]]   ;;  %s10806_s7 = smov 34  }
  0x38   :  { %s10999_s14 = sld [smem:[%s12779_s0 + %s10803_s15]]   ;;  %s10807_s15 = smov 35  }
  0x39   :  { %12870 = sst [smem:[#allocation95_spill]] %s10984_s13 }
  0x3a   :  { %s11004_s13 = sld [smem:[%s12779_s0 + %s10804_s22]]   ;;  %s10808_s22 = smov 36  }
  0x3b   :  { %s11009_s19 = sld [smem:[%s12779_s0 + %s10805_s28]]   ;;  %s10809_s28 = smov 37  }
  0x3c   :  { %s11014_s24 = sld [smem:[%s12779_s0 + %s10806_s7]]   ;;  %s10810_s7 = smov 38  }
  0x3d   :  { %12871 = sst [smem:[#allocation96_spill]] %s10994_s12 }
  0x3e   :  { %12872 = sst [smem:[#allocation97_spill]] %s10999_s14 }
  0x3f   :  { %s11019_s14 = sld [smem:[%s12779_s0 + %s10807_s15]]   ;;  %s10811_s15 = smov 39  }
  0x40   :  { %12873 = sst [smem:[#allocation98_spill]] %s11004_s13 }
  0x41   :  { %s11024_s13 = sld [smem:[%s12779_s0 + %s10808_s22]]   ;;  %s10812_s22 = smov 40  }
  0x42   :  { %s11029_s5 = sld [smem:[%s12779_s0 + %s10809_s28]]   ;;  %s10813_s28 = smov 41  }
  0x43   :  { %s11034_s27 = sld [smem:[%s12779_s0 + %s10810_s7]]   ;;  %s10814_s7 = smov 42  }
  0x45   :  { %12874 = sst [smem:[#allocation99_spill]] %s11019_s14 }
  0x46   :  { %s11039_s14 = sld [smem:[%s12779_s0 + %s10811_s15]]   ;;  %s10815_s15 = smov 43  }
  0x47   :  { %12875 = sst [smem:[#allocation100_spill]] %s11024_s13 }
  0x48   :  { %12876 = sst [smem:[#allocation101_spill]] %s11029_s5 }
  0x49   :  { %12877 = sst [smem:[#allocation102_spill]] %s11034_s27 }
  0x4a   :  { %s11044_s13 = sld [smem:[%s12779_s0 + %s10812_s22]]   ;;  %s10816_s22 = smov 44  }
  0x4b   :  { %s11049_s5 = sld [smem:[%s12779_s0 + %s10813_s28]]   ;;  %s10817_s28 = smov 45  }
  0x4c   :  { %12878 = sst [smem:[#allocation103_spill]] %s11039_s14 }
  0x4d   :  { %s11054_s27 = sld [smem:[%s12779_s0 + %s10814_s7]]  }
  0x4e   :  { %s11059_s14 = sld [smem:[%s12779_s0 + %s10815_s15]]  }
  0x4f   :  { %s11064_s30 = sld [smem:[%s12779_s0 + %s10816_s22]]  }
  0x50   :  { %12879 = sst [smem:[#allocation104_spill]] %s11044_s13 }
  0x51   :  { %12880 = sst [smem:[#allocation105_spill]] %s11049_s5 }
  0x52   :  { %s11069_s5 = sld [smem:[%s12779_s0 + %s10817_s28]]  }
  0x54   :  { %12881 = sst [smem:[#allocation106_spill]] %s11059_s14 }
  0x55   :  { %12882 = sst [smem:[#allocation107_spill]] %s11064_s30 }
  0x58   :  { %12883 = sst [smem:[#allocation108_spill]] %s11069_s5 }
  0x59   :  { %96 = vsyncpa [#allocation10], 0 }
  0x5a   :  { %98 = vsyncpa [#allocation10 + $0x1], 0 }
  0x5b   :  { %99 = vsyncpa [#allocation13], 0 }
  0x5c   :  { %101 = vsyncpa [#allocation13 + $0x1], 0 }
  0x5d   :  { %102 = vsyncpa [#allocation16], 0 }
  0x5e   :  { %104 = vsyncpa [#allocation16 + $0x1], 0 }
  0x5f   :  { %105 = vsyncpa [#allocation19], 0 }
  0x60   :  { %107 = vsyncpa [#allocation19 + $0x1], 0 }
  0x61   :  { %108 = vsyncpa [#allocation22], 0 }
  0x62   :  { %110 = vsyncpa [#allocation22 + $0x1], 0 }
  0x63   :  { %111 = vsyncpa [#allocation25], 0 }
  0x64   :  { %112 = vsyncpa [#allocation33], 0 }
  0x65   :  { %114 = vsyncpa [#allocation33 + $0x1], 0 }
  0x66   :  { %115 = vsyncpa [#allocation36], 0 }
  0x67   :  { %116 = vsyncpa [#allocation39], 0 }
  0x68   :  { %118 = vsyncpa [#allocation39 + $0x1], 0 }
  0x69   :  { %119 = vsyncpa [#allocation42], 0 }
  0x6a   :  { %120 = vsyncpa [#allocation45], 0 }
  0x6b   :  { %122 = vsyncpa [#allocation45 + $0x1], 0 }
  0x6c   :  { %123 = vsyncpa [#allocation48], 0 }
  0x6d   :  { %124 = vsyncpa [#allocation11], 0  ;;  %s11071_s0 = smov 0   ;;  %s11073_s7 = smov 0  }
  0x6e   :  { %s11075_s10 = smov 0   ;;  %s11077_s11 = smov 0  }
  0x6f LB: > { %s12884_s13 = sld [smem:[#allocation104_spill]]  ;;  %s11090_s15 = sadd.s32 4294967295, %s10771_s11   ;;  %s10767_s10 = sphi %s11075_s10, %s12971_s10   ;;  %s10763_s7 = sphi %s11073_s7, %s12970_s7   ;;  %s10759_s0 = sphi %s11071_s0, %s12968_s0   ;;  %s10771_s11 = sphi %s11077_s11, %s12967_s11  }
  0x70   : > { %s12885_s12 = sld [smem:[#allocation96_spill]]  ;;  %s11093_s16 = sadd.s32 1, %s10771_s11  }
  0x71   : > { %s12886_s9 = sld [smem:[#allocation92_spill]]  ;;  %s202_s18 = ssub.s32 %s10771_s11, %s11093_s16 }
  0x72   : > { %s12887_s8 = sld [smem:[#allocation77_spill]]  ;;  %s205_s22 = sadd.s32 1, %s10767_s10 }
  0x73   : > { %s12888_s3 = sld [smem:[#allocation76_spill]]  ;;  %p203_p0 = scmp.eq.s32.totalorder %s202_s18, 0 }
  0x74   : > { %s12889_s6 = sld [smem:[#allocation82_spill]]  ;;  %p212_p1 = scmp.ne.s32.totalorder %s10767_s10, %s10763_s7 }
  0x75   : > { %s12890_s4 = sld [smem:[#allocation85_spill]]  ;;  %p213_p2 = scmp.eq.s32.totalorder %s10771_s11, 0 }
  0x76   : > { %12891 = sst [smem:[#allocation109_spill]] %s10763_s7  ;;  %p218_p3 = scmp.ne.s32.totalorder %s10763_s7, %s10759_s0 }
  0x77   : > { %12892 = sst [smem:[#allocation110_spill]] %s11090_s15  ;;  %p11105_p4 = por %p213_p2, %p212_p1 }
  0x78   : > { %12893 = sst [smem:[#allocation111_spill]] %s11093_s16  ;;  %p219_p5 = scmp.eq.s32.totalorder %s11090_s15, 0 }
  0x79   : > { %s11103_s23 = scalar_select %p203_p0, %s10767_s10, %s205_s22  }
  0x7a   : > { %p8177_p6 = scmp.ge.s32.totalorder %s10771_s11, 1  ;;  %p1196_p7 = scmp.lt.s32.totalorder %s10771_s11, 3 }
  0x7b   : > { %12894 = sst [smem:[#allocation112_spill]] %s11103_s23  ;;  %p11114_p8 = por %p219_p5, %p218_p3 }
  0x7c   : > { %p11119_p10 = pnand %p8177_p6, %p1196_p7  ;;  %s1242_s2 = sshll.u32 %s12890_s4, 4  ;;  %s1243_s2 = int_to_ptr.hbm [resolvable:$true] %s1242_s2 }
  0x7d   : > { %s12896_s28 = scalar_select %p11114_p8, 1, 0 }
  0x7e   : > { %p9663_p11 = pneg %p11119_p10  ;;  %s1293_s0 = sshll.u32 %s10989_s25, 4  ;;  %s11133_s0 = int_to_ptr.hbm [resolvable:$true] %s1293_s0 }
  0x7f   : > { %12897 = sst [smem:[#allocation113_spill]] %s12896_s28  ;;  %s10818_s22 = smov [#allocation24]  }
  0x80   : > { %p11129_p12 = pnand %p9663_p11, %p219_p5  ;;  %s1244_s23 = sshll.u32 %s10818_s22, 4  ;;  %s1245_s23 = int_to_ptr.vmem [resolvable:$true] %s1244_s23 }
  0x81   : > { %s9829_s16 = sshra.s32 %s1243_s2, 4  ;;  %s9836_s14 = scalar_lea.hbm %s12890_s4, 48  ;;  %s9830_s16 = int_to_ptr.hbm [resolvable:$true] %s9829_s16 }
  0x82   : > { %s9831_s5 = scalar_lea.hbm %s9830_s16, 48  ;;  %p11137_p0 = pneg %p11129_p12 }
  0x83   : > { %p9832_p13 = scmp.ne.s32.totalorder %s9830_s16, %s9831_s5  ;;  %p9837_p3 = scmp.lt.s32.totalorder %s9830_s16, %s12890_s4 }
  0x84   : > { %p9838_p6 = scmp.lt.s32.totalorder %s9836_s14, %s9831_s5 }
  0x85   : > { %p9834_p1 = pnand %p11137_p0, %p9832_p13 }
  0x86   : > { %p9839_p7 = por %p9838_p6, %p9837_p3 }
  0x87   : > { %p9835_p2 = pneg %p9834_p1 }
  0x89   : > { %p9840_p11 = pnand %p9839_p7, %p9835_p2 }
  0x8b   : > { %9843 = shalt.err (!%p9840_p11)
}
  0x8c   : > { %s10819_s22 = smov 64   ;;  %s10820_s28 = smov 4  }
  0x8d   : > { %9669 = dma.hbm_to_vmem [thread:$0]  (!%p11129_p12), %s1243_s2, 768, %s1245_s23, [#allocation25], %s10819_s22, %s10819_s22, %s10820_s28  }
  0x8e   : > { %s10821_s7 = smov [#allocation35]   ;;  %s1321_s16 = sshll.u32 %s11009_s19, 4  ;;  %s11151_s16 = int_to_ptr.hbm [resolvable:$true] %s1321_s16 }
  0x8f   : > { %s1295_s15 = sshll.u32 %s10821_s7, 4  ;;  %s9859_s5 = sshra.s32 %s11133_s0, 4  ;;  %s1296_s15 = int_to_ptr.vmem [resolvable:$true] %s1295_s15  ;;  %s9860_s5 = int_to_ptr.hbm [resolvable:$true] %s9859_s5 }
  0x90   : > { %s9861_s14 = scalar_lea.hbm %s9860_s5, 16  ;;  %s9866_s4 = scalar_lea.hbm %s10989_s25, 16 }
  0x91   : > { %p9862_p13 = scmp.ne.s32.totalorder %s9860_s5, %s9861_s14  ;;  %p9867_p3 = scmp.lt.s32.totalorder %s9860_s5, %s10989_s25 }
  0x92   : > { %p9868_p6 = scmp.lt.s32.totalorder %s9866_s4, %s9861_s14 }
  0x93   : > { %p9864_p1 = pnand %p9862_p13, %p11137_p0 }
  0x94   : > { %p9869_p7 = por %p9868_p6, %p9867_p3 }
  0x95   : > { %p9865_p2 = pneg %p9864_p1 }
  0x97   : > { %p9870_p11 = pnand %p9869_p7, %p9865_p2 }
  0x99   : > { %9873 = shalt.err (!%p9870_p11)
}
  0x9a   : > { %9678 = dma.hbm_to_vmem [thread:$0]  (!%p11129_p12), %s11133_s0, 256, %s1296_s15, [#allocation36], %s10819_s22, %s10819_s22, %s10820_s28  }
  0x9b   : > { %s1359_s7 = sshll.u32 %s12884_s13, 4  ;;  %s10822_s23 = smov [#allocation41]   ;;  %s11165_s7 = int_to_ptr.hbm [resolvable:$true] %s1359_s7 }
  0x9c   : > { %s1323_s2 = sshll.u32 %s10822_s23, 4  ;;  %s9889_s4 = sshra.s32 %s11151_s16, 4  ;;  %s1324_s2 = int_to_ptr.vmem [resolvable:$true] %s1323_s2  ;;  %s9890_s4 = int_to_ptr.hbm [resolvable:$true] %s9889_s4 }
  0x9d   : > { %s9891_s5 = scalar_lea.hbm %s9890_s4, 8  ;;  %s9896_s14 = scalar_lea.hbm %s11009_s19, 8 }
  0x9e   : > { %p9892_p13 = scmp.ne.s32.totalorder %s9890_s4, %s9891_s5  ;;  %p9897_p3 = scmp.lt.s32.totalorder %s9890_s4, %s11009_s19 }
  0x9f   : > { %p9898_p6 = scmp.lt.s32.totalorder %s9896_s14, %s9891_s5 }
  0xa0   : > { %p9894_p1 = pnand %p9892_p13, %p11137_p0 }
  0xa1   : > { %p9899_p7 = por %p9898_p6, %p9897_p3 }
  0xa2   : > { %p9895_p2 = pneg %p9894_p1 }
  0xa4   : > { %p9900_p11 = pnand %p9899_p7, %p9895_p2 }
  0xa6   : > { %9903 = shalt.err (!%p9900_p11)
}
  0xa7   : > { %9684 = dma.hbm_to_vmem [thread:$0]  (!%p11129_p12), %s11151_s16, 128, %s1324_s2, [#allocation42], %s10819_s22, %s10819_s22, %s10820_s28  }
  0xa8   : > { %s10823_s15 = smov [#allocation47]   ;;  %s1225_s23 = sshll.u32 %s12889_s6, 4  ;;  %s11179_s23 = int_to_ptr.hbm [resolvable:$true] %s1225_s23 }
  0xa9   : > { %s1361_s0 = sshll.u32 %s10823_s15, 4  ;;  %s9919_s4 = sshra.s32 %s11165_s7, 4  ;;  %s1362_s0 = int_to_ptr.vmem [resolvable:$true] %s1361_s0  ;;  %s9920_s4 = int_to_ptr.hbm [resolvable:$true] %s9919_s4 }
  0xaa   : > { %s9921_s5 = scalar_lea.hbm %s9920_s4, 8  ;;  %s9926_s14 = scalar_lea.hbm %s12884_s13, 8 }
  0xab   : > { %p9922_p13 = scmp.ne.s32.totalorder %s9920_s4, %s9921_s5  ;;  %p9927_p3 = scmp.lt.s32.totalorder %s9920_s4, %s12884_s13 }
  0xac   : > { %p9928_p6 = scmp.lt.s32.totalorder %s9926_s14, %s9921_s5 }
  0xad   : > { %p9924_p1 = pnand %p9922_p13, %p11137_p0 }
  0xae   : > { %p9929_p7 = por %p9928_p6, %p9927_p3 }
  0xaf   : > { %p9925_p2 = pneg %p9924_p1 }
  0xb1   : > { %p9930_p11 = pnand %p9929_p7, %p9925_p2 }
  0xb3   : > { %9933 = shalt.err (!%p9930_p11)
}
  0xb4   : > { %9690 = dma.hbm_to_vmem [thread:$0]  (!%p11129_p12), %s11165_s7, 128, %s1362_s0, [#allocation48]  }
  0xb5   : > { %s1259_s16 = sshll.u32 %s10949_s29, 4  ;;  %s10824_s2 = smov [#allocation20]   ;;  %s11190_s16 = int_to_ptr.hbm [resolvable:$true] %s1259_s16 }
  0xb6   : > { %s1227_s15 = sshll.u32 %s10824_s2, 4  ;;  %s9949_s4 = sshra.s32 %s11179_s23, 4  ;;  %s1228_s15 = int_to_ptr.vmem [resolvable:$true] %s1227_s15  ;;  %s9950_s4 = int_to_ptr.hbm [resolvable:$true] %s9949_s4 }
  0xb7   : > { %s9951_s5 = scalar_lea.hbm %s9950_s4, 48  ;;  %s9956_s14 = scalar_lea.hbm %s12889_s6, 48 }
  0xb8   : > { %p9952_p13 = scmp.ne.s32.totalorder %s9950_s4, %s9951_s5  ;;  %p9957_p3 = scmp.lt.s32.totalorder %s9950_s4, %s12889_s6 }
  0xb9   : > { %p9958_p6 = scmp.lt.s32.totalorder %s9956_s14, %s9951_s5 }
  0xba   : > { %p9954_p1 = pnand %p9952_p13, %p11137_p0 }
  0xbb   : > { %p9959_p7 = por %p9958_p6, %p9957_p3 }
  0xbc   : > { %p9955_p2 = pneg %p9954_p1 }
  0xbe   : > { %p9960_p11 = pnand %p9959_p7, %p9955_p2 }
  0xc0   : > { %9963 = shalt.err (!%p9960_p11)
}
  0xc1   : > { %9666 = dma.hbm_to_vmem [thread:$0]  (!%p11129_p12), %s11179_s23, 768, %s1228_s15, [#allocation19], %s10819_s22, %s10819_s22, %s10820_s28  }
  0xc2   : > { %s10825_s7 = smov [#allocation28]   ;;  %s1276_s2 = sshll.u32 %s12886_s9, 4  ;;  %s11204_s2 = int_to_ptr.hbm [resolvable:$true] %s1276_s2 }
  0xc3   : > { %s1261_s0 = sshll.u32 %s10825_s7, 4  ;;  %s9979_s4 = sshra.s32 %s11190_s16, 4  ;;  %s1262_s0 = int_to_ptr.vmem [resolvable:$true] %s1261_s0  ;;  %s9980_s4 = int_to_ptr.hbm [resolvable:$true] %s9979_s4 }
  0xc4   : > { %s9981_s5 = scalar_lea.hbm %s9980_s4, 24  ;;  %s9986_s14 = scalar_lea.hbm %s10949_s29, 24 }
  0xc5   : > { %p9982_p13 = scmp.ne.s32.totalorder %s9980_s4, %s9981_s5  ;;  %p9987_p3 = scmp.lt.s32.totalorder %s9980_s4, %s10949_s29 }
  0xc6   : > { %p9988_p6 = scmp.lt.s32.totalorder %s9986_s14, %s9981_s5 }
  0xc7   : > { %p9984_p1 = pnand %p9982_p13, %p11137_p0 }
  0xc8   : > { %p9989_p7 = por %p9988_p6, %p9987_p3 }
  0xc9   : > { %p9985_p2 = pneg %p9984_p1 }
  0xcb   : > { %p9990_p11 = pnand %p9989_p7, %p9985_p2 }
  0xcd   : > { %9993 = shalt.err (!%p9990_p11)
}
  0xce   : > { %9672 = dma.hbm_to_vmem [thread:$0]  (!%p11129_p12), %s11190_s16, 384, %s1262_s0, [#allocation16], %s10819_s22, %s10819_s22, %s10820_s28  }
  0xcf   : > { %s1307_s23 = sshll.u32 %s12885_s12, 4  ;;  %s10826_s15 = smov [#allocation31]   ;;  %s11218_s23 = int_to_ptr.hbm [resolvable:$true] %s1307_s23 }
  0xd0   : > { %s1278_s7 = sshll.u32 %s10826_s15, 4  ;;  %s10009_s4 = sshra.s32 %s11204_s2, 4  ;;  %s1279_s7 = int_to_ptr.vmem [resolvable:$true] %s1278_s7  ;;  %s10010_s4 = int_to_ptr.hbm [resolvable:$true] %s10009_s4 }
  0xd1   : > { %s10011_s5 = scalar_lea.hbm %s10010_s4, 24  ;;  %s10016_s14 = scalar_lea.hbm %s12886_s9, 24 }
  0xd2   : > { %p10012_p13 = scmp.ne.s32.totalorder %s10010_s4, %s10011_s5  ;;  %p10017_p3 = scmp.lt.s32.totalorder %s10010_s4, %s12886_s9 }
  0xd3   : > { %p10018_p6 = scmp.lt.s32.totalorder %s10016_s14, %s10011_s5 }
  0xd4   : > { %p10014_p1 = pnand %p10012_p13, %p11137_p0 }
  0xd5   : > { %p10019_p7 = por %p10018_p6, %p10017_p3 }
  0xd6   : > { %p10015_p2 = pneg %p10014_p1 }
  0xd8   : > { %p10020_p11 = pnand %p10019_p7, %p10015_p2 }
  0xda   : > { %10023 = shalt.err (!%p10020_p11)
}
  0xdb   : > { %9675 = dma.hbm_to_vmem [thread:$0]  (!%p11129_p12), %s11204_s2, 384, %s1279_s7, [#allocation25], %s10819_s22, %s10819_s22, %s10820_s28  }
  0xdc   : > { %s10827_s16 = smov [#allocation37]   ;;  %s1335_s15 = sshll.u32 %s11014_s24, 4  ;;  %s11232_s15 = int_to_ptr.hbm [resolvable:$true] %s1335_s15 }
  0xdd   : > { %s1309_s0 = sshll.u32 %s10827_s16, 4  ;;  %s10039_s4 = sshra.s32 %s11218_s23, 4  ;;  %s1310_s0 = int_to_ptr.vmem [resolvable:$true] %s1309_s0  ;;  %s10040_s4 = int_to_ptr.hbm [resolvable:$true] %s10039_s4 }
  0xde   : > { %s10041_s5 = scalar_lea.hbm %s10040_s4, 64  ;;  %s10046_s14 = scalar_lea.hbm %s12885_s12, 64 }
  0xdf   : > { %p10042_p13 = scmp.ne.s32.totalorder %s10040_s4, %s10041_s5  ;;  %p10047_p3 = scmp.lt.s32.totalorder %s10040_s4, %s12885_s12 }
  0xe0   : > { %p10048_p6 = scmp.lt.s32.totalorder %s10046_s14, %s10041_s5 }
  0xe1   : > { %p10044_p1 = pnand %p10042_p13, %p11137_p0 }
  0xe2   : > { %p10049_p7 = por %p10048_p6, %p10047_p3 }
  0xe3   : > { %p10045_p2 = pneg %p10044_p1 }
  0xe5   : > { %p10050_p11 = pnand %p10049_p7, %p10045_p2 }
  0xe7   : > { %10053 = shalt.err (!%p10050_p11)
}
  0xe8   : > { %9681 = dma.hbm_to_vmem [thread:$0]  (!%p11129_p12), %s11218_s23, 1024, %s1310_s0, [#allocation36], %s10819_s22, %s10819_s22, %s10820_s28  }
  0xe9   : > { %s1373_s2 = sshll.u32 %s11054_s27, 4  ;;  %s10828_s7 = smov [#allocation43]   ;;  %s11246_s2 = int_to_ptr.hbm [resolvable:$true] %s1373_s2 }
  0xea   : > { %s1337_s16 = sshll.u32 %s10828_s7, 4  ;;  %s10069_s4 = sshra.s32 %s11232_s15, 4  ;;  %s1338_s16 = int_to_ptr.vmem [resolvable:$true] %s1337_s16  ;;  %s10070_s4 = int_to_ptr.hbm [resolvable:$true] %s10069_s4 }
  0xeb   : > { %s10071_s5 = scalar_lea.hbm %s10070_s4, 64  ;;  %s10076_s14 = scalar_lea.hbm %s11014_s24, 64 }
  0xec   : > { %p10072_p13 = scmp.ne.s32.totalorder %s10070_s4, %s10071_s5  ;;  %p10077_p3 = scmp.lt.s32.totalorder %s10070_s4, %s11014_s24 }
  0xed   : > { %p10078_p6 = scmp.lt.s32.totalorder %s10076_s14, %s10071_s5 }
  0xee   : > { %p10074_p1 = pnand %p10072_p13, %p11137_p0 }
  0xef   : > { %p10079_p7 = por %p10078_p6, %p10077_p3 }
  0xf0   : > { %p10075_p2 = pneg %p10074_p1 }
  0xf2   : > { %p10080_p11 = pnand %p10079_p7, %p10075_p2 }
  0xf4   : > { %10083 = shalt.err (!%p10080_p11)
}
  0xf5   : > { %9687 = dma.hbm_to_vmem [thread:$0]  (!%p11129_p12), %s11232_s15, 1024, %s1338_s16, [#allocation42], %s10819_s22, %s10819_s22, %s10820_s28  }
  0xf6   : > { %s10829_s23 = smov [#allocation49]   ;;  %s10099_s7 = sshra.s32 %s11246_s2, 4  ;;  %s10100_s7 = int_to_ptr.hbm [resolvable:$true] %s10099_s7 }
  0xf7   : > { %s1375_s0 = sshll.u32 %s10829_s23, 4  ;;  %s10101_s4 = scalar_lea.hbm %s10100_s7, 16  ;;  %s1376_s0 = int_to_ptr.vmem [resolvable:$true] %s1375_s0 }
  0xf8   : > { %p10102_p13 = scmp.ne.s32.totalorder %s10100_s7, %s10101_s4  ;;  %s10106_s5 = scalar_lea.hbm %s11054_s27, 16 }
  0xf9   : > { %p10107_p3 = scmp.lt.s32.totalorder %s10100_s7, %s11054_s27  ;;  %p10108_p6 = scmp.lt.s32.totalorder %s10106_s5, %s10101_s4 }
  0xfa   : > { %p10104_p1 = pnand %p10102_p13, %p11137_p0 }
  0xfb   : > { %p10109_p7 = por %p10108_p6, %p10107_p3 }
  0xfc   : > { %p10105_p2 = pneg %p10104_p1 }
  0xfe   : > { %p10110_p11 = pnand %p10109_p7, %p10105_p2 }
 0x100   : > { %10113 = shalt.err (!%p10110_p11)
}
 0x101   : > { %s10830_s14 = smov 128   ;;  %s10831_s28 = smov 8  }
 0x102   : > { %9693 = dma.hbm_to_vmem [thread:$0]  (!%p11129_p12), %s11246_s2, 256, %s1376_s0, [#allocation48], %s10830_s14, %s10830_s14, %s10831_s28  }
 0x103   : > { %p8188_p9 = scmp.ge.s32.totalorder %s10771_s11, 2 }
 0x104   : > { %s11269_s30 = sand.u32 (!%p8188_p9), 1, %s10771_s11   ;;  %s11272_s22 = sand.u32 (!%p8188_p9), 1, %s10767_s10  }
 0x105   : > { %1391 = sbr.rel (%p8188_p9) target bundleno = 580 (0x244), region = 120  ;;  %s1426_s15 = scalar_lea.hbm (!%p8188_p9), %s10864_s21, %s10771_s11 }
 0x106   : > { %s1423_s16 = scalar_lea.vmem (!%p8188_p9), [#allocation12], %s11272_s22  ;;  %s1428_s2 = sshll.u32 (!%p8188_p9), %s1426_s15, 4  ;;  %s1429_s2 = int_to_ptr.hbm [resolvable:$true] %s1428_s2 }
 0x107   : > { %s1430_s18 = sshll.u32 (!%p8188_p9), %s1423_s16, 4  ;;  %s11278_s23 = scalar_lea.sflag (!%p8188_p9), [#allocation13], %s11269_s30  ;;  %s1431_s18 = int_to_ptr.vmem [resolvable:$true] %s1430_s18 }
 0x108   : > { %s10129_s0 = sshra.s32 (!%p8188_p9), %s1429_s2, 4  ;;  %s10135_s4 = scalar_lea.hbm (!%p8188_p9), %s10864_s21, 2  ;;  %s10130_s0 = int_to_ptr.hbm [resolvable:$true] %s10129_s0 }
 0x109   : > { %s10131_s7 = scalar_lea.hbm (!%p8188_p9), %s10130_s0, 1  ;;  %p10136_p13 = scmp.lt.s32.totalorder (!%p8188_p9), %s10130_s0, %s10864_s21 }
 0x10a   : > { %p10132_p9 = scmp.ne.s32.totalorder %s10130_s0, %s10131_s7  ;;  %p10137_p1 = scmp.lt.s32.totalorder %s10135_s4, %s10131_s7 }
 0x10c   : > { %p10133_p12 = pnand %p10132_p9, %p11105_p4  ;;  %p10138_p2 = por %p10137_p1, %p10136_p13 }
 0x10e   : > { %p10134_p0 = pneg %p10133_p12 }
 0x110   : > { %p10139_p3 = pnand %p10138_p2, %p10134_p0 }
 0x112   : > { %10142 = shalt.err (!%p10139_p3)
}
 0x113   : > { %9604 = dma.hbm_to_vmem [thread:$0]  (%p11105_p4), %s1429_s2, 16, %s1431_s18, %s11278_s23  }
 0x114   : > { %s1511_s5 = scalar_lea.hbm %s10919_s20, %s10771_s11  ;;  %s1508_s28 = scalar_lea.vmem [#allocation21], %s11272_s22 }
 0x115   : > { %s1513_s14 = sshll.u32 %s1511_s5, 4  ;;  %s1515_s15 = sshll.u32 %s1508_s28, 4  ;;  %s1514_s14 = int_to_ptr.hbm [resolvable:$true] %s1513_s14  ;;  %s1516_s15 = int_to_ptr.vmem [resolvable:$true] %s1515_s15 }
 0x116   : > { %s11291_s16 = scalar_lea.sflag [#allocation22], %s11269_s30  ;;  %s10157_s0 = sshra.s32 %s1514_s14, 4  ;;  %s10158_s0 = int_to_ptr.hbm [resolvable:$true] %s10157_s0 }
 0x117   : > { %s10159_s7 = scalar_lea.hbm %s10158_s0, 1  ;;  %s10163_s4 = scalar_lea.hbm %s10919_s20, 2 }
 0x118   : > { %p10160_p6 = scmp.ne.s32.totalorder %s10158_s0, %s10159_s7  ;;  %p10164_p9 = scmp.lt.s32.totalorder %s10158_s0, %s10919_s20 }
 0x119   : > { %p10165_p12 = scmp.lt.s32.totalorder %s10163_s4, %s10159_s7 }
 0x11a   : > { %p10161_p7 = pnand %p10160_p6, %p11105_p4 }
 0x11b   : > { %p10166_p0 = por %p10165_p12, %p10164_p9 }
 0x11c   : > { %p10162_p11 = pneg %p10161_p7 }
 0x11e   : > { %p10167_p13 = pnand %p10166_p0, %p10162_p11 }
 0x120   : > { %10170 = shalt.err (!%p10167_p13)
}
 0x121   : > { %9609 = dma.hbm_to_vmem [thread:$0]  (%p11105_p4), %s1514_s14, 16, %s1516_s15, %s11291_s16  }
 0x122   : > { %s1409_s18 = scalar_lea.hbm %s10859_s17, %s10771_s11  ;;  %s1406_s2 = scalar_lea.vmem [#allocation9], %s11272_s22 }
 0x123   : > { %s1413_s5 = sshll.u32 %s1406_s2, 4  ;;  %s1411_s28 = sshll.u32 %s1409_s18, 4  ;;  %s1414_s5 = int_to_ptr.vmem [resolvable:$true] %s1413_s5  ;;  %s1412_s28 = int_to_ptr.hbm [resolvable:$true] %s1411_s28 }
 0x124   : > { %s12819_s0 = scalar_lea.sflag [#allocation10], %s11269_s30  ;;  %s10185_s7 = sshra.s32 %s1412_s28, 4  ;;  %s10186_s7 = int_to_ptr.hbm [resolvable:$true] %s10185_s7 }
 0x125   : > { %s10187_s4 = scalar_lea.hbm %s10186_s7, 1  ;;  %s10191_s6 = scalar_lea.hbm %s10859_s17, 2 }
 0x126   : > { %p10188_p1 = scmp.ne.s32.totalorder %s10186_s7, %s10187_s4  ;;  %p10192_p6 = scmp.lt.s32.totalorder %s10186_s7, %s10859_s17 }
 0x127   : > { %p10193_p7 = scmp.lt.s32.totalorder %s10191_s6, %s10187_s4 }
 0x128   : > { %p10189_p2 = pnand %p10188_p1, %p11105_p4 }
 0x129   : > { %p10194_p11 = por %p10193_p7, %p10192_p6 }
 0x12a   : > { %p10190_p3 = pneg %p10189_p2 }
 0x12c   : > { %p10195_p9 = pnand %p10194_p11, %p10190_p3 }
 0x12e   : > { %10198 = shalt.err (!%p10195_p9)
}
 0x12f   : > { %9603 = dma.hbm_to_vmem [thread:$0]  (%p11105_p4), %s1412_s28, 16, %s1414_s5, %s12819_s0  }
 0x130   : > { %s1443_s14 = scalar_lea.hbm %s12888_s3, %s10771_s11  ;;  %s1440_s15 = scalar_lea.vmem [#allocation14], %s11272_s22 }
 0x131   : > { %s1447_s18 = sshll.u32 %s1440_s15, 4  ;;  %s1445_s2 = sshll.u32 %s1443_s14, 4  ;;  %s1448_s18 = int_to_ptr.vmem [resolvable:$true] %s1447_s18  ;;  %s1446_s2 = int_to_ptr.hbm [resolvable:$true] %s1445_s2 }
 0x132   : > { %s10213_s6 = sshra.s32 %s1446_s2, 4  ;;  %s10219_s4 = scalar_lea.hbm %s12888_s3, 2  ;;  %s10214_s6 = int_to_ptr.hbm [resolvable:$true] %s10213_s6 }
 0x133   : > { %s10215_s7 = scalar_lea.hbm %s10214_s6, 1  ;;  %p10220_p1 = scmp.lt.s32.totalorder %s10214_s6, %s12888_s3 }
 0x134   : > { %p10216_p12 = scmp.ne.s32.totalorder %s10214_s6, %s10215_s7  ;;  %p10221_p2 = scmp.lt.s32.totalorder %s10219_s4, %s10215_s7 }
 0x136   : > { %p10217_p0 = pnand %p10216_p12, %p11105_p4  ;;  %p10222_p3 = por %p10221_p2, %p10220_p1 }
 0x138   : > { %p10218_p13 = pneg %p10217_p0 }
 0x13a   : > { %p10223_p6 = pnand %p10222_p3, %p10218_p13 }
 0x13c   : > { %10226 = shalt.err (!%p10223_p6)
}
 0x13d   : > { %9605 = dma.hbm_to_vmem [thread:$0]  (%p11105_p4), %s1446_s2, 16, %s1448_s18, %s11278_s23  }
 0x13e   : > { %s1460_s5 = scalar_lea.hbm %s12887_s8, %s10771_s11  ;;  %s1457_s14 = scalar_lea.vmem [#allocation15], %s11272_s22 }
 0x13f   : > { %s1462_s28 = sshll.u32 %s1460_s5, 4  ;;  %s1464_s15 = sshll.u32 %s1457_s14, 4  ;;  %s1463_s28 = int_to_ptr.hbm [resolvable:$true] %s1462_s28  ;;  %s1465_s15 = int_to_ptr.vmem [resolvable:$true] %s1464_s15 }
 0x140   : > { %s12822_s6 = scalar_lea.sflag [#allocation16], %s11269_s30  ;;  %s10241_s7 = sshra.s32 %s1463_s28, 4  ;;  %s10242_s7 = int_to_ptr.hbm [resolvable:$true] %s10241_s7 }
 0x141   : > { %s10243_s4 = scalar_lea.hbm %s10242_s7, 1  ;;  %s10247_s0 = scalar_lea.hbm %s12887_s8, 2 }
 0x142   : > { %p10244_p7 = scmp.ne.s32.totalorder %s10242_s7, %s10243_s4  ;;  %p10248_p12 = scmp.lt.s32.totalorder %s10242_s7, %s12887_s8 }
 0x143   : > { %p10249_p0 = scmp.lt.s32.totalorder %s10247_s0, %s10243_s4 }
 0x144   : > { %p10245_p11 = pnand %p10244_p7, %p11105_p4 }
 0x145   : > { %p10250_p13 = por %p10249_p0, %p10248_p12 }
 0x146   : > { %p10246_p9 = pneg %p10245_p11 }
 0x148   : > { %p10251_p1 = pnand %p10250_p13, %p10246_p9 }
 0x14a   : > { %10254 = shalt.err (!%p10251_p1)
}
 0x14b   : > { %s12901_s18 = sld [smem:[#allocation81_spill]]  ;;  %s1491_s5 = scalar_lea.vmem [#allocation18], %s11272_s22 }
 0x14c   : > { %9606 = dma.hbm_to_vmem [thread:$0]  (%p11105_p4), %s1463_s28, 16, %s1465_s15, %s12822_s6  }
 0x14d   : > { %s1498_s14 = sshll.u32 %s1491_s5, 4  ;;  %s12823_s0 = scalar_lea.sflag [#allocation19], %s11269_s30  ;;  %s1499_s14 = int_to_ptr.vmem [resolvable:$true] %s1498_s14 }
 0x151   : > { %s1494_s2 = scalar_lea.hbm %s12901_s18, %s10771_s11  ;;  %s10275_s8 = scalar_lea.hbm %s12901_s18, 2 }
 0x152   : > { %s1496_s7 = sshll.u32 %s1494_s2, 4  ;;  %s1497_s7 = int_to_ptr.hbm [resolvable:$true] %s1496_s7 }
 0x153   : > { %s10269_s4 = sshra.s32 %s1497_s7, 4  ;;  %s10270_s4 = int_to_ptr.hbm [resolvable:$true] %s10269_s4 }
 0x154   : > { %s10271_s3 = scalar_lea.hbm %s10270_s4, 1  ;;  %p10276_p7 = scmp.lt.s32.totalorder %s10270_s4, %s12901_s18 }
 0x155   : > { %p10272_p2 = scmp.ne.s32.totalorder %s10270_s4, %s10271_s3  ;;  %p10277_p11 = scmp.lt.s32.totalorder %s10275_s8, %s10271_s3 }
 0x157   : > { %p10273_p3 = pnand %p10272_p2, %p11105_p4  ;;  %p10278_p9 = por %p10277_p11, %p10276_p7 }
 0x159   : > { %p10274_p6 = pneg %p10273_p3 }
 0x15b   : > { %p10279_p12 = pnand %p10278_p9, %p10274_p6 }
 0x15d   : > { %10282 = shalt.err (!%p10279_p12)
}
 0x15e   : > { %s12902_s28 = sld [smem:[#allocation84_spill]]  ;;  %s1525_s2 = scalar_lea.vmem [#allocation23], %s11272_s22 }
 0x15f   : > { %9608 = dma.hbm_to_vmem [thread:$0]  (%p11105_p4), %s1497_s7, 16, %s1499_s14, %s12823_s0  }
 0x160   : > { %s1532_s5 = sshll.u32 %s1525_s2, 4  ;;  %s1533_s5 = int_to_ptr.vmem [resolvable:$true] %s1532_s5 }
 0x164   : > { %s1528_s15 = scalar_lea.hbm %s12902_s28, %s10771_s11  ;;  %s10303_s4 = scalar_lea.hbm %s12902_s28, 2 }
 0x165   : > { %s1530_s6 = sshll.u32 %s1528_s15, 4  ;;  %s1531_s6 = int_to_ptr.hbm [resolvable:$true] %s1530_s6 }
 0x166   : > { %s10297_s3 = sshra.s32 %s1531_s6, 4  ;;  %s10298_s3 = int_to_ptr.hbm [resolvable:$true] %s10297_s3 }
 0x167   : > { %s10299_s8 = scalar_lea.hbm %s10298_s3, 1  ;;  %p10304_p2 = scmp.lt.s32.totalorder %s10298_s3, %s12902_s28 }
 0x168   : > { %p10300_p0 = scmp.ne.s32.totalorder %s10298_s3, %s10299_s8  ;;  %p10305_p3 = scmp.lt.s32.totalorder %s10303_s4, %s10299_s8 }
 0x16a   : > { %p10301_p13 = pnand %p10300_p0, %p11105_p4  ;;  %p10306_p6 = por %p10305_p3, %p10304_p2 }
 0x16c   : > { %p10302_p1 = pneg %p10301_p13 }
 0x16e   : > { %p10307_p7 = pnand %p10306_p6, %p10302_p1 }
 0x170   : > { %10310 = shalt.err (!%p10307_p7)
}
 0x171   : > { %s12903_s14 = sld [smem:[#allocation94_spill]]  ;;  %s1610_s2 = scalar_lea.vmem [#allocation32], %s11272_s22 }
 0x172   : > { %9610 = dma.hbm_to_vmem [thread:$0]  (%p11105_p4), %s1531_s6, 16, %s1533_s5, %s11291_s16  }
 0x173   : > { %s1617_s0 = sshll.u32 %s1610_s2, 4  ;;  %s12827_s3 = scalar_lea.sflag [#allocation33], %s11269_s30  ;;  %s1618_s0 = int_to_ptr.vmem [resolvable:$true] %s1617_s0 }
 0x177   : > { %s1613_s7 = scalar_lea.hbm %s12903_s14, %s10771_s11  ;;  %s10331_s9 = scalar_lea.hbm %s12903_s14, 2 }
 0x178   : > { %s1615_s15 = sshll.u32 %s1613_s7, 4  ;;  %s1616_s15 = int_to_ptr.hbm [resolvable:$true] %s1615_s15 }
 0x179   : > { %s10325_s8 = sshra.s32 %s1616_s15, 4  ;;  %s10326_s8 = int_to_ptr.hbm [resolvable:$true] %s10325_s8 }
 0x17a   : > { %s10327_s4 = scalar_lea.hbm %s10326_s8, 1  ;;  %p10332_p0 = scmp.lt.s32.totalorder %s10326_s8, %s12903_s14 }
 0x17b   : > { %p10328_p11 = scmp.ne.s32.totalorder %s10326_s8, %s10327_s4  ;;  %p10333_p13 = scmp.lt.s32.totalorder %s10331_s9, %s10327_s4 }
 0x17d   : > { %p10329_p9 = pnand %p10328_p11, %p11105_p4  ;;  %p10334_p1 = por %p10333_p13, %p10332_p0 }
 0x17f   : > { %p10330_p12 = pneg %p10329_p9 }
 0x181   : > { %p10335_p2 = pnand %p10334_p1, %p10330_p12 }
 0x183   : > { %10338 = shalt.err (!%p10335_p2)
}
 0x184   : > { %s12904_s6 = sld [smem:[#allocation97_spill]]  ;;  %s1644_s7 = scalar_lea.vmem [#allocation38], %s11272_s22 }
 0x185   : > { %9615 = dma.hbm_to_vmem [thread:$0]  (%p11105_p4), %s1616_s15, 16, %s1618_s0, %s12827_s3  }
 0x186   : > { %s1651_s2 = sshll.u32 %s1644_s7, 4  ;;  %s12831_s9 = scalar_lea.sflag [#allocation39], %s11269_s30  ;;  %s1652_s2 = int_to_ptr.vmem [resolvable:$true] %s1651_s2 }
 0x18a   : > { %s1647_s5 = scalar_lea.hbm %s12904_s6, %s10771_s11  ;;  %s10359_s13 = scalar_lea.hbm %s12904_s6, 2 }
 0x18b   : > { %s1649_s8 = sshll.u32 %s1647_s5, 4  ;;  %s1650_s8 = int_to_ptr.hbm [resolvable:$true] %s1649_s8 }
 0x18c   : > { %s10353_s4 = sshra.s32 %s1650_s8, 4  ;;  %s10354_s4 = int_to_ptr.hbm [resolvable:$true] %s10353_s4 }
 0x18d   : > { %s10355_s12 = scalar_lea.hbm %s10354_s4, 1  ;;  %p10360_p11 = scmp.lt.s32.totalorder %s10354_s4, %s12904_s6 }
 0x18e   : > { %p10356_p3 = scmp.ne.s32.totalorder %s10354_s4, %s10355_s12  ;;  %p10361_p9 = scmp.lt.s32.totalorder %s10359_s13, %s10355_s12 }
 0x190   : > { %p10357_p6 = pnand %p10356_p3, %p11105_p4  ;;  %p10362_p12 = por %p10361_p9, %p10360_p11 }
 0x192   : > { %p10358_p7 = pneg %p10357_p6 }
 0x194   : > { %p10363_p0 = pnand %p10362_p12, %p10358_p7 }
 0x196   : > { %10366 = shalt.err (!%p10363_p0)
}
 0x197   : > { %s12905_s0 = sld [smem:[#allocation99_spill]]  ;;  %s1678_s3 = scalar_lea.vmem [#allocation44], %s11272_s22 }
 0x198   : > { %9617 = dma.hbm_to_vmem [thread:$0]  (%p11105_p4), %s1650_s8, 16, %s1652_s2, %s12831_s9  }
 0x199   : > { %s1685_s4 = sshll.u32 %s1678_s3, 4  ;;  %s12830_s13 = scalar_lea.sflag [#allocation45], %s11269_s30  ;;  %s1686_s4 = int_to_ptr.vmem [resolvable:$true] %s1685_s4 }
 0x19d   : > { %s12906_s15 = smov %s12905_s0  ;;  %s1681_s5 = scalar_lea.hbm %s12905_s0, %s10771_s11 }
 0x19e   : > { %s1683_s7 = sshll.u32 %s1681_s5, 4  ;;  %s10387_s14 = scalar_lea.hbm %s12906_s15, 2  ;;  %s1684_s7 = int_to_ptr.hbm [resolvable:$true] %s1683_s7 }
 0x19f   : > { %s10381_s12 = sshra.s32 %s1684_s7, 4  ;;  %s10382_s12 = int_to_ptr.hbm [resolvable:$true] %s10381_s12 }
 0x1a0   : > { %s10383_s6 = scalar_lea.hbm %s10382_s12, 1  ;;  %p10388_p3 = scmp.lt.s32.totalorder %s10382_s12, %s12906_s15 }
 0x1a1   : > { %p10384_p13 = scmp.ne.s32.totalorder %s10382_s12, %s10383_s6  ;;  %p10389_p6 = scmp.lt.s32.totalorder %s10387_s14, %s10383_s6 }
 0x1a3   : > { %p10385_p1 = pnand %p10384_p13, %p11105_p4  ;;  %p10390_p7 = por %p10389_p6, %p10388_p3 }
 0x1a5   : > { %p10386_p2 = pneg %p10385_p1 }
 0x1a7   : > { %p10391_p11 = pnand %p10390_p7, %p10386_p2 }
 0x1a9   : > { %10394 = shalt.err (!%p10391_p11)
}
 0x1aa   : > { %s12907_s3 = sld [smem:[#allocation80_spill]]  ;;  %s1474_s0 = scalar_lea.vmem [#allocation17], %s11272_s22 }
 0x1ab   : > { %9619 = dma.hbm_to_vmem [thread:$0]  (%p11105_p4), %s1684_s7, 16, %s1686_s4, %s12830_s13  }
 0x1ac   : > { %s1481_s5 = sshll.u32 %s1474_s0, 4  ;;  %s1482_s5 = int_to_ptr.vmem [resolvable:$true] %s1481_s5 }
 0x1b0   : > { %s1477_s2 = scalar_lea.hbm %s12907_s3, %s10771_s11  ;;  %s10415_s12 = scalar_lea.hbm %s12907_s3, 2 }
 0x1b1   : > { %s1479_s8 = sshll.u32 %s1477_s2, 4  ;;  %s1480_s8 = int_to_ptr.hbm [resolvable:$true] %s1479_s8 }
 0x1b2   : > { %s10409_s14 = sshra.s32 %s1480_s8, 4  ;;  %s10410_s14 = int_to_ptr.hbm [resolvable:$true] %s10409_s14 }
 0x1b3   : > { %s10411_s6 = scalar_lea.hbm %s10410_s14, 1  ;;  %p10416_p13 = scmp.lt.s32.totalorder %s10410_s14, %s12907_s3 }
 0x1b4   : > { %p10412_p9 = scmp.ne.s32.totalorder %s10410_s14, %s10411_s6  ;;  %p10417_p1 = scmp.lt.s32.totalorder %s10415_s12, %s10411_s6 }
 0x1b6   : > { %p10413_p12 = pnand %p10412_p9, %p11105_p4  ;;  %p10418_p2 = por %p10417_p1, %p10416_p13 }
 0x1b8   : > { %p10414_p0 = pneg %p10413_p12 }
 0x1ba   : > { %p10419_p3 = pnand %p10418_p2, %p10414_p0 }
 0x1bc   : > { %10422 = shalt.err (!%p10419_p3)
}
 0x1bd   : > { %s12908_s7 = scalar_lea.sflag [#allocation16], %s11269_s30  ;;  %s12909_s4 = sld [smem:[#allocation87_spill]] }
 0x1be   : > { %9607 = dma.hbm_to_vmem [thread:$0]  (%p11105_p4), %s1480_s8, 16, %s1482_s5, %s12908_s7  }
 0x1bf   : > { %s1542_s13 = scalar_lea.vmem [#allocation26], %s11272_s22 }
 0x1c0   : > { %s1549_s9 = sshll.u32 %s1542_s13, 4  ;;  %s1550_s9 = int_to_ptr.vmem [resolvable:$true] %s1549_s9 }
 0x1c3   : > { %s1545_s2 = scalar_lea.hbm %s12909_s4, %s10771_s11  ;;  %s10443_s12 = scalar_lea.hbm %s12909_s4, 2 }
 0x1c4   : > { %s1547_s0 = sshll.u32 %s1545_s2, 4  ;;  %s1548_s0 = int_to_ptr.hbm [resolvable:$true] %s1547_s0 }
 0x1c5   : > { %s10437_s14 = sshra.s32 %s1548_s0, 4  ;;  %s10438_s14 = int_to_ptr.hbm [resolvable:$true] %s10437_s14 }
 0x1c6   : > { %s10439_s6 = scalar_lea.hbm %s10438_s14, 1  ;;  %p10444_p9 = scmp.lt.s32.totalorder %s10438_s14, %s12909_s4 }
 0x1c7   : > { %p10440_p6 = scmp.ne.s32.totalorder %s10438_s14, %s10439_s6  ;;  %p10445_p12 = scmp.lt.s32.totalorder %s10443_s12, %s10439_s6 }
 0x1c9   : > { %p10441_p7 = pnand %p10440_p6, %p11105_p4  ;;  %p10446_p0 = por %p10445_p12, %p10444_p9 }
 0x1cb   : > { %p10442_p11 = pneg %p10441_p7 }
 0x1cd   : > { %p10447_p13 = pnand %p10446_p0, %p10442_p11 }
 0x1cf   : > { %10450 = shalt.err (!%p10447_p13)
}
 0x1d0   : > { %s12910_s8 = scalar_lea.sflag [#allocation10], %s11269_s30  ;;  %s12911_s13 = sld [smem:[#allocation88_spill]] }
 0x1d1   : > { %9611 = dma.hbm_to_vmem [thread:$0]  (%p11105_p4), %s1548_s0, 16, %s1550_s9, %s12910_s8  }
 0x1d2   : > { %s1559_s2 = scalar_lea.vmem [#allocation27], %s11272_s22 }
 0x1d3   : > { %s1566_s3 = sshll.u32 %s1559_s2, 4  ;;  %s1567_s3 = int_to_ptr.vmem [resolvable:$true] %s1566_s3 }
 0x1d6   : > { %s1562_s5 = scalar_lea.hbm %s12911_s13, %s10771_s11  ;;  %s10471_s12 = scalar_lea.hbm %s12911_s13, 2 }
 0x1d7   : > { %s1564_s7 = sshll.u32 %s1562_s5, 4  ;;  %s1565_s7 = int_to_ptr.hbm [resolvable:$true] %s1564_s7 }
 0x1d8   : > { %s10465_s14 = sshra.s32 %s1565_s7, 4  ;;  %s10466_s14 = int_to_ptr.hbm [resolvable:$true] %s10465_s14 }
 0x1d9   : > { %s10467_s6 = scalar_lea.hbm %s10466_s14, 1  ;;  %p10472_p6 = scmp.lt.s32.totalorder %s10466_s14, %s12911_s13 }
 0x1da   : > { %p10468_p1 = scmp.ne.s32.totalorder %s10466_s14, %s10467_s6  ;;  %p10473_p7 = scmp.lt.s32.totalorder %s10471_s12, %s10467_s6 }
 0x1dc   : > { %p10469_p2 = pnand %p10468_p1, %p11105_p4  ;;  %p10474_p11 = por %p10473_p7, %p10472_p6 }
 0x1de   : > { %p10470_p3 = pneg %p10469_p2 }
 0x1e0   : > { %p10475_p9 = pnand %p10474_p11, %p10470_p3 }
 0x1e2   : > { %10478 = shalt.err (!%p10475_p9)
}
 0x1e3   : > { %s12912_s9 = sld [smem:[#allocation90_spill]]  ;;  %s1576_s5 = scalar_lea.vmem [#allocation29], %s11272_s22 }
 0x1e4   : > { %9612 = dma.hbm_to_vmem [thread:$0]  (%p11105_p4), %s1565_s7, 16, %s1567_s3, %s11278_s23  }
 0x1e5   : > { %s1583_s2 = sshll.u32 %s1576_s5, 4  ;;  %s1584_s2 = int_to_ptr.vmem [resolvable:$true] %s1583_s2 }
 0x1e9   : > { %s1579_s0 = scalar_lea.hbm %s12912_s9, %s10771_s11  ;;  %s10499_s12 = scalar_lea.hbm %s12912_s9, 2 }
 0x1ea   : > { %s1581_s8 = sshll.u32 %s1579_s0, 4  ;;  %s1582_s8 = int_to_ptr.hbm [resolvable:$true] %s1581_s8 }
 0x1eb   : > { %s10493_s14 = sshra.s32 %s1582_s8, 4  ;;  %s10494_s14 = int_to_ptr.hbm [resolvable:$true] %s10493_s14 }
 0x1ec   : > { %s10495_s6 = scalar_lea.hbm %s10494_s14, 1  ;;  %p10500_p1 = scmp.lt.s32.totalorder %s10494_s14, %s12912_s9 }
 0x1ed   : > { %p10496_p12 = scmp.ne.s32.totalorder %s10494_s14, %s10495_s6  ;;  %p10501_p2 = scmp.lt.s32.totalorder %s10499_s12, %s10495_s6 }
 0x1ef   : > { %p10497_p0 = pnand %p10496_p12, %p11105_p4  ;;  %p10502_p3 = por %p10501_p2, %p10500_p1 }
 0x1f1   : > { %p10498_p13 = pneg %p10497_p0 }
 0x1f3   : > { %p10503_p6 = pnand %p10502_p3, %p10498_p13 }
 0x1f5   : > { %10506 = shalt.err (!%p10503_p6)
}
 0x1f6   : > { %s12913_s23 = scalar_lea.sflag [#allocation19], %s11269_s30  ;;  %s12914_s3 = sld [smem:[#allocation91_spill]] }
 0x1f7   : > { %9613 = dma.hbm_to_vmem [thread:$0]  (%p11105_p4), %s1582_s8, 16, %s1584_s2, %s12913_s23  }
 0x1f8   : > { %s1593_s5 = scalar_lea.vmem [#allocation30], %s11272_s22 }
 0x1f9   : > { %s1600_s4 = sshll.u32 %s1593_s5, 4  ;;  %s1601_s4 = int_to_ptr.vmem [resolvable:$true] %s1600_s4 }
 0x1fc   : > { %s1596_s7 = scalar_lea.hbm %s12914_s3, %s10771_s11  ;;  %s10527_s12 = scalar_lea.hbm %s12914_s3, 2 }
 0x1fd   : > { %s1598_s0 = sshll.u32 %s1596_s7, 4  ;;  %s1599_s0 = int_to_ptr.hbm [resolvable:$true] %s1598_s0 }
 0x1fe   : > { %s10521_s14 = sshra.s32 %s1599_s0, 4  ;;  %s10522_s14 = int_to_ptr.hbm [resolvable:$true] %s10521_s14 }
 0x1ff   : > { %s10523_s6 = scalar_lea.hbm %s10522_s14, 1  ;;  %p10528_p12 = scmp.lt.s32.totalorder %s10522_s14, %s12914_s3 }
 0x200   : > { %p10524_p7 = scmp.ne.s32.totalorder %s10522_s14, %s10523_s6  ;;  %p10529_p0 = scmp.lt.s32.totalorder %s10527_s12, %s10523_s6 }
 0x202   : > { %p10525_p11 = pnand %p10524_p7, %p11105_p4  ;;  %p10530_p13 = por %p10529_p0, %p10528_p12 }
 0x204   : > { %p10526_p9 = pneg %p10525_p11 }
 0x206   : > { %p10531_p1 = pnand %p10530_p13, %p10526_p9 }
 0x208   : > { %10534 = shalt.err (!%p10531_p1)
}
 0x209   : > { %s12915_s8 = sld [smem:[#allocation95_spill]]  ;;  %s1627_s7 = scalar_lea.vmem [#allocation34], %s11272_s22 }
 0x20a   : > { %9614 = dma.hbm_to_vmem [thread:$0]  (%p11105_p4), %s1599_s0, 16, %s1601_s4, %s11291_s16  }
 0x20b   : > { %s1634_s5 = sshll.u32 %s1627_s7, 4  ;;  %s1635_s5 = int_to_ptr.vmem [resolvable:$true] %s1634_s5 }
 0x20f   : > { %s1630_s2 = scalar_lea.hbm %s12915_s8, %s10771_s11  ;;  %s10555_s12 = scalar_lea.hbm %s12915_s8, 2 }
 0x210   : > { %s1632_s23 = sshll.u32 %s1630_s2, 4  ;;  %s1633_s23 = int_to_ptr.hbm [resolvable:$true] %s1632_s23 }
 0x211   : > { %s10549_s14 = sshra.s32 %s1633_s23, 4  ;;  %s10550_s14 = int_to_ptr.hbm [resolvable:$true] %s10549_s14 }
 0x212   : > { %s10551_s6 = scalar_lea.hbm %s10550_s14, 1  ;;  %p10556_p7 = scmp.lt.s32.totalorder %s10550_s14, %s12915_s8 }
 0x213   : > { %p10552_p2 = scmp.ne.s32.totalorder %s10550_s14, %s10551_s6  ;;  %p10557_p11 = scmp.lt.s32.totalorder %s10555_s12, %s10551_s6 }
 0x215   : > { %p10553_p3 = pnand %p10552_p2, %p11105_p4  ;;  %p10558_p9 = por %p10557_p11, %p10556_p7 }
 0x217   : > { %p10554_p6 = pneg %p10553_p3 }
 0x219   : > { %p10559_p12 = pnand %p10558_p9, %p10554_p6 }
 0x21b   : > { %10562 = shalt.err (!%p10559_p12)
}
 0x21c   : > { %s12916_s16 = scalar_lea.sflag [#allocation33], %s11269_s30  ;;  %s12917_s4 = sld [smem:[#allocation98_spill]] }
 0x21d   : > { %9616 = dma.hbm_to_vmem [thread:$0]  (%p11105_p4), %s1633_s23, 16, %s1635_s5, %s12916_s16  }
 0x21e   : > { %s1661_s7 = scalar_lea.vmem [#allocation40], %s11272_s22 }
 0x21f   : > { %s1668_s3 = sshll.u32 %s1661_s7, 4  ;;  %s1669_s3 = int_to_ptr.vmem [resolvable:$true] %s1668_s3 }
 0x222   : > { %s1664_s0 = scalar_lea.hbm %s12917_s4, %s10771_s11  ;;  %s10583_s12 = scalar_lea.hbm %s12917_s4, 2 }
 0x223   : > { %s1666_s2 = sshll.u32 %s1664_s0, 4  ;;  %s1667_s2 = int_to_ptr.hbm [resolvable:$true] %s1666_s2 }
 0x224   : > { %s10577_s14 = sshra.s32 %s1667_s2, 4  ;;  %s10578_s14 = int_to_ptr.hbm [resolvable:$true] %s10577_s14 }
 0x225   : > { %s10579_s6 = scalar_lea.hbm %s10578_s14, 1  ;;  %p10584_p2 = scmp.lt.s32.totalorder %s10578_s14, %s12917_s4 }
 0x226   : > { %p10580_p0 = scmp.ne.s32.totalorder %s10578_s14, %s10579_s6  ;;  %p10585_p3 = scmp.lt.s32.totalorder %s10583_s12, %s10579_s6 }
 0x228   : > { %p10581_p13 = pnand %p10580_p0, %p11105_p4  ;;  %p10586_p6 = por %p10585_p3, %p10584_p2 }
 0x22a   : > { %p10582_p1 = pneg %p10581_p13 }
 0x22c   : > { %p10587_p7 = pnand %p10586_p6, %p10582_p1 }
 0x22e   : > { %10590 = shalt.err (!%p10587_p7)
}
 0x22f   : > { %s12918_s23 = scalar_lea.sflag [#allocation39], %s11269_s30  ;;  %s12919_s5 = sld [smem:[#allocation100_spill]] }
 0x230   : > { %9618 = dma.hbm_to_vmem [thread:$0]  (%p11105_p4), %s1667_s2, 16, %s1669_s3, %s12918_s23  }
 0x231   : > { %s1695_s7 = scalar_lea.vmem [#allocation46], %s11272_s22 }
 0x232   : > { %s1702_s8 = sshll.u32 %s1695_s7, 4  ;;  %s1703_s8 = int_to_ptr.vmem [resolvable:$true] %s1702_s8 }
 0x235   : > { %s1698_s16 = scalar_lea.hbm %s12919_s5, %s10771_s11  ;;  %s10611_s12 = scalar_lea.hbm %s12919_s5, 2 }
 0x236   : > { %s1700_s0 = sshll.u32 %s1698_s16, 4  ;;  %s1701_s0 = int_to_ptr.hbm [resolvable:$true] %s1700_s0 }
 0x237   : > { %s10605_s14 = sshra.s32 %s1701_s0, 4  ;;  %s10606_s14 = int_to_ptr.hbm [resolvable:$true] %s10605_s14 }
 0x238   : > { %s10607_s6 = scalar_lea.hbm %s10606_s14, 1  ;;  %p10612_p0 = scmp.lt.s32.totalorder %s10606_s14, %s12919_s5 }
 0x239   : > { %p10608_p11 = scmp.ne.s32.totalorder %s10606_s14, %s10607_s6  ;;  %p10613_p13 = scmp.lt.s32.totalorder %s10611_s12, %s10607_s6 }
 0x23b   : > { %p10609_p9 = pnand %p10608_p11, %p11105_p4  ;;  %p10614_p1 = por %p10613_p13, %p10612_p0 }
 0x23d   : > { %p10610_p12 = pneg %p10609_p9 }
 0x23f   : > { %p10615_p2 = pnand %p10614_p1, %p10610_p12 }
 0x241   : > { %10618 = shalt.err (!%p10615_p2)
}
 0x242   : > { %s12920_s11 = scalar_lea.sflag [#allocation45], %s11269_s30 }
 0x243   : > { %9620 = dma.hbm_to_vmem [thread:$0]  (%p11105_p4), %s1701_s0, 16, %s1703_s8, %s12920_s11  }
 0x244 PF: > { %1711 = sbr.rel (%p11119_p10) target bundleno = 7082 (0x1baa), region = 200  ;;  %s12921_s22 = sld [smem:[#allocation110_spill]] (!%p11119_p10) }
 0x245   : > { %s12922_s3 = sld [smem:[#allocation109_spill]] (!%p11119_p10) }
 0x24a   : > { %s11481_s23 = sand.u32 1, %s12921_s22  }
 0x24b   : > { %s11484_s16 = sand.u32 1, %s12922_s3   ;;  %s1714_s7 = scalar_lea.sflag [#allocation10], %s11481_s23 }
 0x24c   : > { %s1716_s14 = scalar_lea.vmem [#allocation9], %s11484_s16 }
 0x24d   : > { %10678 = dma.done.wait (%p11114_p8), %s1714_s7, 16  }
 0x24e   : > { %10680 = vsyncadd (%p11114_p8), %s1714_s7, 4294967280  ;;  %s1723_s26 = scalar_lea.sflag [#allocation13], %s11481_s23  ;;  %s1725_s1 = scalar_lea.vmem [#allocation12], %s11484_s16 }
 0x24f   : > { %10682 = dma.done.wait (%p11114_p8), %s1723_s26, 32  }
 0x250   : > { %10684 = vsyncadd (%p11114_p8), %s1723_s26, 4294967264  ;;  %s1734_s30 = scalar_lea.vmem [#allocation14], %s11484_s16  ;;  %s1741_s8 = scalar_lea.sflag [#allocation16], %s11481_s23 }
 0x251   : > { %s1743_s0 = scalar_lea.vmem [#allocation15], %s11484_s16 }
 0x252   : > { %10686 = dma.done.wait (%p11114_p8), %s1741_s8, 32  }
 0x253   : > { %10688 = vsyncadd (%p11114_p8), %s1741_s8, 4294967264  ;;  %s1759_s12 = scalar_lea.sflag [#allocation19], %s11481_s23 }
 0x254   : > { %10690 = dma.done.wait (%p11114_p8), %s1759_s12, 16  }
 0x255   : > { %10692 = vsyncadd (%p11114_p8), %s1759_s12, 4294967280 }
 0x256   : > { %10694 = dma.done.wait (%p219_p5), [#allocation19], 768  }
 0x257   : > { %10696 = vsyncadd (%p219_p5), [#allocation19], 4294966528  ;;  %s1773_s3 = scalar_lea.sflag [#allocation22], %s11481_s23 }
 0x258   : > { %10698 = dma.done.wait (%p11114_p8), %s1773_s3, 32  }
 0x259   : > { %10700 = vsyncadd (%p11114_p8), %s1773_s3, 4294967264  ;;  %s1784_s11 = scalar_lea.vmem [#allocation23], %s11484_s16 }
 0x25a   : > { %10702 = dma.done.wait (%p219_p5), [#allocation25], 768  }
 0x25b   : > { %10704 = vsyncadd (%p219_p5), [#allocation25], 4294966528 }
 0x25c   : > { %10706 = dma.done.wait (%p11114_p8), %s1714_s7, 16  }
 0x25d   : > { %10708 = vsyncadd (%p11114_p8), %s1714_s7, 4294967280 }
 0x25e   : > { %10710 = dma.done.wait (%p11114_p8), %s1723_s26, 16  }
 0x25f   : > { %10712 = vsyncadd (%p11114_p8), %s1723_s26, 4294967280 }
 0x260   : > { %10714 = dma.done.wait (%p219_p5), [#allocation16], 384  }
 0x261   : > { %10716 = vsyncadd (%p219_p5), [#allocation16], 4294966912 }
 0x262   : > { %10718 = dma.done.wait (%p11114_p8), %s1759_s12, 16  }
 0x263   : > { %10720 = vsyncadd (%p11114_p8), %s1759_s12, 4294967280 }
 0x264   : > { %10722 = dma.done.wait (%p11114_p8), %s1773_s3, 16  }
 0x265   : > { %10724 = vsyncadd (%p11114_p8), %s1773_s3, 4294967280 }
 0x266   : > { %10726 = dma.done.wait (%p219_p5), [#allocation25], 384  }
 0x267   : > { %10728 = vsyncadd (%p219_p5), [#allocation25], 4294966912  ;;  %s1842_s26 = scalar_lea.sflag [#allocation33], %s11481_s23 }
 0x268   : > { %10730 = dma.done.wait (%p11114_p8), %s1842_s26, 32  }
 0x269   : > { %10732 = vsyncadd (%p11114_p8), %s1842_s26, 4294967264 }
 0x26a   : > { %10734 = dma.done.wait (%p219_p5), [#allocation36], 1280  }
 0x26b   : > { %10736 = vsyncadd (%p219_p5), [#allocation36], 4294966016  ;;  %s1870_s3 = scalar_lea.sflag [#allocation39], %s11481_s23 }
 0x26c   : > { %10738 = dma.done.wait (%p11114_p8), %s1870_s3, 32  }
 0x26d   : > { %10740 = vsyncadd (%p11114_p8), %s1870_s3, 4294967264 }
 0x26e   : > { %10742 = dma.done.wait (%p219_p5), [#allocation42], 1152  }
 0x26f   : > { %10744 = vsyncadd (%p219_p5), [#allocation42], 4294966144  ;;  %s1898_s12 = scalar_lea.sflag [#allocation45], %s11481_s23 }
 0x270   : > { %10746 = dma.done.wait (%p11114_p8), %s1898_s12, 32  }
 0x271   : > { %10748 = vsyncadd (%p11114_p8), %s1898_s12, 4294967264 }
 0x272   : > { %10750 = dma.done.wait (%p219_p5), [#allocation48], 384  }
 0x273   : > { %10752 = vsyncadd (%p219_p5), [#allocation48], 4294966912  ;;  %s12924_s26 = sld [smem:[#allocation71_spill]]  ;;  %p2094_p4 = scmp.lt.s32.totalorder %s12921_s22, 1 }
 0x274   : > { %p12925_p10 = scmp.ne.s32.totalorder %s12921_s22, 0 }
 0x275   : > { %s2095_s7 = scalar_select %p2094_p4, %s12921_s22, 1 }
 0x276   : > { %2103 = sbr.rel (%p12925_p10) target bundleno = 673 (0x2a1), region = 316 }
 0x277   : > { %s9333_s23 = sshll.u32 %s2095_s7, 6 }
 0x279   : > { %s11591_s6 = scalar_lea.vmem %s12924_s26, %s9333_s23 }
 0x27b   : > { %vm2104_vm0 = vcmask 74752   ;;  %v10832_v0 = vmov 0.0  }
 0x27c   : > { %2105 = vst.msk [vmem:[#allocation50] sm:$0x3] %vm2104_vm0, %v10832_v0 }
 0x27d   : > { %2106 = vst [vmem:[#allocation2 + $0x30] sm:$0xff] %v10832_v0 }
 0x27e   : > { %2107 = vst [vmem:[#allocation2] sm:$0xff] %v10832_v0 }
 0x27f   : > { %2108 = vst [vmem:[#allocation2 + $0x18] sm:$0xff] %v10832_v0 }
 0x280   : > { %2109 = vst [vmem:[#allocation2 + $0x10] sm:$0xff] %v10832_v0 }
 0x281   : > { %2110 = vst [vmem:[#allocation2 + $0x8] sm:$0xff] %v10832_v0 }
 0x282   : > { %2111 = vst [vmem:[#allocation2 + $0x20] sm:$0xff] %v10832_v0 }
 0x283   : > { %2112 = vst [vmem:[#allocation2 + $0x28] sm:$0xff] %v10832_v0 }
 0x284   : > { %2113 = vst [vmem:[#allocation2 + $0x38] sm:$0xff] %v10832_v0 }
 0x285   : > { %2114 = vst [vmem:[#allocation3] sm:$0xff] %v10832_v0 }
 0x286   : > { %2115 = vst [vmem:[#allocation3 + $0x18] sm:$0xff] %v10832_v0 }
 0x287   : > { %2116 = vst [vmem:[#allocation3 + $0x10] sm:$0xff] %v10832_v0 }
 0x288   : > { %2117 = vst [vmem:[#allocation3 + $0x20] sm:$0xff] %v10832_v0 }
 0x289   : > { %2118 = vst [vmem:[#allocation3 + $0x28] sm:$0xff] %v10832_v0 }
 0x28a   : > { %2119 = vst [vmem:[#allocation3 + $0x8] sm:$0xff] %v10832_v0 }
 0x28b   : > { %2120 = vst [vmem:[#allocation3 + $0x30] sm:$0xff] %v10832_v0 }
 0x28c   : > { %2121 = vst [vmem:[#allocation3 + $0x38] sm:$0xff] %v10832_v0 }
 0x28d   : > { %2122 = vst [vmem:[#allocation4 + $0x28] sm:$0xff] %v10832_v0 }
 0x28e   : > { %2123 = vst [vmem:[#allocation4 + $0x20] sm:$0xff] %v10832_v0 }
 0x28f   : > { %2124 = vst [vmem:[#allocation4 + $0x38] sm:$0xff] %v10832_v0 }
 0x290   : > { %2125 = vst [vmem:[#allocation4 + $0x10] sm:$0xff] %v10832_v0 }
 0x291   : > { %2126 = vst [vmem:[#allocation4 + $0x8] sm:$0xff] %v10832_v0 }
 0x292   : > { %2127 = vst [vmem:[#allocation4 + $0x30] sm:$0xff] %v10832_v0 }
 0x293   : > { %2128 = vst [vmem:[#allocation4 + $0x18] sm:$0xff] %v10832_v0 }
 0x294   : > { %2129 = vst [vmem:[#allocation4] sm:$0xff] %v10832_v0 }
 0x295   : > { %2130 = vst [vmem:[#allocation5 + $0x8] sm:$0xff] %v10832_v0 }
 0x296   : > { %2131 = vst [vmem:[#allocation5] sm:$0xff] %v10832_v0 }
 0x297   : > { %2132 = vst [vmem:[#allocation5 + $0x10] sm:$0xff] %v10832_v0 }
 0x298   : > { %2133 = vst [vmem:[#allocation5 + $0x18] sm:$0xff] %v10832_v0 }
 0x299   : > { %2134 = vst [vmem:[#allocation6 + $0x8] sm:$0xff] %v10832_v0 }
 0x29a   : > { %2135 = vst [vmem:[#allocation6 + $0x18] sm:$0xff] %v10832_v0 }
 0x29b   : > { %2136 = vst [vmem:[#allocation6] sm:$0xff] %v10832_v0 }
 0x29c   : > { %2137 = vst [vmem:[#allocation6 + $0x10] sm:$0xff] %v10832_v0 }
 0x29d   : > { %2138 = vst [vmem:[#allocation7] sm:$0xff] %v10832_v0 }
 0x29e   : > { %2139 = vst [vmem:[#allocation7 + $0x8] sm:$0xff] %v10832_v0 }
 0x29f   : > { %2140 = vst [vmem:[#allocation8] sm:$0xff] %v10832_v0 }
 0x2a0   : > { %2141 = vst [vmem:[#allocation8 + $0x8] sm:$0xff] %v10832_v0 }
 0x2a1 PF: > { %s12926_s22 = sld [smem:[#allocation72_spill]]  ;;  %v9341_v1 = vld [vmem:[%s11591_s6 + $0x38] sm:$0xff]  ;;  %v9340_v2 = vld [vmem:[%s11591_s6 + $0x30] sm:$0xff]  ;;  %v9339_v3 = vld [vmem:[%s11591_s6 + $0x28] sm:$0xff]  ;;  %vm2811_vm1 = vcmask 31744   ;;  %vm2927_vm2 = vcmask 1043456  }
 0x2a2   : > { %2302 = vmatpush.bf16.msra.mxu0 %v9341_v1  ;;  %v9338_v4 = vld [vmem:[%s11591_s6 + $0x20] sm:$0xff]  ;;  %v9337_v5 = vld [vmem:[%s11591_s6 + $0x18] sm:$0xff]  ;;  %v9336_v6 = vld [vmem:[%s11591_s6 + $0x10] sm:$0xff]  ;;  %s12927_s2 = sld [smem:[#allocation73_spill]]  ;;  %s12936_s23 = scalar_lea.vmem [#allocation17], %s11484_s16 }
 0x2a3   : > { %v9335_v7 = vld [vmem:[%s11591_s6 + $0x8] sm:$0xff]  ;;  %v9334_v8 = vld [vmem:[%s11591_s6] sm:$0xff]  ;;  %s12928_s6 = sld [smem:[#allocation101_spill]] }
 0x2a4   : > { %s12929_s7 = sld [smem:[#allocation102_spill]] }
 0x2a6   : > { %2303 = vmatpush.bf16.msra.mxu0 %v9340_v2 }
 0x2a7   : > { %v9342_v9 = vld [vmem:[%s12926_s22] sm:$0xff]  ;;  %v9343_v10 = vld [vmem:[%s12926_s22 + $0x8] sm:$0xff]  ;;  %v9344_v11 = vld [vmem:[%s12926_s22 + $0x10] sm:$0xff] }
 0x2a8   : > { %v9345_v12 = vld [vmem:[%s12926_s22 + $0x18] sm:$0xff]  ;;  %v9346_v13 = vld [vmem:[%s12926_s22 + $0x20] sm:$0xff]  ;;  %v9347_v15 = vld [vmem:[%s12926_s22 + $0x28] sm:$0xff] }
 0x2a9   : > { %v9361_v14 = vld [vmem:[%s12927_s2 + $0x38] sm:$0xff]  ;;  %v9360_v16 = vld [vmem:[%s12927_s2 + $0x30] sm:$0xff]  ;;  %v9359_v17 = vld [vmem:[%s12927_s2 + $0x28] sm:$0xff] }
 0x2aa   : > { %2304 = vmatpush.bf16.msra.mxu0 %v9339_v3  ;;  %2600 = vmatpush.bf16.msra.mxu2 %v9361_v14  ;;  %v9358_v18 = vld [vmem:[%s12927_s2 + $0x20] sm:$0xff]  ;;  %v9357_v19 = vld [vmem:[%s12927_s2 + $0x18] sm:$0xff]  ;;  %v9348_v20 = vld [vmem:[%s12926_s22 + $0x30] sm:$0xff]  ;;  %s12930_s12 = smov %s12929_s7 }
 0x2ab   : > { %v9356_v21 = vld [vmem:[%s12927_s2 + $0x10] sm:$0xff]  ;;  %v9355_v22 = vld [vmem:[%s12927_s2 + $0x8] sm:$0xff]  ;;  %v9354_v23 = vld [vmem:[%s12927_s2] sm:$0xff] }
 0x2ac   : > { %v9349_v24 = vld [vmem:[%s12926_s22 + $0x38] sm:$0xff]  ;;  %v9350_v25 = vld [vmem:[%s12926_s22 + $0x40] sm:$0xff]  ;;  %v9351_v34 = vld [vmem:[%s12926_s22 + $0x48] sm:$0xff] }
 0x2ad   : > { %v9369_v33 = vld [vmem:[%s12927_s2 + $0x78] sm:$0xff]  ;;  %v9368_v36 = vld [vmem:[%s12927_s2 + $0x70] sm:$0xff]  ;;  %v9367_v37 = vld [vmem:[%s12927_s2 + $0x68] sm:$0xff] }
 0x2ae   : > { %2305 = vmatpush.bf16.msra.mxu0 %v9338_v4  ;;  %2601 = vmatpush.bf16.msra.mxu2 %v9360_v16  ;;  %v9366_v41 = vld [vmem:[%s12927_s2 + $0x60] sm:$0xff]  ;;  %v9365_v45 = vld [vmem:[%s12927_s2 + $0x58] sm:$0xff]  ;;  %v9352_v46 = vld [vmem:[%s12926_s22 + $0x50] sm:$0xff] }
 0x2af   : > { %2499 = vmatpush.bf16.msra.mxu1 %v9369_v33  ;;  %v9364_v48 = vld [vmem:[%s12927_s2 + $0x50] sm:$0xff]  ;;  %v9363_v49 = vld [vmem:[%s12927_s2 + $0x48] sm:$0xff]  ;;  %v9362_v53 = vld [vmem:[%s12927_s2 + $0x40] sm:$0xff] }
 0x2b0   : > { %v9353_v57 = vld [vmem:[%s12926_s22 + $0x58] sm:$0xff] }
 0x2b2   : > { %2306 = vmatpush.bf16.msra.mxu0 %v9337_v5  ;;  %2602 = vmatpush.bf16.msra.mxu2 %v9359_v17 }
 0x2b3   : > { %2500 = vmatpush.bf16.msra.mxu1 %v9368_v36 }
 0x2b6   : > { %2307 = vmatpush.bf16.msra.mxu0 %v9336_v6  ;;  %2603 = vmatpush.bf16.msra.mxu2 %v9358_v18 }
 0x2b7   : > { %2501 = vmatpush.bf16.msra.mxu1 %v9367_v37 }
 0x2ba   : > { %2308 = vmatpush.bf16.msra.mxu0 %v9335_v7  ;;  %2604 = vmatpush.bf16.msra.mxu2 %v9357_v19  ;;  %v9373_v19 = vld [vmem:[%s12927_s2 + $0x98] sm:$0xff] }
 0x2bb   : > { %2502 = vmatpush.bf16.msra.mxu1 %v9366_v41 }
 0x2be   : > { %2309 = vmatpush.bf16.msra.mxu0 %v9334_v8  ;;  %2605 = vmatpush.bf16.msra.mxu2 %v9356_v21  ;;  %v9377_v8 = vld [vmem:[%s12927_s2 + $0xb8] sm:$0xff]  ;;  %v9372_v21 = vld [vmem:[%s12927_s2 + $0x90] sm:$0xff] }
 0x2bf   : > { %2503 = vmatpush.bf16.msra.mxu1 %v9365_v45  ;;  %2717 = vmatpush.bf16.msra.mxu3 %v9377_v8  ;;  %v2762_v8 = vld [vmem:[%s12928_s6 + $0x40] sm:$0xff] }
 0x2c1   : > { %2310 = vmatmul.bf16.vlgmr.msra.gmra.mxu0 %v9342_v9 }
 0x2c2   : > { %2606 = vmatpush.bf16.msra.mxu2 %v9355_v22  ;;  %v9371_v22 = vld [vmem:[%s12927_s2 + $0x88] sm:$0xff] }
 0x2c3   : > { %2504 = vmatpush.bf16.msra.mxu1 %v9364_v48 }
 0x2c6   : > { %2607 = vmatpush.bf16.msra.mxu2 %v9354_v23 }
 0x2c7   : > { %2505 = vmatpush.bf16.msra.mxu1 %v9363_v49 }
 0x2cb   : > { %2506 = vmatpush.bf16.msra.mxu1 %v9362_v53 }
 0x2d1   : > { %2315 = vmatmul.bf16.gmra.mxu0 %v9343_v10  ;;  %v9376_v10 = vld [vmem:[%s12927_s2 + $0xb0] sm:$0xff] }
 0x2d2   : > { %2718 = vmatpush.bf16.msra.mxu3 %v9376_v10  ;;  %v2760_v10 = vld [vmem:[%s12928_s6 + $0x30] sm:$0xff] }
 0x2e1   : > { %2320 = vmatmul.bf16.gmra.mxu0 %v9344_v11  ;;  %v9375_v11 = vld [vmem:[%s12927_s2 + $0xa8] sm:$0xff] }
 0x2e2   : > { %2719 = vmatpush.bf16.msra.mxu3 %v9375_v11  ;;  %v2759_v11 = vld [vmem:[%s12928_s6 + $0x28] sm:$0xff] }
 0x2f1   : > { %2325 = vmatmul.bf16.gmra.mxu0 %v9345_v12 }
 0x301   : > { %2330 = vmatmul.bf16.gmra.mxu0 %v9346_v13 }
 0x311   : > { %2335 = vmatmul.bf16.gmra.mxu0 %v9347_v15  ;;  %v9374_v15 = vld [vmem:[%s12927_s2 + $0xa0] sm:$0xff] }
 0x312   : > { %2720 = vmatpush.bf16.msra.mxu3 %v9374_v15  ;;  %v2755_v15 = vld [vmem:[%s12928_s6 + $0x8] sm:$0xff] }
 0x316   : > { %2721 = vmatpush.bf16.msra.mxu3 %v9373_v19 }
 0x31a   : > { %2722 = vmatpush.bf16.msra.mxu3 %v9372_v21 }
 0x31e   : > { %2723 = vmatpush.bf16.msra.mxu3 %v9371_v22 }
 0x321   : > { %2340 = vmatmul.bf16.gmra.mxu0 %v9348_v20 }
 0x331   : > { %2345 = vmatmul.bf16.gmra.mxu0 %v9349_v24 }
 0x33e   : > { %v2311_v26 = vpop.f32.mrf.mxu0 }
 0x33f   : > { %v2371_v27 = vpack.c.bf16 %v2311_v26, %v2311_v26  ;;  %v9370_v26 = vld [vmem:[%s12927_s2 + $0x80] sm:$0xff] }
 0x340   : > { %2724 = vmatpush.bf16.msra.mxu3 %v9370_v26 }
 0x341   : > { %2350 = vmatmul.bf16.gmra.mxu0 %v9350_v25  ;;  %v2536_v30 = vunpack.c.l.b16 %v2371_v27 }
 0x346   : > { %v2313_v28 = vpop.f32.mrf.mxu0 }
 0x347   : > { %v2372_v29 = vpack.c.bf16 %v2313_v28, %v2313_v28 }
 0x349   : > { %v2537_v31 = vunpack.c.l.b16 %v2372_v29 }
 0x34b   : > { %v2544_v32 = vpack.c.b16 %v2537_v31, %v2536_v30 }
 0x34d   : > { %2608 = vmatmul.bf16.vlgmr.msra.gmra.mxu2 %v2544_v32 }
 0x34e   : > { %v2316_v35 = vpop.f32.mrf.mxu0 }
 0x34f   : > { %v2373_v38 = vpack.c.bf16 %v2316_v35, %v2316_v35 }
 0x351   : > { %2355 = vmatmul.bf16.gmra.mxu0 %v9351_v34  ;;  %v2538_v42 = vunpack.c.l.b16 %v2373_v38 }
 0x356   : > { %v2318_v39 = vpop.f32.mrf.mxu0 }
 0x357   : > { %v2374_v40 = vpack.c.bf16 %v2318_v39, %v2318_v39 }
 0x359   : > { %v2539_v43 = vunpack.c.l.b16 %v2374_v40 }
 0x35b   : > { %v2545_v44 = vpack.c.b16 %v2539_v43, %v2538_v42 }
 0x35d   : > { %2613 = vmatmul.bf16.gmra.mxu2 %v2545_v44 }
 0x35e   : > { %v2321_v47 = vpop.f32.mrf.mxu0 }
 0x35f   : > { %v2375_v50 = vpack.c.bf16 %v2321_v47, %v2321_v47 }
 0x361   : > { %2360 = vmatmul.bf16.gmra.mxu0 %v9352_v46  ;;  %v2540_v54 = vunpack.c.l.b16 %v2375_v50 }
 0x366   : > { %v2323_v51 = vpop.f32.mrf.mxu0 }
 0x367   : > { %v2376_v52 = vpack.c.bf16 %v2323_v51, %v2323_v51 }
 0x369   : > { %v2541_v55 = vunpack.c.l.b16 %v2376_v52 }
 0x36b   : > { %v2546_v56 = vpack.c.b16 %v2541_v55, %v2540_v54 }
 0x36d   : > { %2618 = vmatmul.bf16.gmra.mxu2 %v2546_v56 }
 0x36e   : > { %v2326_v58 = vpop.f32.mrf.mxu0 }
 0x36f   : > { %v2377_v59 = vpack.c.bf16 %v2326_v58, %v2326_v58 }
 0x371   : > { %2365 = vmatmul.bf16.gmra.mxu0 %v9353_v57  ;;  %v2542_v62 = vunpack.c.l.b16 %v2377_v59 }
 0x376   : > { %v2328_v60 = vpop.f32.mrf.mxu0 }
 0x377   : > { %v2378_v61 = vpack.c.bf16 %v2328_v60, %v2328_v60 }
 0x379   : > { %v2543_v63 = vunpack.c.l.b16 %v2378_v61 }
 0x37b   : > { %v2547_v0 = vpack.c.b16 %v2543_v63, %v2542_v62 }
 0x37d   : > { %2623 = vmatmul.bf16.gmra.mxu2 %v2547_v0 }
 0x37e   : > { %v2331_v1 = vpop.f32.mrf.mxu0 }
 0x37f   : > { %v2379_v2 = vpack.c.bf16 %v2331_v1, %v2331_v1  ;;  %v2769_v1 = vld [vmem:[%s12928_s6 + $0x78] sm:$0xff] }
 0x380   : > { %2770 = vmatpush.msrb.mxu1 %v2769_v1  ;;  %2841 = vmatpush.msrb.mxu2 %v2769_v1 }
 0x381   : > { %v2435_v5 = vunpack.c.l.b16 %v2379_v2  ;;  %v2768_v2 = vld [vmem:[%s12928_s6 + $0x70] sm:$0xff] }
 0x382   : > { %2771 = vmatpush.msrb.mxu1 %v2768_v2  ;;  %2842 = vmatpush.msrb.mxu2 %v2768_v2 }
 0x386   : > { %v2333_v3 = vpop.f32.mrf.mxu0 }
 0x387   : > { %v2380_v4 = vpack.c.bf16 %v2333_v3, %v2333_v3  ;;  %v2767_v3 = vld [vmem:[%s12928_s6 + $0x68] sm:$0xff] }
 0x388   : > { %2772 = vmatpush.msrb.mxu1 %v2767_v3  ;;  %2843 = vmatpush.msrb.mxu2 %v2767_v3 }
 0x389   : > { %v2436_v6 = vunpack.c.l.b16 %v2380_v4  ;;  %v2766_v4 = vld [vmem:[%s12928_s6 + $0x60] sm:$0xff] }
 0x38a   : > { %2773 = vmatpush.msrb.mxu1 %v2766_v4  ;;  %2844 = vmatpush.msrb.mxu2 %v2766_v4 }
 0x38b   : > { %v2443_v7 = vpack.c.b16 %v2436_v6, %v2435_v5  ;;  %v2765_v5 = vld [vmem:[%s12928_s6 + $0x58] sm:$0xff]  ;;  %v2764_v6 = vld [vmem:[%s12928_s6 + $0x50] sm:$0xff] }
 0x38c   : > { %2774 = vmatpush.msrb.mxu1 %v2765_v5  ;;  %2845 = vmatpush.msrb.mxu2 %v2765_v5 }
 0x38d   : > { %2507 = vmatmul.bf16.vlgmr.msra.gmra.mxu1 %v2443_v7  ;;  %v2763_v7 = vld [vmem:[%s12928_s6 + $0x48] sm:$0xff] }
 0x38e   : > { %v2336_v9 = vpop.f32.mrf.mxu0  ;;  %2775 = vmatpush.msrb.mxu1 %v2764_v6  ;;  %2846 = vmatpush.msrb.mxu2 %v2764_v6 }
 0x38f   : > { %v2381_v12 = vpack.c.bf16 %v2336_v9, %v2336_v9  ;;  %v2761_v9 = vld [vmem:[%s12928_s6 + $0x38] sm:$0xff] }
 0x390   : > { %2776 = vmatpush.msrb.mxu1 %v2763_v7  ;;  %2847 = vmatpush.msrb.mxu2 %v2763_v7 }
 0x391   : > { %v2437_v16 = vunpack.c.l.b16 %v2381_v12  ;;  %v2758_v12 = vld [vmem:[%s12928_s6 + $0x20] sm:$0xff] }
 0x392   : > { %2777 = vmatpush.msrb.mxu1 %v2762_v8  ;;  %2848 = vmatpush.msrb.mxu2 %v2762_v8 }
 0x394   : > { %2778 = vmatpush.msrb.mxu1 %v2761_v9  ;;  %2849 = vmatpush.msrb.mxu2 %v2761_v9 }
 0x396   : > { %v2338_v13 = vpop.f32.mrf.mxu0  ;;  %2779 = vmatpush.msrb.mxu1 %v2760_v10  ;;  %2850 = vmatpush.msrb.mxu2 %v2760_v10 }
 0x397   : > { %v2382_v14 = vpack.c.bf16 %v2338_v13, %v2338_v13  ;;  %v2757_v13 = vld [vmem:[%s12928_s6 + $0x18] sm:$0xff] }
 0x398   : > { %2780 = vmatpush.msrb.mxu1 %v2759_v11  ;;  %2851 = vmatpush.msrb.mxu2 %v2759_v11 }
 0x399   : > { %v2438_v17 = vunpack.c.l.b16 %v2382_v14  ;;  %v2756_v14 = vld [vmem:[%s12928_s6 + $0x10] sm:$0xff] }
 0x39a   : > { %2781 = vmatpush.msrb.mxu1 %v2758_v12  ;;  %2852 = vmatpush.msrb.mxu2 %v2758_v12 }
 0x39b   : > { %v2444_v18 = vpack.c.b16 %v2438_v17, %v2437_v16  ;;  %v2754_v16 = vld [vmem:[%s12928_s6] sm:$0xff] }
 0x39c   : > { %2782 = vmatpush.msrb.mxu1 %v2757_v13  ;;  %2853 = vmatpush.msrb.mxu2 %v2757_v13 }
 0x39d   : > { %2512 = vmatmul.bf16.gmra.mxu1 %v2444_v18 }
 0x39e   : > { %v2341_v20 = vpop.f32.mrf.mxu0  ;;  %2783 = vmatpush.msrb.mxu1 %v2756_v14  ;;  %2854 = vmatpush.msrb.mxu2 %v2756_v14 }
 0x39f   : > { %v2383_v23 = vpack.c.bf16 %v2341_v20, %v2341_v20 }
 0x3a0   : > { %2784 = vmatpush.msrb.mxu1 %v2755_v15  ;;  %2855 = vmatpush.msrb.mxu2 %v2755_v15 }
 0x3a1   : > { %v2439_v27 = vunpack.c.l.b16 %v2383_v23 }
 0x3a2   : > { %2785 = vmatpush.msrb.mxu1 %v2754_v16  ;;  %2856 = vmatpush.msrb.mxu2 %v2754_v16 }
 0x3a6   : > { %v2343_v24 = vpop.f32.mrf.mxu0 }
 0x3a7   : > { %v2384_v25 = vpack.c.bf16 %v2343_v24, %v2343_v24 }
 0x3a9   : > { %v2440_v28 = vunpack.c.l.b16 %v2384_v25 }
 0x3ab   : > { %v2445_v29 = vpack.c.b16 %v2440_v28, %v2439_v27 }
 0x3ad   : > { %2517 = vmatmul.bf16.gmra.mxu1 %v2445_v29 }
 0x3ae   : > { %v2346_v30 = vpop.f32.mrf.mxu0 }
 0x3af   : > { %v2385_v31 = vpack.c.bf16 %v2346_v30, %v2346_v30 }
 0x3b1   : > { %v2441_v34 = vunpack.c.l.b16 %v2385_v31 }
 0x3b6   : > { %v2348_v32 = vpop.f32.mrf.mxu0 }
 0x3b7   : > { %v2386_v33 = vpack.c.bf16 %v2348_v32, %v2348_v32 }
 0x3b9   : > { %v2442_v35 = vunpack.c.l.b16 %v2386_v33 }
 0x3bb   : > { %v2446_v36 = vpack.c.b16 %v2442_v35, %v2441_v34 }
 0x3bd   : > { %2522 = vmatmul.bf16.gmra.mxu1 %v2446_v36 }
 0x3be   : > { %v2351_v37 = vpop.f32.mrf.mxu0 }
 0x3bf   : > { %v2387_v38 = vpack.c.bf16 %v2351_v37, %v2351_v37 }
 0x3c1   : > { %v2653_v41 = vunpack.c.l.b16 %v2387_v38 }
 0x3c6   : > { %v2353_v39 = vpop.f32.mrf.mxu0 }
 0x3c7   : > { %v2388_v40 = vpack.c.bf16 %v2353_v39, %v2353_v39 }
 0x3c9   : > { %v2654_v42 = vunpack.c.l.b16 %v2388_v40 }
 0x3cb   : > { %v2661_v43 = vpack.c.b16 %v2654_v42, %v2653_v41 }
 0x3cd   : > { %2725 = vmatmul.bf16.vlgmr.msra.gmra.mxu3 %v2661_v43 }
 0x3ce   : > { %v2356_v44 = vpop.f32.mrf.mxu0 }
 0x3cf   : > { %v2389_v45 = vpack.c.bf16 %v2356_v44, %v2356_v44 }
 0x3d0   : > { %v2609_v18 = vpop.f32.mrf.mxu2 }
 0x3d1   : > { %v2655_v48 = vunpack.c.l.b16 %v2389_v45 }
 0x3d6   : > { %v2358_v46 = vpop.f32.mrf.mxu0 }
 0x3d7   : > { %v2390_v47 = vpack.c.bf16 %v2358_v46, %v2358_v46 }
 0x3d8   : > { %v2611_v20 = vpop.f32.mrf.mxu2 }
 0x3d9   : > { %v2656_v49 = vunpack.c.l.b16 %v2390_v47 }
 0x3db   : > { %v2662_v50 = vpack.c.b16 %v2656_v49, %v2655_v48 }
 0x3dd   : > { %2730 = vmatmul.bf16.gmra.mxu3 %v2662_v50 }
 0x3de   : > { %v2361_v51 = vpop.f32.mrf.mxu0 }
 0x3df   : > { %v2391_v52 = vpack.c.bf16 %v2361_v51, %v2361_v51 }
 0x3e0   : > { %v2614_v26 = vpop.f32.mrf.mxu2 }
 0x3e1   : > { %v2657_v55 = vunpack.c.l.b16 %v2391_v52 }
 0x3e6   : > { %v2363_v53 = vpop.f32.mrf.mxu0 }
 0x3e7   : > { %v2392_v54 = vpack.c.bf16 %v2363_v53, %v2363_v53 }
 0x3e8   : > { %v2616_v32 = vpop.f32.mrf.mxu2 }
 0x3e9   : > { %v2658_v56 = vunpack.c.l.b16 %v2392_v54 }
 0x3eb   : > { %v2663_v57 = vpack.c.b16 %v2658_v56, %v2657_v55 }
 0x3ed   : > { %2735 = vmatmul.bf16.gmra.mxu3 %v2663_v57 }
 0x3ee   : > { %v2366_v58 = vpop.f32.mrf.mxu0 }
 0x3ef   : > { %v2393_v59 = vpack.c.bf16 %v2366_v58, %v2366_v58 }
 0x3f0   : > { %v2619_v39 = vpop.f32.mrf.mxu2 }
 0x3f1   : > { %v2659_v62 = vunpack.c.l.b16 %v2393_v59 }
 0x3f6   : > { %v2368_v60 = vpop.f32.mrf.mxu0 }
 0x3f7   : > { %v2394_v61 = vpack.c.bf16 %v2368_v60, %v2368_v60 }
 0x3f8   : > { %v2621_v47 = vpop.f32.mrf.mxu2 }
 0x3f9   : > { %v2660_v63 = vunpack.c.l.b16 %v2394_v61 }
 0x3fb   : > { %v2664_v0 = vpack.c.b16 %v2660_v63, %v2659_v62 }
 0x3fd   : > { %2740 = vmatmul.bf16.gmra.mxu3 %v2664_v0 }
 0x400   : > { %v2624_v54 = vpop.f32.mrf.mxu2 }
 0x408   : > { %v2626_v60 = vpop.f32.mrf.mxu2 }
 0x40a   : > { %v2508_v17 = vpop.f32.mrf.mxu1 }
 0x40b   : > { %v2610_v21 = vadd.f32 %v2609_v18, %v2508_v17 }
 0x412   : > { %v2510_v19 = vpop.f32.mrf.mxu1 }
 0x413   : > { %v2612_v27 = vadd.f32 %v2611_v20, %v2510_v19 }
 0x41a   : > { %v2513_v24 = vpop.f32.mrf.mxu1 }
 0x41b   : > { %v2615_v33 = vadd.f32 %v2614_v26, %v2513_v24 }
 0x422   : > { %v2515_v31 = vpop.f32.mrf.mxu1 }
 0x423   : > { %v2617_v38 = vadd.f32 %v2616_v32, %v2515_v31 }
 0x42a   : > { %v2518_v37 = vpop.f32.mrf.mxu1 }
 0x42b   : > { %v2620_v43 = vadd.f32 %v2619_v39, %v2518_v37 }
 0x432   : > { %v2520_v44 = vpop.f32.mrf.mxu1 }
 0x433   : > { %v2622_v49 = vadd.f32 %v2621_v47, %v2520_v44 }
 0x43a   : > { %v2523_v52 = vpop.f32.mrf.mxu1 }
 0x43b   : > { %v2625_v55 = vadd.f32 %v2624_v54, %v2523_v52 }
 0x442   : > { %v2525_v59 = vpop.f32.mrf.mxu1 }
 0x443   : > { %v2627_v61 = vadd.f32 %v2626_v60, %v2525_v59 }
 0x450   : > { %v2726_v22 = vpop.f32.mrf.mxu3 }
 0x451   : > { %v11655_v23 = vadd.f32 %v2726_v22, %v2610_v21 }
 0x453   : > { %2786 = vmatmul.f32.vlgmr.msrb.gmra.mxu1 %v11655_v23  ;;  %v2833_v25 = vmul.f32 %v11655_v23, %v11655_v23 }
 0x455   : > { %2857 = vmatmul.f32.vlgmr.msrb.gmra.mxu2 %v2833_v25 }
 0x458   : > { %v2728_v28 = vpop.f32.mrf.mxu3 }
 0x459   : > { %v11660_v29 = vadd.f32 %v2728_v28, %v2612_v27 }
 0x45b   : > { %2789 = vmatmul.f32.gmra.mxu1 %v11660_v29  ;;  %v2834_v30 = vmul.f32 %v11660_v29, %v11660_v29 }
 0x45d   : > { %2860 = vmatmul.f32.gmra.mxu2 %v2834_v30 }
 0x460   : > { %v2731_v34 = vpop.f32.mrf.mxu3 }
 0x461   : > { %v11665_v35 = vadd.f32 %v2731_v34, %v2615_v33 }
 0x463   : > { %2792 = vmatmul.f32.gmra.mxu1 %v11665_v35  ;;  %v2835_v36 = vmul.f32 %v11665_v35, %v11665_v35 }
 0x465   : > { %2863 = vmatmul.f32.gmra.mxu2 %v2835_v36 }
 0x468   : > { %v2733_v40 = vpop.f32.mrf.mxu3 }
 0x469   : > { %v11670_v41 = vadd.f32 %v2733_v40, %v2617_v38 }
 0x46b   : > { %2795 = vmatmul.f32.gmra.mxu1 %v11670_v41  ;;  %v2836_v42 = vmul.f32 %v11670_v41, %v11670_v41 }
 0x46d   : > { %2866 = vmatmul.f32.gmra.mxu2 %v2836_v42 }
 0x470   : > { %v2736_v45 = vpop.f32.mrf.mxu3 }
 0x471   : > { %v11675_v46 = vadd.f32 %v2736_v45, %v2620_v43 }
 0x473   : > { %2798 = vmatmul.f32.gmra.mxu1 %v11675_v46  ;;  %v2837_v48 = vmul.f32 %v11675_v46, %v11675_v46 }
 0x475   : > { %2869 = vmatmul.f32.gmra.mxu2 %v2837_v48  ;;  %v2923_v48 = vld [vmem:[%s12929_s7] sm:$0xf]  ;;  %s12937_s7 = scalar_lea.vmem [#allocation18], %s11484_s16 }
 0x476   : > { %8379 = vmatpush.msk.msrb.mxu3 %vm2927_vm2, %v2923_v48 }
 0x478   : > { %v2738_v50 = vpop.f32.mrf.mxu3  ;;  %8381 = vmatpush.msk.msra.mxu3 %vm2927_vm2, %v2923_v48 }
 0x479   : > { %v11680_v51 = vadd.f32 %v2738_v50, %v2622_v49 }
 0x47b   : > { %2801 = vmatmul.f32.gmra.mxu1 %v11680_v51  ;;  %v2838_v53 = vmul.f32 %v11680_v51, %v11680_v51 }
 0x47d   : > { %2872 = vmatmul.f32.gmra.mxu2 %v2838_v53 }
 0x480   : > { %v2741_v56 = vpop.f32.mrf.mxu3 }
 0x481   : > { %v11685_v57 = vadd.f32 %v2741_v56, %v2625_v55 }
 0x483   : > { %2804 = vmatmul.f32.gmra.mxu1 %v11685_v57  ;;  %v2839_v58 = vmul.f32 %v11685_v57, %v11685_v57 }
 0x485   : > { %2875 = vmatmul.f32.gmra.mxu2 %v2839_v58 }
 0x488   : > { %v2743_v62 = vpop.f32.mrf.mxu3 }
 0x489   : > { %v11690_v63 = vadd.f32 %v2743_v62, %v2627_v61 }
 0x48b   : > { %2807 = vmatmul.f32.gmra.mxu1 %v11690_v63  ;;  %v2840_v0 = vmul.f32 %v11690_v63, %v11690_v63 }
 0x48d   : > { %2878 = vmatmul.f32.gmra.mxu2 %v2840_v0 }
 0x4d0   : > { %v2787_v1 = vpop.f32.mrf.mxu1 }
 0x4d1   : > { %v2812_v13 = vsel %vm2811_vm1, %v2787_v1, 0.0 }
 0x4d8   : > { %v2790_v2 = vpop.f32.mrf.mxu1  ;;  %v2858_v3 = vpop.f32.mrf.mxu2 }
 0x4d9   : > { %v2813_v12 = vsel %vm2811_vm1, %v2790_v2, 0.0  ;;  %v2882_v26 = vsel %vm2811_vm1, %v2858_v3, 0.0 }
 0x4da   : > { %v2814_v15 = vadd.f32 %v2813_v12, %v2812_v13 }
 0x4e0   : > { %v2793_v4 = vpop.f32.mrf.mxu1  ;;  %v2861_v5 = vpop.f32.mrf.mxu2 }
 0x4e1   : > { %v2815_v14 = vsel %vm2811_vm1, %v2793_v4, 0.0  ;;  %v2883_v22 = vsel %vm2811_vm1, %v2861_v5, 0.0 }
 0x4e2   : > { %v2816_v17 = vadd.f32 %v2815_v14, %v2814_v15  ;;  %v2884_v30 = vadd.f32 %v2883_v22, %v2882_v26  ;;  %v2907_v14 = vld [vmem:[%s1716_s14] sm:$0x1]  ;;  %v2998_v22 = vld [vmem:[#allocation2 + $0x28] sm:$0xff]  ;;  %s12931_s14 = sld [smem:[#allocation74_spill]] }
 0x4e3   : > { %v2997_v26 = vld [vmem:[#allocation2 + $0x20] sm:$0xff] }
 0x4e8   : > { %v2796_v6 = vpop.f32.mrf.mxu1  ;;  %v2864_v7 = vpop.f32.mrf.mxu2 }
 0x4e9   : > { %v2817_v16 = vsel %vm2811_vm1, %v2796_v6, 0.0  ;;  %v2885_v27 = vsel %vm2811_vm1, %v2864_v7, 0.0 }
 0x4ea   : > { %v2818_v21 = vadd.f32 %v2817_v16, %v2816_v17  ;;  %v2886_v33 = vadd.f32 %v2885_v27, %v2884_v30  ;;  %v2995_v30 = vld [vmem:[#allocation2 + $0x10] sm:$0xff] }
 0x4f0   : > { %v2799_v8 = vpop.f32.mrf.mxu1  ;;  %v2867_v9 = vpop.f32.mrf.mxu2 }
 0x4f1   : > { %v2819_v20 = vsel %vm2811_vm1, %v2799_v8, 0.0  ;;  %v2887_v32 = vsel %vm2811_vm1, %v2867_v9, 0.0 }
 0x4f2   : > { %v2820_v25 = vadd.f32 %v2819_v20, %v2818_v21  ;;  %v2888_v40 = vadd.f32 %v2887_v32, %v2886_v33  ;;  %v2992_v32 = vld [vmem:[#allocation2 + $0x30] sm:$0xff]  ;;  %v2993_v33 = vld [vmem:[#allocation2] sm:$0xff] }
 0x4f8   : > { %v2802_v10 = vpop.f32.mrf.mxu1  ;;  %v2870_v11 = vpop.f32.mrf.mxu2 }
 0x4f9   : > { %v2821_v24 = vsel %vm2811_vm1, %v2802_v10, 0.0  ;;  %v2889_v38 = vsel %vm2811_vm1, %v2870_v11, 0.0 }
 0x4fa   : > { %v2822_v31 = vadd.f32 %v2821_v24, %v2820_v25  ;;  %v2890_v44 = vadd.f32 %v2889_v38, %v2888_v40  ;;  %v2999_v24 = vld [vmem:[#allocation2 + $0x38] sm:$0xff]  ;;  %v2996_v25 = vld [vmem:[#allocation2 + $0x8] sm:$0xff] }
 0x500   : > { %v2805_v18 = vpop.f32.mrf.mxu1  ;;  %v2873_v19 = vpop.f32.mrf.mxu2 }
 0x501   : > { %v2823_v28 = vsel %vm2811_vm1, %v2805_v18, 0.0  ;;  %v2891_v43 = vsel %vm2811_vm1, %v2873_v19, 0.0  ;;  %v2920_v19 = vld [vmem:[%s1725_s1] sm:$0x1]  ;;  %s12932_s1 = sld [smem:[#allocation75_spill]] }
 0x502   : > { %v2824_v34 = vadd.f32 %v2823_v28, %v2822_v31  ;;  %v2892_v49 = vadd.f32 %v2891_v43, %v2890_v44  ;;  %v2994_v28 = vld [vmem:[#allocation2 + $0x18] sm:$0xff]  ;;  %v3006_v31 = vmul.f32 0.95, %v2998_v22  ;;  %v3000_v43 = vmul.f32 0.95, %v2992_v32 }
 0x503   : > { %v3002_v38 = vmul.f32 0.95, %v2994_v28  ;;  %v3001_v44 = vmul.f32 0.95, %v2993_v33  ;;  %v9381_v22 = vld [vmem:[%s12931_s14 + $0x18] sm:$0xff] }
 0x507   : > { %v9395_v28 = vld [vmem:[%s12932_s1 + $0x28] sm:$0xff]  ;;  %v9393_v32 = vld [vmem:[%s12932_s1 + $0x18] sm:$0xff] }
 0x508   : > { %v2808_v36 = vpop.f32.mrf.mxu1  ;;  %v2876_v37 = vpop.f32.mrf.mxu2  ;;  %v9413_v33 = vld [vmem:[%s12932_s1 + $0xb8] sm:$0xff] }
 0x509   : > { %v2825_v39 = vsel %vm2811_vm1, %v2808_v36, 0.0  ;;  %v2893_v47 = vsel %vm2811_vm1, %v2876_v37, 0.0  ;;  %v3004_v36 = vmul.f32 0.95, %v2996_v25  ;;  %v3005_v37 = vmul.f32 0.95, %v2997_v26  ;;  %3596 = vmatpush.bf16.msrb.mxu0 %v9413_v33 }
 0x50a   : > { %v2826_v42 = vadd.f32 %v2825_v39, %v2824_v34  ;;  %v2894_v53 = vadd.f32 %v2893_v47, %v2892_v49  ;;  %v3007_v34 = vmul.f32 0.95, %v2999_v24  ;;  %v3003_v39 = vmul.f32 0.95, %v2995_v30  ;;  %v9382_v24 = vld [vmem:[%s12931_s14 + $0x20] sm:$0xff]  ;;  %v9383_v25 = vld [vmem:[%s12931_s14 + $0x28] sm:$0xff] }
 0x50b   : > { %v9397_v26 = vld [vmem:[%s12932_s1 + $0x38] sm:$0xff]  ;;  %v9394_v30 = vld [vmem:[%s12932_s1 + $0x20] sm:$0xff] }
 0x50c   : > { %v2827_v45 = vrot.slane %v2826_v42, 4  ;;  %3479 = vmatpush.bf16.msra.mxu2 %v9397_v26 }
 0x50e   : > { %v2828_v50 = vadd.f32 %v2827_v45, %v2826_v42 }
 0x510   : > { %v2829_v52 = vrot.slane %v2828_v50, 2  ;;  %v2879_v54 = vpop.f32.mrf.mxu2 }
 0x511   : > { %v2895_v55 = vsel %vm2811_vm1, %v2879_v54, 0.0 }
 0x512   : > { %v2830_v56 = vadd.f32 %v2829_v52, %v2828_v50  ;;  %v2896_v58 = vadd.f32 %v2895_v55, %v2894_v53 }
 0x514   : > { %v2831_v59 = vrot.slane %v2830_v56, 1  ;;  %v2897_v60 = vrot.slane %v2896_v58, 4 }
 0x516   : > { %v2898_v61 = vadd.f32 %v2897_v60, %v2896_v58  ;;  %v2832_v62 = vadd.f32 %v2831_v59, %v2830_v56 }
 0x518   : > { %v2899_v0 = vrot.slane %v2898_v61, 2  ;;  %v2903_v2 = vmul.f32 0.00048828125, %v2832_v62 }
 0x51a   : > { %v2900_v1 = vadd.f32 %v2899_v0, %v2898_v61  ;;  %v2905_v5 = vmul.f32 %v2903_v2, %v2903_v2 }
 0x51c   : > { %v2901_v3 = vrot.slane %v2900_v1, 1 }
 0x51e   : > { %v2902_v4 = vadd.f32 %v2901_v3, %v2900_v1 }
 0x520   : > { %v2904_v6 = vmul.f32 0.00048828125, %v2902_v4 }
 0x522   : > { %v2906_v7 = vsub.f32 %v2904_v6, %v2905_v5 }
 0x524   : > { %v2908_v8 = vadd.f32 0.0001, %v2906_v7 }
 0x526   : > { %9811 = vrsqrt.f32 %v2908_v8  ;;  %vm2915_vm4 = vweird.f32 %v2908_v8 }
 0x52c   : > { %v9812_v9 = vpop.eup %9811 }
 0x52d   : > { %v2910_v10 = vmul.f32 %v9812_v9, %v2908_v8  ;;  %vm2916_vm3 = vweird.f32 %v9812_v9  ;;  %v10834_v8 = vmov 1.0|1.0  }
 0x52e   : > { %vm2917_vm5 = vmor %vm2915_vm4, %vm2916_vm3  ;;  %vm3144_vm4 = vcmask 523264  }
 0x52f   : > { %v2911_v11 = vmul.f32 %v9812_v9, %v2910_v10 }
 0x531   : > { %v2912_v12 = vmul.f32 0.5, %v2911_v11 }
 0x533   : > { %v2913_v13 = vsub.f32 1.5, %v2912_v12 }
 0x535   : > { %v2914_v15 = vmul.f32 %v9812_v9, %v2913_v13 }
 0x537   : > { %v2918_v16 = vsel %vm2917_vm5, %v9812_v9, %v2914_v15 }
 0x538   : > { %v2919_v17 = vmul.f32 %v2918_v16, %v2907_v14 }
 0x53a   : > { %8380 = vmatmul.msk.f32.vlgmr.msrb.gmra.mxu3 %vm2811_vm1, %v2919_v17  ;;  %v2921_v18 = vmul.f32 %v2919_v17, %v2903_v2 }
 0x53c   : > { %v2922_v20 = vsub.f32 %v2920_v19, %v2921_v18  ;;  %v9378_v19 = vld [vmem:[%s12931_s14] sm:$0xff] }
 0x542   : > { %8382 = vmatmul.msk.f32.vlgmr.msra.gmra.mxu3 %vm2811_vm1, %v2922_v20  ;;  %v9379_v20 = vld [vmem:[%s12931_s14 + $0x8] sm:$0xff] }
 0x5bd   : > { %v2948_v21 = vpop.f32.mrf.mxu3 }
 0x5be   : > { %v2951_v27 = vperm.slane %v2948_v21, 0  ;;  %v9380_v21 = vld [vmem:[%s12931_s14 + $0x10] sm:$0xff] }
 0x5c0   : > { %v2958_v42 = vmul.f32 %v2951_v27, %v11685_v57  ;;  %v2959_v47 = vmul.f32 %v2951_v27, %v11690_v63  ;;  %v2956_v48 = vmul.f32 %v2951_v27, %v11675_v46  ;;  %v2957_v49 = vmul.f32 %v2951_v27, %v11680_v51 }
 0x5c1   : > { %v2954_v50 = vmul.f32 %v2951_v27, %v11665_v35  ;;  %v2955_v52 = vmul.f32 %v2951_v27, %v11670_v41  ;;  %v2952_v53 = vmul.f32 %v2951_v27, %v11655_v23  ;;  %v2953_v54 = vmul.f32 %v2951_v27, %v11660_v29  ;;  %v9396_v27 = vld [vmem:[%s12932_s1 + $0x30] sm:$0xff] }
 0x5c2   : > { %v10833_v23 = vmov 0.0   ;;  %3480 = vmatpush.bf16.msra.mxu2 %v9396_v27  ;;  %v9409_v27 = vld [vmem:[%s12932_s1 + $0x98] sm:$0xff] }
 0x5c5   : > { %v2980_v40 = vpop.f32.mrf.mxu3 }
 0x5c6   : > { %v2983_v45 = vperm.slane %v2980_v40, 0  ;;  %3481 = vmatpush.bf16.msra.mxu2 %v9395_v28  ;;  %v9412_v40 = vld [vmem:[%s12932_s1 + $0xb0] sm:$0xff] }
 0x5c7   : > { %3597 = vmatpush.bf16.msrb.mxu0 %v9412_v40 }
 0x5c8   : > { %v2990_v55 = vadd.f32 %v2983_v45, %v2958_v42  ;;  %v2991_v56 = vadd.f32 %v2983_v45, %v2959_v47  ;;  %v2988_v57 = vadd.f32 %v2983_v45, %v2956_v48  ;;  %v2989_v58 = vadd.f32 %v2983_v45, %v2957_v49  ;;  %v9387_v47 = vld [vmem:[%s12931_s14 + $0x48] sm:$0xff] }
 0x5c9   : > { %v2986_v59 = vadd.f32 %v2983_v45, %v2954_v50  ;;  %v2987_v60 = vadd.f32 %v2983_v45, %v2955_v52  ;;  %v2984_v61 = vadd.f32 %v2983_v45, %v2952_v53  ;;  %v2985_v63 = vadd.f32 %v2983_v45, %v2953_v54  ;;  %v9405_v53 = vld [vmem:[%s12932_s1 + $0x78] sm:$0xff]  ;;  %v9411_v54 = vld [vmem:[%s12932_s1 + $0xa8] sm:$0xff] }
 0x5ca   : > { %v3014_v62 = vadd.f32 %v3006_v31, %v2990_v55  ;;  %v3015_v46 = vadd.f32 %v3007_v34, %v2991_v56  ;;  %v3012_v0 = vadd.f32 %v3004_v36, %v2988_v57  ;;  %v3013_v51 = vadd.f32 %v3005_v37, %v2989_v58  ;;  %v9384_v31 = vld [vmem:[%s12931_s14 + $0x30] sm:$0xff]  ;;  %3482 = vmatpush.bf16.msra.mxu2 %v9394_v30  ;;  %v9385_v36 = vld [vmem:[%s12931_s14 + $0x38] sm:$0xff]  ;;  %v9391_v37 = vld [vmem:[%s12932_s1 + $0x8] sm:$0xff] }
 0x5cb   : > { %v3010_v1 = vadd.f32 %v3002_v38, %v2986_v59  ;;  %v3011_v35 = vadd.f32 %v3003_v39, %v2987_v60  ;;  %v3008_v2 = vadd.f32 %v3000_v43, %v2984_v61  ;;  %v3009_v41 = vadd.f32 %v3001_v44, %v2985_v63  ;;  %v9392_v34 = vld [vmem:[%s12932_s1 + $0x10] sm:$0xff]  ;;  %v9390_v38 = vld [vmem:[%s12932_s1] sm:$0xff]  ;;  %3378 = vmatpush.bf16.msra.mxu1 %v9405_v53  ;;  %v9403_v63 = vld [vmem:[%s12932_s1 + $0x68] sm:$0xff] }
 0x5cc   : > { %vm3022_vm6 = vcmp.gt.f32.partialorder %v3014_v62, 1.0  ;;  %vm3023_vm7 = vcmp.gt.f32.partialorder %v3015_v46, 1.0  ;;  %vm3020_vm8 = vcmp.gt.f32.partialorder %v3012_v0, 1.0  ;;  %vm3021_vm9 = vcmp.gt.f32.partialorder %v3013_v51, 1.0  ;;  %v9386_v39 = vld [vmem:[%s12931_s14 + $0x40] sm:$0xff]  ;;  %3598 = vmatpush.bf16.msrb.mxu0 %v9411_v54  ;;  %v9404_v55 = vld [vmem:[%s12932_s1 + $0x70] sm:$0xff] }
 0x5cd   : > { %v11729_v29 = vsel %vm3022_vm6, 1.0, %v10833_v23  ;;  %v11732_v3 = vsel %vm3023_vm7, 1.0, %v10833_v23  ;;  %vm8439_vm10 = vmpackc.low %vm3023_vm7, %vm3022_vm6  ;;  %v11736_v4 = vsel %vm3020_vm8, 1.0, %v10833_v23  ;;  %v11740_v5 = vsel %vm3021_vm9, 1.0, %v10833_v23  ;;  %v9388_v59 = vld [vmem:[%s12931_s14 + $0x50] sm:$0xff]  ;;  %v9407_v54 = vld [vmem:[%s12932_s1 + $0x88] sm:$0xff] }
 0x5ce   : > { %v3046_v6 = vsub.f32 %v3014_v62, %v11729_v29  ;;  %v3047_v7 = vsub.f32 %v3015_v46, %v11732_v3  ;;  %8440 = vmatpush.bf16.msk.msrb.mxu3 %vm8439_vm10, %v10834_v8  ;;  %v3044_v9 = vsub.f32 %v3012_v0, %v11736_v4  ;;  %v3045_v10 = vsub.f32 %v3013_v51, %v11740_v5  ;;  %vm8441_vm15 = vmpackc.low %vm3021_vm9, %vm3020_vm8  ;;  %v9402_v46 = vld [vmem:[%s12932_s1 + $0x60] sm:$0xff]  ;;  %v9401_v51 = vld [vmem:[%s12932_s1 + $0x58] sm:$0xff] }
 0x5cf   : > { %vm3018_vm11 = vcmp.gt.f32.partialorder %v3010_v1, 1.0  ;;  %vm3019_vm12 = vcmp.gt.f32.partialorder %v3011_v35, 1.0  ;;  %vm3016_vm13 = vcmp.gt.f32.partialorder %v3008_v2, 1.0  ;;  %vm3017_vm14 = vcmp.gt.f32.partialorder %v3009_v41, 1.0  ;;  %3483 = vmatpush.bf16.msra.mxu2 %v9393_v32  ;;  %3379 = vmatpush.bf16.msra.mxu1 %v9404_v55  ;;  %v9406_v55 = vld [vmem:[%s12932_s1 + $0x80] sm:$0xff] }
 0x5d0   : > { %3054 = vst [vmem:[#allocation2 + $0x28] sm:$0xff] %v3046_v6  ;;  %v11749_v11 = vsel %vm3018_vm11, 1.0, %v10833_v23  ;;  %v11753_v12 = vsel %vm3019_vm12, 1.0, %v10833_v23  ;;  %v11757_v13 = vsel %vm3016_vm13, 1.0, %v10833_v23  ;;  %v11761_v14 = vsel %vm3017_vm14, 1.0, %v10833_v23  ;;  %vm8443_vm0 = vmpackc.low %vm3019_vm12, %vm3018_vm11  ;;  %v9389_v6 = vld [vmem:[%s12931_s14 + $0x58] sm:$0xff] }
 0x5d1   : > { %3055 = vst [vmem:[#allocation2 + $0x38] sm:$0xff] %v3047_v7  ;;  %v3042_v15 = vsub.f32 %v3010_v1, %v11749_v11  ;;  %v3043_v16 = vsub.f32 %v3011_v35, %v11753_v12  ;;  %v3040_v17 = vsub.f32 %v3008_v2, %v11757_v13  ;;  %v3041_v18 = vsub.f32 %v3009_v41, %v11761_v14  ;;  %vm8445_vm3 = vmpackc.low %vm3017_vm14, %vm3016_vm13  ;;  %v9400_v1 = vld [vmem:[%s12932_s1 + $0x50] sm:$0xff] }
 0x5d2   : > { %3052 = vst [vmem:[#allocation2 + $0x8] sm:$0xff] %v3044_v9  ;;  %8442 = vmatpush.bf16.msk.msrb.mxu3 %vm8441_vm15, %v10834_v8 }
 0x5d3   : > { %3053 = vst [vmem:[#allocation2 + $0x20] sm:$0xff] %v3045_v10  ;;  %3484 = vmatpush.bf16.msra.mxu2 %v9392_v34  ;;  %3380 = vmatpush.bf16.msra.mxu1 %v9403_v63 }
 0x5d4   : > { %3050 = vst [vmem:[#allocation2 + $0x18] sm:$0xff] %v3042_v15  ;;  %v9399_v15 = vld [vmem:[%s12932_s1 + $0x48] sm:$0xff] }
 0x5d5   : > { %3051 = vst [vmem:[#allocation2 + $0x10] sm:$0xff] %v3043_v16  ;;  %v9410_v16 = vld [vmem:[%s12932_s1 + $0xa0] sm:$0xff] }
 0x5d6   : > { %8444 = vmatpush.bf16.msk.msrb.mxu3 %vm8443_vm0, %v10834_v8  ;;  %3048 = vst [vmem:[#allocation2 + $0x30] sm:$0xff] %v3040_v17  ;;  %v9398_v17 = vld [vmem:[%s12932_s1 + $0x40] sm:$0xff]  ;;  %3599 = vmatpush.bf16.msrb.mxu0 %v9410_v16 }
 0x5d7   : > { %3049 = vst [vmem:[#allocation2] sm:$0xff] %v3041_v18  ;;  %3485 = vmatpush.bf16.msra.mxu2 %v9391_v37  ;;  %3381 = vmatpush.bf16.msra.mxu1 %v9402_v46 }
 0x5da   : > { %8446 = vmatpush.bf16.msk.msrb.mxu3 %vm8445_vm3, %v10834_v8  ;;  %3600 = vmatpush.bf16.msrb.mxu0 %v9409_v27 }
 0x5db   : > { %3486 = vmatpush.bf16.msra.mxu2 %v9390_v38  ;;  %3382 = vmatpush.bf16.msra.mxu1 %v9401_v51 }
 0x5dd   : > { %8447 = vmatmul.msk.bf16.vlgmr.msrb.gmra.mxu3 %vm3144_vm4, %v9378_v19 }
 0x5df   : > { %3383 = vmatpush.bf16.msra.mxu1 %v9400_v1 }
 0x5e3   : > { %3384 = vmatpush.bf16.msra.mxu1 %v9399_v15 }
 0x5e7   : > { %3385 = vmatpush.bf16.msra.mxu1 %v9398_v17 }
 0x5ed   : > { %8448 = vmatmul.msk.bf16.gmra.mxu3 %vm3144_vm4, %v9379_v20 }
 0x5fd   : > { %8449 = vmatmul.msk.bf16.gmra.mxu3 %vm3144_vm4, %v9380_v21 }
 0x60d   : > { %8450 = vmatmul.msk.bf16.gmra.mxu3 %vm3144_vm4, %v9381_v22 }
 0x61d   : > { %8451 = vmatmul.msk.bf16.gmra.mxu3 %vm3144_vm4, %v9382_v24 }
 0x62d   : > { %8452 = vmatmul.msk.bf16.gmra.mxu3 %vm3144_vm4, %v9383_v25 }
 0x63d   : > { %8453 = vmatmul.msk.bf16.gmra.mxu3 %vm3144_vm4, %v9384_v31 }
 0x64d   : > { %8454 = vmatmul.msk.bf16.gmra.mxu3 %vm3144_vm4, %v9385_v36 }
 0x65d   : > { %8455 = vmatmul.msk.bf16.gmra.mxu3 %vm3144_vm4, %v9386_v39 }
 0x660   : > { %v3190_v42 = vpop.f32.mrf.mxu3 }
 0x661   : > { %v3250_v43 = vpack.c.bf16 %v3190_v42, %v3190_v42 }
 0x663   : > { %v3415_v48 = vunpack.c.l.b16 %v3250_v43  ;;  %v9408_v43 = vld [vmem:[%s12932_s1 + $0x90] sm:$0xff] }
 0x664   : > { %3601 = vmatpush.bf16.msrb.mxu0 %v9408_v43  ;;  %v3640_v43 = vld [vmem:[%s12928_s6 + $0x38] sm:$0xff] }
 0x668   : > { %v3192_v44 = vpop.f32.mrf.mxu3  ;;  %3602 = vmatpush.bf16.msrb.mxu0 %v9407_v54 }
 0x669   : > { %v3251_v45 = vpack.c.bf16 %v3192_v44, %v3192_v44 }
 0x66b   : > { %v3416_v49 = vunpack.c.l.b16 %v3251_v45 }
 0x66c   : > { %3603 = vmatpush.bf16.msrb.mxu0 %v9406_v55 }
 0x66d   : > { %v3423_v50 = vpack.c.b16 %v3416_v49, %v3415_v48  ;;  %8456 = vmatmul.msk.bf16.gmra.mxu3 %vm3144_vm4, %v9387_v47 }
 0x66f   : > { %3487 = vmatmul.bf16.vlgmr.msra.gmra.mxu2 %v3423_v50 }
 0x670   : > { %v3195_v52 = vpop.f32.mrf.mxu3 }
 0x671   : > { %v3252_v56 = vpack.c.bf16 %v3195_v52, %v3195_v52 }
 0x673   : > { %v3417_v60 = vunpack.c.l.b16 %v3252_v56 }
 0x678   : > { %v3197_v57 = vpop.f32.mrf.mxu3 }
 0x679   : > { %v3253_v58 = vpack.c.bf16 %v3197_v57, %v3197_v57 }
 0x67b   : > { %v3418_v61 = vunpack.c.l.b16 %v3253_v58 }
 0x67d   : > { %8457 = vmatmul.msk.bf16.gmra.mxu3 %vm3144_vm4, %v9388_v59  ;;  %v3424_v62 = vpack.c.b16 %v3418_v61, %v3417_v60 }
 0x67f   : > { %3492 = vmatmul.bf16.gmra.mxu2 %v3424_v62 }
 0x680   : > { %v3200_v0 = vpop.f32.mrf.mxu3 }
 0x681   : > { %v3254_v35 = vpack.c.bf16 %v3200_v0, %v3200_v0 }
 0x683   : > { %v3419_v7 = vunpack.c.l.b16 %v3254_v35 }
 0x688   : > { %v3202_v2 = vpop.f32.mrf.mxu3 }
 0x689   : > { %v3255_v41 = vpack.c.bf16 %v3202_v2, %v3202_v2 }
 0x68b   : > { %v3420_v9 = vunpack.c.l.b16 %v3255_v41 }
 0x68d   : > { %8458 = vmatmul.msk.bf16.gmra.mxu3 %vm3144_vm4, %v9389_v6  ;;  %v3425_v10 = vpack.c.b16 %v3420_v9, %v3419_v7 }
 0x68f   : > { %3497 = vmatmul.bf16.gmra.mxu2 %v3425_v10 }
 0x690   : > { %v3205_v18 = vpop.f32.mrf.mxu3 }
 0x691   : > { %v3256_v19 = vpack.c.bf16 %v3205_v18, %v3205_v18 }
 0x693   : > { %v3421_v22 = vunpack.c.l.b16 %v3256_v19 }
 0x698   : > { %v3207_v20 = vpop.f32.mrf.mxu3 }
 0x699   : > { %v3257_v21 = vpack.c.bf16 %v3207_v20, %v3207_v20 }
 0x69b   : > { %v3422_v24 = vunpack.c.l.b16 %v3257_v21 }
 0x69d   : > { %v3426_v25 = vpack.c.b16 %v3422_v24, %v3421_v22 }
 0x69f   : > { %3502 = vmatmul.bf16.gmra.mxu2 %v3426_v25 }
 0x6a0   : > { %v3210_v26 = vpop.f32.mrf.mxu3 }
 0x6a1   : > { %v3258_v28 = vpack.c.bf16 %v3210_v26, %v3210_v26 }
 0x6a3   : > { %v3314_v32 = vunpack.c.l.b16 %v3258_v28 }
 0x6a8   : > { %v3212_v30 = vpop.f32.mrf.mxu3 }
 0x6a9   : > { %v3259_v31 = vpack.c.bf16 %v3212_v30, %v3212_v30 }
 0x6ab   : > { %v3315_v33 = vunpack.c.l.b16 %v3259_v31 }
 0x6ad   : > { %v3322_v34 = vpack.c.b16 %v3315_v33, %v3314_v32  ;;  %v3648_v33 = vld [vmem:[%s12928_s6 + $0x78] sm:$0xff] }
 0x6ae   : > { %3649 = vmatpush.msrb.mxu1 %v3648_v33  ;;  %3719 = vmatpush.msrb.mxu2 %v3648_v33 }
 0x6af   : > { %3386 = vmatmul.bf16.vlgmr.msra.gmra.mxu1 %v3322_v34  ;;  %v3647_v34 = vld [vmem:[%s12928_s6 + $0x70] sm:$0xff] }
 0x6b0   : > { %v3215_v36 = vpop.f32.mrf.mxu3  ;;  %3650 = vmatpush.msrb.mxu1 %v3647_v34  ;;  %3720 = vmatpush.msrb.mxu2 %v3647_v34 }
 0x6b1   : > { %v3260_v37 = vpack.c.bf16 %v3215_v36, %v3215_v36  ;;  %v3646_v36 = vld [vmem:[%s12928_s6 + $0x68] sm:$0xff] }
 0x6b2   : > { %3651 = vmatpush.msrb.mxu1 %v3646_v36  ;;  %3721 = vmatpush.msrb.mxu2 %v3646_v36 }
 0x6b3   : > { %v3316_v40 = vunpack.c.l.b16 %v3260_v37  ;;  %v3645_v37 = vld [vmem:[%s12928_s6 + $0x60] sm:$0xff] }
 0x6b4   : > { %3652 = vmatpush.msrb.mxu1 %v3645_v37  ;;  %3722 = vmatpush.msrb.mxu2 %v3645_v37 }
 0x6b8   : > { %v3217_v38 = vpop.f32.mrf.mxu3 }
 0x6b9   : > { %v3261_v39 = vpack.c.bf16 %v3217_v38, %v3217_v38  ;;  %v3644_v38 = vld [vmem:[%s12928_s6 + $0x58] sm:$0xff] }
 0x6ba   : > { %3653 = vmatpush.msrb.mxu1 %v3644_v38  ;;  %3723 = vmatpush.msrb.mxu2 %v3644_v38 }
 0x6bb   : > { %v3317_v42 = vunpack.c.l.b16 %v3261_v39  ;;  %v3643_v39 = vld [vmem:[%s12928_s6 + $0x50] sm:$0xff] }
 0x6bc   : > { %3654 = vmatpush.msrb.mxu1 %v3643_v39  ;;  %3724 = vmatpush.msrb.mxu2 %v3643_v39 }
 0x6bd   : > { %v3323_v44 = vpack.c.b16 %v3317_v42, %v3316_v40  ;;  %v3642_v40 = vld [vmem:[%s12928_s6 + $0x48] sm:$0xff]  ;;  %v3641_v42 = vld [vmem:[%s12928_s6 + $0x40] sm:$0xff] }
 0x6be   : > { %3655 = vmatpush.msrb.mxu1 %v3642_v40  ;;  %3725 = vmatpush.msrb.mxu2 %v3642_v40 }
 0x6bf   : > { %3391 = vmatmul.bf16.gmra.mxu1 %v3323_v44  ;;  %v3639_v44 = vld [vmem:[%s12928_s6 + $0x30] sm:$0xff] }
 0x6c0   : > { %v3220_v45 = vpop.f32.mrf.mxu3  ;;  %3656 = vmatpush.msrb.mxu1 %v3641_v42  ;;  %3726 = vmatpush.msrb.mxu2 %v3641_v42 }
 0x6c1   : > { %v3262_v47 = vpack.c.bf16 %v3220_v45, %v3220_v45  ;;  %v3638_v45 = vld [vmem:[%s12928_s6 + $0x28] sm:$0xff] }
 0x6c2   : > { %3657 = vmatpush.msrb.mxu1 %v3640_v43  ;;  %3727 = vmatpush.msrb.mxu2 %v3640_v43 }
 0x6c3   : > { %v3318_v50 = vunpack.c.l.b16 %v3262_v47  ;;  %v3637_v47 = vld [vmem:[%s12928_s6 + $0x20] sm:$0xff] }
 0x6c4   : > { %3658 = vmatpush.msrb.mxu1 %v3639_v44  ;;  %3728 = vmatpush.msrb.mxu2 %v3639_v44 }
 0x6c6   : > { %3659 = vmatpush.msrb.mxu1 %v3638_v45  ;;  %3729 = vmatpush.msrb.mxu2 %v3638_v45 }
 0x6c8   : > { %v3222_v48 = vpop.f32.mrf.mxu3  ;;  %3660 = vmatpush.msrb.mxu1 %v3637_v47  ;;  %3730 = vmatpush.msrb.mxu2 %v3637_v47 }
 0x6c9   : > { %v3263_v49 = vpack.c.bf16 %v3222_v48, %v3222_v48  ;;  %v3636_v48 = vld [vmem:[%s12928_s6 + $0x18] sm:$0xff] }
 0x6ca   : > { %3661 = vmatpush.msrb.mxu1 %v3636_v48  ;;  %3731 = vmatpush.msrb.mxu2 %v3636_v48 }
 0x6cb   : > { %v3319_v52 = vunpack.c.l.b16 %v3263_v49  ;;  %v3635_v49 = vld [vmem:[%s12928_s6 + $0x10] sm:$0xff] }
 0x6cc   : > { %3662 = vmatpush.msrb.mxu1 %v3635_v49  ;;  %3732 = vmatpush.msrb.mxu2 %v3635_v49 }
 0x6cd   : > { %v3324_v53 = vpack.c.b16 %v3319_v52, %v3318_v50  ;;  %v3634_v50 = vld [vmem:[%s12928_s6 + $0x8] sm:$0xff]  ;;  %v3633_v52 = vld [vmem:[%s12928_s6] sm:$0xff] }
 0x6ce   : > { %3663 = vmatpush.msrb.mxu1 %v3634_v50  ;;  %3733 = vmatpush.msrb.mxu2 %v3634_v50 }
 0x6cf   : > { %3396 = vmatmul.bf16.gmra.mxu1 %v3324_v53 }
 0x6d0   : > { %v3225_v56 = vpop.f32.mrf.mxu3  ;;  %3664 = vmatpush.msrb.mxu1 %v3633_v52  ;;  %3734 = vmatpush.msrb.mxu2 %v3633_v52 }
 0x6d1   : > { %v3264_v57 = vpack.c.bf16 %v3225_v56, %v3225_v56 }
 0x6d3   : > { %v3320_v60 = vunpack.c.l.b16 %v3264_v57 }
 0x6d8   : > { %v3227_v58 = vpop.f32.mrf.mxu3 }
 0x6d9   : > { %v3265_v59 = vpack.c.bf16 %v3227_v58, %v3227_v58 }
 0x6db   : > { %v3321_v61 = vunpack.c.l.b16 %v3265_v59 }
 0x6dd   : > { %v3325_v63 = vpack.c.b16 %v3321_v61, %v3320_v60 }
 0x6df   : > { %3401 = vmatmul.bf16.gmra.mxu1 %v3325_v63 }
 0x6e0   : > { %v3230_v62 = vpop.f32.mrf.mxu3 }
 0x6e1   : > { %v3266_v46 = vpack.c.bf16 %v3230_v62, %v3230_v62 }
 0x6e3   : > { %v3532_v1 = vunpack.c.l.b16 %v3266_v46 }
 0x6e8   : > { %v3232_v0 = vpop.f32.mrf.mxu3 }
 0x6e9   : > { %v3267_v51 = vpack.c.bf16 %v3232_v0, %v3232_v0 }
 0x6eb   : > { %v3533_v35 = vunpack.c.l.b16 %v3267_v51 }
 0x6ed   : > { %v3540_v2 = vpack.c.b16 %v3533_v35, %v3532_v1 }
 0x6ef   : > { %3604 = vmatmul.bf16.vlgmr.msrb.gmra.mxu0 %v3540_v2 }
 0x6f0   : > { %v3235_v41 = vpop.f32.mrf.mxu3 }
 0x6f1   : > { %v3268_v6 = vpack.c.bf16 %v3235_v41, %v3235_v41 }
 0x6f2   : > { %v3488_v54 = vpop.f32.mrf.mxu2 }
 0x6f3   : > { %v3534_v10 = vunpack.c.l.b16 %v3268_v6 }
 0x6f8   : > { %v3237_v7 = vpop.f32.mrf.mxu3 }
 0x6f9   : > { %v3269_v9 = vpack.c.bf16 %v3237_v7, %v3237_v7 }
 0x6fa   : > { %v3490_v56 = vpop.f32.mrf.mxu2 }
 0x6fb   : > { %v3535_v15 = vunpack.c.l.b16 %v3269_v9 }
 0x6fd   : > { %v3541_v16 = vpack.c.b16 %v3535_v15, %v3534_v10 }
 0x6ff   : > { %3609 = vmatmul.bf16.gmra.mxu0 %v3541_v16 }
 0x700   : > { %v3240_v17 = vpop.f32.mrf.mxu3 }
 0x701   : > { %v3270_v18 = vpack.c.bf16 %v3240_v17, %v3240_v17 }
 0x702   : > { %v3493_v63 = vpop.f32.mrf.mxu2 }
 0x703   : > { %v3536_v21 = vunpack.c.l.b16 %v3270_v18 }
 0x708   : > { %v3242_v19 = vpop.f32.mrf.mxu3 }
 0x709   : > { %v3271_v20 = vpack.c.bf16 %v3242_v19, %v3242_v19 }
 0x70a   : > { %v3495_v35 = vpop.f32.mrf.mxu2 }
 0x70b   : > { %v3537_v22 = vunpack.c.l.b16 %v3271_v20 }
 0x70d   : > { %v3542_v24 = vpack.c.b16 %v3537_v22, %v3536_v21 }
 0x70f   : > { %3614 = vmatmul.bf16.gmra.mxu0 %v3542_v24 }
 0x710   : > { %v3245_v25 = vpop.f32.mrf.mxu3 }
 0x711   : > { %v3272_v26 = vpack.c.bf16 %v3245_v25, %v3245_v25 }
 0x712   : > { %v3498_v15 = vpop.f32.mrf.mxu2 }
 0x713   : > { %v3538_v30 = vunpack.c.l.b16 %v3272_v26 }
 0x718   : > { %v3247_v27 = vpop.f32.mrf.mxu3 }
 0x719   : > { %v3273_v28 = vpack.c.bf16 %v3247_v27, %v3247_v27 }
 0x71a   : > { %v3500_v24 = vpop.f32.mrf.mxu2 }
 0x71b   : > { %v3539_v31 = vunpack.c.l.b16 %v3273_v28 }
 0x71d   : > { %v3543_v32 = vpack.c.b16 %v3539_v31, %v3538_v30 }
 0x71f   : > { %3619 = vmatmul.bf16.gmra.mxu0 %v3543_v32 }
 0x722   : > { %v3503_v32 = vpop.f32.mrf.mxu2 }
 0x72a   : > { %v3505_v39 = vpop.f32.mrf.mxu2 }
 0x72c   : > { %v3387_v53 = vpop.f32.mrf.mxu1 }
 0x72d   : > { %v3489_v57 = vadd.f32 %v3488_v54, %v3387_v53 }
 0x734   : > { %v3389_v55 = vpop.f32.mrf.mxu1 }
 0x735   : > { %v3491_v62 = vadd.f32 %v3490_v56, %v3389_v55 }
 0x73c   : > { %v3392_v60 = vpop.f32.mrf.mxu1 }
 0x73d   : > { %v3494_v2 = vadd.f32 %v3493_v63, %v3392_v60 }
 0x744   : > { %v3394_v1 = vpop.f32.mrf.mxu1 }
 0x745   : > { %v3496_v10 = vadd.f32 %v3495_v35, %v3394_v1 }
 0x74c   : > { %v3397_v9 = vpop.f32.mrf.mxu1 }
 0x74d   : > { %v3499_v19 = vadd.f32 %v3498_v15, %v3397_v9 }
 0x754   : > { %v3399_v20 = vpop.f32.mrf.mxu1 }
 0x755   : > { %v3501_v26 = vadd.f32 %v3500_v24, %v3399_v20 }
 0x75c   : > { %v3402_v30 = vpop.f32.mrf.mxu1 }
 0x75d   : > { %v3504_v33 = vadd.f32 %v3503_v32, %v3402_v30 }
 0x764   : > { %v3404_v38 = vpop.f32.mrf.mxu1 }
 0x765   : > { %v3506_v40 = vadd.f32 %v3505_v39, %v3404_v38 }
 0x76c   : > { %v3605_v58 = vpop.f32.mrf.mxu0 }
 0x76d   : > { %v11840_v59 = vadd.f32 %v3605_v58, %v3489_v57 }
 0x76f   : > { %v3711_v61 = vmul.f32 %v11840_v59, %v11840_v59  ;;  %3665 = vmatmul.f32.vlgmr.msrb.gmra.mxu1 %v11840_v59 }
 0x771   : > { %3735 = vmatmul.f32.vlgmr.msrb.gmra.mxu2 %v3711_v61 }
 0x774   : > { %v3607_v46 = vpop.f32.mrf.mxu0 }
 0x775   : > { %v11845_v0 = vadd.f32 %v3607_v46, %v3491_v62 }
 0x777   : > { %3668 = vmatmul.f32.gmra.mxu1 %v11845_v0  ;;  %v3712_v51 = vmul.f32 %v11845_v0, %v11845_v0 }
 0x779   : > { %3738 = vmatmul.f32.gmra.mxu2 %v3712_v51 }
 0x77c   : > { %v3610_v41 = vpop.f32.mrf.mxu0 }
 0x77d   : > { %v11850_v6 = vadd.f32 %v3610_v41, %v3494_v2 }
 0x77f   : > { %3671 = vmatmul.f32.gmra.mxu1 %v11850_v6  ;;  %v3713_v7 = vmul.f32 %v11850_v6, %v11850_v6 }
 0x781   : > { %3741 = vmatmul.f32.gmra.mxu2 %v3713_v7 }
 0x784   : > { %v3612_v16 = vpop.f32.mrf.mxu0 }
 0x785   : > { %v11855_v17 = vadd.f32 %v3612_v16, %v3496_v10 }
 0x787   : > { %3674 = vmatmul.f32.gmra.mxu1 %v11855_v17  ;;  %v3714_v18 = vmul.f32 %v11855_v17, %v11855_v17 }
 0x789   : > { %3744 = vmatmul.f32.gmra.mxu2 %v3714_v18 }
 0x78c   : > { %v3615_v21 = vpop.f32.mrf.mxu0 }
 0x78d   : > { %v11860_v22 = vadd.f32 %v3615_v21, %v3499_v19 }
 0x78f   : > { %3677 = vmatmul.f32.gmra.mxu1 %v11860_v22  ;;  %v3715_v25 = vmul.f32 %v11860_v22, %v11860_v22 }
 0x791   : > { %3747 = vmatmul.f32.gmra.mxu2 %v3715_v25 }
 0x794   : > { %v3617_v27 = vpop.f32.mrf.mxu0 }
 0x795   : > { %v11865_v28 = vadd.f32 %v3617_v27, %v3501_v26 }
 0x797   : > { %3680 = vmatmul.f32.gmra.mxu1 %v11865_v28  ;;  %v3716_v31 = vmul.f32 %v11865_v28, %v11865_v28 }
 0x799   : > { %3750 = vmatmul.f32.gmra.mxu2 %v3716_v31 }
 0x79c   : > { %v3620_v34 = vpop.f32.mrf.mxu0 }
 0x79d   : > { %v11870_v36 = vadd.f32 %v3620_v34, %v3504_v33 }
 0x79f   : > { %3683 = vmatmul.f32.gmra.mxu1 %v11870_v36  ;;  %v3717_v37 = vmul.f32 %v11870_v36, %v11870_v36 }
 0x7a1   : > { %3753 = vmatmul.f32.gmra.mxu2 %v3717_v37 }
 0x7a4   : > { %v3622_v42 = vpop.f32.mrf.mxu0 }
 0x7a5   : > { %v11875_v43 = vadd.f32 %v3622_v42, %v3506_v40 }
 0x7a7   : > { %3686 = vmatmul.f32.gmra.mxu1 %v11875_v43  ;;  %v3718_v44 = vmul.f32 %v11875_v43, %v11875_v43 }
 0x7a9   : > { %3756 = vmatmul.f32.gmra.mxu2 %v3718_v44 }
 0x7ec   : > { %v3666_v45 = vpop.f32.mrf.mxu1 }
 0x7ed   : > { %v3690_v60 = vsel %vm2811_vm1, %v3666_v45, 0.0 }
 0x7f4   : > { %v3669_v47 = vpop.f32.mrf.mxu1  ;;  %v3736_v48 = vpop.f32.mrf.mxu2 }
 0x7f5   : > { %v3691_v58 = vsel %vm2811_vm1, %v3669_v47, 0.0  ;;  %v3760_v10 = vsel %vm2811_vm1, %v3736_v48, 0.0 }
 0x7f6   : > { %v3692_v63 = vadd.f32 %v3691_v58, %v3690_v60 }
 0x7fc   : > { %v3672_v49 = vpop.f32.mrf.mxu1  ;;  %v3739_v50 = vpop.f32.mrf.mxu2 }
 0x7fd   : > { %v3693_v61 = vsel %vm2811_vm1, %v3672_v49, 0.0  ;;  %v3761_v41 = vsel %vm2811_vm1, %v3739_v50, 0.0 }
 0x7fe   : > { %v3694_v46 = vadd.f32 %v3693_v61, %v3692_v63  ;;  %v3762_v18 = vadd.f32 %v3761_v41, %v3760_v10  ;;  %v3785_v10 = vld [vmem:[%s1734_s30] sm:$0x1]  ;;  %s12933_s30 = sld [smem:[#allocation78_spill]] }
 0x804   : > { %v3675_v52 = vpop.f32.mrf.mxu1  ;;  %v3742_v53 = vpop.f32.mrf.mxu2 }
 0x805   : > { %v3695_v62 = vsel %vm2811_vm1, %v3675_v52, 0.0  ;;  %v3763_v15 = vsel %vm2811_vm1, %v3742_v53, 0.0  ;;  %v3801_v53 = vld [vmem:[%s12930_s12] sm:$0xf] }
 0x806   : > { %v3696_v2 = vadd.f32 %v3695_v62, %v3694_v46  ;;  %v3764_v21 = vadd.f32 %v3763_v15, %v3762_v18  ;;  %8555 = vmatpush.msk.msra.mxu0 %vm2927_vm2, %v3801_v53  ;;  %8557 = vmatpush.msk.msra.mxu1 %vm2927_vm2, %v3801_v53  ;;  %v3798_v18 = vld [vmem:[%s1743_s0] sm:$0x1]  ;;  %s12934_s0 = sld [smem:[#allocation79_spill]] }
 0x80c   : > { %v3678_v54 = vpop.f32.mrf.mxu1  ;;  %v3745_v55 = vpop.f32.mrf.mxu2  ;;  %s12935_s26 = smov %s12934_s0 }
 0x80d   : > { %v3697_v35 = vsel %vm2811_vm1, %v3678_v54, 0.0  ;;  %v3765_v20 = vsel %vm2811_vm1, %v3745_v55, 0.0 }
 0x80e   : > { %v3698_v9 = vadd.f32 %v3697_v35, %v3696_v2  ;;  %v3766_v31 = vadd.f32 %v3765_v20, %v3764_v21  ;;  %v3875_v21 = vld [vmem:[#allocation3 + $0x30] sm:$0xff] }
 0x814   : > { %v3681_v56 = vpop.f32.mrf.mxu1  ;;  %v3748_v57 = vpop.f32.mrf.mxu2 }
 0x815   : > { %v3699_v7 = vsel %vm2811_vm1, %v3681_v56, 0.0  ;;  %v3767_v27 = vsel %vm2811_vm1, %v3748_v57, 0.0 }
 0x816   : > { %v3700_v19 = vadd.f32 %v3699_v7, %v3698_v9  ;;  %v3768_v34 = vadd.f32 %v3767_v27, %v3766_v31  ;;  %v3874_v27 = vld [vmem:[#allocation3 + $0x8] sm:$0xff] }
 0x81c   : > { %v3684_v51 = vpop.f32.mrf.mxu1  ;;  %v3751_v1 = vpop.f32.mrf.mxu2 }
 0x81d   : > { %v3701_v16 = vsel %vm2811_vm1, %v3684_v51, 0.0  ;;  %v3769_v33 = vsel %vm2811_vm1, %v3751_v1, 0.0 }
 0x81e   : > { %v3702_v24 = vadd.f32 %v3701_v16, %v3700_v19  ;;  %v3770_v39 = vadd.f32 %v3769_v33, %v3768_v34  ;;  %v3869_v33 = vld [vmem:[#allocation3] sm:$0xff]  ;;  %v3870_v34 = vld [vmem:[#allocation3 + $0x18] sm:$0xff] }
 0x824   : > { %v3687_v25 = vpop.f32.mrf.mxu1  ;;  %v3754_v26 = vpop.f32.mrf.mxu2 }
 0x825   : > { %v3703_v30 = vsel %vm2811_vm1, %v3687_v25, 0.0  ;;  %v3771_v38 = vsel %vm2811_vm1, %v3754_v26, 0.0  ;;  %v3873_v26 = vld [vmem:[#allocation3 + $0x28] sm:$0xff] }
 0x826   : > { %v3704_v32 = vadd.f32 %v3703_v30, %v3702_v24  ;;  %v3772_v44 = vadd.f32 %v3771_v38, %v3770_v39  ;;  %v3876_v24 = vld [vmem:[#allocation3 + $0x38] sm:$0xff]  ;;  %v3871_v30 = vld [vmem:[#allocation3 + $0x10] sm:$0xff]  ;;  %v3881_v39 = vmul.f32 0.95, %v3873_v26 }
 0x827   : > { %v3884_v38 = vmul.f32 0.95, %v3876_v24 }
 0x828   : > { %v3705_v37 = vrot.slane %v3704_v32, 4 }
 0x82a   : > { %v3706_v40 = vadd.f32 %v3705_v37, %v3704_v32  ;;  %v3872_v32 = vld [vmem:[#allocation3 + $0x20] sm:$0xff]  ;;  %v3883_v37 = vmul.f32 0.95, %v3875_v21 }
 0x82c   : > { %v3707_v42 = vrot.slane %v3706_v40, 2  ;;  %v3757_v45 = vpop.f32.mrf.mxu2 }
 0x82d   : > { %v3773_v47 = vsel %vm2811_vm1, %v3757_v45, 0.0 }
 0x82e   : > { %v3708_v48 = vadd.f32 %v3707_v42, %v3706_v40  ;;  %v3774_v49 = vadd.f32 %v3773_v47, %v3772_v44  ;;  %v3882_v40 = vmul.f32 0.95, %v3874_v27  ;;  %v3879_v42 = vmul.f32 0.95, %v3871_v30 }
 0x82f   : > { %v3880_v47 = vmul.f32 0.95, %v3872_v32  ;;  %v9415_v32 = vld [vmem:[%s12933_s30 + $0x8] sm:$0xff] }
 0x830   : > { %v3709_v50 = vrot.slane %v3708_v48, 1  ;;  %v3775_v52 = vrot.slane %v3774_v49, 4 }
 0x832   : > { %v3776_v54 = vadd.f32 %v3775_v52, %v3774_v49  ;;  %v3710_v55 = vadd.f32 %v3709_v50, %v3708_v48  ;;  %v3877_v48 = vmul.f32 0.95, %v3869_v33  ;;  %v3878_v49 = vmul.f32 0.95, %v3870_v34  ;;  %v9416_v33 = vld [vmem:[%s12933_s30 + $0x10] sm:$0xff]  ;;  %v9417_v34 = vld [vmem:[%s12933_s30 + $0x18] sm:$0xff] }
 0x834   : > { %v3777_v56 = vrot.slane %v3776_v54, 2  ;;  %v3781_v58 = vmul.f32 0.00048828125, %v3710_v55 }
 0x836   : > { %v3778_v57 = vadd.f32 %v3777_v56, %v3776_v54  ;;  %v3783_v63 = vmul.f32 %v3781_v58, %v3781_v58 }
 0x838   : > { %v3779_v60 = vrot.slane %v3778_v57, 1 }
 0x83a   : > { %v3780_v61 = vadd.f32 %v3779_v60, %v3778_v57 }
 0x83c   : > { %v3782_v62 = vmul.f32 0.00048828125, %v3780_v61 }
 0x83e   : > { %v3784_v46 = vsub.f32 %v3782_v62, %v3783_v63 }
 0x840   : > { %v3786_v51 = vadd.f32 0.0001, %v3784_v46 }
 0x842   : > { %9813 = vrsqrt.f32 %v3786_v51  ;;  %vm3793_vm6 = vweird.f32 %v3786_v51 }
 0x848   : > { %v9814_v1 = vpop.eup %9813 }
 0x849   : > { %v3788_v35 = vmul.f32 %v9814_v1, %v3786_v51  ;;  %vm3794_vm5 = vweird.f32 %v9814_v1 }
 0x84a   : > { %vm3795_vm7 = vmor %vm3793_vm6, %vm3794_vm5 }
 0x84b   : > { %v3789_v2 = vmul.f32 %v9814_v1, %v3788_v35 }
 0x84d   : > { %v3790_v41 = vmul.f32 0.5, %v3789_v2 }
 0x84f   : > { %v3791_v7 = vsub.f32 1.5, %v3790_v41 }
 0x851   : > { %v3792_v9 = vmul.f32 %v9814_v1, %v3791_v7 }
 0x853   : > { %v3796_v15 = vsel %vm3795_vm7, %v9814_v1, %v3792_v9 }
 0x854   : > { %v3797_v16 = vmul.f32 %v3796_v15, %v3785_v10 }
 0x856   : > { %8556 = vmatmul.msk.f32.vlgmr.msra.gmra.mxu0 %vm2811_vm1, %v3797_v16  ;;  %v3799_v19 = vmul.f32 %v3797_v16, %v3781_v58 }
 0x858   : > { %v3800_v20 = vsub.f32 %v3798_v18, %v3799_v19 }
 0x85a   : > { %8558 = vmatmul.msk.f32.vlgmr.msra.gmra.mxu1 %vm2811_vm1, %v3800_v20 }
 0x8d3   : > { %v3825_v25 = vpop.f32.mrf.mxu0 }
 0x8d4   : > { %v3828_v31 = vperm.slane %v3825_v25, 0 }
 0x8d6   : > { %v3835_v45 = vmul.f32 %v3828_v31, %v11870_v36  ;;  %v3836_v52 = vmul.f32 %v3828_v31, %v11875_v43  ;;  %v3833_v53 = vmul.f32 %v3828_v31, %v11860_v22  ;;  %v3834_v54 = vmul.f32 %v3828_v31, %v11865_v28 }
 0x8d7   : > { %v3857_v44 = vpop.f32.mrf.mxu1  ;;  %v3831_v55 = vmul.f32 %v3828_v31, %v11850_v6  ;;  %v3832_v56 = vmul.f32 %v3828_v31, %v11855_v17  ;;  %v3829_v57 = vmul.f32 %v3828_v31, %v11840_v59  ;;  %v3830_v58 = vmul.f32 %v3828_v31, %v11845_v0  ;;  %v9414_v31 = vld [vmem:[%s12933_s30] sm:$0xff] }
 0x8d8   : > { %v3860_v50 = vperm.slane %v3857_v44, 0  ;;  %v9420_v44 = vld [vmem:[%s12933_s30 + $0x30] sm:$0xff] }
 0x8da   : > { %v3867_v60 = vadd.f32 %v3860_v50, %v3835_v45  ;;  %v3868_v36 = vadd.f32 %v3860_v50, %v3836_v52  ;;  %v3865_v61 = vadd.f32 %v3860_v50, %v3833_v53  ;;  %v3866_v63 = vadd.f32 %v3860_v50, %v3834_v54  ;;  %v9431_v45 = vld [vmem:[%s12935_s26 + $0x28] sm:$0xff]  ;;  %v9426_v53 = vld [vmem:[%s12935_s26] sm:$0xff]  ;;  %v9440_v54 = vld [vmem:[%s12935_s26 + $0x70] sm:$0xff] }
 0x8db   : > { %v3863_v62 = vadd.f32 %v3860_v50, %v3831_v55  ;;  %v3864_v46 = vadd.f32 %v3860_v50, %v3832_v56  ;;  %v3861_v51 = vadd.f32 %v3860_v50, %v3829_v57  ;;  %v3862_v43 = vadd.f32 %v3860_v50, %v3830_v58  ;;  %v9428_v50 = vld [vmem:[%s12935_s26 + $0x10] sm:$0xff]  ;;  %v9427_v52 = vld [vmem:[%s12935_s26 + $0x8] sm:$0xff]  ;;  %v9422_v55 = vld [vmem:[%s12933_s30 + $0x40] sm:$0xff] }
 0x8dc   : > { %v3891_v1 = vadd.f32 %v3883_v37, %v3867_v60  ;;  %v3892_v22 = vadd.f32 %v3884_v38, %v3868_v36  ;;  %v3889_v35 = vadd.f32 %v3881_v39, %v3865_v61  ;;  %v3890_v28 = vadd.f32 %v3882_v40, %v3866_v63  ;;  %v9418_v37 = vld [vmem:[%s12933_s30 + $0x20] sm:$0xff]  ;;  %v9419_v38 = vld [vmem:[%s12933_s30 + $0x28] sm:$0xff]  ;;  %v9441_v39 = vld [vmem:[%s12934_s0 + $0x78] sm:$0xff]  ;;  %s12938_s0 = sld [smem:[#allocation83_spill]] }
 0x8dd   : > { %v3887_v2 = vadd.f32 %v3879_v42, %v3863_v62  ;;  %v3888_v6 = vadd.f32 %v3880_v47, %v3864_v46  ;;  %v3885_v41 = vadd.f32 %v3877_v48, %v3861_v51  ;;  %v3886_v17 = vadd.f32 %v3878_v49, %v3862_v43  ;;  %v9433_v40 = vld [vmem:[%s12935_s26 + $0x38] sm:$0xff]  ;;  %4254 = vmatpush.bf16.msra.mxu3 %v9441_v39  ;;  %v9432_v42 = vld [vmem:[%s12935_s26 + $0x30] sm:$0xff]  ;;  %v9430_v47 = vld [vmem:[%s12935_s26 + $0x20] sm:$0xff] }
 0x8de   : > { %vm3899_vm8 = vcmp.gt.f32.partialorder %v3891_v1, 1.0  ;;  %vm3900_vm9 = vcmp.gt.f32.partialorder %v3892_v22, 1.0  ;;  %vm3897_vm10 = vcmp.gt.f32.partialorder %v3889_v35, 1.0  ;;  %vm3898_vm11 = vcmp.gt.f32.partialorder %v3890_v28, 1.0  ;;  %4355 = vmatpush.bf16.msrb.mxu0 %v9433_v40  ;;  %v9429_v48 = vld [vmem:[%s12935_s26 + $0x18] sm:$0xff]  ;;  %v9423_v36 = vld [vmem:[%s12933_s30 + $0x48] sm:$0xff] }
 0x8df   : > { %v8565_v59 = vsel %vm3899_vm8, 1.0, %v10833_v23  ;;  %v8566_v0 = vsel %vm3900_vm9, 1.0, %v10833_v23  ;;  %vm8615_vm12 = vmpackc.low %vm3900_vm9, %vm3899_vm8  ;;  %v8563_v7 = vsel %vm3897_vm10, 1.0, %v10833_v23  ;;  %v8564_v9 = vsel %vm3898_vm11, 1.0, %v10833_v23  ;;  %v9421_v49 = vld [vmem:[%s12933_s30 + $0x38] sm:$0xff]  ;;  %v9439_v62 = vld [vmem:[%s12935_s26 + $0x68] sm:$0xff] }
 0x8e0   : > { %v3923_v10 = vsub.f32 %v3891_v1, %v8565_v59  ;;  %v3924_v15 = vsub.f32 %v3892_v22, %v8566_v0  ;;  %8616 = vmatpush.bf16.msk.msra.mxu2 %vm8615_vm12, %v10834_v8  ;;  %v3921_v16 = vsub.f32 %v3889_v35, %v8563_v7  ;;  %v3922_v18 = vsub.f32 %v3890_v28, %v8564_v9  ;;  %vm8617_vm3 = vmpackc.low %vm3898_vm11, %vm3897_vm10  ;;  %v9424_v35 = vld [vmem:[%s12933_s30 + $0x50] sm:$0xff]  ;;  %v9437_v59 = vld [vmem:[%s12935_s26 + $0x58] sm:$0xff] }
 0x8e1   : > { %vm3895_vm13 = vcmp.gt.f32.partialorder %v3887_v2, 1.0  ;;  %vm3896_vm14 = vcmp.gt.f32.partialorder %v3888_v6, 1.0  ;;  %vm3893_vm15 = vcmp.gt.f32.partialorder %v3885_v41, 1.0  ;;  %vm3894_vm0 = vcmp.gt.f32.partialorder %v3886_v17, 1.0  ;;  %4255 = vmatpush.bf16.msra.mxu3 %v9440_v54  ;;  %v9436_v0 = vld [vmem:[%s12935_s26 + $0x50] sm:$0xff]  ;;  %v9447_v54 = vld [vmem:[%s12935_s26 + $0xa8] sm:$0xff] }
 0x8e2   : > { %3931 = vst [vmem:[#allocation3 + $0x30] sm:$0xff] %v3923_v10  ;;  %v8561_v19 = vsel %vm3895_vm13, 1.0, %v10833_v23  ;;  %v8562_v20 = vsel %vm3896_vm14, 1.0, %v10833_v23  ;;  %v8559_v21 = vsel %vm3893_vm15, 1.0, %v10833_v23  ;;  %v8560_v24 = vsel %vm3894_vm0, 1.0, %v10833_v23  ;;  %vm8619_vm5 = vmpackc.low %vm3896_vm14, %vm3895_vm13  ;;  %4356 = vmatpush.bf16.msrb.mxu0 %v9432_v42 }
 0x8e3   : > { %3932 = vst [vmem:[#allocation3 + $0x38] sm:$0xff] %v3924_v15  ;;  %v3919_v25 = vsub.f32 %v3887_v2, %v8561_v19  ;;  %v3920_v26 = vsub.f32 %v3888_v6, %v8562_v20  ;;  %v3917_v27 = vsub.f32 %v3885_v41, %v8559_v21  ;;  %v3918_v30 = vsub.f32 %v3886_v17, %v8560_v24  ;;  %vm8621_vm6 = vmpackc.low %vm3894_vm0, %vm3893_vm15  ;;  %v9438_v6 = vld [vmem:[%s12935_s26 + $0x60] sm:$0xff]  ;;  %v9425_v15 = vld [vmem:[%s12933_s30 + $0x58] sm:$0xff] }
 0x8e4   : > { %3929 = vst [vmem:[#allocation3 + $0x28] sm:$0xff] %v3921_v16  ;;  %8618 = vmatpush.bf16.msk.msra.mxu2 %vm8617_vm3, %v10834_v8  ;;  %v9435_v20 = vld [vmem:[%s12935_s26 + $0x48] sm:$0xff]  ;;  %v9434_v21 = vld [vmem:[%s12935_s26 + $0x40] sm:$0xff]  ;;  %vm5266_vm0 = vcmask 64512  }
 0x8e5   : > { %3930 = vst [vmem:[#allocation3 + $0x8] sm:$0xff] %v3922_v18  ;;  %4256 = vmatpush.bf16.msra.mxu3 %v9439_v62 }
 0x8e6   : > { %3927 = vst [vmem:[#allocation3 + $0x10] sm:$0xff] %v3919_v25  ;;  %4357 = vmatpush.bf16.msrb.mxu0 %v9431_v45  ;;  %v9449_v45 = vld [vmem:[%s12935_s26 + $0xb8] sm:$0xff] }
 0x8e7   : > { %3928 = vst [vmem:[#allocation3 + $0x20] sm:$0xff] %v3920_v26  ;;  %4472 = vmatpush.bf16.msrb.mxu1 %v9449_v45 }
 0x8e8   : > { %8620 = vmatpush.bf16.msk.msra.mxu2 %vm8619_vm5, %v10834_v8  ;;  %3925 = vst [vmem:[#allocation3] sm:$0xff] %v3917_v27 }
 0x8e9   : > { %3926 = vst [vmem:[#allocation3 + $0x18] sm:$0xff] %v3918_v30  ;;  %4257 = vmatpush.bf16.msra.mxu3 %v9438_v6 }
 0x8ea   : > { %4358 = vmatpush.bf16.msrb.mxu0 %v9430_v47  ;;  %v9448_v47 = vld [vmem:[%s12935_s26 + $0xb0] sm:$0xff] }
 0x8eb   : > { %4473 = vmatpush.bf16.msrb.mxu1 %v9448_v47 }
 0x8ec   : > { %8622 = vmatpush.bf16.msk.msra.mxu2 %vm8621_vm6, %v10834_v8 }
 0x8ed   : > { %4258 = vmatpush.bf16.msra.mxu3 %v9437_v59 }
 0x8ee   : > { %4359 = vmatpush.bf16.msrb.mxu0 %v9429_v48 }
 0x8ef   : > { %8623 = vmatmul.msk.bf16.vlgmr.msra.gmra.mxu2 %vm3144_vm4, %v9414_v31  ;;  %4474 = vmatpush.bf16.msrb.mxu1 %v9447_v54  ;;  %v4519_v54 = vld [vmem:[%s12928_s6 + $0x50] sm:$0xff] }
 0x8f1   : > { %4259 = vmatpush.bf16.msra.mxu3 %v9436_v0 }
 0x8f2   : > { %4360 = vmatpush.bf16.msrb.mxu0 %v9428_v50 }
 0x8f5   : > { %4260 = vmatpush.bf16.msra.mxu3 %v9435_v20 }
 0x8f6   : > { %4361 = vmatpush.bf16.msrb.mxu0 %v9427_v52 }
 0x8f9   : > { %4261 = vmatpush.bf16.msra.mxu3 %v9434_v21 }
 0x8fa   : > { %4362 = vmatpush.bf16.msrb.mxu0 %v9426_v53 }
 0x8ff   : > { %8624 = vmatmul.msk.bf16.gmra.mxu2 %vm3144_vm4, %v9415_v32 }
 0x90f   : > { %8625 = vmatmul.msk.bf16.gmra.mxu2 %vm3144_vm4, %v9416_v33 }
 0x91f   : > { %8626 = vmatmul.msk.bf16.gmra.mxu2 %vm3144_vm4, %v9417_v34 }
 0x92f   : > { %8627 = vmatmul.msk.bf16.gmra.mxu2 %vm3144_vm4, %v9418_v37 }
 0x93f   : > { %8628 = vmatmul.msk.bf16.gmra.mxu2 %vm3144_vm4, %v9419_v38 }
 0x94f   : > { %8629 = vmatmul.msk.bf16.gmra.mxu2 %vm3144_vm4, %v9420_v44 }
 0x95f   : > { %8630 = vmatmul.msk.bf16.gmra.mxu2 %vm3144_vm4, %v9421_v49 }
 0x96f   : > { %8631 = vmatmul.msk.bf16.gmra.mxu2 %vm3144_vm4, %v9422_v55 }
 0x972   : > { %v4066_v56 = vpop.f32.mrf.mxu2 }
 0x973   : > { %v4126_v57 = vpack.c.bf16 %v4066_v56, %v4066_v56  ;;  %v9446_v56 = vld [vmem:[%s12935_s26 + $0xa0] sm:$0xff] }
 0x974   : > { %4475 = vmatpush.bf16.msrb.mxu1 %v9446_v56  ;;  %v4517_v56 = vld [vmem:[%s12928_s6 + $0x40] sm:$0xff] }
 0x975   : > { %v4291_v61 = vunpack.c.l.b16 %v4126_v57 }
 0x97a   : > { %v4068_v58 = vpop.f32.mrf.mxu2 }
 0x97b   : > { %v4127_v60 = vpack.c.bf16 %v4068_v58, %v4068_v58  ;;  %v9445_v58 = vld [vmem:[%s12935_s26 + $0x98] sm:$0xff] }
 0x97c   : > { %4476 = vmatpush.bf16.msrb.mxu1 %v9445_v58  ;;  %v4515_v58 = vld [vmem:[%s12928_s6 + $0x30] sm:$0xff] }
 0x97d   : > { %v4292_v63 = vunpack.c.l.b16 %v4127_v60  ;;  %v9444_v60 = vld [vmem:[%s12935_s26 + $0x90] sm:$0xff] }
 0x97f   : > { %v4299_v46 = vpack.c.b16 %v4292_v63, %v4291_v61  ;;  %8632 = vmatmul.msk.bf16.gmra.mxu2 %vm3144_vm4, %v9423_v36 }
 0x980   : > { %4477 = vmatpush.bf16.msrb.mxu1 %v9444_v60  ;;  %v4514_v60 = vld [vmem:[%s12928_s6 + $0x28] sm:$0xff] }
 0x981   : > { %4363 = vmatmul.bf16.vlgmr.msrb.gmra.mxu0 %v4299_v46 }
 0x982   : > { %v4071_v51 = vpop.f32.mrf.mxu2 }
 0x983   : > { %v4128_v43 = vpack.c.bf16 %v4071_v51, %v4071_v51 }
 0x985   : > { %v4293_v28 = vunpack.c.l.b16 %v4128_v43  ;;  %v9443_v43 = vld [vmem:[%s12935_s26 + $0x88] sm:$0xff] }
 0x986   : > { %4478 = vmatpush.bf16.msrb.mxu1 %v9443_v43 }
 0x98a   : > { %v4073_v1 = vpop.f32.mrf.mxu2 }
 0x98b   : > { %v4129_v22 = vpack.c.bf16 %v4073_v1, %v4073_v1  ;;  %v9442_v1 = vld [vmem:[%s12935_s26 + $0x80] sm:$0xff] }
 0x98c   : > { %4479 = vmatpush.bf16.msrb.mxu1 %v9442_v1 }
 0x98d   : > { %v4294_v2 = vunpack.c.l.b16 %v4129_v22 }
 0x98f   : > { %8633 = vmatmul.msk.bf16.gmra.mxu2 %vm3144_vm4, %v9424_v35  ;;  %v4300_v41 = vpack.c.b16 %v4294_v2, %v4293_v28 }
 0x991   : > { %4368 = vmatmul.bf16.gmra.mxu0 %v4300_v41 }
 0x992   : > { %v4076_v17 = vpop.f32.mrf.mxu2 }
 0x993   : > { %v4130_v7 = vpack.c.bf16 %v4076_v17, %v4076_v17 }
 0x995   : > { %v4295_v16 = vunpack.c.l.b16 %v4130_v7 }
 0x99a   : > { %v4078_v9 = vpop.f32.mrf.mxu2 }
 0x99b   : > { %v4131_v10 = vpack.c.bf16 %v4078_v9, %v4078_v9 }
 0x99d   : > { %v4296_v18 = vunpack.c.l.b16 %v4131_v10 }
 0x99f   : > { %8634 = vmatmul.msk.bf16.gmra.mxu2 %vm3144_vm4, %v9425_v15  ;;  %v4301_v19 = vpack.c.b16 %v4296_v18, %v4295_v16 }
 0x9a1   : > { %4373 = vmatmul.bf16.gmra.mxu0 %v4301_v19 }
 0x9a2   : > { %v4081_v24 = vpop.f32.mrf.mxu2 }
 0x9a3   : > { %v4132_v25 = vpack.c.bf16 %v4081_v24, %v4081_v24 }
 0x9a5   : > { %v4297_v30 = vunpack.c.l.b16 %v4132_v25 }
 0x9aa   : > { %v4083_v26 = vpop.f32.mrf.mxu2 }
 0x9ab   : > { %v4133_v27 = vpack.c.bf16 %v4083_v26, %v4083_v26 }
 0x9ad   : > { %v4298_v31 = vunpack.c.l.b16 %v4133_v27 }
 0x9af   : > { %v4302_v32 = vpack.c.b16 %v4298_v31, %v4297_v30 }
 0x9b1   : > { %4378 = vmatmul.bf16.gmra.mxu0 %v4302_v32 }
 0x9b2   : > { %v4086_v33 = vpop.f32.mrf.mxu2 }
 0x9b3   : > { %v4134_v34 = vpack.c.bf16 %v4086_v33, %v4086_v33 }
 0x9b5   : > { %v4190_v39 = vunpack.c.l.b16 %v4134_v34 }
 0x9ba   : > { %v4088_v37 = vpop.f32.mrf.mxu2 }
 0x9bb   : > { %v4135_v38 = vpack.c.bf16 %v4088_v37, %v4088_v37 }
 0x9bd   : > { %v4191_v40 = vunpack.c.l.b16 %v4135_v38 }
 0x9bf   : > { %v4198_v42 = vpack.c.b16 %v4191_v40, %v4190_v39 }
 0x9c1   : > { %4262 = vmatmul.bf16.vlgmr.msra.gmra.mxu3 %v4198_v42 }
 0x9c2   : > { %v4091_v44 = vpop.f32.mrf.mxu2 }
 0x9c3   : > { %v4136_v48 = vpack.c.bf16 %v4091_v44, %v4091_v44 }
 0x9c5   : > { %v4192_v52 = vunpack.c.l.b16 %v4136_v48  ;;  %v4524_v48 = vld [vmem:[%s12928_s6 + $0x78] sm:$0xff] }
 0x9c6   : > { %4525 = vmatpush.msrb.mxu3 %v4524_v48  ;;  %4595 = vmatpush.msra.mxu0 %v4524_v48 }
 0x9ca   : > { %v4093_v49 = vpop.f32.mrf.mxu2 }
 0x9cb   : > { %v4137_v50 = vpack.c.bf16 %v4093_v49, %v4093_v49  ;;  %v4523_v49 = vld [vmem:[%s12928_s6 + $0x70] sm:$0xff] }
 0x9cc   : > { %4526 = vmatpush.msrb.mxu3 %v4523_v49  ;;  %4596 = vmatpush.msra.mxu0 %v4523_v49 }
 0x9cd   : > { %v4193_v53 = vunpack.c.l.b16 %v4137_v50  ;;  %v4522_v50 = vld [vmem:[%s12928_s6 + $0x68] sm:$0xff] }
 0x9ce   : > { %4527 = vmatpush.msrb.mxu3 %v4522_v50  ;;  %4597 = vmatpush.msra.mxu0 %v4522_v50 }
 0x9cf   : > { %v4199_v55 = vpack.c.b16 %v4193_v53, %v4192_v52  ;;  %v4521_v52 = vld [vmem:[%s12928_s6 + $0x60] sm:$0xff]  ;;  %v4520_v53 = vld [vmem:[%s12928_s6 + $0x58] sm:$0xff] }
 0x9d0   : > { %4528 = vmatpush.msrb.mxu3 %v4521_v52  ;;  %4598 = vmatpush.msra.mxu0 %v4521_v52 }
 0x9d1   : > { %4267 = vmatmul.bf16.gmra.mxu3 %v4199_v55  ;;  %v4518_v55 = vld [vmem:[%s12928_s6 + $0x48] sm:$0xff] }
 0x9d2   : > { %v4096_v57 = vpop.f32.mrf.mxu2  ;;  %4529 = vmatpush.msrb.mxu3 %v4520_v53  ;;  %4599 = vmatpush.msra.mxu0 %v4520_v53 }
 0x9d3   : > { %v4138_v36 = vpack.c.bf16 %v4096_v57, %v4096_v57  ;;  %v4516_v57 = vld [vmem:[%s12928_s6 + $0x38] sm:$0xff] }
 0x9d4   : > { %4530 = vmatpush.msrb.mxu3 %v4519_v54  ;;  %4600 = vmatpush.msra.mxu0 %v4519_v54 }
 0x9d5   : > { %v4194_v62 = vunpack.c.l.b16 %v4138_v36  ;;  %v4513_v36 = vld [vmem:[%s12928_s6 + $0x20] sm:$0xff] }
 0x9d6   : > { %4531 = vmatpush.msrb.mxu3 %v4518_v55  ;;  %4601 = vmatpush.msra.mxu0 %v4518_v55 }
 0x9d8   : > { %4532 = vmatpush.msrb.mxu3 %v4517_v56  ;;  %4602 = vmatpush.msra.mxu0 %v4517_v56 }
 0x9da   : > { %v4098_v61 = vpop.f32.mrf.mxu2  ;;  %4533 = vmatpush.msrb.mxu3 %v4516_v57  ;;  %4603 = vmatpush.msra.mxu0 %v4516_v57 }
 0x9db   : > { %v4139_v63 = vpack.c.bf16 %v4098_v61, %v4098_v61  ;;  %v4512_v61 = vld [vmem:[%s12928_s6 + $0x18] sm:$0xff] }
 0x9dc   : > { %4534 = vmatpush.msrb.mxu3 %v4515_v58  ;;  %4604 = vmatpush.msra.mxu0 %v4515_v58 }
 0x9dd   : > { %v4195_v46 = vunpack.c.l.b16 %v4139_v63  ;;  %v4511_v63 = vld [vmem:[%s12928_s6 + $0x10] sm:$0xff] }
 0x9de   : > { %4535 = vmatpush.msrb.mxu3 %v4514_v60  ;;  %4605 = vmatpush.msra.mxu0 %v4514_v60 }
 0x9df   : > { %v4200_v51 = vpack.c.b16 %v4195_v46, %v4194_v62  ;;  %v4510_v62 = vld [vmem:[%s12928_s6 + $0x8] sm:$0xff]  ;;  %v4509_v46 = vld [vmem:[%s12928_s6] sm:$0xff] }
 0x9e0   : > { %4536 = vmatpush.msrb.mxu3 %v4513_v36  ;;  %4606 = vmatpush.msra.mxu0 %v4513_v36 }
 0x9e1   : > { %4272 = vmatmul.bf16.gmra.mxu3 %v4200_v51 }
 0x9e2   : > { %v4101_v22 = vpop.f32.mrf.mxu2  ;;  %4537 = vmatpush.msrb.mxu3 %v4512_v61  ;;  %4607 = vmatpush.msra.mxu0 %v4512_v61 }
 0x9e3   : > { %v4140_v35 = vpack.c.bf16 %v4101_v22, %v4101_v22 }
 0x9e4   : > { %4538 = vmatpush.msrb.mxu3 %v4511_v63  ;;  %4608 = vmatpush.msra.mxu0 %v4511_v63 }
 0x9e5   : > { %v4196_v6 = vunpack.c.l.b16 %v4140_v35 }
 0x9e6   : > { %4539 = vmatpush.msrb.mxu3 %v4510_v62  ;;  %4609 = vmatpush.msra.mxu0 %v4510_v62 }
 0x9e8   : > { %4540 = vmatpush.msrb.mxu3 %v4509_v46  ;;  %4610 = vmatpush.msra.mxu0 %v4509_v46 }
 0x9ea   : > { %v4103_v28 = vpop.f32.mrf.mxu2 }
 0x9eb   : > { %v4141_v2 = vpack.c.bf16 %v4103_v28, %v4103_v28 }
 0x9ed   : > { %v4197_v41 = vunpack.c.l.b16 %v4141_v2 }
 0x9ef   : > { %v4201_v17 = vpack.c.b16 %v4197_v41, %v4196_v6 }
 0x9f1   : > { %4277 = vmatmul.bf16.gmra.mxu3 %v4201_v17 }
 0x9f2   : > { %v4106_v59 = vpop.f32.mrf.mxu2 }
 0x9f3   : > { %v4142_v0 = vpack.c.bf16 %v4106_v59, %v4106_v59 }
 0x9f5   : > { %v4408_v10 = vunpack.c.l.b16 %v4142_v0 }
 0x9fa   : > { %v4108_v7 = vpop.f32.mrf.mxu2 }
 0x9fb   : > { %v4143_v9 = vpack.c.bf16 %v4108_v7, %v4108_v7 }
 0x9fd   : > { %v4409_v15 = vunpack.c.l.b16 %v4143_v9 }
 0x9fe   : > { %v4364_v43 = vpop.f32.mrf.mxu0 }
 0x9ff   : > { %v4416_v16 = vpack.c.b16 %v4409_v15, %v4408_v10 }
 0xa01   : > { %4480 = vmatmul.bf16.vlgmr.msrb.gmra.mxu1 %v4416_v16 }
 0xa02   : > { %v4111_v18 = vpop.f32.mrf.mxu2 }
 0xa03   : > { %v4144_v19 = vpack.c.bf16 %v4111_v18, %v4111_v18 }
 0xa05   : > { %v4410_v24 = vunpack.c.l.b16 %v4144_v19 }
 0xa06   : > { %v4366_v22 = vpop.f32.mrf.mxu0 }
 0xa0a   : > { %v4113_v20 = vpop.f32.mrf.mxu2 }
 0xa0b   : > { %v4145_v21 = vpack.c.bf16 %v4113_v20, %v4113_v20 }
 0xa0d   : > { %v4411_v25 = vunpack.c.l.b16 %v4145_v21 }
 0xa0e   : > { %v4369_v17 = vpop.f32.mrf.mxu0 }
 0xa0f   : > { %v4417_v26 = vpack.c.b16 %v4411_v25, %v4410_v24 }
 0xa11   : > { %4485 = vmatmul.bf16.gmra.mxu1 %v4417_v26 }
 0xa12   : > { %v4116_v27 = vpop.f32.mrf.mxu2 }
 0xa13   : > { %v4146_v30 = vpack.c.bf16 %v4116_v27, %v4116_v27 }
 0xa15   : > { %v4412_v33 = vunpack.c.l.b16 %v4146_v30 }
 0xa16   : > { %v4371_v15 = vpop.f32.mrf.mxu0 }
 0xa1a   : > { %v4118_v31 = vpop.f32.mrf.mxu2 }
 0xa1b   : > { %v4147_v32 = vpack.c.bf16 %v4118_v31, %v4118_v31 }
 0xa1d   : > { %v4413_v34 = vunpack.c.l.b16 %v4147_v32 }
 0xa1e   : > { %v4374_v25 = vpop.f32.mrf.mxu0 }
 0xa1f   : > { %v4418_v37 = vpack.c.b16 %v4413_v34, %v4412_v33 }
 0xa21   : > { %4490 = vmatmul.bf16.gmra.mxu1 %v4418_v37 }
 0xa22   : > { %v4121_v38 = vpop.f32.mrf.mxu2 }
 0xa23   : > { %v4148_v39 = vpack.c.bf16 %v4121_v38, %v4121_v38 }
 0xa25   : > { %v4414_v44 = vunpack.c.l.b16 %v4148_v39 }
 0xa26   : > { %v4376_v37 = vpop.f32.mrf.mxu0 }
 0xa2a   : > { %v4123_v40 = vpop.f32.mrf.mxu2 }
 0xa2b   : > { %v4149_v42 = vpack.c.bf16 %v4123_v40, %v4123_v40 }
 0xa2d   : > { %v4415_v45 = vunpack.c.l.b16 %v4149_v42 }
 0xa2f   : > { %v4419_v47 = vpack.c.b16 %v4415_v45, %v4414_v44 }
 0xa31   : > { %4495 = vmatmul.bf16.gmra.mxu1 %v4419_v47  ;;  %v4379_v47 = vpop.f32.mrf.mxu0 }
 0xa39   : > { %v4381_v54 = vpop.f32.mrf.mxu0 }
 0xa44   : > { %v4263_v51 = vpop.f32.mrf.mxu3 }
 0xa45   : > { %v4365_v35 = vadd.f32 %v4364_v43, %v4263_v51 }
 0xa4c   : > { %v4265_v1 = vpop.f32.mrf.mxu3 }
 0xa4d   : > { %v4367_v59 = vadd.f32 %v4366_v22, %v4265_v1 }
 0xa54   : > { %v4268_v6 = vpop.f32.mrf.mxu3 }
 0xa55   : > { %v4370_v16 = vadd.f32 %v4369_v17, %v4268_v6 }
 0xa5c   : > { %v4270_v10 = vpop.f32.mrf.mxu3 }
 0xa5d   : > { %v4372_v24 = vadd.f32 %v4371_v15, %v4270_v10 }
 0xa64   : > { %v4273_v21 = vpop.f32.mrf.mxu3 }
 0xa65   : > { %v4375_v31 = vadd.f32 %v4374_v25, %v4273_v21 }
 0xa6c   : > { %v4275_v32 = vpop.f32.mrf.mxu3 }
 0xa6d   : > { %v4377_v39 = vadd.f32 %v4376_v37, %v4275_v32 }
 0xa74   : > { %v4278_v44 = vpop.f32.mrf.mxu3 }
 0xa75   : > { %v4380_v48 = vadd.f32 %v4379_v47, %v4278_v44 }
 0xa7c   : > { %v4280_v53 = vpop.f32.mrf.mxu3 }
 0xa7d   : > { %v4382_v55 = vadd.f32 %v4381_v54, %v4280_v53 }
 0xa7e   : > { %v4481_v28 = vpop.f32.mrf.mxu1 }
 0xa7f   : > { %v12001_v2 = vadd.f32 %v4481_v28, %v4365_v35 }
 0xa81   : > { %v4587_v41 = vmul.f32 %v12001_v2, %v12001_v2  ;;  %4541 = vmatmul.f32.vlgmr.msrb.gmra.mxu3 %v12001_v2 }
 0xa83   : > { %4611 = vmatmul.f32.vlgmr.msra.gmra.mxu0 %v4587_v41 }
 0xa86   : > { %v4483_v0 = vpop.f32.mrf.mxu1 }
 0xa87   : > { %v12006_v7 = vadd.f32 %v4483_v0, %v4367_v59 }
 0xa89   : > { %4544 = vmatmul.f32.gmra.mxu3 %v12006_v7  ;;  %v4588_v9 = vmul.f32 %v12006_v7, %v12006_v7 }
 0xa8b   : > { %4614 = vmatmul.f32.gmra.mxu0 %v4588_v9 }
 0xa8e   : > { %v4486_v18 = vpop.f32.mrf.mxu1 }
 0xa8f   : > { %v12011_v19 = vadd.f32 %v4486_v18, %v4370_v16 }
 0xa91   : > { %4547 = vmatmul.f32.gmra.mxu3 %v12011_v19  ;;  %v4589_v20 = vmul.f32 %v12011_v19, %v12011_v19 }
 0xa93   : > { %4617 = vmatmul.f32.gmra.mxu0 %v4589_v20 }
 0xa96   : > { %v4488_v26 = vpop.f32.mrf.mxu1 }
 0xa97   : > { %v12016_v27 = vadd.f32 %v4488_v26, %v4372_v24 }
 0xa99   : > { %4550 = vmatmul.f32.gmra.mxu3 %v12016_v27  ;;  %v4590_v30 = vmul.f32 %v12016_v27, %v12016_v27 }
 0xa9b   : > { %4620 = vmatmul.f32.gmra.mxu0 %v4590_v30 }
 0xa9e   : > { %v4491_v33 = vpop.f32.mrf.mxu1 }
 0xa9f   : > { %v12021_v34 = vadd.f32 %v4491_v33, %v4375_v31 }
 0xaa1   : > { %4553 = vmatmul.f32.gmra.mxu3 %v12021_v34  ;;  %v4591_v38 = vmul.f32 %v12021_v34, %v12021_v34 }
 0xaa3   : > { %4623 = vmatmul.f32.gmra.mxu0 %v4591_v38 }
 0xaa6   : > { %v4493_v40 = vpop.f32.mrf.mxu1 }
 0xaa7   : > { %v12026_v42 = vadd.f32 %v4493_v40, %v4377_v39 }
 0xaa9   : > { %4556 = vmatmul.f32.gmra.mxu3 %v12026_v42  ;;  %v4592_v45 = vmul.f32 %v12026_v42, %v12026_v42 }
 0xaab   : > { %4626 = vmatmul.f32.gmra.mxu0 %v4592_v45 }
 0xaae   : > { %v4496_v49 = vpop.f32.mrf.mxu1 }
 0xaaf   : > { %v12031_v50 = vadd.f32 %v4496_v49, %v4380_v48 }
 0xab1   : > { %4559 = vmatmul.f32.gmra.mxu3 %v12031_v50  ;;  %v4593_v52 = vmul.f32 %v12031_v50, %v12031_v50 }
 0xab3   : > { %4629 = vmatmul.f32.gmra.mxu0 %v4593_v52 }
 0xab6   : > { %v4498_v56 = vpop.f32.mrf.mxu1 }
 0xab7   : > { %v12036_v57 = vadd.f32 %v4498_v56, %v4382_v55 }
 0xab9   : > { %4562 = vmatmul.f32.gmra.mxu3 %v12036_v57  ;;  %v4594_v58 = vmul.f32 %v12036_v57, %v12036_v57 }
 0xabb   : > { %4632 = vmatmul.f32.gmra.mxu0 %v4594_v58 }
 0xb00   : > { %v4612_v60 = vpop.f32.mrf.mxu0 }
 0xb01   : > { %v4636_v41 = vsel %vm2811_vm1, %v4612_v60, 0.0 }
 0xb04   : > { %v4542_v36 = vpop.f32.mrf.mxu3 }
 0xb05   : > { %v4566_v16 = vsel %vm2811_vm1, %v4542_v36, 0.0 }
 0xb08   : > { %v4615_v61 = vpop.f32.mrf.mxu0 }
 0xb09   : > { %v4637_v28 = vsel %vm2811_vm1, %v4615_v61, 0.0 }
 0xb0a   : > { %v4638_v59 = vadd.f32 %v4637_v28, %v4636_v41 }
 0xb0c   : > { %v4545_v63 = vpop.f32.mrf.mxu3 }
 0xb0d   : > { %v4567_v0 = vsel %vm2811_vm1, %v4545_v63, 0.0 }
 0xb0e   : > { %v4568_v21 = vadd.f32 %v4567_v0, %v4566_v16 }
 0xb10   : > { %v4618_v62 = vpop.f32.mrf.mxu0 }
 0xb11   : > { %v4639_v17 = vsel %vm2811_vm1, %v4618_v62, 0.0 }
 0xb12   : > { %v4640_v10 = vadd.f32 %v4639_v17, %v4638_v59 }
 0xb14   : > { %v4548_v46 = vpop.f32.mrf.mxu3 }
 0xb15   : > { %v4569_v18 = vsel %vm2811_vm1, %v4548_v46, 0.0 }
 0xb16   : > { %v4570_v30 = vadd.f32 %v4569_v18, %v4568_v21  ;;  %v4661_v21 = vld [vmem:[%s12936_s23] sm:$0x1]  ;;  %s12939_s23 = smov %s12938_s0 }
 0xb18   : > { %v4621_v51 = vpop.f32.mrf.mxu0 }
 0xb19   : > { %v4641_v9 = vsel %vm2811_vm1, %v4621_v51, 0.0 }
 0xb1a   : > { %v4642_v24 = vadd.f32 %v4641_v9, %v4640_v10 }
 0xb1c   : > { %v4551_v43 = vpop.f32.mrf.mxu3 }
 0xb1d   : > { %v4571_v25 = vsel %vm2811_vm1, %v4551_v43, 0.0 }
 0xb1e   : > { %v4572_v38 = vadd.f32 %v4571_v25, %v4570_v30 }
 0xb20   : > { %v4624_v1 = vpop.f32.mrf.mxu0 }
 0xb21   : > { %v4643_v20 = vsel %vm2811_vm1, %v4624_v1, 0.0 }
 0xb22   : > { %v4644_v31 = vadd.f32 %v4643_v20, %v4642_v24 }
 0xb24   : > { %v4554_v22 = vpop.f32.mrf.mxu3 }
 0xb25   : > { %v4573_v33 = vsel %vm2811_vm1, %v4554_v22, 0.0 }
 0xb26   : > { %v4574_v44 = vadd.f32 %v4573_v33, %v4572_v38  ;;  %v4752_v38 = vld [vmem:[#allocation4] sm:$0xff] }
 0xb28   : > { %v4627_v35 = vpop.f32.mrf.mxu0 }
 0xb29   : > { %v4645_v26 = vsel %vm2811_vm1, %v4627_v35, 0.0 }
 0xb2a   : > { %v4646_v39 = vadd.f32 %v4645_v26, %v4644_v31  ;;  %v4674_v31 = vld [vmem:[%s12937_s7] sm:$0x1]  ;;  %s12940_s7 = sld [smem:[#allocation103_spill]] }
 0xb2c   : > { %v4557_v6 = vpop.f32.mrf.mxu3 }
 0xb2d   : > { %v4575_v40 = vsel %vm2811_vm1, %v4557_v6, 0.0  ;;  %v4677_v6 = vld [vmem:[%s12930_s12] sm:$0xf] }
 0xb2e   : > { %v4576_v52 = vadd.f32 %v4575_v40, %v4574_v44  ;;  %8731 = vmatpush.msk.msra.mxu1 %vm2927_vm2, %v4677_v6  ;;  %v4749_v40 = vld [vmem:[#allocation4 + $0x8] sm:$0xff]  ;;  %v4750_v44 = vld [vmem:[#allocation4 + $0x30] sm:$0xff] }
 0xb30   : > { %v4630_v15 = vpop.f32.mrf.mxu0  ;;  %8733 = vmatpush.msk.msrb.mxu1 %vm2927_vm2, %v4677_v6  ;;  %s12941_s3 = smov %s12940_s7 }
 0xb31   : > { %v4647_v37 = vsel %vm2811_vm1, %v4630_v15, 0.0 }
 0xb32   : > { %v4648_v45 = vadd.f32 %v4647_v37, %v4646_v39  ;;  %v4751_v37 = vld [vmem:[#allocation4 + $0x18] sm:$0xff] }
 0xb34   : > { %v4560_v32 = vpop.f32.mrf.mxu3 }
 0xb35   : > { %v4577_v48 = vsel %vm2811_vm1, %v4560_v32, 0.0 }
 0xb36   : > { %v4578_v54 = vadd.f32 %v4577_v48, %v4576_v52  ;;  %v4745_v48 = vld [vmem:[#allocation4 + $0x28] sm:$0xff]  ;;  %v4759_v52 = vmul.f32 0.95, %v4751_v37 }
 0xb38   : > { %v4633_v47 = vpop.f32.mrf.mxu0 }
 0xb39   : > { %v4649_v49 = vsel %vm2811_vm1, %v4633_v47, 0.0  ;;  %v4748_v47 = vld [vmem:[#allocation4 + $0x10] sm:$0xff] }
 0xb3a   : > { %v4650_v53 = vadd.f32 %v4649_v49, %v4648_v45  ;;  %v4747_v45 = vld [vmem:[#allocation4 + $0x38] sm:$0xff]  ;;  %v4746_v49 = vld [vmem:[#allocation4 + $0x20] sm:$0xff] }
 0xb3c   : > { %v4651_v55 = vrot.slane %v4650_v53, 4  ;;  %v4563_v56 = vpop.f32.mrf.mxu3 }
 0xb3d   : > { %v4579_v58 = vsel %vm2811_vm1, %v4563_v56, 0.0  ;;  %v4755_v56 = vmul.f32 0.95, %v4747_v45 }
 0xb3e   : > { %v4652_v60 = vadd.f32 %v4651_v55, %v4650_v53  ;;  %v4580_v36 = vadd.f32 %v4579_v58, %v4578_v54  ;;  %v4760_v53 = vmul.f32 0.95, %v4752_v38  ;;  %v4757_v54 = vmul.f32 0.95, %v4749_v40 }
 0xb3f   : > { %v4758_v55 = vmul.f32 0.95, %v4750_v44 }
 0xb40   : > { %v4653_v61 = vrot.slane %v4652_v60, 2  ;;  %v4581_v63 = vrot.slane %v4580_v36, 4 }
 0xb42   : > { %v4654_v62 = vadd.f32 %v4653_v61, %v4652_v60  ;;  %v4582_v46 = vadd.f32 %v4581_v63, %v4580_v36  ;;  %v4756_v36 = vmul.f32 0.95, %v4748_v47  ;;  %v4753_v61 = vmul.f32 0.95, %v4745_v48 }
 0xb43   : > { %v4754_v63 = vmul.f32 0.95, %v4746_v49 }
 0xb44   : > { %v4583_v51 = vrot.slane %v4582_v46, 2  ;;  %v4655_v43 = vrot.slane %v4654_v62, 1 }
 0xb46   : > { %v4584_v1 = vadd.f32 %v4583_v51, %v4582_v46  ;;  %v4656_v35 = vadd.f32 %v4655_v43, %v4654_v62 }
 0xb48   : > { %v4585_v22 = vrot.slane %v4584_v1, 1  ;;  %v4658_v17 = vmul.f32 0.00048828125, %v4656_v35 }
 0xb4a   : > { %v4586_v28 = vadd.f32 %v4585_v22, %v4584_v1 }
 0xb4c   : > { %v4657_v41 = vmul.f32 0.00048828125, %v4586_v28 }
 0xb4e   : > { %v4659_v59 = vmul.f32 %v4657_v41, %v4657_v41 }
 0xb50   : > { %v4660_v0 = vsub.f32 %v4658_v17, %v4659_v59 }
 0xb52   : > { %v4662_v9 = vadd.f32 0.0001, %v4660_v0 }
 0xb54   : > { %9815 = vrsqrt.f32 %v4662_v9  ;;  %vm4669_vm8 = vweird.f32 %v4662_v9 }
 0xb5a   : > { %v9816_v10 = vpop.eup %9815 }
 0xb5b   : > { %v4664_v15 = vmul.f32 %v9816_v10, %v4662_v9  ;;  %vm4670_vm7 = vweird.f32 %v9816_v10 }
 0xb5c   : > { %vm4671_vm9 = vmor %vm4669_vm8, %vm4670_vm7 }
 0xb5d   : > { %v4665_v16 = vmul.f32 %v9816_v10, %v4664_v15 }
 0xb5f   : > { %v4666_v18 = vmul.f32 0.5, %v4665_v16 }
 0xb61   : > { %v4667_v20 = vsub.f32 1.5, %v4666_v18 }
 0xb63   : > { %v4668_v24 = vmul.f32 %v9816_v10, %v4667_v20 }
 0xb65   : > { %v4672_v25 = vsel %vm4671_vm9, %v9816_v10, %v4668_v24 }
 0xb66   : > { %v4673_v26 = vmul.f32 %v4672_v25, %v4661_v21 }
 0xb68   : > { %8732 = vmatmul.msk.f32.vlgmr.msra.gmra.mxu1 %vm2811_vm1, %v4673_v26  ;;  %v4675_v30 = vmul.f32 %v4673_v26, %v4657_v41 }
 0xb6a   : > { %v4676_v32 = vsub.f32 %v4674_v31, %v4675_v30 }
 0xb70   : > { %8734 = vmatmul.msk.f32.vlgmr.msrb.gmra.mxu1 %vm2811_vm1, %v4676_v32 }
 0xbe5   : > { %v4701_v33 = vpop.f32.mrf.mxu1 }
 0xbe6   : > { %v4704_v39 = vperm.slane %v4701_v33, 0 }
 0xbe8   : > { %v4711_v60 = vmul.f32 %v4704_v39, %v12031_v50  ;;  %v4712_v46 = vmul.f32 %v4704_v39, %v12036_v57  ;;  %v4709_v51 = vmul.f32 %v4704_v39, %v12021_v34  ;;  %v4710_v43 = vmul.f32 %v4704_v39, %v12026_v42 }
 0xbe9   : > { %v4707_v1 = vmul.f32 %v4704_v39, %v12011_v19  ;;  %v4708_v22 = vmul.f32 %v4704_v39, %v12016_v27  ;;  %v4705_v35 = vmul.f32 %v4704_v39, %v12001_v2  ;;  %v4706_v28 = vmul.f32 %v4704_v39, %v12006_v7 }
 0xbed   : > { %v4733_v58 = vpop.f32.mrf.mxu1 }
 0xbee   : > { %v4736_v62 = vperm.slane %v4733_v58, 0  ;;  %v9462_v58 = vld [vmem:[%s12939_s23 + $0x30] sm:$0xff] }
 0xbf0   : > { %v4743_v6 = vadd.f32 %v4736_v62, %v4711_v60  ;;  %v4744_v50 = vadd.f32 %v4736_v62, %v4712_v46  ;;  %v4741_v41 = vadd.f32 %v4736_v62, %v4709_v51  ;;  %v4742_v17 = vadd.f32 %v4736_v62, %v4710_v43  ;;  %v9454_v60 = vld [vmem:[#allocation20 + $0x20] sm:$0xff]  ;;  %v9456_v43 = vld [vmem:[%s12939_s23] sm:$0xff] }
 0xbf1   : > { %v4739_v59 = vadd.f32 %v4736_v62, %v4707_v1  ;;  %v4740_v0 = vadd.f32 %v4736_v62, %v4708_v22  ;;  %v4737_v9 = vadd.f32 %v4736_v62, %v4705_v35  ;;  %v4738_v57 = vadd.f32 %v4736_v62, %v4706_v28  ;;  %v9459_v62 = vld [vmem:[%s12939_s23 + $0x18] sm:$0xff]  ;;  %v9458_v46 = vld [vmem:[%s12939_s23 + $0x10] sm:$0xff]  ;;  %v9457_v51 = vld [vmem:[%s12939_s23 + $0x8] sm:$0xff] }
 0xbf2   : > { %v4767_v10 = vadd.f32 %v4759_v52, %v4743_v6  ;;  %v4768_v34 = vadd.f32 %v4760_v53, %v4744_v50  ;;  %v4765_v15 = vadd.f32 %v4757_v54, %v4741_v41  ;;  %v4766_v42 = vadd.f32 %v4758_v55, %v4742_v17  ;;  %v9471_v1 = vld [vmem:[%s12939_s23 + $0x78] sm:$0xff]  ;;  %v9470_v22 = vld [vmem:[%s12939_s23 + $0x70] sm:$0xff]  ;;  %v9469_v35 = vld [vmem:[%s12939_s23 + $0x68] sm:$0xff] }
 0xbf3   : > { %v4763_v16 = vadd.f32 %v4755_v56, %v4739_v59  ;;  %v4764_v19 = vadd.f32 %v4756_v36, %v4740_v0  ;;  %v4761_v18 = vadd.f32 %v4753_v61, %v4737_v9  ;;  %v4762_v27 = vadd.f32 %v4754_v63, %v4738_v57  ;;  %v9452_v56 = vld [vmem:[#allocation20 + $0x10] sm:$0xff]  ;;  %v9455_v36 = vld [vmem:[#allocation20 + $0x28] sm:$0xff]  ;;  %v9461_v61 = vld [vmem:[%s12939_s23 + $0x28] sm:$0xff]  ;;  %5024 = vmatpush.bf16.msra.mxu3 %v9471_v1 }
 0xbf4   : > { %vm4775_vm1 = vcmp.gt.f32.partialorder %v4767_v10, 1.0  ;;  %vm4776_vm2 = vcmp.gt.f32.partialorder %v4768_v34, 1.0  ;;  %vm4773_vm10 = vcmp.gt.f32.partialorder %v4765_v15, 1.0  ;;  %vm4774_vm11 = vcmp.gt.f32.partialorder %v4766_v42, 1.0  ;;  %v9460_v63 = vld [vmem:[%s12939_s23 + $0x20] sm:$0xff]  ;;  %v9467_v50 = vld [vmem:[%s12939_s23 + $0x58] sm:$0xff] }
 0xbf5   : > { %v8741_v2 = vsel %vm4775_vm1, 1.0, %v10833_v23  ;;  %v8742_v7 = vsel %vm4776_vm2, 1.0, %v10833_v23  ;;  %v8739_v20 = vsel %vm4773_vm10, 1.0, %v10833_v23  ;;  %v8740_v21 = vsel %vm4774_vm11, 1.0, %v10833_v23  ;;  %v9468_v28 = vld [vmem:[%s12939_s23 + $0x60] sm:$0xff]  ;;  %v9466_v17 = vld [vmem:[%s12939_s23 + $0x50] sm:$0xff] }
 0xbf6   : > { %v4799_v24 = vsub.f32 %v4767_v10, %v8741_v2  ;;  %v4800_v25 = vsub.f32 %v4768_v34, %v8742_v7  ;;  %v4815_v26 = vadd.f32 %v8741_v2, %v11729_v29  ;;  %v4816_v30 = vadd.f32 %v8742_v7, %v11732_v3  ;;  %v9465_v34 = vld [vmem:[%s12939_s23 + $0x48] sm:$0xff] }
 0xbf7   : > { %v4797_v31 = vsub.f32 %v4765_v15, %v8739_v20  ;;  %v4798_v32 = vsub.f32 %v4766_v42, %v8740_v21  ;;  %v4813_v33 = vadd.f32 %v8739_v20, %v11736_v4  ;;  %v4814_v37 = vadd.f32 %v8740_v21, %v11740_v5  ;;  %5025 = vmatpush.bf16.msra.mxu3 %v9470_v22  ;;  %v9464_v15 = vld [vmem:[%s12939_s23 + $0x40] sm:$0xff]  ;;  %v9477_v21 = vld [vmem:[%s12939_s23 + $0xa8] sm:$0xff] }
 0xbf8   : > { %4807 = vst [vmem:[#allocation4 + $0x18] sm:$0xff] %v4799_v24  ;;  %v12082_v38 = vpack.c.bf16 %v4816_v30, %v4815_v26  ;;  %vm4771_vm12 = vcmp.gt.f32.partialorder %v4763_v16, 1.0  ;;  %vm4772_vm13 = vcmp.gt.f32.partialorder %v4764_v19, 1.0  ;;  %vm4769_vm14 = vcmp.gt.f32.partialorder %v4761_v18, 1.0  ;;  %v9475_v30 = vld [vmem:[%s12939_s23 + $0x98] sm:$0xff] }
 0xbf9   : > { %4808 = vst [vmem:[#allocation4] sm:$0xff] %v4800_v25  ;;  %v8737_v39 = vsel %vm4771_vm12, 1.0, %v10833_v23  ;;  %v8738_v40 = vsel %vm4772_vm13, 1.0, %v10833_v23  ;;  %vm4770_vm15 = vcmp.gt.f32.partialorder %v4762_v27, 1.0  ;;  %v8735_v4 = vsel %vm4769_vm14, 1.0, %v10833_v23  ;;  %v9476_v25 = vld [vmem:[%s12939_s23 + $0xa0] sm:$0xff] }
 0xbfa   : > { %4885 = vmatpush.bf16.msra.mxu1 %v12082_v38  ;;  %4805 = vst [vmem:[#allocation4 + $0x8] sm:$0xff] %v4797_v31  ;;  %v4795_v29 = vsub.f32 %v4763_v16, %v8737_v39  ;;  %v4796_v3 = vsub.f32 %v4764_v19, %v8738_v40  ;;  %v8736_v5 = vsel %vm4770_vm15, 1.0, %v10833_v23  ;;  %v4793_v44 = vsub.f32 %v4761_v18, %v8735_v4  ;;  %v9479_v16 = vld [vmem:[%s12939_s23 + $0xb8] sm:$0xff]  ;;  %v9478_v19 = vld [vmem:[%s12939_s23 + $0xb0] sm:$0xff] }
 0xbfb   : > { %4806 = vst [vmem:[#allocation4 + $0x30] sm:$0xff] %v4798_v32  ;;  %v12089_v45 = vpack.c.bf16 %v4814_v37, %v4813_v33  ;;  %v4811_v47 = vadd.f32 %v8737_v39, %v11749_v11  ;;  %v4812_v48 = vadd.f32 %v8738_v40, %v11753_v12  ;;  %v4794_v49 = vsub.f32 %v4762_v27, %v8736_v5  ;;  %v9450_v11 = vld [vmem:[#allocation20] sm:$0xff]  ;;  %v9451_v12 = vld [vmem:[#allocation20 + $0x8] sm:$0xff] }
 0xbfc   : > { %4803 = vst [vmem:[#allocation4 + $0x38] sm:$0xff] %v4795_v29  ;;  %v4809_v53 = vadd.f32 %v8735_v4, %v11757_v13  ;;  %v4810_v54 = vadd.f32 %v8736_v5, %v11761_v14  ;;  %v9453_v13 = vld [vmem:[#allocation20 + $0x18] sm:$0xff]  ;;  %v9463_v14 = vld [vmem:[%s12938_s0 + $0x38] sm:$0xff]  ;;  %5026 = vmatpush.bf16.msra.mxu3 %v9469_v35  ;;  %v9474_v31 = vld [vmem:[%s12939_s23 + $0x90] sm:$0xff]  ;;  %s12942_s0 = scalar_lea.vmem [#allocation21], %s11484_s16  ;;  %vm5479_vm11 = vcmask 261120  }
 0xbfd   : > { %4804 = vst [vmem:[#allocation4 + $0x10] sm:$0xff] %v4796_v3  ;;  %v12094_v52 = vpack.c.bf16 %v4812_v48, %v4811_v47  ;;  %5103 = vmatpush.bf16.msrb.mxu0 %v9463_v14  ;;  %v9473_v3 = vld [vmem:[%s12939_s23 + $0x88] sm:$0xff]  ;;  %v12132_v4 = vld [vmem:[%s12940_s7 + $0x78] sm:$0xff]  ;;  %v12138_v47 = vld [vmem:[%s12941_s3 + $0x70] sm:$0xff]  ;;  %s12945_s7 = scalar_lea.vmem [#allocation26], %s11484_s16 }
 0xbfe   : > { %4886 = vmatpush.bf16.msra.mxu1 %v12089_v45  ;;  %4801 = vst [vmem:[#allocation4 + $0x28] sm:$0xff] %v4793_v44  ;;  %v12099_v55 = vpack.c.bf16 %v4810_v54, %v4809_v53  ;;  %5284 = vmatpush.msrb.mxu2 %v12132_v4  ;;  %v9472_v44 = vld [vmem:[%s12939_s23 + $0x80] sm:$0xff] }
 0xbff   : > { %4802 = vst [vmem:[#allocation4 + $0x20] sm:$0xff] %v4794_v49 }
 0xc00   : > { %5027 = vmatpush.bf16.msra.mxu3 %v9468_v28  ;;  %5285 = vmatpush.msrb.mxu2 %v12138_v47 }
 0xc01   : > { %5104 = vmatpush.bf16.msrb.mxu0 %v9462_v58  ;;  %v12151_v58 = vld [vmem:[%s12941_s3 + $0x58] sm:$0xff] }
 0xc02   : > { %4887 = vmatpush.bf16.msra.mxu1 %v12094_v52 }
 0xc04   : > { %5028 = vmatpush.bf16.msra.mxu3 %v9467_v50 }
 0xc05   : > { %5105 = vmatpush.bf16.msrb.mxu0 %v9461_v61 }
 0xc06   : > { %4888 = vmatpush.bf16.msra.mxu1 %v12099_v55 }
 0xc08   : > { %5029 = vmatpush.bf16.msra.mxu3 %v9466_v17  ;;  %v12168_v17 = vld [vmem:[%s12941_s3 + $0x40] sm:$0xff] }
 0xc09   : > { %8767 = vmatmul.msk.bf16.vlgmr.msra.gmra.mxu1 %vm3144_vm4, %v9450_v11  ;;  %5106 = vmatpush.bf16.msrb.mxu0 %v9460_v63 }
 0xc0c   : > { %5030 = vmatpush.bf16.msra.mxu3 %v9465_v34  ;;  %v12196_v34 = vld [vmem:[%s12941_s3 + $0x10] sm:$0xff] }
 0xc0d   : > { %5107 = vmatpush.bf16.msrb.mxu0 %v9459_v62 }
 0xc10   : > { %5031 = vmatpush.bf16.msra.mxu3 %v9464_v15 }
 0xc11   : > { %5108 = vmatpush.bf16.msrb.mxu0 %v9458_v46 }
 0xc14   : > { %5198 = vmatpush.bf16.msrb.mxu3 %v9479_v16  ;;  %v12206_v16 = vld [vmem:[%s12941_s3] sm:$0xff] }
 0xc15   : > { %5109 = vmatpush.bf16.msrb.mxu0 %v9457_v51 }
 0xc18   : > { %5199 = vmatpush.bf16.msrb.mxu3 %v9478_v19 }
 0xc19   : > { %8768 = vmatmul.msk.bf16.gmra.mxu1 %vm3144_vm4, %v9451_v12  ;;  %5110 = vmatpush.bf16.msrb.mxu0 %v9456_v43 }
 0xc1c   : > { %5200 = vmatpush.bf16.msrb.mxu3 %v9477_v21 }
 0xc1d   : > { %5237 = vmatpush.msra.mxu0 %v12132_v4 }
 0xc1f   : > { %5238 = vmatpush.msra.mxu0 %v12138_v47 }
 0xc20   : > { %5201 = vmatpush.bf16.msrb.mxu3 %v9476_v25 }
 0xc24   : > { %5202 = vmatpush.bf16.msrb.mxu3 %v9475_v30 }
 0xc28   : > { %5203 = vmatpush.bf16.msrb.mxu3 %v9474_v31 }
 0xc29   : > { %8769 = vmatmul.msk.bf16.gmra.mxu1 %vm3144_vm4, %v9452_v56  ;;  %v12143_v56 = vld [vmem:[%s12941_s3 + $0x68] sm:$0xff] }
 0xc2a   : > { %5286 = vmatpush.msrb.mxu2 %v12143_v56  ;;  %5239 = vmatpush.msra.mxu0 %v12143_v56 }
 0xc2c   : > { %5204 = vmatpush.bf16.msrb.mxu3 %v9473_v3 }
 0xc30   : > { %5205 = vmatpush.bf16.msrb.mxu3 %v9472_v44 }
 0xc39   : > { %8770 = vmatmul.msk.bf16.gmra.mxu1 %vm3144_vm4, %v9453_v13  ;;  %v12146_v13 = vld [vmem:[%s12941_s3 + $0x60] sm:$0xff] }
 0xc3a   : > { %5287 = vmatpush.msrb.mxu2 %v12146_v13  ;;  %5240 = vmatpush.msra.mxu0 %v12146_v13 }
 0xc3c   : > { %5288 = vmatpush.msrb.mxu2 %v12151_v58  ;;  %5241 = vmatpush.msra.mxu0 %v12151_v58 }
 0xc49   : > { %8771 = vmatmul.msk.bf16.gmra.mxu1 %vm3144_vm4, %v9454_v60  ;;  %v12156_v60 = vld [vmem:[%s12941_s3 + $0x50] sm:$0xff] }
 0xc4a   : > { %5289 = vmatpush.msrb.mxu2 %v12156_v60  ;;  %5242 = vmatpush.msra.mxu0 %v12156_v60 }
 0xc59   : > { %8772 = vmatmul.msk.bf16.gmra.mxu1 %vm3144_vm4, %v9455_v36  ;;  %v12161_v36 = vld [vmem:[%s12941_s3 + $0x48] sm:$0xff] }
 0xc5a   : > { %5290 = vmatpush.msrb.mxu2 %v12161_v36  ;;  %5243 = vmatpush.msra.mxu0 %v12161_v36 }
 0xc5c   : > { %5291 = vmatpush.msrb.mxu2 %v12168_v17  ;;  %5244 = vmatpush.msra.mxu0 %v12168_v17 }
 0xc86   : > { %v4890_v6 = vpop.f32.mrf.mxu1 }
 0xc87   : > { %v4920_v41 = vpack.c.bf16 %v4890_v6, %v4890_v6 }
 0xc89   : > { %v5047_v9 = vunpack.c.l.b16 %v4920_v41 }
 0xc8e   : > { %v4892_v59 = vpop.f32.mrf.mxu1 }
 0xc8f   : > { %v4921_v0 = vpack.c.bf16 %v4892_v59, %v4892_v59  ;;  %v12173_v59 = vld [vmem:[%s12941_s3 + $0x38] sm:$0xff] }
 0xc90   : > { %5292 = vmatpush.msrb.mxu2 %v12173_v59  ;;  %5245 = vmatpush.msra.mxu0 %v12173_v59 }
 0xc91   : > { %v5048_v57 = vunpack.c.l.b16 %v4921_v0  ;;  %v12178_v0 = vld [vmem:[%s12941_s3 + $0x30] sm:$0xff] }
 0xc92   : > { %5293 = vmatpush.msrb.mxu2 %v12178_v0  ;;  %5246 = vmatpush.msra.mxu0 %v12178_v0 }
 0xc93   : > { %v5051_v10 = vpack.c.b16 %v5048_v57, %v5047_v9  ;;  %v12183_v9 = vld [vmem:[%s12941_s3 + $0x28] sm:$0xff]  ;;  %v12188_v57 = vld [vmem:[%s12941_s3 + $0x20] sm:$0xff] }
 0xc94   : > { %5294 = vmatpush.msrb.mxu2 %v12183_v9  ;;  %5247 = vmatpush.msra.mxu0 %v12183_v9 }
 0xc95   : > { %5111 = vmatmul.bf16.vlgmr.msrb.gmra.mxu0 %v5051_v10  ;;  %v12191_v10 = vld [vmem:[%s12941_s3 + $0x18] sm:$0xff] }
 0xc96   : > { %v4895_v42 = vpop.f32.mrf.mxu1  ;;  %5248 = vmatpush.msra.mxu0 %v12188_v57  ;;  %5295 = vmatpush.msrb.mxu2 %v12188_v57 }
 0xc97   : > { %v4922_v18 = vpack.c.bf16 %v4895_v42, %v4895_v42  ;;  %v12203_v42 = vld [vmem:[%s12941_s3 + $0x8] sm:$0xff] }
 0xc98   : > { %5249 = vmatpush.msra.mxu0 %v12191_v10  ;;  %5296 = vmatpush.msrb.mxu2 %v12191_v10 }
 0xc99   : > { %v5049_v7 = vunpack.c.l.b16 %v4922_v18 }
 0xc9a   : > { %5250 = vmatpush.msra.mxu0 %v12196_v34  ;;  %5297 = vmatpush.msrb.mxu2 %v12196_v34 }
 0xc9c   : > { %5251 = vmatpush.msra.mxu0 %v12203_v42  ;;  %5298 = vmatpush.msrb.mxu2 %v12203_v42 }
 0xc9e   : > { %v4897_v27 = vpop.f32.mrf.mxu1  ;;  %5252 = vmatpush.msra.mxu0 %v12206_v16  ;;  %5299 = vmatpush.msrb.mxu2 %v12206_v16 }
 0xc9f   : > { %v4923_v2 = vpack.c.bf16 %v4897_v27, %v4897_v27 }
 0xca1   : > { %v5050_v20 = vunpack.c.l.b16 %v4923_v2 }
 0xca3   : > { %v5052_v24 = vpack.c.b16 %v5050_v20, %v5049_v7 }
 0xca5   : > { %5116 = vmatmul.bf16.gmra.mxu0 %v5052_v24 }
 0xca6   : > { %v4900_v26 = vpop.f32.mrf.mxu1 }
 0xca7   : > { %v4924_v32 = vpack.c.bf16 %v4900_v26, %v4900_v26 }
 0xca9   : > { %v4968_v39 = vunpack.c.l.b16 %v4924_v32 }
 0xcae   : > { %v4902_v33 = vpop.f32.mrf.mxu1 }
 0xcaf   : > { %v4925_v37 = vpack.c.bf16 %v4902_v33, %v4902_v33 }
 0xcb1   : > { %v4969_v40 = vunpack.c.l.b16 %v4925_v37 }
 0xcb3   : > { %v4972_v29 = vpack.c.b16 %v4969_v40, %v4968_v39 }
 0xcb5   : > { %5032 = vmatmul.bf16.vlgmr.msra.gmra.mxu3 %v4972_v29 }
 0xcb6   : > { %v4905_v5 = vpop.f32.mrf.mxu1 }
 0xcb7   : > { %v4926_v48 = vpack.c.bf16 %v4905_v5, %v4905_v5 }
 0xcb9   : > { %v4970_v54 = vunpack.c.l.b16 %v4926_v48 }
 0xcbe   : > { %v4907_v49 = vpop.f32.mrf.mxu1 }
 0xcbf   : > { %v4927_v53 = vpack.c.bf16 %v4907_v49, %v4907_v49 }
 0xcc1   : > { %v4971_v11 = vunpack.c.l.b16 %v4927_v53 }
 0xcc3   : > { %v4973_v12 = vpack.c.b16 %v4971_v11, %v4970_v54 }
 0xcc5   : > { %5037 = vmatmul.bf16.gmra.mxu3 %v4973_v12 }
 0xcc6   : > { %v4910_v14 = vpop.f32.mrf.mxu1 }
 0xcc7   : > { %v4928_v61 = vpack.c.bf16 %v4910_v14, %v4910_v14 }
 0xcc9   : > { %v5142_v46 = vunpack.c.l.b16 %v4928_v61 }
 0xcce   : > { %v4912_v63 = vpop.f32.mrf.mxu1 }
 0xccf   : > { %v4929_v62 = vpack.c.bf16 %v4912_v63, %v4912_v63 }
 0xcd1   : > { %v5143_v51 = vunpack.c.l.b16 %v4929_v62 }
 0xcd3   : > { %v5146_v43 = vpack.c.b16 %v5143_v51, %v5142_v46 }
 0xcd5   : > { %5206 = vmatmul.bf16.vlgmr.msrb.gmra.mxu3 %v5146_v43 }
 0xcd6   : > { %v4915_v1 = vpop.f32.mrf.mxu1 }
 0xcd7   : > { %v4930_v22 = vpack.c.bf16 %v4915_v1, %v4915_v1 }
 0xcd9   : > { %v5144_v6 = vunpack.c.l.b16 %v4930_v22 }
 0xcde   : > { %v4917_v35 = vpop.f32.mrf.mxu1 }
 0xcdf   : > { %v4931_v28 = vpack.c.bf16 %v4917_v35, %v4917_v35 }
 0xce1   : > { %v5145_v50 = vunpack.c.l.b16 %v4931_v28 }
 0xce3   : > { %v5147_v41 = vpack.c.b16 %v5145_v50, %v5144_v6 }
 0xce5   : > { %5211 = vmatmul.bf16.gmra.mxu3 %v5147_v41 }
 0xd12   : > { %v5112_v27 = vpop.f32.mrf.mxu0 }
 0xd1a   : > { %v5114_v24 = vpop.f32.mrf.mxu0 }
 0xd22   : > { %v5117_v33 = vpop.f32.mrf.mxu0 }
 0xd2a   : > { %v5119_v3 = vpop.f32.mrf.mxu0 }
 0xd38   : > { %v5033_v15 = vpop.f32.mrf.mxu3 }
 0xd39   : > { %v5113_v7 = vadd.f32 %v5112_v27, %v5033_v15 }
 0xd40   : > { %v5035_v19 = vpop.f32.mrf.mxu3 }
 0xd41   : > { %v5115_v26 = vadd.f32 %v5114_v24, %v5035_v19 }
 0xd48   : > { %v5038_v18 = vpop.f32.mrf.mxu3 }
 0xd49   : > { %v5118_v37 = vadd.f32 %v5117_v33, %v5038_v18 }
 0xd50   : > { %v5040_v2 = vpop.f32.mrf.mxu3 }
 0xd51   : > { %v5120_v5 = vadd.f32 %v5119_v3, %v5040_v2 }
 0xd58   : > { %v5207_v20 = vpop.f32.mrf.mxu3 }
 0xd59   : > { %v12212_v21 = vadd.f32 %v5207_v20, %v5113_v7 }
 0xd5b   : > { %v5280_v25 = vmul.f32 %v12212_v21, %v12212_v21  ;;  %5253 = vmatmul.f32.vlgmr.msra.gmra.mxu0 %v12212_v21 }
 0xd5d   : > { %5300 = vmatmul.f32.vlgmr.msrb.gmra.mxu2 %v5280_v25 }
 0xd60   : > { %v5209_v30 = vpop.f32.mrf.mxu3 }
 0xd61   : > { %v12217_v31 = vadd.f32 %v5209_v30, %v5115_v26  ;;  %v12240_v30 = vld [vmem:[#allocation47] sm:$0xff] }
 0xd62   : > { %5365 = vmatpush.msrb.mxu1 %v12240_v30  ;;  %5393 = vmatpush.msra.mxu3 %v12240_v30 }
 0xd63   : > { %5256 = vmatmul.f32.gmra.mxu0 %v12217_v31  ;;  %v5281_v32 = vmul.f32 %v12217_v31, %v12217_v31 }
 0xd65   : > { %5303 = vmatmul.f32.gmra.mxu2 %v5281_v32 }
 0xd68   : > { %v5212_v39 = vpop.f32.mrf.mxu3 }
 0xd69   : > { %v12222_v40 = vadd.f32 %v5212_v39, %v5118_v37 }
 0xd6b   : > { %5259 = vmatmul.f32.gmra.mxu0 %v12222_v40  ;;  %v5282_v29 = vmul.f32 %v12222_v40, %v12222_v40 }
 0xd6d   : > { %5306 = vmatmul.f32.gmra.mxu2 %v5282_v29 }
 0xd70   : > { %v5214_v44 = vpop.f32.mrf.mxu3 }
 0xd71   : > { %v12227_v48 = vadd.f32 %v5214_v44, %v5120_v5 }
 0xd73   : > { %5262 = vmatmul.f32.gmra.mxu0 %v12227_v48  ;;  %v5283_v49 = vmul.f32 %v12227_v48, %v12227_v48 }
 0xd75   : > { %5309 = vmatmul.f32.gmra.mxu2 %v5283_v49 }
 0xdd8   : > { %v5254_v53 = vpop.f32.mrf.mxu0 }
 0xdd9   : > { %v5267_v63 = vsel %vm5266_vm0, %v5254_v53, 0.0 }
 0xde0   : > { %v5257_v54 = vpop.f32.mrf.mxu0  ;;  %v5301_v11 = vpop.f32.mrf.mxu2 }
 0xde1   : > { %v5268_v61 = vsel %vm5266_vm0, %v5257_v54, 0.0  ;;  %v5313_v50 = vsel %vm5266_vm0, %v5301_v11, 0.0 }
 0xde2   : > { %v5269_v46 = vadd.f32 %v5268_v61, %v5267_v63 }
 0xde8   : > { %v5260_v12 = vpop.f32.mrf.mxu0  ;;  %v5304_v14 = vpop.f32.mrf.mxu2 }
 0xde9   : > { %v5270_v62 = vsel %vm5266_vm0, %v5260_v12, 0.0  ;;  %v5314_v28 = vsel %vm5266_vm0, %v5304_v14, 0.0 }
 0xdea   : > { %v5271_v51 = vadd.f32 %v5270_v62, %v5269_v46  ;;  %v5315_v15 = vadd.f32 %v5314_v28, %v5313_v50  ;;  %v5330_v46 = vld [vmem:[%s12942_s0] sm:$0x1]  ;;  %v5405_v50 = vld [vmem:[#allocation5 + $0x10] sm:$0xff]  ;;  %s12946_s0 = scalar_lea.vmem [#allocation27], %s11484_s16 }
 0xdf0   : > { %v5263_v43 = vpop.f32.mrf.mxu0  ;;  %v5307_v1 = vpop.f32.mrf.mxu2 }
 0xdf1   : > { %v5272_v22 = vsel %vm5266_vm0, %v5263_v43, 0.0  ;;  %v5316_v41 = vsel %vm5266_vm0, %v5307_v1, 0.0  ;;  %v5343_v1 = vld [vmem:[%s1784_s11] sm:$0x1]  ;;  %s12943_s11 = sld [smem:[#allocation86_spill]] }
 0xdf2   : > { %v5273_v35 = vadd.f32 %v5272_v22, %v5271_v51  ;;  %v5317_v27 = vadd.f32 %v5316_v41, %v5315_v15  ;;  %v5406_v41 = vld [vmem:[#allocation5 + $0x18] sm:$0xff]  ;;  %v5403_v15 = vld [vmem:[#allocation5 + $0x8] sm:$0xff] }
 0xdf4   : > { %v5274_v6 = vrot.slane %v5273_v35, 4 }
 0xdf6   : > { %v5275_v19 = vadd.f32 %v5274_v6, %v5273_v35 }
 0xdf7   : > { %s12944_s8 = smov %s12943_s11 }
 0xdf8   : > { %v5276_v18 = vrot.slane %v5275_v19, 2  ;;  %v5310_v2 = vpop.f32.mrf.mxu2 }
 0xdf9   : > { %v5318_v7 = vsel %vm5266_vm0, %v5310_v2, 0.0 }
 0xdfa   : > { %v5277_v20 = vadd.f32 %v5276_v18, %v5275_v19  ;;  %v5319_v24 = vadd.f32 %v5318_v7, %v5317_v27  ;;  %v5404_v19 = vld [vmem:[#allocation5] sm:$0xff]  ;;  %v5409_v18 = vmul.f32 0.95, %v5405_v50  ;;  %v5410_v7 = vmul.f32 0.95, %v5406_v41  ;;  %v9488_v50 = vld [vmem:[%s12944_s8 + $0x10] sm:$0xff] }
 0xdfb   : > { %v9487_v41 = vld [vmem:[%s12944_s8 + $0x8] sm:$0xff] }
 0xdfc   : > { %v5278_v25 = vrot.slane %v5277_v20, 1  ;;  %v5320_v26 = vrot.slane %v5319_v24, 4 }
 0xdfe   : > { %v5321_v32 = vadd.f32 %v5320_v26, %v5319_v24  ;;  %v5279_v33 = vadd.f32 %v5278_v25, %v5277_v20  ;;  %v5407_v20 = vmul.f32 0.95, %v5403_v15  ;;  %v5408_v24 = vmul.f32 0.95, %v5404_v19  ;;  %v9486_v15 = vld [vmem:[%s12944_s8] sm:$0xff]  ;;  %v9501_v19 = vld [vmem:[%s12944_s8 + $0x78] sm:$0xff] }
 0xdff   : > { %5641 = vmatpush.bf16.msra.mxu2 %v9501_v19 }
 0xe00   : > { %v5322_v37 = vrot.slane %v5321_v32, 2  ;;  %v5326_v29 = vmul.f32 0.001953125, %v5279_v33 }
 0xe02   : > { %v5323_v39 = vadd.f32 %v5322_v37, %v5321_v32  ;;  %v5328_v44 = vmul.f32 %v5326_v29, %v5326_v29 }
 0xe04   : > { %v5324_v3 = vrot.slane %v5323_v39, 1 }
 0xe06   : > { %v5325_v5 = vadd.f32 %v5324_v3, %v5323_v39 }
 0xe08   : > { %v5327_v49 = vmul.f32 0.001953125, %v5325_v5 }
 0xe0a   : > { %v5329_v53 = vsub.f32 %v5327_v49, %v5328_v44 }
 0xe0c   : > { %v5331_v54 = vadd.f32 0.0001, %v5329_v53 }
 0xe0e   : > { %9817 = vrsqrt.f32 %v5331_v54  ;;  %vm5338_vm5 = vweird.f32 %v5331_v54 }
 0xe14   : > { %v9818_v11 = vpop.eup %9817 }
 0xe15   : > { %v5333_v12 = vmul.f32 %v9818_v11, %v5331_v54  ;;  %vm5339_vm3 = vweird.f32 %v9818_v11 }
 0xe16   : > { %vm5340_vm6 = vmor %vm5338_vm5, %vm5339_vm3 }
 0xe17   : > { %v5334_v14 = vmul.f32 %v9818_v11, %v5333_v12 }
 0xe19   : > { %v5335_v61 = vmul.f32 0.5, %v5334_v14 }
 0xe1b   : > { %v5336_v63 = vsub.f32 1.5, %v5335_v61  ;;  %v9480_v61 = vld [vmem:[#allocation24] sm:$0xff] }
 0xe1d   : > { %v5337_v62 = vmul.f32 %v9818_v11, %v5336_v63  ;;  %v9481_v63 = vld [vmem:[#allocation24 + $0x8] sm:$0xff] }
 0xe1f   : > { %v5341_v51 = vsel %vm5340_vm6, %v9818_v11, %v5337_v62  ;;  %v9482_v62 = vld [vmem:[#allocation24 + $0x10] sm:$0xff] }
 0xe20   : > { %v5342_v43 = vmul.f32 %v5341_v51, %v5330_v46  ;;  %v9483_v46 = vld [vmem:[#allocation24 + $0x18] sm:$0xff] }
 0xe21   : > { %v9493_v51 = vld [vmem:[%s12943_s11 + $0x38] sm:$0xff]  ;;  %s12947_s11 = scalar_lea.vmem [#allocation38], %s11484_s16 }
 0xe22   : > { %8869 = vmatmul.msk.f32.vlgmr.msrb.gmra.mxu1 %vm5266_vm0, %v5342_v43  ;;  %v5344_v22 = vmul.f32 %v5342_v43, %v5326_v29  ;;  %v9492_v43 = vld [vmem:[%s12944_s8 + $0x30] sm:$0xff] }
 0xe23   : > { %5720 = vmatpush.bf16.msra.mxu1 %v9493_v51 }
 0xe24   : > { %v5345_v35 = vsub.f32 %v5343_v1, %v5344_v22  ;;  %v9484_v1 = vld [vmem:[#allocation24 + $0x20] sm:$0xff]  ;;  %v9485_v22 = vld [vmem:[#allocation24 + $0x28] sm:$0xff] }
 0xe26   : > { %8870 = vmatmul.msk.f32.vlgmr.msra.gmra.mxu3 %vm5266_vm0, %v5345_v35  ;;  %v9491_v35 = vld [vmem:[%s12944_s8 + $0x28] sm:$0xff] }
 0xe27   : > { %5721 = vmatpush.bf16.msra.mxu1 %v9492_v43 }
 0xe2b   : > { %5722 = vmatpush.bf16.msra.mxu1 %v9491_v35 }
 0xe9f   : > { %v5367_v28 = vpop.f32.mrf.mxu1 }
 0xea0   : > { %v5370_v6 = vperm.slane %v5367_v28, 0  ;;  %v9490_v28 = vld [vmem:[%s12944_s8 + $0x20] sm:$0xff] }
 0xea1   : > { %5723 = vmatpush.bf16.msra.mxu1 %v9490_v28 }
 0xea2   : > { %v5371_v27 = vmul.f32 %v5370_v6, %v12212_v21  ;;  %v5372_v25 = vmul.f32 %v5370_v6, %v12217_v31  ;;  %v5373_v26 = vmul.f32 %v5370_v6, %v12222_v40  ;;  %v5374_v32 = vmul.f32 %v5370_v6, %v12227_v48  ;;  %v9489_v6 = vld [vmem:[%s12944_s8 + $0x18] sm:$0xff] }
 0xea5   : > { %5724 = vmatpush.bf16.msra.mxu1 %v9489_v6 }
 0xea9   : > { %v5395_v2 = vpop.f32.mrf.mxu3  ;;  %5725 = vmatpush.bf16.msra.mxu1 %v9488_v50 }
 0xeaa   : > { %v5398_v33 = vperm.slane %v5395_v2, 0  ;;  %v9498_v2 = vld [vmem:[%s12944_s8 + $0x60] sm:$0xff] }
 0xeac   : > { %v5401_v37 = vadd.f32 %v5398_v33, %v5373_v26  ;;  %v5402_v39 = vadd.f32 %v5398_v33, %v5374_v32  ;;  %v5399_v29 = vadd.f32 %v5398_v33, %v5371_v27  ;;  %v5400_v3 = vadd.f32 %v5398_v33, %v5372_v25  ;;  %v9499_v27 = vld [vmem:[%s12944_s8 + $0x68] sm:$0xff] }
 0xead   : > { %5726 = vmatpush.bf16.msra.mxu1 %v9487_v41 }
 0xeae   : > { %v5413_v5 = vadd.f32 %v5409_v18, %v5401_v37  ;;  %v5414_v44 = vadd.f32 %v5410_v7, %v5402_v39  ;;  %v5411_v49 = vadd.f32 %v5407_v20, %v5399_v29  ;;  %v5412_v53 = vadd.f32 %v5408_v24, %v5400_v3  ;;  %v9500_v18 = vld [vmem:[%s12944_s8 + $0x70] sm:$0xff]  ;;  %v9497_v20 = vld [vmem:[%s12944_s8 + $0x58] sm:$0xff]  ;;  %v9495_v29 = vld [vmem:[%s12944_s8 + $0x48] sm:$0xff] }
 0xeaf   : > { %5642 = vmatpush.bf16.msra.mxu2 %v9500_v18  ;;  %v9496_v24 = vld [vmem:[%s12944_s8 + $0x50] sm:$0xff]  ;;  %v9494_v3 = vld [vmem:[%s12944_s8 + $0x40] sm:$0xff] }
 0xeb0   : > { %vm5417_vm7 = vcmp.gt.f32.partialorder %v5413_v5, 1.0  ;;  %vm5418_vm8 = vcmp.gt.f32.partialorder %v5414_v44, 1.0  ;;  %vm5415_vm9 = vcmp.gt.f32.partialorder %v5411_v49, 1.0  ;;  %vm5416_vm1 = vcmp.gt.f32.partialorder %v5412_v53, 1.0 }
 0xeb1   : > { %v8873_v21 = vsel %vm5417_vm7, 1.0, %v10833_v23  ;;  %v8874_v31 = vsel %vm5418_vm8, 1.0, %v10833_v23  ;;  %vm8899_vm2 = vmpackc.low %vm5418_vm8, %vm5417_vm7  ;;  %v8871_v40 = vsel %vm5415_vm9, 1.0, %v10833_v23  ;;  %v8872_v48 = vsel %vm5416_vm1, 1.0, %v10833_v23  ;;  %5727 = vmatpush.bf16.msra.mxu1 %v9486_v15 }
 0xeb2   : > { %v5429_v54 = vsub.f32 %v5413_v5, %v8873_v21  ;;  %v5430_v11 = vsub.f32 %v5414_v44, %v8874_v31  ;;  %8900 = vmatpush.bf16.msk.msrb.mxu0 %vm8899_vm2, %v10834_v8  ;;  %v5427_v12 = vsub.f32 %v5411_v49, %v8871_v40  ;;  %v5428_v14 = vsub.f32 %v5412_v53, %v8872_v48  ;;  %vm8901_vm10 = vmpackc.low %vm5416_vm1, %vm5415_vm9  ;;  %v9509_v5 = vld [vmem:[%s12944_s8 + $0xb8] sm:$0xff]  ;;  %v9508_v49 = vld [vmem:[%s12944_s8 + $0xb0] sm:$0xff] }
 0xeb3   : > { %5643 = vmatpush.bf16.msra.mxu2 %v9499_v27  ;;  %5815 = vmatpush.bf16.msrb.mxu3 %v9509_v5  ;;  %v9507_v53 = vld [vmem:[%s12944_s8 + $0xa8] sm:$0xff] }
 0xeb4   : > { %5433 = vst [vmem:[#allocation5 + $0x10] sm:$0xff] %v5429_v54 }
 0xeb5   : > { %5434 = vst [vmem:[#allocation5 + $0x18] sm:$0xff] %v5430_v11  ;;  %5900 = vmatpush.msrb.mxu1 %v12132_v4  ;;  %v9506_v11 = vld [vmem:[%s12944_s8 + $0xa0] sm:$0xff] }
 0xeb6   : > { %5431 = vst [vmem:[#allocation5 + $0x8] sm:$0xff] %v5427_v12  ;;  %8902 = vmatpush.bf16.msk.msrb.mxu0 %vm8901_vm10, %v10834_v8 }
 0xeb7   : > { %5432 = vst [vmem:[#allocation5] sm:$0xff] %v5428_v14  ;;  %5901 = vmatpush.msrb.mxu1 %v12138_v47  ;;  %5644 = vmatpush.bf16.msra.mxu2 %v9498_v2 }
 0xeb8   : > { %5816 = vmatpush.bf16.msrb.mxu3 %v9508_v49 }
 0xeb9   : > { %8903 = vmatmul.msk.bf16.vlgmr.msrb.gmra.mxu0 %vm5479_vm11, %v9480_v61  ;;  %5902 = vmatpush.msrb.mxu1 %v12143_v56 }
 0xebb   : > { %5903 = vmatpush.msrb.mxu1 %v12146_v13  ;;  %5645 = vmatpush.bf16.msra.mxu2 %v9497_v20 }
 0xebc   : > { %5817 = vmatpush.bf16.msrb.mxu3 %v9507_v53 }
 0xebd   : > { %5904 = vmatpush.msrb.mxu1 %v12151_v58 }
 0xebf   : > { %5905 = vmatpush.msrb.mxu1 %v12156_v60  ;;  %5646 = vmatpush.bf16.msra.mxu2 %v9496_v24 }
 0xec0   : > { %5818 = vmatpush.bf16.msrb.mxu3 %v9506_v11 }
 0xec1   : > { %5906 = vmatpush.msrb.mxu1 %v12161_v36 }
 0xec3   : > { %5907 = vmatpush.msrb.mxu1 %v12168_v17  ;;  %5647 = vmatpush.bf16.msra.mxu2 %v9495_v29 }
 0xec5   : > { %5908 = vmatpush.msrb.mxu1 %v12173_v59 }
 0xec7   : > { %5909 = vmatpush.msrb.mxu1 %v12178_v0  ;;  %5648 = vmatpush.bf16.msra.mxu2 %v9494_v3 }
 0xec9   : > { %8904 = vmatmul.msk.bf16.gmra.mxu0 %vm5479_vm11, %v9481_v63  ;;  %5910 = vmatpush.msrb.mxu1 %v12183_v9  ;;  %v9502_v63 = vld [vmem:[%s12944_s8 + $0x80] sm:$0xff] }
 0xecb   : > { %5911 = vmatpush.msrb.mxu1 %v12188_v57  ;;  %5854 = vmatpush.msrb.mxu2 %v12132_v4 }
 0xecd   : > { %5912 = vmatpush.msrb.mxu1 %v12191_v10  ;;  %5855 = vmatpush.msrb.mxu2 %v12138_v47  ;;  %v9505_v47 = vld [vmem:[%s12944_s8 + $0x98] sm:$0xff] }
 0xece   : > { %5819 = vmatpush.bf16.msrb.mxu3 %v9505_v47 }
 0xecf   : > { %5913 = vmatpush.msrb.mxu1 %v12196_v34  ;;  %5856 = vmatpush.msrb.mxu2 %v12143_v56  ;;  %v9504_v56 = vld [vmem:[%s12944_s8 + $0x90] sm:$0xff] }
 0xed1   : > { %5914 = vmatpush.msrb.mxu1 %v12203_v42  ;;  %5857 = vmatpush.msrb.mxu2 %v12146_v13 }
 0xed2   : > { %5820 = vmatpush.bf16.msrb.mxu3 %v9504_v56 }
 0xed3   : > { %5915 = vmatpush.msrb.mxu1 %v12206_v16  ;;  %5858 = vmatpush.msrb.mxu2 %v12151_v58  ;;  %v9503_v58 = vld [vmem:[%s12944_s8 + $0x88] sm:$0xff] }
 0xed5   : > { %5859 = vmatpush.msrb.mxu2 %v12156_v60 }
 0xed6   : > { %5821 = vmatpush.bf16.msrb.mxu3 %v9503_v58 }
 0xed7   : > { %5860 = vmatpush.msrb.mxu2 %v12161_v36 }
 0xed9   : > { %8905 = vmatmul.msk.bf16.gmra.mxu0 %vm5479_vm11, %v9482_v62  ;;  %5861 = vmatpush.msrb.mxu2 %v12168_v17 }
 0xeda   : > { %5822 = vmatpush.bf16.msrb.mxu3 %v9502_v63 }
 0xedb   : > { %5862 = vmatpush.msrb.mxu2 %v12173_v59 }
 0xedd   : > { %5863 = vmatpush.msrb.mxu2 %v12178_v0 }
 0xede   : > { %5981 = vmatpush.msra.mxu3 %v12240_v30 }
 0xedf   : > { %5864 = vmatpush.msrb.mxu2 %v12183_v9 }
 0xee1   : > { %5865 = vmatpush.msrb.mxu2 %v12188_v57 }
 0xee3   : > { %5866 = vmatpush.msrb.mxu2 %v12191_v10 }
 0xee5   : > { %5867 = vmatpush.msrb.mxu2 %v12196_v34 }
 0xee7   : > { %5868 = vmatpush.msrb.mxu2 %v12203_v42 }
 0xee9   : > { %8906 = vmatmul.msk.bf16.gmra.mxu0 %vm5479_vm11, %v9483_v46  ;;  %5869 = vmatpush.msrb.mxu2 %v12206_v16 }
 0xef9   : > { %8907 = vmatmul.msk.bf16.gmra.mxu0 %vm5479_vm11, %v9484_v1 }
 0xf09   : > { %8908 = vmatmul.msk.bf16.gmra.mxu0 %vm5479_vm11, %v9485_v22 }
 0xf36   : > { %v5507_v7 = vpop.f32.mrf.mxu0 }
 0xf37   : > { %v5537_v25 = vpack.c.bf16 %v5507_v7, %v5507_v7 }
 0xf39   : > { %v5664_v33 = vunpack.c.l.b16 %v5537_v25 }
 0xf3e   : > { %v5509_v26 = vpop.f32.mrf.mxu0 }
 0xf3f   : > { %v5538_v32 = vpack.c.bf16 %v5509_v26, %v5509_v26 }
 0xf41   : > { %v5665_v37 = vunpack.c.l.b16 %v5538_v32 }
 0xf43   : > { %v5668_v39 = vpack.c.b16 %v5665_v37, %v5664_v33 }
 0xf45   : > { %5728 = vmatmul.bf16.vlgmr.msra.gmra.mxu1 %v5668_v39 }
 0xf46   : > { %v5512_v44 = vpop.f32.mrf.mxu0 }
 0xf47   : > { %v5539_v21 = vpack.c.bf16 %v5512_v44, %v5512_v44 }
 0xf49   : > { %v5666_v48 = vunpack.c.l.b16 %v5539_v21 }
 0xf4e   : > { %v5514_v31 = vpop.f32.mrf.mxu0 }
 0xf4f   : > { %v5540_v40 = vpack.c.bf16 %v5514_v31, %v5514_v31 }
 0xf51   : > { %v5667_v54 = vunpack.c.l.b16 %v5540_v40 }
 0xf53   : > { %v5669_v4 = vpack.c.b16 %v5667_v54, %v5666_v48 }
 0xf55   : > { %5733 = vmatmul.bf16.gmra.mxu1 %v5669_v4 }
 0xf56   : > { %v5517_v12 = vpop.f32.mrf.mxu0 }
 0xf57   : > { %v5541_v13 = vpack.c.bf16 %v5517_v12, %v5517_v12 }
 0xf59   : > { %v5585_v61 = vunpack.c.l.b16 %v5541_v13 }
 0xf5e   : > { %v5519_v14 = vpop.f32.mrf.mxu0 }
 0xf5f   : > { %v5542_v60 = vpack.c.bf16 %v5519_v14, %v5519_v14 }
 0xf61   : > { %v5586_v36 = vunpack.c.l.b16 %v5542_v60 }
 0xf63   : > { %v5589_v17 = vpack.c.b16 %v5586_v36, %v5585_v61 }
 0xf65   : > { %5649 = vmatmul.bf16.vlgmr.msra.gmra.mxu2 %v5589_v17 }
 0xf66   : > { %v5522_v59 = vpop.f32.mrf.mxu0  ;;  %6009 = vmatpush.msra.mxu2 %v12240_v30 }
 0xf67   : > { %v5543_v0 = vpack.c.bf16 %v5522_v59, %v5522_v59 }
 0xf69   : > { %v5587_v62 = vunpack.c.l.b16 %v5543_v0 }
 0xf6e   : > { %v5524_v9 = vpop.f32.mrf.mxu0 }
 0xf6f   : > { %v5544_v57 = vpack.c.bf16 %v5524_v9, %v5524_v9 }
 0xf71   : > { %v5588_v10 = vunpack.c.l.b16 %v5544_v57 }
 0xf73   : > { %v5590_v46 = vpack.c.b16 %v5588_v10, %v5587_v62 }
 0xf75   : > { %5654 = vmatmul.bf16.gmra.mxu2 %v5590_v46 }
 0xf76   : > { %v5527_v51 = vpop.f32.mrf.mxu0 }
 0xf77   : > { %v5545_v34 = vpack.c.bf16 %v5527_v51, %v5527_v51 }
 0xf79   : > { %v5759_v22 = vunpack.c.l.b16 %v5545_v34 }
 0xf7e   : > { %v5529_v43 = vpop.f32.mrf.mxu0 }
 0xf7f   : > { %v5546_v1 = vpack.c.bf16 %v5529_v43, %v5529_v43 }
 0xf81   : > { %v5760_v35 = vunpack.c.l.b16 %v5546_v1 }
 0xf83   : > { %v5763_v28 = vpack.c.b16 %v5760_v35, %v5759_v22 }
 0xf85   : > { %5823 = vmatmul.bf16.vlgmr.msrb.gmra.mxu3 %v5763_v28 }
 0xf86   : > { %6075 = vmatpush.bf16.msrb.mxu3 %v12082_v38  ;;  %v5532_v42 = vpop.f32.mrf.mxu0 }
 0xf87   : > { %v5547_v16 = vpack.c.bf16 %v5532_v42, %v5532_v42 }
 0xf89   : > { %v5761_v50 = vunpack.c.l.b16 %v5547_v16 }
 0xf8a   : > { %6076 = vmatpush.bf16.msrb.mxu3 %v12089_v45 }
 0xf8e   : > { %6077 = vmatpush.bf16.msrb.mxu3 %v12094_v52  ;;  %v5534_v30 = vpop.f32.mrf.mxu0 }
 0xf8f   : > { %v5548_v6 = vpack.c.bf16 %v5534_v30, %v5534_v30 }
 0xf91   : > { %v5762_v41 = vunpack.c.l.b16 %v5548_v6 }
 0xf92   : > { %6078 = vmatpush.bf16.msrb.mxu3 %v12099_v55 }
 0xf93   : > { %v5764_v15 = vpack.c.b16 %v5762_v41, %v5761_v50 }
 0xf95   : > { %5828 = vmatmul.bf16.gmra.mxu3 %v5764_v15 }
 0xfc2   : > { %v5729_v18 = vpop.f32.mrf.mxu1 }
 0xfca   : > { %v5731_v20 = vpop.f32.mrf.mxu1 }
 0xfd2   : > { %v5734_v32 = vpop.f32.mrf.mxu1 }
 0xfda   : > { %v5736_v5 = vpop.f32.mrf.mxu1 }
 0xfe8   : > { %v5650_v19 = vpop.f32.mrf.mxu2 }
 0xfe9   : > { %v5730_v27 = vadd.f32 %v5729_v18, %v5650_v19 }
 0xff0   : > { %v5652_v2 = vpop.f32.mrf.mxu2 }
 0xff1   : > { %v5732_v52 = vadd.f32 %v5731_v20, %v5652_v2  ;;  %v9519_v20 = vld [vmem:[#allocation37 + $0x38] sm:$0xff] }
 0xff2   : > { %6156 = vmatpush.bf16.msra.mxu1 %v9519_v20  ;;  %v6181_v20 = vld [vmem:[%s12941_s3 + $0x30] sm:$0xff] }
 0xff8   : > { %v5655_v55 = vpop.f32.mrf.mxu2 }
 0xff9   : > { %v5735_v33 = vadd.f32 %v5734_v32, %v5655_v55 }
0x1000   : > { %v5657_v3 = vpop.f32.mrf.mxu2 }
0x1001   : > { %v5737_v44 = vadd.f32 %v5736_v5, %v5657_v3  ;;  %v9510_v5 = vld [vmem:[#allocation35] sm:$0xff] }
0x1008   : > { %v5824_v7 = vpop.f32.mrf.mxu3 }
0x1009   : > { %v12328_v38 = vadd.f32 %v5824_v7, %v5730_v27 }
0x100b   : > { %v5896_v45 = vmul.f32 %v12328_v38, %v12328_v38  ;;  %5870 = vmatmul.f32.vlgmr.msrb.gmra.mxu2 %v12328_v38 }
0x100d   : > { %5916 = vmatmul.f32.vlgmr.msrb.gmra.mxu1 %v5896_v45 }
0x1010   : > { %v5826_v24 = vpop.f32.mrf.mxu3 }
0x1011   : > { %v12333_v25 = vadd.f32 %v5826_v24, %v5732_v52  ;;  %v9518_v52 = vld [vmem:[#allocation37 + $0x30] sm:$0xff]  ;;  %v5946_v24 = vld [vmem:[%s12945_s7] sm:$0x1]  ;;  %s12948_s7 = scalar_lea.vmem [#allocation40], %s11484_s16 }
0x1012   : > { %6157 = vmatpush.bf16.msra.mxu1 %v9518_v52  ;;  %v6179_v52 = vld [vmem:[%s12941_s3 + $0x20] sm:$0xff] }
0x1013   : > { %5873 = vmatmul.f32.gmra.mxu2 %v12333_v25  ;;  %v5897_v26 = vmul.f32 %v12333_v25, %v12333_v25 }
0x1015   : > { %5919 = vmatmul.f32.gmra.mxu1 %v5897_v26 }
0x1018   : > { %v5829_v37 = vpop.f32.mrf.mxu3 }
0x1019   : > { %v12338_v39 = vadd.f32 %v5829_v37, %v5735_v33  ;;  %v9517_v33 = vld [vmem:[#allocation37 + $0x28] sm:$0xff]  ;;  %v5959_v37 = vld [vmem:[%s12946_s0] sm:$0x1]  ;;  %s12949_s0 = sld [smem:[#allocation89_spill]] }
0x101a   : > { %6158 = vmatpush.bf16.msra.mxu1 %v9517_v33 }
0x101b   : > { %5876 = vmatmul.f32.gmra.mxu2 %v12338_v39  ;;  %v5898_v29 = vmul.f32 %v12338_v39, %v12338_v39 }
0x101d   : > { %5922 = vmatmul.f32.gmra.mxu1 %v5898_v29 }
0x101f   : > { %s12950_s1 = smov %s12949_s0 }
0x1020   : > { %v5831_v49 = vpop.f32.mrf.mxu3 }
0x1021   : > { %v12343_v53 = vadd.f32 %v5831_v49, %v5737_v44  ;;  %v9511_v44 = vld [vmem:[#allocation35 + $0x8] sm:$0xff]  ;;  %v9516_v49 = vld [vmem:[#allocation37 + $0x20] sm:$0xff] }
0x1022   : > { %6159 = vmatpush.bf16.msra.mxu1 %v9516_v49 }
0x1023   : > { %5879 = vmatmul.f32.gmra.mxu2 %v12343_v53  ;;  %v5899_v21 = vmul.f32 %v12343_v53, %v12343_v53 }
0x1025   : > { %5925 = vmatmul.f32.gmra.mxu1 %v5899_v21  ;;  %v9515_v21 = vld [vmem:[#allocation37 + $0x18] sm:$0xff] }
0x1026   : > { %6160 = vmatpush.bf16.msra.mxu1 %v9515_v21 }
0x108a   : > { %v5917_v31 = vpop.f32.mrf.mxu1 }
0x108b   : > { %v5929_v12 = vsel %vm5266_vm0, %v5917_v31, 0.0  ;;  %v9514_v31 = vld [vmem:[#allocation37 + $0x10] sm:$0xff] }
0x108c   : > { %6161 = vmatpush.bf16.msra.mxu1 %v9514_v31 }
0x108e   : > { %v5871_v40 = vpop.f32.mrf.mxu2 }
0x108f   : > { %v5883_v61 = vsel %vm5266_vm0, %v5871_v40, 0.0  ;;  %v9513_v40 = vld [vmem:[#allocation37 + $0x8] sm:$0xff] }
0x1090   : > { %6162 = vmatpush.bf16.msra.mxu1 %v9513_v40 }
0x1092   : > { %v5920_v48 = vpop.f32.mrf.mxu1 }
0x1093   : > { %v5930_v11 = vsel %vm5266_vm0, %v5920_v48, 0.0  ;;  %v9512_v48 = vld [vmem:[#allocation37] sm:$0xff] }
0x1094   : > { %v5931_v13 = vadd.f32 %v5930_v11, %v5929_v12  ;;  %6163 = vmatpush.bf16.msra.mxu1 %v9512_v48  ;;  %v6019_v12 = vld [vmem:[#allocation6 + $0x8] sm:$0xff] }
0x1096   : > { %v5874_v54 = vpop.f32.mrf.mxu2 }
0x1097   : > { %v5884_v58 = vsel %vm5266_vm0, %v5874_v54, 0.0 }
0x1098   : > { %v5885_v63 = vadd.f32 %v5884_v58, %v5883_v61  ;;  %v6190_v58 = vld [vmem:[%s12941_s3 + $0x78] sm:$0xff] }
0x1099   : > { %6191 = vmatpush.msra.mxu0 %v6190_v58  ;;  %6237 = vmatpush.msrb.mxu2 %v6190_v58 }
0x109a   : > { %v5923_v4 = vpop.f32.mrf.mxu1 }
0x109b   : > { %v5932_v56 = vsel %vm5266_vm0, %v5923_v4, 0.0  ;;  %v6021_v4 = vld [vmem:[#allocation6] sm:$0xff] }
0x109c   : > { %v5933_v14 = vadd.f32 %v5932_v56, %v5931_v13  ;;  %v6020_v56 = vld [vmem:[#allocation6 + $0x18] sm:$0xff]  ;;  %v6025_v13 = vmul.f32 0.95, %v6021_v4 }
0x109e   : > { %v5877_v47 = vpop.f32.mrf.mxu2 }
0x109f   : > { %v5886_v36 = vsel %vm5266_vm0, %v5877_v47, 0.0  ;;  %v6022_v47 = vld [vmem:[#allocation6 + $0x10] sm:$0xff] }
0x10a0   : > { %v5887_v0 = vadd.f32 %v5886_v36, %v5885_v63  ;;  %v6026_v36 = vmul.f32 0.95, %v6022_v47  ;;  %v6024_v63 = vmul.f32 0.95, %v6020_v56 }
0x10a2   : > { %v5926_v60 = vpop.f32.mrf.mxu1 }
0x10a3   : > { %v5934_v17 = vsel %vm5266_vm0, %v5926_v60, 0.0 }
0x10a4   : > { %v5935_v59 = vadd.f32 %v5934_v17, %v5933_v14  ;;  %v6189_v14 = vld [vmem:[%s12941_s3 + $0x70] sm:$0xff]  ;;  %v6023_v17 = vmul.f32 0.95, %v6019_v12 }
0x10a5   : > { %6192 = vmatpush.msra.mxu0 %v6189_v14  ;;  %6238 = vmatpush.msrb.mxu2 %v6189_v14 }
0x10a6   : > { %v5936_v9 = vrot.slane %v5935_v59, 4  ;;  %v5880_v57 = vpop.f32.mrf.mxu2 }
0x10a7   : > { %v5888_v62 = vsel %vm5266_vm0, %v5880_v57, 0.0 }
0x10a8   : > { %v5937_v10 = vadd.f32 %v5936_v9, %v5935_v59  ;;  %v5889_v46 = vadd.f32 %v5888_v62, %v5887_v0  ;;  %v6188_v62 = vld [vmem:[%s12941_s3 + $0x68] sm:$0xff] }
0x10a9   : > { %6193 = vmatpush.msra.mxu0 %v6188_v62  ;;  %6239 = vmatpush.msrb.mxu2 %v6188_v62 }
0x10aa   : > { %v5938_v51 = vrot.slane %v5937_v10, 2  ;;  %v5890_v34 = vrot.slane %v5889_v46, 4 }
0x10ac   : > { %v5939_v43 = vadd.f32 %v5938_v51, %v5937_v10  ;;  %v5891_v1 = vadd.f32 %v5890_v34, %v5889_v46  ;;  %v6187_v34 = vld [vmem:[%s12941_s3 + $0x60] sm:$0xff] }
0x10ad   : > { %6194 = vmatpush.msra.mxu0 %v6187_v34  ;;  %6240 = vmatpush.msrb.mxu2 %v6187_v34 }
0x10ae   : > { %v5892_v22 = vrot.slane %v5891_v1, 2  ;;  %v5940_v35 = vrot.slane %v5939_v43, 1 }
0x10b0   : > { %v5893_v28 = vadd.f32 %v5892_v22, %v5891_v1  ;;  %v5941_v16 = vadd.f32 %v5940_v35, %v5939_v43  ;;  %v6186_v22 = vld [vmem:[%s12941_s3 + $0x58] sm:$0xff] }
0x10b1   : > { %6195 = vmatpush.msra.mxu0 %v6186_v22  ;;  %6241 = vmatpush.msrb.mxu2 %v6186_v22 }
0x10b2   : > { %v5894_v42 = vrot.slane %v5893_v28, 1  ;;  %v5943_v50 = vmul.f32 0.001953125, %v5941_v16 }
0x10b4   : > { %v5895_v30 = vadd.f32 %v5894_v42, %v5893_v28 }
0x10b6   : > { %v5942_v6 = vmul.f32 0.001953125, %v5895_v30 }
0x10b8   : > { %v5944_v41 = vmul.f32 %v5942_v6, %v5942_v6 }
0x10ba   : > { %v5945_v15 = vsub.f32 %v5943_v50, %v5944_v41 }
0x10bc   : > { %v5947_v19 = vadd.f32 0.0001, %v5945_v15 }
0x10be   : > { %9819 = vrsqrt.f32 %v5947_v19  ;;  %vm5954_vm13 = vweird.f32 %v5947_v19 }
0x10c4   : > { %v9820_v18 = vpop.eup %9819 }
0x10c5   : > { %v5949_v27 = vmul.f32 %v9820_v18, %v5947_v19  ;;  %vm5955_vm12 = vweird.f32 %v9820_v18 }
0x10c6   : > { %vm5956_vm14 = vmor %vm5954_vm13, %vm5955_vm12 }
0x10c7   : > { %v5950_v2 = vmul.f32 %v9820_v18, %v5949_v27 }
0x10c9   : > { %v5951_v7 = vmul.f32 0.5, %v5950_v2 }
0x10cb   : > { %v5952_v45 = vsub.f32 1.5, %v5951_v7  ;;  %v6182_v7 = vld [vmem:[%s12941_s3 + $0x38] sm:$0xff] }
0x10cd   : > { %v5953_v55 = vmul.f32 %v9820_v18, %v5952_v45  ;;  %v6180_v45 = vld [vmem:[%s12941_s3 + $0x28] sm:$0xff] }
0x10cf   : > { %v5957_v26 = vsel %vm5956_vm14, %v9820_v18, %v5953_v55  ;;  %v6183_v18 = vld [vmem:[%s12941_s3 + $0x40] sm:$0xff]  ;;  %v6178_v55 = vld [vmem:[%s12941_s3 + $0x18] sm:$0xff] }
0x10d0   : > { %v5958_v32 = vmul.f32 %v5957_v26, %v5946_v24  ;;  %v6177_v26 = vld [vmem:[%s12941_s3 + $0x10] sm:$0xff] }
0x10d2   : > { %v5960_v29 = vmul.f32 %v5958_v32, %v5942_v6  ;;  %9005 = vmatmul.msk.f32.vlgmr.msra.gmra.mxu3 %vm5266_vm0, %v5958_v32  ;;  %v6184_v6 = vld [vmem:[%s12941_s3 + $0x48] sm:$0xff] }
0x10d3   : > { %v6176_v32 = vld [vmem:[%s12941_s3 + $0x8] sm:$0xff] }
0x10d4   : > { %v5961_v3 = vsub.f32 %v5959_v37, %v5960_v29  ;;  %v6175_v29 = vld [vmem:[%s12941_s3] sm:$0xff] }
0x10d6   : > { %9006 = vmatmul.msk.f32.vlgmr.msra.gmra.mxu2 %vm5266_vm0, %v5961_v3 }
0x10da   : > { %9019 = vmatmul.msk.bf16.vlgmr.msrb.gmra.mxu3 %vm3144_vm4, %v9510_v5 }
0x10ea   : > { %9020 = vmatmul.msk.bf16.gmra.mxu3 %vm3144_vm4, %v9511_v44 }
0x1155   : > { %v5983_v54 = vpop.f32.mrf.mxu3 }
0x1156   : > { %v5986_v11 = vperm.slane %v5983_v54, 0 }
0x1158   : > { %v5987_v60 = vmul.f32 %v5986_v11, %v12328_v38  ;;  %v5988_v59 = vmul.f32 %v5986_v11, %v12333_v25  ;;  %v5989_v0 = vmul.f32 %v5986_v11, %v12338_v39  ;;  %v5990_v9 = vmul.f32 %v5986_v11, %v12343_v53  ;;  %v6185_v53 = vld [vmem:[%s12941_s3 + $0x50] sm:$0xff] }
0x1159   : > { %v6011_v61 = vpop.f32.mrf.mxu2  ;;  %6196 = vmatpush.msra.mxu0 %v6185_v53  ;;  %6242 = vmatpush.msrb.mxu2 %v6185_v53 }
0x115a   : > { %v6014_v57 = vperm.slane %v6011_v61, 0 }
0x115b   : > { %6197 = vmatpush.msra.mxu0 %v6184_v6  ;;  %6243 = vmatpush.msrb.mxu2 %v6184_v6 }
0x115c   : > { %v6015_v38 = vadd.f32 %v6014_v57, %v5987_v60  ;;  %v6016_v10 = vadd.f32 %v6014_v57, %v5988_v59  ;;  %v6017_v46 = vadd.f32 %v6014_v57, %v5989_v0  ;;  %v6018_v51 = vadd.f32 %v6014_v57, %v5990_v9 }
0x115d   : > { %v6080_v43 = vpop.f32.mrf.mxu3  ;;  %6198 = vmatpush.msra.mxu0 %v6183_v18  ;;  %6244 = vmatpush.msrb.mxu2 %v6183_v18 }
0x115e   : > { %v6029_v1 = vadd.f32 %v6025_v13, %v6017_v46  ;;  %v6030_v25 = vadd.f32 %v6026_v36, %v6018_v51  ;;  %v6027_v39 = vadd.f32 %v6023_v17, %v6015_v38  ;;  %v6028_v35 = vadd.f32 %v6024_v63, %v6016_v10 }
0x115f   : > { %6199 = vmatpush.msra.mxu0 %v6182_v7  ;;  %6245 = vmatpush.msrb.mxu2 %v6182_v7 }
0x1160   : > { %vm6033_vm4 = vcmp.gt.f32.partialorder %v6029_v1, 1.0  ;;  %vm6034_vm15 = vcmp.gt.f32.partialorder %v6030_v25, 1.0  ;;  %vm6031_vm3 = vcmp.gt.f32.partialorder %v6027_v39, 1.0  ;;  %vm6032_vm5 = vcmp.gt.f32.partialorder %v6028_v35, 1.0 }
0x1161   : > { %v12375_v28 = vsel %vm6033_vm4, 1.0, %v10833_v23  ;;  %v12378_v42 = vsel %vm6034_vm15, 1.0, %v10833_v23  ;;  %v12381_v16 = vsel %vm6031_vm3, 1.0, %v10833_v23  ;;  %v12384_v30 = vsel %vm6032_vm5, 1.0, %v10833_v23  ;;  %6200 = vmatpush.msra.mxu0 %v6181_v20  ;;  %6246 = vmatpush.msrb.mxu2 %v6181_v20 }
0x1162   : > { %v6045_v50 = vsub.f32 %v6029_v1, %v12375_v28  ;;  %v6046_v41 = vsub.f32 %v6030_v25, %v12378_v42  ;;  %v6043_v15 = vsub.f32 %v6027_v39, %v12381_v16  ;;  %v6044_v19 = vsub.f32 %v6028_v35, %v12384_v30  ;;  %v6299_v35 = vld [vmem:[#allocation47] sm:$0xff] }
0x1163   : > { %6201 = vmatpush.msra.mxu0 %v6180_v45  ;;  %6247 = vmatpush.msrb.mxu2 %v6180_v45 }
0x1164   : > { %6049 = vst [vmem:[#allocation6] sm:$0xff] %v6045_v50  ;;  %6318 = vmatpush.msra.mxu3 %v6299_v35 }
0x1165   : > { %v6082_v27 = vpop.f32.mrf.mxu3  ;;  %6050 = vst [vmem:[#allocation6 + $0x10] sm:$0xff] %v6046_v41  ;;  %6202 = vmatpush.msra.mxu0 %v6179_v52  ;;  %6248 = vmatpush.msrb.mxu2 %v6179_v52 }
0x1166   : > { %v6090_v2 = vpack.c.bf16 %v6082_v27, %v6080_v43  ;;  %6047 = vst [vmem:[#allocation6 + $0x8] sm:$0xff] %v6043_v15  ;;  %6346 = vmatpush.msrb.mxu3 %v6299_v35  ;;  %v9543_v35 = vld [vmem:[%s12950_s1 + $0xa0] sm:$0xff] }
0x1167   : > { %6048 = vst [vmem:[#allocation6 + $0x18] sm:$0xff] %v6044_v19  ;;  %6203 = vmatpush.msra.mxu0 %v6178_v55  ;;  %6249 = vmatpush.msrb.mxu2 %v6178_v55 }
0x1168   : > { %6164 = vmatmul.bf16.vlgmr.msra.gmra.mxu1 %v6090_v2 }
0x1169   : > { %6204 = vmatpush.msra.mxu0 %v6177_v26  ;;  %6250 = vmatpush.msrb.mxu2 %v6177_v26 }
0x116b   : > { %6205 = vmatpush.msra.mxu0 %v6176_v32  ;;  %6251 = vmatpush.msrb.mxu2 %v6176_v32  ;;  %v6283_v32 = vld [vmem:[%s12947_s11] sm:$0x1]  ;;  %s12951_s11 = sld [smem:[#allocation105_spill]] }
0x116d   : > { %v6085_v24 = vpop.f32.mrf.mxu3  ;;  %6206 = vmatpush.msra.mxu0 %v6175_v29  ;;  %6252 = vmatpush.msrb.mxu2 %v6175_v29 }
0x1171   : > { %s12952_s2 = smov %s12951_s11 }
0x1175   : > { %v6087_v33 = vpop.f32.mrf.mxu3 }
0x1176   : > { %v6091_v37 = vpack.c.bf16 %v6087_v33, %v6085_v24 }
0x1178   : > { %6169 = vmatmul.bf16.gmra.mxu1 %v6091_v37 }
0x11e5   : > { %v12400_v3 = vpop.f32.mrf.mxu1 }
0x11e6   : > { %v6233_v5 = vmul.f32 %v12400_v3, %v12400_v3  ;;  %6207 = vmatmul.f32.vlgmr.msra.gmra.mxu0 %v12400_v3 }
0x11e8   : > { %6253 = vmatmul.f32.vlgmr.msrb.gmra.mxu2 %v6233_v5  ;;  %v6296_v5 = vld [vmem:[%s12948_s7] sm:$0x1]  ;;  %s12953_s7 = scalar_lea.vmem [#allocation29], %s11484_s16 }
0x11ed   : > { %v12405_v44 = vpop.f32.mrf.mxu1 }
0x11ee   : > { %v6234_v49 = vmul.f32 %v12405_v44, %v12405_v44  ;;  %6210 = vmatmul.f32.gmra.mxu0 %v12405_v44 }
0x11f0   : > { %6256 = vmatmul.f32.gmra.mxu2 %v6234_v49 }
0x11f5   : > { %v12410_v21 = vpop.f32.mrf.mxu1 }
0x11f6   : > { %v6235_v31 = vmul.f32 %v12410_v21, %v12410_v21  ;;  %6213 = vmatmul.f32.gmra.mxu0 %v12410_v21 }
0x11f8   : > { %6259 = vmatmul.f32.gmra.mxu2 %v6235_v31 }
0x11fd   : > { %v12415_v40 = vpop.f32.mrf.mxu1 }
0x11fe   : > { %v6236_v48 = vmul.f32 %v12415_v40, %v12415_v40  ;;  %6216 = vmatmul.f32.gmra.mxu0 %v12415_v40 }
0x1200   : > { %6262 = vmatmul.f32.gmra.mxu2 %v6236_v48 }
0x1263   : > { %v6208_v54 = vpop.f32.mrf.mxu0 }
0x1264   : > { %v6220_v13 = vsel %vm5266_vm0, %v6208_v54, 0.0 }
0x126b   : > { %v6211_v4 = vpop.f32.mrf.mxu0  ;;  %v6254_v11 = vpop.f32.mrf.mxu2 }
0x126c   : > { %v6221_v56 = vsel %vm5266_vm0, %v6211_v4, 0.0  ;;  %v6266_v9 = vsel %vm5266_vm0, %v6254_v11, 0.0 }
0x126d   : > { %v6222_v14 = vadd.f32 %v6221_v56, %v6220_v13 }
0x1273   : > { %v6214_v47 = vpop.f32.mrf.mxu0  ;;  %v6257_v12 = vpop.f32.mrf.mxu2 }
0x1274   : > { %v6223_v58 = vsel %vm5266_vm0, %v6214_v47, 0.0  ;;  %v6267_v59 = vsel %vm5266_vm0, %v6257_v12, 0.0 }
0x1275   : > { %v6224_v60 = vadd.f32 %v6223_v58, %v6222_v14  ;;  %v6268_v62 = vadd.f32 %v6267_v59, %v6266_v9  ;;  %v9527_v59 = vld [vmem:[%s12950_s1 + $0x20] sm:$0xff]  ;;  %v9526_v9 = vld [vmem:[%s12950_s1 + $0x18] sm:$0xff] }
0x127b   : > { %v6217_v61 = vpop.f32.mrf.mxu0  ;;  %v6260_v36 = vpop.f32.mrf.mxu2 }
0x127c   : > { %v6225_v17 = vsel %vm5266_vm0, %v6217_v61, 0.0  ;;  %v6269_v57 = vsel %vm5266_vm0, %v6260_v36, 0.0 }
0x127d   : > { %v6226_v63 = vadd.f32 %v6225_v17, %v6224_v60  ;;  %v6270_v46 = vadd.f32 %v6269_v57, %v6268_v62  ;;  %v9537_v57 = vld [vmem:[%s12950_s1 + $0x70] sm:$0xff] }
0x127e   : > { %v9525_v62 = vld [vmem:[%s12950_s1 + $0x10] sm:$0xff] }
0x127f   : > { %v6227_v0 = vrot.slane %v6226_v63, 4 }
0x1281   : > { %v6228_v38 = vadd.f32 %v6227_v0, %v6226_v63  ;;  %v9528_v63 = vld [vmem:[%s12950_s1 + $0x28] sm:$0xff]  ;;  %v9538_v0 = vld [vmem:[%s12950_s1 + $0x78] sm:$0xff] }
0x1282   : > { %6508 = vmatpush.bf16.msrb.mxu0 %v9538_v0 }
0x1283   : > { %v6229_v10 = vrot.slane %v6228_v38, 2  ;;  %v6263_v51 = vpop.f32.mrf.mxu2 }
0x1284   : > { %v6271_v34 = vsel %vm5266_vm0, %v6263_v51, 0.0  ;;  %v9523_v51 = vld [vmem:[%s12950_s1] sm:$0xff] }
0x1285   : > { %v6230_v43 = vadd.f32 %v6229_v10, %v6228_v38  ;;  %v6272_v1 = vadd.f32 %v6271_v34, %v6270_v46  ;;  %v9536_v38 = vld [vmem:[%s12950_s1 + $0x68] sm:$0xff]  ;;  %v9535_v46 = vld [vmem:[%s12950_s1 + $0x60] sm:$0xff]  ;;  %v9546_v34 = vld [vmem:[%s12950_s1 + $0xb8] sm:$0xff] }
0x1286   : > { %6509 = vmatpush.bf16.msrb.mxu0 %v9537_v57  ;;  %v9524_v10 = vld [vmem:[%s12950_s1 + $0x8] sm:$0xff] }
0x1287   : > { %v6231_v25 = vrot.slane %v6230_v43, 1  ;;  %v6273_v22 = vrot.slane %v6272_v1, 4 }
0x1289   : > { %v6274_v39 = vadd.f32 %v6273_v22, %v6272_v1  ;;  %v6232_v53 = vadd.f32 %v6231_v25, %v6230_v43  ;;  %v9545_v43 = vld [vmem:[%s12950_s1 + $0xb0] sm:$0xff]  ;;  %v9534_v1 = vld [vmem:[%s12950_s1 + $0x58] sm:$0xff]  ;;  %v9544_v22 = vld [vmem:[%s12950_s1 + $0xa8] sm:$0xff] }
0x128a   : > { %6510 = vmatpush.bf16.msrb.mxu0 %v9536_v38  ;;  %v9533_v25 = vld [vmem:[%s12950_s1 + $0x50] sm:$0xff] }
0x128b   : > { %v6275_v6 = vrot.slane %v6274_v39, 2  ;;  %v6279_v41 = vmul.f32 0.001953125, %v6232_v53 }
0x128d   : > { %v6276_v50 = vadd.f32 %v6275_v6, %v6274_v39  ;;  %v6281_v18 = vmul.f32 %v6279_v41, %v6279_v41  ;;  %v9532_v39 = vld [vmem:[%s12950_s1 + $0x48] sm:$0xff]  ;;  %v9531_v6 = vld [vmem:[%s12950_s1 + $0x40] sm:$0xff] }
0x128e   : > { %6511 = vmatpush.bf16.msrb.mxu0 %v9535_v46 }
0x128f   : > { %v6277_v15 = vrot.slane %v6276_v50, 1 }
0x1291   : > { %v6278_v19 = vadd.f32 %v6277_v15, %v6276_v50  ;;  %v9542_v50 = vld [vmem:[%s12950_s1 + $0x98] sm:$0xff]  ;;  %v9541_v15 = vld [vmem:[%s12950_s1 + $0x90] sm:$0xff] }
0x1292   : > { %6512 = vmatpush.bf16.msrb.mxu0 %v9534_v1 }
0x1293   : > { %v6280_v27 = vmul.f32 0.001953125, %v6278_v19 }
0x1295   : > { %v6282_v2 = vsub.f32 %v6280_v27, %v6281_v18 }
0x1296   : > { %6513 = vmatpush.bf16.msrb.mxu0 %v9533_v25 }
0x1297   : > { %v6284_v7 = vadd.f32 0.0001, %v6282_v2 }
0x1299   : > { %9821 = vrsqrt.f32 %v6284_v7  ;;  %vm6291_vm7 = vweird.f32 %v6284_v7 }
0x129a   : > { %6514 = vmatpush.bf16.msrb.mxu0 %v9532_v39 }
0x129e   : > { %6515 = vmatpush.bf16.msrb.mxu0 %v9531_v6 }
0x129f   : > { %v9822_v20 = vpop.eup %9821 }
0x12a0   : > { %v6286_v45 = vmul.f32 %v9822_v20, %v6284_v7  ;;  %vm6292_vm6 = vweird.f32 %v9822_v20 }
0x12a1   : > { %vm6293_vm8 = vmor %vm6291_vm7, %vm6292_vm6 }
0x12a2   : > { %v6287_v52 = vmul.f32 %v9822_v20, %v6286_v45  ;;  %v9539_v45 = vld [vmem:[%s12950_s1 + $0x80] sm:$0xff] }
0x12a4   : > { %v6288_v24 = vmul.f32 0.5, %v6287_v52  ;;  %v12476_v52 = vld [vmem:[%s12951_s11 + $0x78] sm:$0xff]  ;;  %s12955_s11 = sld [smem:[#allocation93_spill]] }
0x12a5   : > { %6692 = vmatpush.msra.mxu0 %v12476_v52 }
0x12a6   : > { %v6289_v55 = vsub.f32 1.5, %v6288_v24  ;;  %v12479_v24 = vld [vmem:[%s12952_s2 + $0x70] sm:$0xff] }
0x12a7   : > { %6693 = vmatpush.msra.mxu0 %v12479_v24 }
0x12a8   : > { %v6290_v26 = vmul.f32 %v9822_v20, %v6289_v55 }
0x12aa   : > { %v6294_v33 = vsel %vm6293_vm8, %v9822_v20, %v6290_v26  ;;  %v9540_v20 = vld [vmem:[%s12950_s1 + $0x88] sm:$0xff]  ;;  %vm7668_vm8 = vcmask 74752  }
0x12ab   : > { %v6295_v37 = vmul.f32 %v6294_v33, %v6283_v32  ;;  %v12484_v26 = vld [vmem:[%s12952_s2 + $0x68] sm:$0xff]  ;;  %v12489_v32 = vld [vmem:[%s12952_s2 + $0x60] sm:$0xff]  ;;  %v12494_v33 = vld [vmem:[%s12952_s2 + $0x58] sm:$0xff] }
0x12ac   : > { %6694 = vmatpush.msra.mxu0 %v12484_v26 }
0x12ad   : > { %9053 = vmatmul.msk.f32.vlgmr.msra.gmra.mxu3 %vm5266_vm0, %v6295_v37  ;;  %v6297_v29 = vmul.f32 %v6295_v37, %v6279_v41 }
0x12ae   : > { %6660 = vmatpush.bf16.msra.mxu3 %v9546_v34  ;;  %6695 = vmatpush.msra.mxu0 %v12489_v32 }
0x12af   : > { %v6298_v49 = vsub.f32 %v6296_v5, %v6297_v29  ;;  %v12499_v29 = vld [vmem:[%s12952_s2 + $0x50] sm:$0xff] }
0x12b0   : > { %6696 = vmatpush.msra.mxu0 %v12494_v33 }
0x12b2   : > { %6661 = vmatpush.bf16.msra.mxu3 %v9545_v43  ;;  %6697 = vmatpush.msra.mxu0 %v12499_v29 }
0x12b5   : > { %9054 = vmatmul.msk.f32.vlgmr.msrb.gmra.mxu3 %vm5266_vm0, %v6298_v49  ;;  %vm6715_vm0 = vcmask 130048  }
0x12b6   : > { %6662 = vmatpush.bf16.msra.mxu3 %v9544_v22 }
0x12ba   : > { %6663 = vmatpush.bf16.msra.mxu3 %v9543_v35 }
0x12be   : > { %6664 = vmatpush.bf16.msra.mxu3 %v9542_v50 }
0x12c2   : > { %6665 = vmatpush.bf16.msra.mxu3 %v9541_v15 }
0x12c6   : > { %6666 = vmatpush.bf16.msra.mxu3 %v9540_v20 }
0x12ca   : > { %6667 = vmatpush.bf16.msra.mxu3 %v9539_v45  ;;  %v12569_v45 = vld [vmem:[#allocation49 + $0x8] sm:$0xff] }
0x12ce   : > { %6798 = vmatpush.msrb.mxu3 %v12569_v45 }
0x1330   : > { %v6320_v31 = vpop.f32.mrf.mxu3 }
0x1331   : > { %v6323_v48 = vperm.slane %v6320_v31, 0  ;;  %v12504_v31 = vld [vmem:[%s12952_s2 + $0x48] sm:$0xff] }
0x1332   : > { %6698 = vmatpush.msra.mxu0 %v12504_v31 }
0x1333   : > { %v6324_v54 = vmul.f32 %v6323_v48, %v12400_v3  ;;  %v6325_v11 = vmul.f32 %v6323_v48, %v12405_v44  ;;  %v6326_v47 = vmul.f32 %v6323_v48, %v12410_v21  ;;  %v6327_v12 = vmul.f32 %v6323_v48, %v12415_v40  ;;  %v9520_v40 = vld [vmem:[#allocation28] sm:$0xff] }
0x1338   : > { %v6348_v4 = vpop.f32.mrf.mxu3 }
0x1339   : > { %v6351_v56 = vperm.slane %v6348_v4, 0  ;;  %v12509_v4 = vld [vmem:[%s12952_s2 + $0x40] sm:$0xff] }
0x133a   : > { %6699 = vmatpush.msra.mxu0 %v12509_v4 }
0x133b   : > { %v6354_v13 = vadd.f32 %v6351_v56, %v6326_v47  ;;  %v6355_v58 = vadd.f32 %v6351_v56, %v6327_v12  ;;  %v6352_v14 = vadd.f32 %v6351_v56, %v6324_v54  ;;  %v6353_v60 = vadd.f32 %v6351_v56, %v6325_v11  ;;  %v12514_v47 = vld [vmem:[%s12952_s2 + $0x38] sm:$0xff]  ;;  %v12519_v12 = vld [vmem:[%s12952_s2 + $0x30] sm:$0xff] }
0x133c   : > { %6700 = vmatpush.msra.mxu0 %v12514_v47 }
0x133d   : > { %v6358_v61 = vadd.f32 %v12375_v28, %v6354_v13  ;;  %v6359_v36 = vadd.f32 %v12378_v42, %v6355_v58  ;;  %v6356_v3 = vadd.f32 %v12381_v16, %v6352_v14  ;;  %v6357_v44 = vadd.f32 %v12384_v30, %v6353_v60  ;;  %v9521_v28 = vld [vmem:[#allocation28 + $0x8] sm:$0xff]  ;;  %v9522_v42 = vld [vmem:[#allocation28 + $0x10] sm:$0xff]  ;;  %v9529_v30 = vld [vmem:[%s12950_s1 + $0x30] sm:$0xff]  ;;  %s12956_s1 = smov %s12955_s11 }
0x133e   : > { %v9530_v16 = vld [vmem:[%s12949_s0 + $0x38] sm:$0xff]  ;;  %v12524_v13 = vld [vmem:[%s12952_s2 + $0x28] sm:$0xff]  ;;  %6701 = vmatpush.msra.mxu0 %v12519_v12  ;;  %v12529_v58 = vld [vmem:[%s12952_s2 + $0x20] sm:$0xff]  ;;  %s12954_s0 = scalar_lea.vmem [#allocation30], %s11484_s16 }
0x133f   : > { %v12440_v17 = vpack.c.bf16 %v6359_v36, %v6358_v61  ;;  %v12445_v21 = vpack.c.bf16 %v6357_v44, %v6356_v3  ;;  %6576 = vmatpush.bf16.msra.mxu2 %v9530_v16  ;;  %v12549_v16 = vld [vmem:[%s12952_s2] sm:$0xff] }
0x1340   : > { %6702 = vmatpush.msra.mxu0 %v12524_v13 }
0x1341   : > { %6398 = vmatpush.bf16.msrb.mxu1 %v12440_v17 }
0x1342   : > { %6703 = vmatpush.msra.mxu0 %v12529_v58 }
0x1343   : > { %6577 = vmatpush.bf16.msra.mxu2 %v9529_v30 }
0x1345   : > { %6399 = vmatpush.bf16.msrb.mxu1 %v12445_v21 }
0x1347   : > { %6578 = vmatpush.bf16.msra.mxu2 %v9528_v63 }
0x1348   : > { %9067 = vmatmul.msk.bf16.vlgmr.msrb.gmra.mxu1 %vm5479_vm11, %v9520_v40  ;;  %v12536_v40 = vld [vmem:[%s12952_s2 + $0x18] sm:$0xff] }
0x1349   : > { %6704 = vmatpush.msra.mxu0 %v12536_v40  ;;  %6824 = vmatpush.msra.mxu1 %v12569_v45 }
0x134b   : > { %6579 = vmatpush.bf16.msra.mxu2 %v9527_v59 }
0x134f   : > { %6580 = vmatpush.bf16.msra.mxu2 %v9526_v9 }
0x1353   : > { %6581 = vmatpush.bf16.msra.mxu2 %v9525_v62 }
0x1357   : > { %6582 = vmatpush.bf16.msra.mxu2 %v9524_v10 }
0x1358   : > { %9068 = vmatmul.msk.bf16.gmra.mxu1 %vm5479_vm11, %v9521_v28  ;;  %v12539_v28 = vld [vmem:[%s12952_s2 + $0x10] sm:$0xff] }
0x1359   : > { %6705 = vmatpush.msra.mxu0 %v12539_v28 }
0x135b   : > { %6583 = vmatpush.bf16.msra.mxu2 %v9523_v51 }
0x135f   : > { %6727 = vmatpush.msrb.mxu2 %v12476_v52 }
0x1361   : > { %6728 = vmatpush.msrb.mxu2 %v12479_v24 }
0x1363   : > { %6729 = vmatpush.msrb.mxu2 %v12484_v26 }
0x1365   : > { %6730 = vmatpush.msrb.mxu2 %v12489_v32 }
0x1367   : > { %6731 = vmatpush.msrb.mxu2 %v12494_v33 }
0x1368   : > { %9069 = vmatmul.msk.bf16.gmra.mxu1 %vm5479_vm11, %v9522_v42  ;;  %v12546_v42 = vld [vmem:[%s12952_s2 + $0x8] sm:$0xff] }
0x1369   : > { %6732 = vmatpush.msrb.mxu2 %v12499_v29  ;;  %6706 = vmatpush.msra.mxu0 %v12546_v42 }
0x136b   : > { %6733 = vmatpush.msrb.mxu2 %v12504_v31  ;;  %6707 = vmatpush.msra.mxu0 %v12549_v16 }
0x136d   : > { %6734 = vmatpush.msrb.mxu2 %v12509_v4 }
0x136f   : > { %6735 = vmatpush.msrb.mxu2 %v12514_v47 }
0x1371   : > { %6736 = vmatpush.msrb.mxu2 %v12519_v12 }
0x1373   : > { %6737 = vmatpush.msrb.mxu2 %v12524_v13 }
0x1375   : > { %6738 = vmatpush.msrb.mxu2 %v12529_v58 }
0x1377   : > { %6739 = vmatpush.msrb.mxu2 %v12536_v40 }
0x1379   : > { %6740 = vmatpush.msrb.mxu2 %v12539_v28 }
0x137b   : > { %6741 = vmatpush.msrb.mxu2 %v12546_v42 }
0x137d   : > { %6742 = vmatpush.msrb.mxu2 %v12549_v16 }
0x13c5   : > { %v6401_v53 = vpop.f32.mrf.mxu1 }
0x13c6   : > { %v6416_v41 = vpack.c.bf16 %v6401_v53, %v6401_v53 }
0x13c8   : > { %v6524_v27 = vunpack.c.l.b16 %v6416_v41 }
0x13cd   : > { %v6403_v19 = vpop.f32.mrf.mxu1 }
0x13ce   : > { %v6417_v18 = vpack.c.bf16 %v6403_v19, %v6403_v19 }
0x13d0   : > { %v6525_v2 = vunpack.c.l.b16 %v6417_v18 }
0x13d2   : > { %v6526_v7 = vpack.c.b16 %v6525_v2, %v6524_v27 }
0x13d4   : > { %6584 = vmatmul.bf16.vlgmr.msra.gmra.mxu2 %v6526_v7 }
0x13d5   : > { %v6406_v55 = vpop.f32.mrf.mxu1 }
0x13d6   : > { %v6418_v37 = vpack.c.bf16 %v6406_v55, %v6406_v55  ;;  %v12571_v55 = vld [vmem:[#allocation49] sm:$0xff] }
0x13d7   : > { %6799 = vmatpush.msrb.mxu3 %v12571_v55  ;;  %6825 = vmatpush.msra.mxu1 %v12571_v55 }
0x13d8   : > { %v6456_v48 = vunpack.c.l.b16 %v6418_v37 }
0x13dd   : > { %v6408_v5 = vpop.f32.mrf.mxu1 }
0x13de   : > { %v6419_v49 = vpack.c.bf16 %v6408_v5, %v6408_v5 }
0x13e0   : > { %v6457_v54 = vunpack.c.l.b16 %v6419_v49 }
0x13e2   : > { %v6458_v11 = vpack.c.b16 %v6457_v54, %v6456_v48 }
0x13e4   : > { %6516 = vmatmul.bf16.vlgmr.msrb.gmra.mxu0 %v6458_v11 }
0x13e5   : > { %v6411_v56 = vpop.f32.mrf.mxu1 }
0x13e6   : > { %v6420_v14 = vpack.c.bf16 %v6411_v56, %v6411_v56 }
0x13e8   : > { %v6608_v36 = vunpack.c.l.b16 %v6420_v14 }
0x13ed   : > { %v6413_v60 = vpop.f32.mrf.mxu1 }
0x13ee   : > { %v6421_v61 = vpack.c.bf16 %v6413_v60, %v6413_v60 }
0x13f0   : > { %v6609_v3 = vunpack.c.l.b16 %v6421_v61 }
0x13f2   : > { %v6610_v44 = vpack.c.b16 %v6609_v3, %v6608_v36 }
0x13f4   : > { %6668 = vmatmul.bf16.vlgmr.msra.gmra.mxu3 %v6610_v44 }
0x1457   : > { %v6585_v63 = vpop.f32.mrf.mxu2 }
0x145f   : > { %v6587_v38 = vpop.f32.mrf.mxu2 }
0x1461   : > { %v6517_v30 = vpop.f32.mrf.mxu0 }
0x1462   : > { %v6586_v59 = vadd.f32 %v6585_v63, %v6517_v30 }
0x1469   : > { %v6519_v62 = vpop.f32.mrf.mxu0 }
0x146a   : > { %v6588_v10 = vadd.f32 %v6587_v38, %v6519_v62  ;;  %v6776_v38 = vld [vmem:[%s12954_s0] sm:$0x1]  ;;  %s12958_s0 = scalar_lea.vmem [#allocation34], %s11484_s16 }
0x1477   : > { %v6669_v0 = vpop.f32.mrf.mxu3 }
0x1478   : > { %v12555_v9 = vadd.f32 %v6669_v0, %v6586_v59  ;;  %v6763_v0 = vld [vmem:[%s12953_s7] sm:$0x1]  ;;  %s12957_s7 = scalar_lea.vmem [#allocation32], %s11484_s16 }
0x147a   : > { %v6725_v57 = vmul.f32 %v12555_v9, %v12555_v9  ;;  %6708 = vmatmul.f32.vlgmr.msra.gmra.mxu0 %v12555_v9 }
0x147c   : > { %6743 = vmatmul.f32.vlgmr.msrb.gmra.mxu2 %v6725_v57 }
0x147f   : > { %v6671_v46 = vpop.f32.mrf.mxu3 }
0x1480   : > { %v12560_v51 = vadd.f32 %v6671_v46, %v6588_v10 }
0x1482   : > { %6711 = vmatmul.f32.gmra.mxu0 %v12560_v51  ;;  %v6726_v34 = vmul.f32 %v12560_v51, %v12560_v51 }
0x1484   : > { %6746 = vmatmul.f32.gmra.mxu2 %v6726_v34  ;;  %v6833_v34 = vld [vmem:[#allocation7] sm:$0xff] }
0x14f7   : > { %v6709_v43 = vpop.f32.mrf.mxu0 }
0x14f8   : > { %v6716_v22 = vsel %vm6715_vm0, %v6709_v43, 0.0 }
0x14ff   : > { %v6712_v1 = vpop.f32.mrf.mxu0  ;;  %v6744_v25 = vpop.f32.mrf.mxu2 }
0x1500   : > { %v6717_v39 = vsel %vm6715_vm0, %v6712_v1, 0.0  ;;  %v6750_v15 = vsel %vm6715_vm0, %v6744_v25, 0.0  ;;  %v6834_v25 = vld [vmem:[#allocation7 + $0x8] sm:$0xff] }
0x1501   : > { %v6718_v35 = vadd.f32 %v6717_v39, %v6716_v22  ;;  %v6835_v39 = vmul.f32 0.95, %v6833_v34 }
0x1503   : > { %v6719_v53 = vrot.slane %v6718_v35, 4 }
0x1505   : > { %v6720_v6 = vadd.f32 %v6719_v53, %v6718_v35 }
0x1507   : > { %v6721_v50 = vrot.slane %v6720_v6, 2  ;;  %v6747_v41 = vpop.f32.mrf.mxu2 }
0x1508   : > { %v6751_v19 = vsel %vm6715_vm0, %v6747_v41, 0.0 }
0x1509   : > { %v6722_v18 = vadd.f32 %v6721_v50, %v6720_v6  ;;  %v6752_v27 = vadd.f32 %v6751_v19, %v6750_v15  ;;  %v6836_v50 = vmul.f32 0.95, %v6834_v25 }
0x150b   : > { %v6723_v2 = vrot.slane %v6722_v18, 1  ;;  %v6753_v7 = vrot.slane %v6752_v27, 4 }
0x150d   : > { %v6754_v20 = vadd.f32 %v6753_v7, %v6752_v27  ;;  %v6724_v37 = vadd.f32 %v6723_v2, %v6722_v18  ;;  %v9547_v7 = vld [vmem:[#allocation31] sm:$0xff] }
0x150f   : > { %v6755_v5 = vrot.slane %v6754_v20, 2  ;;  %v6759_v48 = vmul.f32 0.0078125, %v6724_v37 }
0x1511   : > { %v6756_v49 = vadd.f32 %v6755_v5, %v6754_v20  ;;  %v6761_v56 = vmul.f32 %v6759_v48, %v6759_v48  ;;  %v9556_v5 = vld [vmem:[%s12956_s1 + $0x30] sm:$0xff] }
0x1513   : > { %v6757_v54 = vrot.slane %v6756_v49, 1 }
0x1515   : > { %v6758_v11 = vadd.f32 %v6757_v54, %v6756_v49  ;;  %v9555_v49 = vld [vmem:[%s12956_s1 + $0x28] sm:$0xff]  ;;  %v9565_v54 = vld [vmem:[%s12956_s1 + $0x78] sm:$0xff] }
0x1516   : > { %6996 = vmatpush.bf16.msrb.mxu0 %v9565_v54 }
0x1517   : > { %v6760_v14 = vmul.f32 0.0078125, %v6758_v11  ;;  %v9553_v11 = vld [vmem:[%s12956_s1 + $0x18] sm:$0xff] }
0x1519   : > { %v6762_v60 = vsub.f32 %v6760_v14, %v6761_v56  ;;  %v9564_v56 = vld [vmem:[%s12956_s1 + $0x70] sm:$0xff] }
0x151a   : > { %v9552_v14 = vld [vmem:[%s12956_s1 + $0x10] sm:$0xff]  ;;  %6997 = vmatpush.bf16.msrb.mxu0 %v9564_v56 }
0x151b   : > { %v6764_v61 = vadd.f32 0.0001, %v6762_v60  ;;  %v9563_v60 = vld [vmem:[%s12956_s1 + $0x68] sm:$0xff] }
0x151d   : > { %9823 = vrsqrt.f32 %v6764_v61  ;;  %vm6771_vm1 = vweird.f32 %v6764_v61 }
0x151e   : > { %6998 = vmatpush.bf16.msrb.mxu0 %v9563_v60 }
0x1523   : > { %v9824_v36 = vpop.eup %9823 }
0x1524   : > { %v6766_v3 = vmul.f32 %v9824_v36, %v6764_v61  ;;  %vm6772_vm9 = vweird.f32 %v9824_v36  ;;  %v9551_v61 = vld [vmem:[%s12956_s1 + $0x8] sm:$0xff] }
0x1525   : > { %vm6773_vm2 = vmor %vm6771_vm1, %vm6772_vm9 }
0x1526   : > { %v6767_v44 = vmul.f32 %v9824_v36, %v6766_v3  ;;  %v9550_v3 = vld [vmem:[%s12956_s1] sm:$0xff] }
0x1528   : > { %v6768_v30 = vmul.f32 0.5, %v6767_v44  ;;  %v9573_v44 = vld [vmem:[%s12956_s1 + $0xb8] sm:$0xff] }
0x1529   : > { %7148 = vmatpush.bf16.msrb.mxu1 %v9573_v44 }
0x152a   : > { %v6769_v63 = vsub.f32 1.5, %v6768_v30  ;;  %v9572_v30 = vld [vmem:[%s12956_s1 + $0xb0] sm:$0xff] }
0x152c   : > { %v6770_v59 = vmul.f32 %v9824_v36, %v6769_v63  ;;  %v9561_v63 = vld [vmem:[%s12956_s1 + $0x58] sm:$0xff] }
0x152d   : > { %7149 = vmatpush.bf16.msrb.mxu1 %v9572_v30 }
0x152e   : > { %v6774_v57 = vsel %vm6773_vm2, %v9824_v36, %v6770_v59  ;;  %v9562_v36 = vld [vmem:[%s12956_s1 + $0x60] sm:$0xff]  ;;  %v9560_v59 = vld [vmem:[%s12956_s1 + $0x50] sm:$0xff] }
0x152f   : > { %v6775_v62 = vmul.f32 %v6774_v57, %v6763_v0  ;;  %6999 = vmatpush.bf16.msrb.mxu0 %v9562_v36  ;;  %v9571_v0 = vld [vmem:[%s12956_s1 + $0xa8] sm:$0xff] }
0x1530   : > { %v9559_v57 = vld [vmem:[%s12956_s1 + $0x48] sm:$0xff] }
0x1531   : > { %9166 = vmatmul.msk.f32.vlgmr.msrb.gmra.mxu3 %vm6715_vm0, %v6775_v62  ;;  %v6777_v10 = vmul.f32 %v6775_v62, %v6759_v48  ;;  %v9554_v48 = vld [vmem:[%s12956_s1 + $0x20] sm:$0xff]  ;;  %7150 = vmatpush.bf16.msrb.mxu1 %v9571_v0 }
0x1532   : > { %v9570_v62 = vld [vmem:[%s12956_s1 + $0xa0] sm:$0xff] }
0x1533   : > { %v6778_v46 = vsub.f32 %v6776_v38, %v6777_v10  ;;  %7000 = vmatpush.bf16.msrb.mxu0 %v9561_v63  ;;  %v9558_v10 = vld [vmem:[%s12956_s1 + $0x40] sm:$0xff] }
0x1535   : > { %9167 = vmatmul.msk.f32.vlgmr.msra.gmra.mxu1 %vm6715_vm0, %v6778_v46  ;;  %v9569_v46 = vld [vmem:[%s12956_s1 + $0x98] sm:$0xff] }
0x1536   : > { %7151 = vmatpush.bf16.msrb.mxu1 %v9570_v62 }
0x1537   : > { %7001 = vmatpush.bf16.msrb.mxu0 %v9560_v59 }
0x153a   : > { %7152 = vmatpush.bf16.msrb.mxu1 %v9569_v46 }
0x153b   : > { %7002 = vmatpush.bf16.msrb.mxu0 %v9559_v57 }
0x153f   : > { %7003 = vmatpush.bf16.msrb.mxu0 %v9558_v10 }
0x1543   : > { %7214 = vmatpush.msra.mxu0 %v12476_v52 }
0x1545   : > { %7215 = vmatpush.msra.mxu0 %v12479_v24 }
0x1547   : > { %7216 = vmatpush.msra.mxu0 %v12484_v26 }
0x1549   : > { %7217 = vmatpush.msra.mxu0 %v12489_v32 }
0x154b   : > { %7218 = vmatpush.msra.mxu0 %v12494_v33 }
0x154d   : > { %7219 = vmatpush.msra.mxu0 %v12499_v29 }
0x154f   : > { %7220 = vmatpush.msra.mxu0 %v12504_v31 }
0x1551   : > { %7221 = vmatpush.msra.mxu0 %v12509_v4 }
0x1553   : > { %7222 = vmatpush.msra.mxu0 %v12514_v47 }
0x1555   : > { %7223 = vmatpush.msra.mxu0 %v12519_v12 }
0x1557   : > { %7224 = vmatpush.msra.mxu0 %v12524_v13 }
0x1559   : > { %7225 = vmatpush.msra.mxu0 %v12529_v58 }
0x155b   : > { %7226 = vmatpush.msra.mxu0 %v12536_v40 }
0x155d   : > { %7227 = vmatpush.msra.mxu0 %v12539_v28 }
0x155f   : > { %7228 = vmatpush.msra.mxu0 %v12546_v42 }
0x1561   : > { %7229 = vmatpush.msra.mxu0 %v12549_v16 }
0x15b2   : > { %v6827_v43 = vpop.f32.mrf.mxu1 }
0x15b3   : > { %v6830_v35 = vperm.slane %v6827_v43, 0  ;;  %v9568_v43 = vld [vmem:[%s12956_s1 + $0x90] sm:$0xff] }
0x15b4   : > { %v6801_v1 = vpop.f32.mrf.mxu3  ;;  %7153 = vmatpush.bf16.msrb.mxu1 %v9568_v43 }
0x15b5   : > { %v6804_v22 = vperm.slane %v6801_v1, 0 }
0x15b7   : > { %v6805_v53 = vmul.f32 %v6804_v22, %v12555_v9  ;;  %v6806_v6 = vmul.f32 %v6804_v22, %v12560_v51  ;;  %v9548_v9 = vld [vmem:[#allocation31 + $0x8] sm:$0xff] }
0x15b8   : > { %v9557_v51 = vld [vmem:[%s12955_s11 + $0x38] sm:$0xff]  ;;  %s12959_s11 = scalar_lea.vmem [#allocation44], %s11484_s16 }
0x15b9   : > { %v6831_v41 = vadd.f32 %v6830_v35, %v6805_v53  ;;  %v6832_v15 = vadd.f32 %v6830_v35, %v6806_v6  ;;  %7064 = vmatpush.bf16.msra.mxu2 %v9557_v51  ;;  %v9567_v53 = vld [vmem:[%s12956_s1 + $0x88] sm:$0xff]  ;;  %v9566_v6 = vld [vmem:[%s12956_s1 + $0x80] sm:$0xff]  ;;  %s12962_s1 = sld [smem:[#allocation107_spill]] }
0x15ba   : > { %7154 = vmatpush.bf16.msrb.mxu1 %v9567_v53 }
0x15bb   : > { %v6837_v19 = vadd.f32 %v6835_v39, %v6831_v41  ;;  %v6838_v18 = vadd.f32 %v6836_v50, %v6832_v15 }
0x15bd   : > { %vm6839_vm10 = vcmp.gt.f32.partialorder %v6837_v19, 1.0  ;;  %vm6840_vm12 = vcmp.gt.f32.partialorder %v6838_v18, 1.0  ;;  %7065 = vmatpush.bf16.msra.mxu2 %v9556_v5 }
0x15be   : > { %v9168_v27 = vsel %vm6839_vm10, 1.0, %v10833_v23  ;;  %v9169_v2 = vsel %vm6840_vm12, 1.0, %v10833_v23  ;;  %vm9182_vm13 = vmpackc.low %vm6840_vm12, %vm6839_vm10  ;;  %7155 = vmatpush.bf16.msrb.mxu1 %v9566_v6 }
0x15bf   : > { %v6845_v20 = vsub.f32 %v6837_v19, %v9168_v27  ;;  %v6846_v37 = vsub.f32 %v6838_v18, %v9169_v2  ;;  %9183 = vmatpush.bf16.msk.msra.mxu3 %vm9182_vm13, %v10834_v8  ;;  %v9549_v8 = vld [vmem:[#allocation31 + $0x10] sm:$0xff] }
0x15c1   : > { %6847 = vst [vmem:[#allocation7] sm:$0xff] %v6845_v20  ;;  %7066 = vmatpush.bf16.msra.mxu2 %v9555_v49 }
0x15c2   : > { %6848 = vst [vmem:[#allocation7 + $0x8] sm:$0xff] %v6846_v37  ;;  %9184 = vmatmul.msk.bf16.vlgmr.msra.gmra.mxu3 %vm6715_vm0, %v9547_v7 }
0x15c3   : > { %7180 = vmatpush.msrb.mxu3 %v12476_v52 }
0x15c5   : > { %7181 = vmatpush.msrb.mxu3 %v12479_v24  ;;  %7067 = vmatpush.bf16.msra.mxu2 %v9554_v48 }
0x15c7   : > { %7182 = vmatpush.msrb.mxu3 %v12484_v26 }
0x15c9   : > { %7183 = vmatpush.msrb.mxu3 %v12489_v32  ;;  %7068 = vmatpush.bf16.msra.mxu2 %v9553_v11 }
0x15cb   : > { %7184 = vmatpush.msrb.mxu3 %v12494_v33 }
0x15cd   : > { %7185 = vmatpush.msrb.mxu3 %v12499_v29  ;;  %7069 = vmatpush.bf16.msra.mxu2 %v9552_v14 }
0x15cf   : > { %7186 = vmatpush.msrb.mxu3 %v12504_v31 }
0x15d1   : > { %7187 = vmatpush.msrb.mxu3 %v12509_v4  ;;  %7070 = vmatpush.bf16.msra.mxu2 %v9551_v61 }
0x15d2   : > { %9185 = vmatmul.msk.bf16.gmra.mxu3 %vm6715_vm0, %v9548_v9 }
0x15d3   : > { %7188 = vmatpush.msrb.mxu3 %v12514_v47 }
0x15d5   : > { %7189 = vmatpush.msrb.mxu3 %v12519_v12  ;;  %7071 = vmatpush.bf16.msra.mxu2 %v9550_v3 }
0x15d7   : > { %7190 = vmatpush.msrb.mxu3 %v12524_v13 }
0x15d9   : > { %7191 = vmatpush.msrb.mxu3 %v12529_v58  ;;  %7285 = vmatpush.msrb.mxu2 %v12569_v45 }
0x15db   : > { %7192 = vmatpush.msrb.mxu3 %v12536_v40  ;;  %7286 = vmatpush.msrb.mxu2 %v12571_v55 }
0x15dd   : > { %7193 = vmatpush.msrb.mxu3 %v12539_v28 }
0x15df   : > { %7194 = vmatpush.msrb.mxu3 %v12546_v42 }
0x15e1   : > { %7195 = vmatpush.msrb.mxu3 %v12549_v16 }
0x15e2   : > { %9186 = vmatmul.msk.bf16.gmra.mxu3 %vm6715_vm0, %v9549_v8 }
0x15e3   : > { %7489 = vmatpush.msra.mxu3 %v12476_v52 }
0x15e5   : > { %7490 = vmatpush.msra.mxu3 %v12479_v24 }
0x15e7   : > { %7491 = vmatpush.msra.mxu3 %v12484_v26 }
0x15e9   : > { %7492 = vmatpush.msra.mxu3 %v12489_v32 }
0x15eb   : > { %7493 = vmatpush.msra.mxu3 %v12494_v33 }
0x15ed   : > { %7494 = vmatpush.msra.mxu3 %v12499_v29 }
0x15ef   : > { %7495 = vmatpush.msra.mxu3 %v12504_v31 }
0x15f1   : > { %7496 = vmatpush.msra.mxu3 %v12509_v4 }
0x15f3   : > { %7497 = vmatpush.msra.mxu3 %v12514_v47 }
0x15f5   : > { %7498 = vmatpush.msra.mxu3 %v12519_v12 }
0x15f7   : > { %7499 = vmatpush.msra.mxu3 %v12524_v13 }
0x15f9   : > { %7500 = vmatpush.msra.mxu3 %v12529_v58 }
0x15fb   : > { %7501 = vmatpush.msra.mxu3 %v12536_v40 }
0x15fd   : > { %7502 = vmatpush.msra.mxu3 %v12539_v28 }
0x15ff   : > { %7503 = vmatpush.msra.mxu3 %v12546_v42 }
0x1601   : > { %7504 = vmatpush.msra.mxu3 %v12549_v16 }
0x1645   : > { %v6889_v38 = vpop.f32.mrf.mxu3 }
0x1646   : > { %v6904_v34 = vpack.c.bf16 %v6889_v38, %v6889_v38 }
0x1648   : > { %v7012_v22 = vunpack.c.l.b16 %v6904_v34 }
0x164d   : > { %v6891_v1 = vpop.f32.mrf.mxu3 }
0x164e   : > { %v6905_v25 = vpack.c.bf16 %v6891_v1, %v6891_v1 }
0x1650   : > { %v7013_v39 = vunpack.c.l.b16 %v6905_v25 }
0x1652   : > { %v7014_v35 = vpack.c.b16 %v7013_v39, %v7012_v22 }
0x1654   : > { %7072 = vmatmul.bf16.vlgmr.msra.gmra.mxu2 %v7014_v35 }
0x1655   : > { %v6894_v50 = vpop.f32.mrf.mxu3  ;;  %7311 = vmatpush.msra.mxu2 %v12569_v45 }
0x1656   : > { %v6906_v41 = vpack.c.bf16 %v6894_v50, %v6894_v50 }
0x1657   : > { %7312 = vmatpush.msra.mxu2 %v12571_v55 }
0x1658   : > { %v6944_v18 = vunpack.c.l.b16 %v6906_v41 }
0x165d   : > { %v6896_v15 = vpop.f32.mrf.mxu3 }
0x165e   : > { %v6907_v19 = vpack.c.bf16 %v6896_v15, %v6896_v15 }
0x1660   : > { %v6945_v27 = vunpack.c.l.b16 %v6907_v19 }
0x1662   : > { %v6946_v2 = vpack.c.b16 %v6945_v27, %v6944_v18 }
0x1664   : > { %7004 = vmatmul.bf16.vlgmr.msrb.gmra.mxu0 %v6946_v2 }
0x1665   : > { %v6899_v7 = vpop.f32.mrf.mxu3  ;;  %7560 = vmatpush.msrb.mxu0 %v12569_v45 }
0x1666   : > { %v6908_v20 = vpack.c.bf16 %v6899_v7, %v6899_v7 }
0x1667   : > { %7561 = vmatpush.msrb.mxu0 %v12571_v55 }
0x1668   : > { %v7096_v8 = vunpack.c.l.b16 %v6908_v20  ;;  %v9582_v20 = vld [vmem:[#allocation43 + $0x38] sm:$0xff] }
0x1669   : > { %7425 = vmatpush.bf16.msra.mxu1 %v9582_v20 }
0x166d   : > { %v6901_v37 = vpop.f32.mrf.mxu3 }
0x166e   : > { %v6909_v9 = vpack.c.bf16 %v6901_v37, %v6901_v37 }
0x1670   : > { %v7097_v51 = vunpack.c.l.b16 %v6909_v9 }
0x1672   : > { %v7098_v5 = vpack.c.b16 %v7097_v51, %v7096_v8 }
0x1674   : > { %7156 = vmatmul.bf16.vlgmr.msrb.gmra.mxu1 %v7098_v5 }
0x16d7   : > { %v7073_v48 = vpop.f32.mrf.mxu2 }
0x16df   : > { %v7075_v61 = vpop.f32.mrf.mxu2 }
0x16e1   : > { %v7005_v49 = vpop.f32.mrf.mxu0 }
0x16e2   : > { %v7074_v54 = vadd.f32 %v7073_v48, %v7005_v49  ;;  %v7250_v49 = vld [vmem:[%s12957_s7] sm:$0x1]  ;;  %s12960_s7 = sld [smem:[#allocation106_spill]] }
0x16e9   : > { %v7007_v60 = vpop.f32.mrf.mxu0 }
0x16ea   : > { %v7076_v36 = vadd.f32 %v7075_v61, %v7007_v60  ;;  %v7263_v60 = vld [vmem:[%s12958_s0] sm:$0x1]  ;;  %s12961_s0 = scalar_lea.vmem [#allocation46], %s11484_s16  ;;  %s12963_s16 = sld [smem:[#allocation110_spill]] }
0x16f0   : > { %p9328_p5 = scmp.ne.s32.totalorder %s12963_s16, 1 }
0x16f1   : > { %v7157_v11 = vpop.f32.mrf.mxu1 }
0x16f2   : > { %v12669_v56 = vadd.f32 %v7157_v11, %v7074_v54 }
0x16f4   : > { %v7212_v14 = vmul.f32 %v12669_v56, %v12669_v56  ;;  %7196 = vmatmul.f32.vlgmr.msrb.gmra.mxu3 %v12669_v56 }
0x16f6   : > { %7230 = vmatmul.f32.vlgmr.msra.gmra.mxu0 %v7212_v14 }
0x16f7   : > { %7586 = vmatpush.msra.mxu0 %v12569_v45 }
0x16f9   : > { %v7159_v3 = vpop.f32.mrf.mxu1  ;;  %7587 = vmatpush.msra.mxu0 %v12571_v55 }
0x16fa   : > { %v12676_v44 = vadd.f32 %v7159_v3, %v7076_v36  ;;  %v9574_v36 = vld [vmem:[#allocation41] sm:$0xff]  ;;  %v9579_v3 = vld [vmem:[#allocation43 + $0x20] sm:$0xff] }
0x16fc   : > { %7199 = vmatmul.f32.gmra.mxu3 %v12676_v44  ;;  %v7213_v30 = vmul.f32 %v12676_v44, %v12676_v44 }
0x16fe   : > { %7233 = vmatmul.f32.gmra.mxu0 %v7213_v30  ;;  %v9578_v30 = vld [vmem:[#allocation43 + $0x18] sm:$0xff] }
0x1773   : > { %v7231_v63 = vpop.f32.mrf.mxu0 }
0x1774   : > { %v7237_v57 = vsel %vm6715_vm0, %v7231_v63, 0.0  ;;  %v9577_v63 = vld [vmem:[#allocation43 + $0x10] sm:$0xff] }
0x1777   : > { %v7197_v59 = vpop.f32.mrf.mxu3 }
0x1778   : > { %v7203_v55 = vsel %vm6715_vm0, %v7197_v59, 0.0  ;;  %v9576_v59 = vld [vmem:[#allocation43 + $0x8] sm:$0xff] }
0x177b   : > { %v7234_v0 = vpop.f32.mrf.mxu0 }
0x177c   : > { %v7238_v62 = vsel %vm6715_vm0, %v7234_v0, 0.0  ;;  %v9575_v0 = vld [vmem:[#allocation43] sm:$0xff] }
0x177d   : > { %v7239_v45 = vadd.f32 %v7238_v62, %v7237_v57 }
0x177f   : > { %v7240_v38 = vrot.slane %v7239_v45, 4  ;;  %v7200_v10 = vpop.f32.mrf.mxu3 }
0x1780   : > { %v7204_v46 = vsel %vm6715_vm0, %v7200_v10, 0.0 }
0x1781   : > { %v7241_v34 = vadd.f32 %v7240_v38, %v7239_v45  ;;  %v7205_v43 = vadd.f32 %v7204_v46, %v7203_v55  ;;  %v7320_v45 = vld [vmem:[#allocation8] sm:$0xff]  ;;  %v7321_v38 = vld [vmem:[#allocation8 + $0x8] sm:$0xff] }
0x1782   : > { %v7322_v55 = vmul.f32 0.95, %v7320_v45 }
0x1783   : > { %v7242_v1 = vrot.slane %v7241_v34, 2  ;;  %v7206_v25 = vrot.slane %v7205_v43, 4 }
0x1785   : > { %v7243_v22 = vadd.f32 %v7242_v1, %v7241_v34  ;;  %v7207_v39 = vadd.f32 %v7206_v25, %v7205_v43  ;;  %v7323_v1 = vmul.f32 0.95, %v7321_v38 }
0x1787   : > { %v7208_v35 = vrot.slane %v7207_v39, 2  ;;  %v7244_v53 = vrot.slane %v7243_v22, 1 }
0x1789   : > { %v7209_v6 = vadd.f32 %v7208_v35, %v7207_v39  ;;  %v7245_v41 = vadd.f32 %v7244_v53, %v7243_v22 }
0x178b   : > { %v7210_v50 = vrot.slane %v7209_v6, 1  ;;  %v7247_v18 = vmul.f32 0.0078125, %v7245_v41 }
0x178d   : > { %v7211_v15 = vadd.f32 %v7210_v50, %v7209_v6 }
0x178f   : > { %v7246_v19 = vmul.f32 0.0078125, %v7211_v15 }
0x1791   : > { %v7248_v27 = vmul.f32 %v7246_v19, %v7246_v19 }
0x1793   : > { %v7249_v2 = vsub.f32 %v7247_v18, %v7248_v27 }
0x1795   : > { %v7251_v7 = vadd.f32 0.0001, %v7249_v2 }
0x1797   : > { %9825 = vrsqrt.f32 %v7251_v7  ;;  %vm7258_vm4 = vweird.f32 %v7251_v7 }
0x179d   : > { %v9826_v37 = vpop.eup %9825 }
0x179e   : > { %v7253_v9 = vmul.f32 %v9826_v37, %v7251_v7  ;;  %vm7259_vm14 = vweird.f32 %v9826_v37 }
0x179f   : > { %vm7260_vm15 = vmor %vm7258_vm4, %vm7259_vm14 }
0x17a0   : > { %v7254_v8 = vmul.f32 %v9826_v37, %v7253_v9 }
0x17a2   : > { %v7255_v51 = vmul.f32 0.5, %v7254_v8 }
0x17a4   : > { %v7256_v5 = vsub.f32 1.5, %v7255_v51 }
0x17a6   : > { %v7257_v48 = vmul.f32 %v9826_v37, %v7256_v5 }
0x17a8   : > { %v7261_v54 = vsel %vm7260_vm15, %v9826_v37, %v7257_v48 }
0x17a9   : > { %v7262_v11 = vmul.f32 %v7261_v54, %v7250_v49 }
0x17ab   : > { %9283 = vmatmul.msk.f32.vlgmr.msrb.gmra.mxu2 %vm6715_vm0, %v7262_v11  ;;  %v7264_v14 = vmul.f32 %v7262_v11, %v7246_v19 }
0x17ac   : > { %7352 = vmatpush.bf16.msrb.mxu2 %v12440_v17  ;;  %v9581_v17 = vld [vmem:[#allocation43 + $0x30] sm:$0xff] }
0x17ad   : > { %v7265_v61 = vsub.f32 %v7263_v60, %v7264_v14  ;;  %7426 = vmatpush.bf16.msra.mxu1 %v9581_v17 }
0x17b0   : > { %7353 = vmatpush.bf16.msrb.mxu2 %v12445_v21  ;;  %v9580_v21 = vld [vmem:[#allocation43 + $0x28] sm:$0xff] }
0x17b1   : > { %7427 = vmatpush.bf16.msra.mxu1 %v9580_v21  ;;  %v7525_v21 = vld [vmem:[%s12959_s11] sm:$0x1] }
0x17b3   : > { %9284 = vmatmul.msk.f32.vlgmr.msra.gmra.mxu2 %vm6715_vm0, %v7265_v61 }
0x17b4   : > { %7455 = vmatpush.msra.mxu2 %v12476_v52 }
0x17b5   : > { %7428 = vmatpush.bf16.msra.mxu1 %v9579_v3 }
0x17b6   : > { %7456 = vmatpush.msra.mxu2 %v12479_v24 }
0x17b8   : > { %7457 = vmatpush.msra.mxu2 %v12484_v26 }
0x17b9   : > { %7429 = vmatpush.bf16.msra.mxu1 %v9578_v30 }
0x17ba   : > { %7458 = vmatpush.msra.mxu2 %v12489_v32 }
0x17bb   : > { %9291 = vmatmul.msk.bf16.vlgmr.msrb.gmra.mxu2 %vm5479_vm11, %v9574_v36 }
0x17bc   : > { %7459 = vmatpush.msra.mxu2 %v12494_v33 }
0x17bd   : > { %7430 = vmatpush.bf16.msra.mxu1 %v9577_v63 }
0x17be   : > { %7460 = vmatpush.msra.mxu2 %v12499_v29 }
0x17c0   : > { %7461 = vmatpush.msra.mxu2 %v12504_v31 }
0x17c1   : > { %7431 = vmatpush.bf16.msra.mxu1 %v9576_v59  ;;  %v7538_v59 = vld [vmem:[%s12961_s0] sm:$0x1] }
0x17c2   : > { %7462 = vmatpush.msra.mxu2 %v12509_v4 }
0x17c4   : > { %7463 = vmatpush.msra.mxu2 %v12514_v47 }
0x17c5   : > { %7432 = vmatpush.bf16.msra.mxu1 %v9575_v0 }
0x17c6   : > { %7464 = vmatpush.msra.mxu2 %v12519_v12 }
0x17c8   : > { %7465 = vmatpush.msra.mxu2 %v12524_v13 }
0x17c9   : > { %7621 = vmatpush.msrb.mxu1 %v12476_v52 }
0x17ca   : > { %7466 = vmatpush.msra.mxu2 %v12529_v58 }
0x17cb   : > { %7622 = vmatpush.msrb.mxu1 %v12479_v24 }
0x17cc   : > { %7467 = vmatpush.msra.mxu2 %v12536_v40 }
0x17cd   : > { %7623 = vmatpush.msrb.mxu1 %v12484_v26 }
0x17ce   : > { %7468 = vmatpush.msra.mxu2 %v12539_v28 }
0x17cf   : > { %7624 = vmatpush.msrb.mxu1 %v12489_v32 }
0x17d0   : > { %7469 = vmatpush.msra.mxu2 %v12546_v42 }
0x17d1   : > { %7625 = vmatpush.msrb.mxu1 %v12494_v33 }
0x17d2   : > { %7470 = vmatpush.msra.mxu2 %v12549_v16 }
0x17d3   : > { %7626 = vmatpush.msrb.mxu1 %v12499_v29 }
0x17d5   : > { %7627 = vmatpush.msrb.mxu1 %v12504_v31 }
0x17d7   : > { %7628 = vmatpush.msrb.mxu1 %v12509_v4 }
0x17d9   : > { %7629 = vmatpush.msrb.mxu1 %v12514_v47 }
0x17db   : > { %7630 = vmatpush.msrb.mxu1 %v12519_v12 }
0x17dd   : > { %7631 = vmatpush.msrb.mxu1 %v12524_v13 }
0x17df   : > { %7632 = vmatpush.msrb.mxu1 %v12529_v58 }
0x17e1   : > { %7633 = vmatpush.msrb.mxu1 %v12536_v40 }
0x17e3   : > { %7634 = vmatpush.msrb.mxu1 %v12539_v28 }
0x17e5   : > { %7635 = vmatpush.msrb.mxu1 %v12546_v42 }
0x17e7   : > { %7636 = vmatpush.msrb.mxu1 %v12549_v16 }
0x182e   : > { %v7288_v57 = vpop.f32.mrf.mxu2 }
0x182f   : > { %v7291_v62 = vperm.slane %v7288_v57, 0 }
0x1831   : > { %v7292_v46 = vmul.f32 %v7291_v62, %v12669_v56  ;;  %v7293_v34 = vmul.f32 %v7291_v62, %v12676_v44 }
0x1836   : > { %v7314_v10 = vpop.f32.mrf.mxu2 }
0x1837   : > { %v7317_v43 = vperm.slane %v7314_v10, 0 }
0x1839   : > { %v7318_v52 = vadd.f32 %v7317_v43, %v7292_v46  ;;  %v7319_v24 = vadd.f32 %v7317_v43, %v7293_v34 }
0x183b   : > { %v7324_v26 = vadd.f32 %v7322_v55, %v7318_v52  ;;  %v7325_v25 = vadd.f32 %v7323_v1, %v7319_v24  ;;  %v7597_v52 = vld [vmem:[%s12960_s7] sm:$0x3]  ;;  %v7643_v24 = vld [vmem:[%s12962_s1 + $0x8] sm:$0xff] }
0x183d   : > { %vm7327_vm11 = vcmp.gt.f32.partialorder %v7325_v25, 1.0  ;;  %vm7326_vm3 = vcmp.gt.f32.partialorder %v7324_v26, 1.0 }
0x183e   : > { %v7355_v32 = vpop.f32.mrf.mxu2  ;;  %v12721_v33 = vsel %vm7327_vm11, 1.0, %v10833_v23  ;;  %v12724_v56 = vsel %vm7326_vm3, 1.0, %v10833_v23 }
0x183f   : > { %v7333_v29 = vsub.f32 %v7325_v25, %v12721_v33  ;;  %v7332_v44 = vsub.f32 %v7324_v26, %v12724_v56  ;;  %v7642_v26 = vld [vmem:[%s12962_s1] sm:$0xff] }
0x1841   : > { %7335 = vst [vmem:[#allocation8 + $0x8] sm:$0xff] %v7333_v29  ;;  %v7641_v29 = vld [vmem:[#allocation50] sm:$0x3] }
0x1842   : > { %7334 = vst [vmem:[#allocation8] sm:$0xff] %v7332_v44 }
0x1846   : > { %v7357_v31 = vpop.f32.mrf.mxu2 }
0x1847   : > { %v7360_v4 = vpack.c.bf16 %v7357_v31, %v7355_v32 }
0x1849   : > { %7433 = vmatmul.bf16.vlgmr.msra.gmra.mxu1 %v7360_v4 }
0x18c6   : > { %v7434_v23 = vpop.f32.mrf.mxu1 }
0x18c7   : > { %v7487_v47 = vmul.f32 %v7434_v23, %v7434_v23  ;;  %7471 = vmatmul.f32.vlgmr.msra.gmra.mxu2 %v7434_v23 }
0x18c9   : > { %7505 = vmatmul.f32.vlgmr.msra.gmra.mxu3 %v7487_v47 }
0x18ce   : > { %v7436_v12 = vpop.f32.mrf.mxu1 }
0x18cf   : > { %v7488_v22 = vmul.f32 %v7436_v12, %v7436_v12  ;;  %7474 = vmatmul.f32.gmra.mxu2 %v7436_v12 }
0x18d1   : > { %7508 = vmatmul.f32.gmra.mxu3 %v7488_v22 }
0x194a   : > { %v7472_v13 = vpop.f32.mrf.mxu2 }
0x194b   : > { %v7478_v40 = vsel %vm6715_vm0, %v7472_v13, 0.0 }
0x194c   : > { %v7506_v58 = vpop.f32.mrf.mxu3 }
0x194d   : > { %v7512_v42 = vsel %vm6715_vm0, %v7506_v58, 0.0 }
0x1952   : > { %v7475_v39 = vpop.f32.mrf.mxu2 }
0x1953   : > { %v7479_v28 = vsel %vm6715_vm0, %v7475_v39, 0.0 }
0x1954   : > { %v7480_v35 = vadd.f32 %v7479_v28, %v7478_v40  ;;  %v7509_v53 = vpop.f32.mrf.mxu3 }
0x1955   : > { %v7513_v16 = vsel %vm6715_vm0, %v7509_v53, 0.0 }
0x1956   : > { %v7481_v6 = vrot.slane %v7480_v35, 4  ;;  %v7514_v50 = vadd.f32 %v7513_v16, %v7512_v42 }
0x1958   : > { %v7482_v41 = vadd.f32 %v7481_v6, %v7480_v35  ;;  %v7515_v15 = vrot.slane %v7514_v50, 4 }
0x195a   : > { %v7483_v19 = vrot.slane %v7482_v41, 2  ;;  %v7516_v18 = vadd.f32 %v7515_v15, %v7514_v50 }
0x195c   : > { %v7484_v27 = vadd.f32 %v7483_v19, %v7482_v41  ;;  %v7517_v2 = vrot.slane %v7516_v18, 2 }
0x195e   : > { %v7485_v7 = vrot.slane %v7484_v27, 1  ;;  %v7518_v20 = vadd.f32 %v7517_v2, %v7516_v18 }
0x1960   : > { %v7486_v37 = vadd.f32 %v7485_v7, %v7484_v27  ;;  %v7519_v9 = vrot.slane %v7518_v20, 1 }
0x1962   : > { %v7521_v8 = vmul.f32 0.0078125, %v7486_v37  ;;  %v7520_v51 = vadd.f32 %v7519_v9, %v7518_v20 }
0x1964   : > { %v7523_v5 = vmul.f32 %v7521_v8, %v7521_v8  ;;  %v7522_v49 = vmul.f32 0.0078125, %v7520_v51 }
0x1966   : > { %v7524_v48 = vsub.f32 %v7522_v49, %v7523_v5 }
0x1968   : > { %v7526_v54 = vadd.f32 0.0001, %v7524_v48 }
0x196a   : > { %9827 = vrsqrt.f32 %v7526_v54  ;;  %vm7533_vm6 = vweird.f32 %v7526_v54 }
0x1970   : > { %v9828_v11 = vpop.eup %9827 }
0x1971   : > { %v7528_v14 = vmul.f32 %v9828_v11, %v7526_v54  ;;  %vm7534_vm5 = vweird.f32 %v9828_v11 }
0x1972   : > { %vm7535_vm7 = vmor %vm7533_vm6, %vm7534_vm5 }
0x1973   : > { %v7529_v60 = vmul.f32 %v9828_v11, %v7528_v14 }
0x1975   : > { %v7530_v61 = vmul.f32 0.5, %v7529_v60 }
0x1977   : > { %v7531_v36 = vsub.f32 1.5, %v7530_v61 }
0x1979   : > { %v7532_v17 = vmul.f32 %v9828_v11, %v7531_v36 }
0x197b   : > { %v7536_v3 = vsel %vm7535_vm7, %v9828_v11, %v7532_v17 }
0x197c   : > { %v7537_v30 = vmul.f32 %v7536_v3, %v7525_v21 }
0x197e   : > { %9324 = vmatmul.msk.f32.vlgmr.msrb.gmra.mxu0 %vm6715_vm0, %v7537_v30  ;;  %v7539_v63 = vmul.f32 %v7537_v30, %v7521_v8 }
0x1980   : > { %v7540_v0 = vsub.f32 %v7538_v59, %v7539_v63 }
0x1986   : > { %9325 = vmatmul.msk.f32.vlgmr.msra.gmra.mxu0 %vm6715_vm0, %v7540_v0 }
0x19fb   : > { %v7563_v57 = vpop.f32.mrf.mxu0 }
0x19fc   : > { %v7566_v62 = vperm.slane %v7563_v57, 0 }
0x19fe   : > { %v7567_v38 = vmul.f32 %v7566_v62, %v7434_v23  ;;  %v7568_v10 = vmul.f32 %v7566_v62, %v7436_v12 }
0x1a03   : > { %v7589_v45 = vpop.f32.mrf.mxu0 }
0x1a04   : > { %v7592_v55 = vperm.slane %v7589_v45, 0 }
0x1a06   : > { %v7593_v46 = vadd.f32 %v7592_v55, %v7567_v38  ;;  %v7594_v34 = vadd.f32 %v7592_v55, %v7568_v10 }
0x1a08   : > { %v7596_v43 = vadd.f32 %v12721_v33, %v7594_v34  ;;  %v7595_v1 = vadd.f32 %v12724_v56, %v7593_v46 }
0x1a0a   : > { %7615 = vmatpush.msrb.mxu0 %v7596_v43 }
0x1a0c   : > { %7616 = vmatpush.msrb.mxu0 %v7595_v1 }
0x1a0d   : > { %9326 = vmatmul.msk.f32.vlgmr.msrb.gmra.mxu0 %vm6715_vm0, %v7597_v52 }
0x1a0e   : > { %7661 = vmatpush.msra.mxu0 %v7643_v24 }
0x1a10   : > { %7662 = vmatpush.msra.mxu0 %v7642_v26 }
0x1a8a   : > { %v7618_v25 = vpop.f32.mrf.mxu0 }
0x1a8b   : > { %7637 = vmatmul.f32.vlgmr.msrb.gmra.mxu1 %v7618_v25 }
0x1b08   : > { %v7638_v32 = vpop.f32.mrf.mxu1 }
0x1b09   : > { %9327 = vmatmul.msk.f32.vlgmr.msra.gmra.mxu0 %vm6715_vm0, %v7638_v32 }
0x1b85   : > { %7673 = sbr.rel (%p9328_p5) target bundleno = 7060 (0x1b94), region = 320 }
0x1b86   : > { %v7664_v44 = vpop.f32.mrf.mxu0 }
0x1b87   : > { %v7667_v33 = vadd.f32 %v7664_v44, %v7641_v29 }
0x1b89   : > { %7669 = vst.msk [vmem:[#allocation50] sm:$0x3] %vm7668_vm8, %v7667_v33 }
0x1b90   : > { %v7674_v56 = vld [vmem:[#allocation50] sm:$0x3] }
0x1b91   : > { %v7675_v31 = vmul.f32 0.5, %v7674_v56 }
0x1b93   : > { %7676 = vst.msk [vmem:[#allocation50] sm:$0x3] %vm7668_vm8, %v7675_v31 }
0x1b94 PF: > { %s12964_s11 = sld [smem:[#allocation110_spill]]  ;;  %s10835_s0 = smov [#allocation50]  }
0x1b95   : > { %s12965_s7 = sld [smem:[#allocation108_spill]]  ;;  %s7683_s2 = sshll.u32 %s10835_s0, 4  ;;  %s7684_s2 = int_to_ptr.vmem [resolvable:$true] %s7683_s2 }
0x1b9a   : > { %p9714_p8 = scmp.eq.s32.totalorder %s12964_s11, 1 }
0x1b9b   : > { %s12966_s1 = smov %s12965_s7  ;;  %s7685_s3 = sshll.u32 %s12965_s7, 4  ;;  %s7686_s3 = int_to_ptr.hbm [resolvable:$true] %s7685_s3 }
0x1b9c   : > { %s10647_s4 = sshra.s32 %s7686_s3, 4  ;;  %s10653_s16 = scalar_lea.hbm %s12966_s1, 2  ;;  %s10648_s4 = int_to_ptr.hbm [resolvable:$true] %s10647_s4 }
0x1b9d   : > { %s10649_s5 = scalar_lea.hbm %s10648_s4, 2  ;;  %p10654_p11 = scmp.lt.s32.totalorder %s10648_s4, %s12966_s1 }
0x1b9e   : > { %p10650_p3 = scmp.ne.s32.totalorder %s10648_s4, %s10649_s5  ;;  %p10655_p9 = scmp.lt.s32.totalorder %s10653_s16, %s10649_s5 }
0x1ba0   : > { %p10651_p6 = pnand %p10650_p3, %p9714_p8  ;;  %p10656_p12 = por %p10655_p9, %p10654_p11 }
0x1ba2   : > { %p10652_p7 = pneg %p10651_p6 }
0x1ba4   : > { %p10657_p0 = pnand %p10656_p12, %p10652_p7 }
0x1ba6   : > { %10660 = shalt.err (!%p10657_p0)
}
0x1ba7   : > { %9660 = dma.vmem_to_hbm [thread:$0]  (%p9714_p8), %s7684_s2, 32, %s7686_s3, [#allocation11]  }
0x1ba8   : > { %10754 = dma.done.wait (%p9714_p8), [#allocation11], 32  }
0x1ba9   : > { %10756 = vsyncadd (%p9714_p8), [#allocation11], 4294967264 }
0x1baa PF: > { %s12967_s11 = sld [smem:[#allocation111_spill]]  ;;  %s12970_s7 = smov %s10767_s10 }
0x1bab   : > { %s12968_s0 = sld [smem:[#allocation109_spill]] }
0x1bac   : > { %s12969_s6 = sld [smem:[#allocation112_spill]] }
0x1bb0   : > { %p127_p13 = scmp.ge.s32.totalorder %s12967_s11, 4  }
0x1bb2   : > { %s12971_s10 = smov %s12969_s6  ;;  %129 = sbr.rel (!%p127_p13) target bundleno = 111 (0x6f), region = 534 }
0x1bb7   :  { %7699 = vsyncpa [#allocation10], 1 }
0x1bb8   :  { %7701 = vsyncpa [#allocation10 + $0x1], 1 }
0x1bb9   :  { %7702 = vsyncpa [#allocation13], 1 }
0x1bba   :  { %7704 = vsyncpa [#allocation13 + $0x1], 1 }
0x1bbb   :  { %7705 = vsyncpa [#allocation16], 1 }
0x1bbc   :  { %7707 = vsyncpa [#allocation16 + $0x1], 1 }
0x1bbd   :  { %7708 = vsyncpa [#allocation19], 1 }
0x1bbe   :  { %7710 = vsyncpa [#allocation19 + $0x1], 1 }
0x1bbf   :  { %7711 = vsyncpa [#allocation22], 1 }
0x1bc0   :  { %7713 = vsyncpa [#allocation22 + $0x1], 1 }
0x1bc1   :  { %7714 = vsyncpa [#allocation25], 1 }
0x1bc2   :  { %7715 = vsyncpa [#allocation33], 1 }
0x1bc3   :  { %7717 = vsyncpa [#allocation33 + $0x1], 1 }
0x1bc4   :  { %7718 = vsyncpa [#allocation36], 1 }
0x1bc5   :  { %7719 = vsyncpa [#allocation39], 1 }
0x1bc6   :  { %7721 = vsyncpa [#allocation39 + $0x1], 1 }
0x1bc7   :  { %7722 = vsyncpa [#allocation42], 1 }
0x1bc8   :  { %7723 = vsyncpa [#allocation45], 1 }
0x1bc9   :  { %7725 = vsyncpa [#allocation45 + $0x1], 1 }
0x1bca   :  { %7726 = vsyncpa [#allocation48], 1 }
0x1bcb   :  { %7727 = vsyncpa [#allocation11], 1 }
0x1bcc   :  { %7729 = vsyncpa [#allocation11 + $0x1], 1 }

</bundles_post_ra>
